<compile_context>
chip_gen: v6e
topology: v6e:2x2x1
jax: 0.10.0
libtpu: 0.0.40
codegen_flags: <defaults>
</compile_context>

<pallas_src>
import numpy as np
import jax
import jax.numpy as jnp
from jax import lax
from jax.experimental import pallas as pl
from jax.experimental.pallas import tpu as pltpu

# ---------------- problem constants (fixed by the PyTorch module) ----------------
N = 5            # padding_size
B = 9            # stacked padded blocks per instance
IDX0 = (0, 1, 2, 5, 6)
IDX1 = (3, 7)
IDX2 = (8,)
SRC01 = ((1, 1, 1), (2, 2, 2), (2, 2, 3), (2, 3, 2), (2, 3, 3),
         (5, 1, 1), (6, 3, 3), (6, 3, 4), (6, 4, 3), (6, 4, 4))
DST01 = ((3, 0, 0), (3, 0, 0), (3, 0, 1), (3, 1, 0), (3, 1, 1),
         (7, 0, 0), (7, 0, 0), (7, 0, 1), (7, 1, 0), (7, 1, 1))
SRC12 = ((0, 1, 1), (3, 1, 1), (7, 1, 1))
DST12 = ((8, 0, 0), (8, 0, 0), (8, 0, 0))

# merged per-destination sums require sources to never alias destinations
assert not (set(SRC01) & set(DST01))
assert not (set(SRC12) & set(DST12))

# ---------------- packed layout constants ----------------
SUBL, LANES = 8, 128
GPT = 2              # instances packed per (8,128) tile
LPG = B * N          # 45 lanes per instance
USED = GPT * LPG     # 90 live lanes per tile
NK = N - 1           # k == N-1 is a structural no-op


# ---------------- compile-time constants (numpy) ----------------
def _build_groups(srcs, dsts):
    """Group scatter entries by (src_row, dst_row); lane maps within a group."""
    groups = {}
    for (sb, sr, sc), (db, dr, dc) in zip(srcs, dsts):
        groups.setdefault((sr, dr), []).append((sb * N + sc, db * N + dc))
    return list(groups.items())


_G01 = _build_groups(SRC01, DST01)        # 5 groups
_G12 = _build_groups(SRC12, DST12)        # 1 group
SCAT_KEYS_01 = tuple(k for k, _ in _G01)
SCAT_KEYS_12 = tuple(k for k, _ in _G12)


def _group_mat(pairs):
    """0/1 lane-routing matrix for one scatter group (replicated per instance)."""
    P = np.zeros((LANES, LANES), np.float32)
    for sl, dl in pairs:
        for g in range(GPT):
            P[g * LPG + sl, g * LPG + dl] = 1.0
    return P


_SCAT_NP = np.stack([_group_mat(p) for _, p in _G01 + _G12])        # (6,128,128)


def _build_col_select():
    """S_k with V = M @ S_k  =>  V[r, l] = M[r, 5*(l//5) + k] (column-k broadcast)."""
    sel = np.zeros((NK, LANES, LANES), np.float32)
    for k in range(NK):
        for l in range(USED):
            sel[k, (l // N) * N + k, l] = 1.0
    return sel


_SEL_NP = _build_col_select()                                        # (4,128,128)


def _build_masks():
    """Per-(stage,k) divide/eliminate masks + scatter destination-row masks."""
    lane = np.arange(LANES)
    row = np.arange(SUBL)[:, None]
    in_use = lane < USED
    b_of = np.where(in_use, (lane % LPG) // N, -1)
    c_of = np.where(in_use, lane % N, -1)
    valid = in_use[None, :] & (row < N)
    m = np.zeros((3 * 2 * NK + 2, SUBL, LANES), np.float32)
    for s, batches in enumerate((IDX0, IDX1, IDX2)):
        bm = valid & np.isin(b_of, batches)[None, :]
        for k in range(NK):
            rgt = row > k
            m[s * 2 * NK + 2 * k + 0] = bm & rgt & (c_of == k)[None, :]   # divide mask
            m[s * 2 * NK + 2 * k + 1] = bm & rgt & (c_of > k)[None, :]    # eliminate mask
    m[3 * 2 * NK + 0] = np.broadcast_to(row == 0, (SUBL, LANES))          # dst row 0
    m[3 * 2 * NK + 1] = np.broadcast_to(row == 1, (SUBL, LANES))          # dst row 1
    return m


_MASKS_NP = _build_masks()                                            # (26,8,128)
_ROWSEL0 = 3 * 2 * NK


# ---------------- Pallas kernel ----------------
def _lu_kernel(mask_ref, sel_ref, scat_ref, x_ref, o_ref):
    M = x_ref[...]                                      # (8,128): M[r, 45g+5b+c] = A[g,b,r,c]

    def lu_stage(M, stage):
        for k in range(NK):                             # k == N-1 is a no-op
            base = stage * 2 * NK + 2 * k
            row_k = M[k:k + 1, :]                       # U row: A[g,b,k,c] at its lane
            inv = pl.reciprocal(row_k, approx=True)     # EUP vrcp (free slot)
            inv = inv * (2.0 - row_k * inv)             # one Newton step -> ~f32 exact
            # A[:, k+1:, k] /= A[:, k, k]   (NaN/inf in non-selected lanes discarded by select)
            M = jnp.where(mask_ref[base] != 0.0, M * inv, M)
            # V[r, lane] = A[g,b,r,k] (post-divide) via 0/1 selection matmul on the idle MXU
            V = jnp.dot(M, sel_ref[k], preferred_element_type=jnp.float32,
                        precision=lax.Precision.HIGHEST)
            # A[:, k+1:, k+1:] -= V * U   (mask is exactly 0/1 -> arithmetic blend is exact)
            M = M - mask_ref[base + 1] * (V * row_k)
        return M

    def scatter_sub(M, keys, first):
        # flat[dst] -= flat[src], merged per destination; one routing matmul per
        # (src_row, dst_row) group, placed on the destination row by a 0/1 row mask.
        delta = jnp.zeros_like(M)
        for i, (sr, dr) in enumerate(keys):
            routed = jnp.dot(M, scat_ref[first + i], preferred_element_type=jnp.float32,
                             precision=lax.Precision.HIGHEST)
            delta = delta + mask_ref[_ROWSEL0 + dr] * routed[sr:sr + 1, :]
        return M - delta

    M = lu_stage(M, 0)
    M = scatter_sub(M, SCAT_KEYS_01, 0)
    M = lu_stage(M, 1)
    M = scatter_sub(M, SCAT_KEYS_12, len(SCAT_KEYS_01))
    M = lu_stage(M, 2)
    o_ref[...] = M


def _pallas_lu(xp):
    t = xp.shape[0]

    def const_spec(shape):
        return pl.BlockSpec(shape, lambda i: (0,) * len(shape))

    return pl.pallas_call(
        _lu_kernel,
        out_shape=jax.ShapeDtypeStruct((t, SUBL, LANES), jnp.float32),
        grid_spec=pltpu.PrefetchScalarGridSpec(
            num_scalar_prefetch=0,
            grid=(t,),
            in_specs=[
                const_spec(_MASKS_NP.shape),                     # constant masks
                const_spec(_SEL_NP.shape),                       # column-select matrices
                const_spec(_SCAT_NP.shape),                      # scatter routing matrices
                pl.BlockSpec((None, SUBL, LANES), lambda i: (i, 0, 0)),
            ],
            out_specs=pl.BlockSpec((None, SUBL, LANES), lambda i: (i, 0, 0)),
        ),
        compiler_params=pltpu.CompilerParams(
            dimension_semantics=("parallel",)),                  # shards pairs across TCs (v7x)
        input_output_aliases={3: 0},                             # update in place
    )(jnp.asarray(_MASKS_NP), jnp.asarray(_SEL_NP), jnp.asarray(_SCAT_NP), xp)


# ---------------- wrapper: module layout <-> packed layout ----------------
@jax.jit
def _lu_batched(x):                      # x: (G, 9, 5, 5) float32
    g = x.shape[0]
    gp = -(-g // GPT) * GPT
    if gp != g:
        # Padding instance: block b = (b+1)*I keeps every pivot of the fixed
        # elimination pattern nonzero (plain identity would hit a zero pivot
        # after the scatter and poison the tile with NaNs through the matmuls).
        pad_one = (jnp.arange(1, B + 1, dtype=x.dtype)[:, None, None]
                   * jnp.eye(N, dtype=x.dtype)[None])
        pad = jnp.broadcast_to(pad_one, (gp - g, B, N, N))
        x = jnp.concatenate([x, pad], axis=0)
    t = gp // GPT
    # pack: xt[t, r, 45*s + 5*b + c] = x[2t+s, b, r, c]; pad to a native (8,128) tile
    xt = x.reshape(t, GPT, B, N, N).transpose(0, 3, 1, 2, 4).reshape(t, N, USED)
    xp = jnp.pad(xt, ((0, 0), (0, SUBL - N), (0, LANES - USED)))
    yp = _pallas_lu(xp)
    # unpack (kept here for the module-shaped API; persistent users could keep packed layout)
    y = yp[:, :N, :USED].reshape(t, N, GPT, B, N).transpose(0, 2, 3, 1, 4)
    return y.reshape(gp, B, N, N)[:g]


def lu_forward(x):
    """Forward pass of the PyTorch `LU` module. Accepts (9,5,5) or (G,9,5,5)."""
    x = jnp.asarray(x, jnp.float32)
    if x.ndim == 3:
        return _lu_batched(x[None])[0]
    return _lu_batched(x)


# ---------------- pure-numpy reference (mirrors the PyTorch module) ----------------
def ref_forward(x_np):
    A = x_np.astype(np.float32).copy()

    def lu_inplace(sel):
        for k in range(N):
            sel[:, k + 1:, k] /= sel[:, k, k][:, None]
            V = sel[:, k + 1:, k][:, :, None]
            U = sel[:, k, k + 1:][:, None, :]
            sel[:, k + 1:, k + 1:] -= V * U

    def scatter(A, srcs, dsts):
        flat = A.reshape(-1).copy()
        for (sb, sr, sc), (db, dr, dc) in zip(srcs, dsts):
            s = (sb * N + sr) * N + sc
            d = (db * N + dr) * N + dc
            flat[d] = flat[d] - flat[s]
        return flat.reshape(A.shape)

    sel0 = A[list(IDX0)].copy(); lu_inplace(sel0); A[list(IDX0)] = sel0
    A = scatter(A, SRC01, DST01)
    sel1 = A[list(IDX1)].copy(); lu_inplace(sel1); A[list(IDX1)] = sel1
    A = scatter(A, SRC12, DST12)
    sel2 = A[list(IDX2)].copy(); lu_inplace(sel2); A[list(IDX2)] = sel2
    return A


if __name__ == "__main__":
    key = jax.random.PRNGKey(0)
    G = 4
    x = jax.random.normal(key, (G, B, N, N), dtype=jnp.float32)
    # Per-block scaled diagonal boost keeps every pivot of this fixed,
    # unpivoted elimination pattern O(10), so the demo is well-posed.
    boost = (2.0 * N) * (1.0 + jnp.arange(B, dtype=jnp.float32))[:, None, None]
    x = x + boost * jnp.eye(N, dtype=jnp.float32)[None, None]

    # batched path (2 instances per tile, grid over instance pairs)
    out_b = jax.block_until_ready(lu_forward(x))
    ref_b = np.stack([ref_forward(np.asarray(x[g])) for g in range(G)])
    np.testing.assert_allclose(np.asarray(out_b), ref_b, rtol=1e-4, atol=1e-4)

    # module-shaped single instance path (exercises the odd-count padding slot)
    out_1 = jax.block_until_ready(lu_forward(x[0]))
    np.testing.assert_allclose(np.asarray(out_1), ref_b[0], rtol=1e-4, atol=1e-4)

    print("KERNEL_OK")
</pallas_src>

<mosaic_0001>
module attributes {stable_mosaic.version = 11 : i64} {
  func.func @_lu_kernel(%arg0: i32, %arg1: memref<26x8x128xf32, #tpu.memory_space<vmem>>, %arg2: memref<4x128x128xf32, #tpu.memory_space<vmem>>, %arg3: memref<6x128x128xf32, #tpu.memory_space<vmem>>, %arg4: memref<1x8x128xf32, #tpu.memory_space<vmem>>, %arg5: memref<1x8x128xf32, #tpu.memory_space<vmem>>) attributes {dimension_semantics = [#tpu.dimension_semantics<parallel>], iteration_bounds = array<i64: 2>, scalar_prefetch = 0 : i64, scratch_operands = 0 : i64, tpu.core_type = #tpu.core_type<tc>, window_params = [{pipeline_mode = #tpu.pipeline_mode<synchronous>, transform_indices = @transform_0, window_bounds = array<i64: 26, 8, 128>}, {pipeline_mode = #tpu.pipeline_mode<synchronous>, transform_indices = @transform_1, window_bounds = array<i64: 4, 128, 128>}, {pipeline_mode = #tpu.pipeline_mode<synchronous>, transform_indices = @transform_2, window_bounds = array<i64: 6, 128, 128>}, {transform_indices = @transform_3, window_bounds = array<i64: 1, 8, 128>}, {transform_indices = @transform_4, window_bounds = array<i64: 1, 8, 128>}]} {
    %c0 = arith.constant 0 : index
    %c0_0 = arith.constant 0 : index
    %c0_1 = arith.constant 0 : index
    %0 = vector.load %arg4[%c0, %c0_0, %c0_1] : memref<1x8x128xf32, #tpu.memory_space<vmem>>, vector<1x8x128xf32>
    %1 = vector.shape_cast %0 : vector<1x8x128xf32> to vector<8x128xf32>
    %2 = vector.extract_strided_slice %1 {offsets = [0, 0], sizes = [1, 128], strides = [1, 1]} : vector<8x128xf32> to vector<1x128xf32>
    %3 = tpu.reciprocal %2 {approx = true} : vector<1x128xf32> -> vector<1x128xf32>
    %4 = arith.mulf %2, %3 : vector<1x128xf32>
    %cst = arith.constant 2.000000e+00 : f32
    %5 = vector.broadcast %cst : f32 to vector<1x128xf32>
    %6 = arith.subf %5, %4 : vector<1x128xf32>
    %7 = arith.mulf %3, %6 : vector<1x128xf32>
    %c0_2 = arith.constant 0 : index
    %c0_3 = arith.constant 0 : index
    %c0_4 = arith.constant 0 : index
    %8 = vector.load %arg1[%c0_2, %c0_3, %c0_4] : memref<26x8x128xf32, #tpu.memory_space<vmem>>, vector<1x8x128xf32>
    %9 = vector.shape_cast %8 : vector<1x8x128xf32> to vector<8x128xf32>
    %cst_5 = arith.constant 0.000000e+00 : f32
    %10 = vector.broadcast %cst_5 : f32 to vector<8x128xf32>
    %11 = arith.cmpf one, %9, %10 : vector<8x128xf32>
    %12 = vector.broadcast %7 : vector<1x128xf32> to vector<8x128xf32>
    %13 = arith.mulf %1, %12 : vector<8x128xf32>
    %14 = arith.select %11, %13, %1 : vector<8x128xi1>, vector<8x128xf32>
    %c0_6 = arith.constant 0 : index
    %c0_7 = arith.constant 0 : index
    %c0_8 = arith.constant 0 : index
    %15 = vector.load %arg2[%c0_6, %c0_7, %c0_8] : memref<4x128x128xf32, #tpu.memory_space<vmem>>, vector<1x128x128xf32>
    %16 = vector.shape_cast %15 : vector<1x128x128xf32> to vector<128x128xf32>
    %cst_9 = arith.constant dense<0.000000e+00> : vector<8x128xf32>
    %17 = tpu.matmul %14, %16, %cst_9 {dimension_numbers = #tpu.dot_dimension_numbers<[1], [0], [0], [1], [0, 0, 1, 1], [], []>, precision = #tpu.contract_precision<fp32>} : vector<8x128xf32>, vector<128x128xf32>, vector<8x128xf32> -> vector<8x128xf32>
    %c1 = arith.constant 1 : index
    %c0_10 = arith.constant 0 : index
    %c0_11 = arith.constant 0 : index
    %18 = vector.load %arg1[%c1, %c0_10, %c0_11] : memref<26x8x128xf32, #tpu.memory_space<vmem>>, vector<1x8x128xf32>
    %19 = vector.shape_cast %18 : vector<1x8x128xf32> to vector<8x128xf32>
    %20 = vector.broadcast %2 : vector<1x128xf32> to vector<8x128xf32>
    %21 = arith.mulf %17, %20 : vector<8x128xf32>
    %22 = arith.mulf %19, %21 : vector<8x128xf32>
    %23 = arith.subf %14, %22 : vector<8x128xf32>
    %24 = vector.extract_strided_slice %23 {offsets = [1, 0], sizes = [1, 128], strides = [1, 1]} : vector<8x128xf32> to vector<1x128xf32>
    %25 = tpu.reciprocal %24 {approx = true} : vector<1x128xf32> -> vector<1x128xf32>
    %26 = arith.mulf %24, %25 : vector<1x128xf32>
    %cst_12 = arith.constant 2.000000e+00 : f32
    %27 = vector.broadcast %cst_12 : f32 to vector<1x128xf32>
    %28 = arith.subf %27, %26 : vector<1x128xf32>
    %29 = arith.mulf %25, %28 : vector<1x128xf32>
    %c2 = arith.constant 2 : index
    %c0_13 = arith.constant 0 : index
    %c0_14 = arith.constant 0 : index
    %30 = vector.load %arg1[%c2, %c0_13, %c0_14] : memref<26x8x128xf32, #tpu.memory_space<vmem>>, vector<1x8x128xf32>
    %31 = vector.shape_cast %30 : vector<1x8x128xf32> to vector<8x128xf32>
    %cst_15 = arith.constant 0.000000e+00 : f32
    %32 = vector.broadcast %cst_15 : f32 to vector<8x128xf32>
    %33 = arith.cmpf one, %31, %32 : vector<8x128xf32>
    %34 = vector.broadcast %29 : vector<1x128xf32> to vector<8x128xf32>
    %35 = arith.mulf %23, %34 : vector<8x128xf32>
    %36 = arith.select %33, %35, %23 : vector<8x128xi1>, vector<8x128xf32>
    %c1_16 = arith.constant 1 : index
    %c0_17 = arith.constant 0 : index
    %c0_18 = arith.constant 0 : index
    %37 = vector.load %arg2[%c1_16, %c0_17, %c0_18] : memref<4x128x128xf32, #tpu.memory_space<vmem>>, vector<1x128x128xf32>
    %38 = vector.shape_cast %37 : vector<1x128x128xf32> to vector<128x128xf32>
    %cst_19 = arith.constant dense<0.000000e+00> : vector<8x128xf32>
    %39 = tpu.matmul %36, %38, %cst_19 {dimension_numbers = #tpu.dot_dimension_numbers<[1], [0], [0], [1], [0, 0, 1, 1], [], []>, precision = #tpu.contract_precision<fp32>} : vector<8x128xf32>, vector<128x128xf32>, vector<8x128xf32> -> vector<8x128xf32>
    %c3 = arith.constant 3 : index
    %c0_20 = arith.constant 0 : index
    %c0_21 = arith.constant 0 : index
    %40 = vector.load %arg1[%c3, %c0_20, %c0_21] : memref<26x8x128xf32, #tpu.memory_space<vmem>>, vector<1x8x128xf32>
    %41 = vector.shape_cast %40 : vector<1x8x128xf32> to vector<8x128xf32>
    %42 = vector.broadcast %24 : vector<1x128xf32> to vector<8x128xf32>
    %43 = arith.mulf %39, %42 : vector<8x128xf32>
    %44 = arith.mulf %41, %43 : vector<8x128xf32>
    %45 = arith.subf %36, %44 : vector<8x128xf32>
    %46 = vector.extract_strided_slice %45 {offsets = [2, 0], sizes = [1, 128], strides = [1, 1]} : vector<8x128xf32> to vector<1x128xf32>
    %47 = tpu.reciprocal %46 {approx = true} : vector<1x128xf32> -> vector<1x128xf32>
    %48 = arith.mulf %46, %47 : vector<1x128xf32>
    %cst_22 = arith.constant 2.000000e+00 : f32
    %49 = vector.broadcast %cst_22 : f32 to vector<1x128xf32>
    %50 = arith.subf %49, %48 : vector<1x128xf32>
    %51 = arith.mulf %47, %50 : vector<1x128xf32>
    %c4 = arith.constant 4 : index
    %c0_23 = arith.constant 0 : index
    %c0_24 = arith.constant 0 : index
    %52 = vector.load %arg1[%c4, %c0_23, %c0_24] : memref<26x8x128xf32, #tpu.memory_space<vmem>>, vector<1x8x128xf32>
    %53 = vector.shape_cast %52 : vector<1x8x128xf32> to vector<8x128xf32>
    %cst_25 = arith.constant 0.000000e+00 : f32
    %54 = vector.broadcast %cst_25 : f32 to vector<8x128xf32>
    %55 = arith.cmpf one, %53, %54 : vector<8x128xf32>
    %56 = vector.broadcast %51 : vector<1x128xf32> to vector<8x128xf32>
    %57 = arith.mulf %45, %56 : vector<8x128xf32>
    %58 = arith.select %55, %57, %45 : vector<8x128xi1>, vector<8x128xf32>
    %c2_26 = arith.constant 2 : index
    %c0_27 = arith.constant 0 : index
    %c0_28 = arith.constant 0 : index
    %59 = vector.load %arg2[%c2_26, %c0_27, %c0_28] : memref<4x128x128xf32, #tpu.memory_space<vmem>>, vector<1x128x128xf32>
    %60 = vector.shape_cast %59 : vector<1x128x128xf32> to vector<128x128xf32>
    %cst_29 = arith.constant dense<0.000000e+00> : vector<8x128xf32>
    %61 = tpu.matmul %58, %60, %cst_29 {dimension_numbers = #tpu.dot_dimension_numbers<[1], [0], [0], [1], [0, 0, 1, 1], [], []>, precision = #tpu.contract_precision<fp32>} : vector<8x128xf32>, vector<128x128xf32>, vector<8x128xf32> -> vector<8x128xf32>
    %c5 = arith.constant 5 : index
    %c0_30 = arith.constant 0 : index
    %c0_31 = arith.constant 0 : index
    %62 = vector.load %arg1[%c5, %c0_30, %c0_31] : memref<26x8x128xf32, #tpu.memory_space<vmem>>, vector<1x8x128xf32>
    %63 = vector.shape_cast %62 : vector<1x8x128xf32> to vector<8x128xf32>
    %64 = vector.broadcast %46 : vector<1x128xf32> to vector<8x128xf32>
    %65 = arith.mulf %61, %64 : vector<8x128xf32>
    %66 = arith.mulf %63, %65 : vector<8x128xf32>
    %67 = arith.subf %58, %66 : vector<8x128xf32>
    %68 = vector.extract_strided_slice %67 {offsets = [3, 0], sizes = [1, 128], strides = [1, 1]} : vector<8x128xf32> to vector<1x128xf32>
    %69 = tpu.reciprocal %68 {approx = true} : vector<1x128xf32> -> vector<1x128xf32>
    %70 = arith.mulf %68, %69 : vector<1x128xf32>
    %cst_32 = arith.constant 2.000000e+00 : f32
    %71 = vector.broadcast %cst_32 : f32 to vector<1x128xf32>
    %72 = arith.subf %71, %70 : vector<1x128xf32>
    %73 = arith.mulf %69, %72 : vector<1x128xf32>
    %c6 = arith.constant 6 : index
    %c0_33 = arith.constant 0 : index
    %c0_34 = arith.constant 0 : index
    %74 = vector.load %arg1[%c6, %c0_33, %c0_34] : memref<26x8x128xf32, #tpu.memory_space<vmem>>, vector<1x8x128xf32>
    %75 = vector.shape_cast %74 : vector<1x8x128xf32> to vector<8x128xf32>
    %cst_35 = arith.constant 0.000000e+00 : f32
    %76 = vector.broadcast %cst_35 : f32 to vector<8x128xf32>
    %77 = arith.cmpf one, %75, %76 : vector<8x128xf32>
    %78 = vector.broadcast %73 : vector<1x128xf32> to vector<8x128xf32>
    %79 = arith.mulf %67, %78 : vector<8x128xf32>
    %80 = arith.select %77, %79, %67 : vector<8x128xi1>, vector<8x128xf32>
    %c3_36 = arith.constant 3 : index
    %c0_37 = arith.constant 0 : index
    %c0_38 = arith.constant 0 : index
    %81 = vector.load %arg2[%c3_36, %c0_37, %c0_38] : memref<4x128x128xf32, #tpu.memory_space<vmem>>, vector<1x128x128xf32>
    %82 = vector.shape_cast %81 : vector<1x128x128xf32> to vector<128x128xf32>
    %cst_39 = arith.constant dense<0.000000e+00> : vector<8x128xf32>
    %83 = tpu.matmul %80, %82, %cst_39 {dimension_numbers = #tpu.dot_dimension_numbers<[1], [0], [0], [1], [0, 0, 1, 1], [], []>, precision = #tpu.contract_precision<fp32>} : vector<8x128xf32>, vector<128x128xf32>, vector<8x128xf32> -> vector<8x128xf32>
    %c7 = arith.constant 7 : index
    %c0_40 = arith.constant 0 : index
    %c0_41 = arith.constant 0 : index
    %84 = vector.load %arg1[%c7, %c0_40, %c0_41] : memref<26x8x128xf32, #tpu.memory_space<vmem>>, vector<1x8x128xf32>
    %85 = vector.shape_cast %84 : vector<1x8x128xf32> to vector<8x128xf32>
    %86 = vector.broadcast %68 : vector<1x128xf32> to vector<8x128xf32>
    %87 = arith.mulf %83, %86 : vector<8x128xf32>
    %88 = arith.mulf %85, %87 : vector<8x128xf32>
    %89 = arith.subf %80, %88 : vector<8x128xf32>
    %cst_42 = arith.constant 0.000000e+00 : f32
    %90 = vector.broadcast %cst_42 : f32 to vector<8x128xf32>
    %c0_43 = arith.constant 0 : index
    %c0_44 = arith.constant 0 : index
    %c0_45 = arith.constant 0 : index
    %91 = vector.load %arg3[%c0_43, %c0_44, %c0_45] : memref<6x128x128xf32, #tpu.memory_space<vmem>>, vector<1x128x128xf32>
    %92 = vector.shape_cast %91 : vector<1x128x128xf32> to vector<128x128xf32>
    %cst_46 = arith.constant dense<0.000000e+00> : vector<8x128xf32>
    %93 = tpu.matmul %89, %92, %cst_46 {dimension_numbers = #tpu.dot_dimension_numbers<[1], [0], [0], [1], [0, 0, 1, 1], [], []>, precision = #tpu.contract_precision<fp32>} : vector<8x128xf32>, vector<128x128xf32>, vector<8x128xf32> -> vector<8x128xf32>
    %c24 = arith.constant 24 : index
    %c0_47 = arith.constant 0 : index
    %c0_48 = arith.constant 0 : index
    %94 = vector.load %arg1[%c24, %c0_47, %c0_48] : memref<26x8x128xf32, #tpu.memory_space<vmem>>, vector<1x8x128xf32>
    %95 = vector.shape_cast %94 : vector<1x8x128xf32> to vector<8x128xf32>
    %96 = vector.extract_strided_slice %93 {offsets = [1, 0], sizes = [1, 128], strides = [1, 1]} : vector<8x128xf32> to vector<1x128xf32>
    %97 = vector.broadcast %96 : vector<1x128xf32> to vector<8x128xf32>
    %98 = arith.mulf %95, %97 : vector<8x128xf32>
    %99 = arith.addf %90, %98 : vector<8x128xf32>
    %c1_49 = arith.constant 1 : index
    %c0_50 = arith.constant 0 : index
    %c0_51 = arith.constant 0 : index
    %100 = vector.load %arg3[%c1_49, %c0_50, %c0_51] : memref<6x128x128xf32, #tpu.memory_space<vmem>>, vector<1x128x128xf32>
    %101 = vector.shape_cast %100 : vector<1x128x128xf32> to vector<128x128xf32>
    %cst_52 = arith.constant dense<0.000000e+00> : vector<8x128xf32>
    %102 = tpu.matmul %89, %101, %cst_52 {dimension_numbers = #tpu.dot_dimension_numbers<[1], [0], [0], [1], [0, 0, 1, 1], [], []>, precision = #tpu.contract_precision<fp32>} : vector<8x128xf32>, vector<128x128xf32>, vector<8x128xf32> -> vector<8x128xf32>
    %c24_53 = arith.constant 24 : index
    %c0_54 = arith.constant 0 : index
    %c0_55 = arith.constant 0 : index
    %103 = vector.load %arg1[%c24_53, %c0_54, %c0_55] : memref<26x8x128xf32, #tpu.memory_space<vmem>>, vector<1x8x128xf32>
    %104 = vector.shape_cast %103 : vector<1x8x128xf32> to vector<8x128xf32>
    %105 = vector.extract_strided_slice %102 {offsets = [2, 0], sizes = [1, 128], strides = [1, 1]} : vector<8x128xf32> to vector<1x128xf32>
    %106 = vector.broadcast %105 : vector<1x128xf32> to vector<8x128xf32>
    %107 = arith.mulf %104, %106 : vector<8x128xf32>
    %108 = arith.addf %99, %107 : vector<8x128xf32>
    %c2_56 = arith.constant 2 : index
    %c0_57 = arith.constant 0 : index
    %c0_58 = arith.constant 0 : index
    %109 = vector.load %arg3[%c2_56, %c0_57, %c0_58] : memref<6x128x128xf32, #tpu.memory_space<vmem>>, vector<1x128x128xf32>
    %110 = vector.shape_cast %109 : vector<1x128x128xf32> to vector<128x128xf32>
    %cst_59 = arith.constant dense<0.000000e+00> : vector<8x128xf32>
    %111 = tpu.matmul %89, %110, %cst_59 {dimension_numbers = #tpu.dot_dimension_numbers<[1], [0], [0], [1], [0, 0, 1, 1], [], []>, precision = #tpu.contract_precision<fp32>} : vector<8x128xf32>, vector<128x128xf32>, vector<8x128xf32> -> vector<8x128xf32>
    %c25 = arith.constant 25 : index
    %c0_60 = arith.constant 0 : index
    %c0_61 = arith.constant 0 : index
    %112 = vector.load %arg1[%c25, %c0_60, %c0_61] : memref<26x8x128xf32, #tpu.memory_space<vmem>>, vector<1x8x128xf32>
    %113 = vector.shape_cast %112 : vector<1x8x128xf32> to vector<8x128xf32>
    %114 = vector.extract_strided_slice %111 {offsets = [3, 0], sizes = [1, 128], strides = [1, 1]} : vector<8x128xf32> to vector<1x128xf32>
    %115 = vector.broadcast %114 : vector<1x128xf32> to vector<8x128xf32>
    %116 = arith.mulf %113, %115 : vector<8x128xf32>
    %117 = arith.addf %108, %116 : vector<8x128xf32>
    %c3_62 = arith.constant 3 : index
    %c0_63 = arith.constant 0 : index
    %c0_64 = arith.constant 0 : index
    %118 = vector.load %arg3[%c3_62, %c0_63, %c0_64] : memref<6x128x128xf32, #tpu.memory_space<vmem>>, vector<1x128x128xf32>
    %119 = vector.shape_cast %118 : vector<1x128x128xf32> to vector<128x128xf32>
    %cst_65 = arith.constant dense<0.000000e+00> : vector<8x128xf32>
    %120 = tpu.matmul %89, %119, %cst_65 {dimension_numbers = #tpu.dot_dimension_numbers<[1], [0], [0], [1], [0, 0, 1, 1], [], []>, precision = #tpu.contract_precision<fp32>} : vector<8x128xf32>, vector<128x128xf32>, vector<8x128xf32> -> vector<8x128xf32>
    %c24_66 = arith.constant 24 : index
    %c0_67 = arith.constant 0 : index
    %c0_68 = arith.constant 0 : index
    %121 = vector.load %arg1[%c24_66, %c0_67, %c0_68] : memref<26x8x128xf32, #tpu.memory_space<vmem>>, vector<1x8x128xf32>
    %122 = vector.shape_cast %121 : vector<1x8x128xf32> to vector<8x128xf32>
    %123 = vector.extract_strided_slice %120 {offsets = [3, 0], sizes = [1, 128], strides = [1, 1]} : vector<8x128xf32> to vector<1x128xf32>
    %124 = vector.broadcast %123 : vector<1x128xf32> to vector<8x128xf32>
    %125 = arith.mulf %122, %124 : vector<8x128xf32>
    %126 = arith.addf %117, %125 : vector<8x128xf32>
    %c4_69 = arith.constant 4 : index
    %c0_70 = arith.constant 0 : index
    %c0_71 = arith.constant 0 : index
    %127 = vector.load %arg3[%c4_69, %c0_70, %c0_71] : memref<6x128x128xf32, #tpu.memory_space<vmem>>, vector<1x128x128xf32>
    %128 = vector.shape_cast %127 : vector<1x128x128xf32> to vector<128x128xf32>
    %cst_72 = arith.constant dense<0.000000e+00> : vector<8x128xf32>
    %129 = tpu.matmul %89, %128, %cst_72 {dimension_numbers = #tpu.dot_dimension_numbers<[1], [0], [0], [1], [0, 0, 1, 1], [], []>, precision = #tpu.contract_precision<fp32>} : vector<8x128xf32>, vector<128x128xf32>, vector<8x128xf32> -> vector<8x128xf32>
    %c25_73 = arith.constant 25 : index
    %c0_74 = arith.constant 0 : index
    %c0_75 = arith.constant 0 : index
    %130 = vector.load %arg1[%c25_73, %c0_74, %c0_75] : memref<26x8x128xf32, #tpu.memory_space<vmem>>, vector<1x8x128xf32>
    %131 = vector.shape_cast %130 : vector<1x8x128xf32> to vector<8x128xf32>
    %132 = vector.extract_strided_slice %129 {offsets = [4, 0], sizes = [1, 128], strides = [1, 1]} : vector<8x128xf32> to vector<1x128xf32>
    %133 = vector.broadcast %132 : vector<1x128xf32> to vector<8x128xf32>
    %134 = arith.mulf %131, %133 : vector<8x128xf32>
    %135 = arith.addf %126, %134 : vector<8x128xf32>
    %136 = arith.subf %89, %135 : vector<8x128xf32>
    %137 = vector.extract_strided_slice %136 {offsets = [0, 0], sizes = [1, 128], strides = [1, 1]} : vector<8x128xf32> to vector<1x128xf32>
    %138 = tpu.reciprocal %137 {approx = true} : vector<1x128xf32> -> vector<1x128xf32>
    %139 = arith.mulf %137, %138 : vector<1x128xf32>
    %cst_76 = arith.constant 2.000000e+00 : f32
    %140 = vector.broadcast %cst_76 : f32 to vector<1x128xf32>
    %141 = arith.subf %140, %139 : vector<1x128xf32>
    %142 = arith.mulf %138, %141 : vector<1x128xf32>
    %c8 = arith.constant 8 : index
    %c0_77 = arith.constant 0 : index
    %c0_78 = arith.constant 0 : index
    %143 = vector.load %arg1[%c8, %c0_77, %c0_78] : memref<26x8x128xf32, #tpu.memory_space<vmem>>, vector<1x8x128xf32>
    %144 = vector.shape_cast %143 : vector<1x8x128xf32> to vector<8x128xf32>
    %cst_79 = arith.constant 0.000000e+00 : f32
    %145 = vector.broadcast %cst_79 : f32 to vector<8x128xf32>
    %146 = arith.cmpf one, %144, %145 : vector<8x128xf32>
    %147 = vector.broadcast %142 : vector<1x128xf32> to vector<8x128xf32>
    %148 = arith.mulf %136, %147 : vector<8x128xf32>
    %149 = arith.select %146, %148, %136 : vector<8x128xi1>, vector<8x128xf32>
    %c0_80 = arith.constant 0 : index
    %c0_81 = arith.constant 0 : index
    %c0_82 = arith.constant 0 : index
    %150 = vector.load %arg2[%c0_80, %c0_81, %c0_82] : memref<4x128x128xf32, #tpu.memory_space<vmem>>, vector<1x128x128xf32>
    %151 = vector.shape_cast %150 : vector<1x128x128xf32> to vector<128x128xf32>
    %cst_83 = arith.constant dense<0.000000e+00> : vector<8x128xf32>
    %152 = tpu.matmul %149, %151, %cst_83 {dimension_numbers = #tpu.dot_dimension_numbers<[1], [0], [0], [1], [0, 0, 1, 1], [], []>, precision = #tpu.contract_precision<fp32>} : vector<8x128xf32>, vector<128x128xf32>, vector<8x128xf32> -> vector<8x128xf32>
    %c9 = arith.constant 9 : index
    %c0_84 = arith.constant 0 : index
    %c0_85 = arith.constant 0 : index
    %153 = vector.load %arg1[%c9, %c0_84, %c0_85] : memref<26x8x128xf32, #tpu.memory_space<vmem>>, vector<1x8x128xf32>
    %154 = vector.shape_cast %153 : vector<1x8x128xf32> to vector<8x128xf32>
    %155 = vector.broadcast %137 : vector<1x128xf32> to vector<8x128xf32>
    %156 = arith.mulf %152, %155 : vector<8x128xf32>
    %157 = arith.mulf %154, %156 : vector<8x128xf32>
    %158 = arith.subf %149, %157 : vector<8x128xf32>
    %159 = vector.extract_strided_slice %158 {offsets = [1, 0], sizes = [1, 128], strides = [1, 1]} : vector<8x128xf32> to vector<1x128xf32>
    %160 = tpu.reciprocal %159 {approx = true} : vector<1x128xf32> -> vector<1x128xf32>
    %161 = arith.mulf %159, %160 : vector<1x128xf32>
    %cst_86 = arith.constant 2.000000e+00 : f32
    %162 = vector.broadcast %cst_86 : f32 to vector<1x128xf32>
    %163 = arith.subf %162, %161 : vector<1x128xf32>
    %164 = arith.mulf %160, %163 : vector<1x128xf32>
    %c10 = arith.constant 10 : index
    %c0_87 = arith.constant 0 : index
    %c0_88 = arith.constant 0 : index
    %165 = vector.load %arg1[%c10, %c0_87, %c0_88] : memref<26x8x128xf32, #tpu.memory_space<vmem>>, vector<1x8x128xf32>
    %166 = vector.shape_cast %165 : vector<1x8x128xf32> to vector<8x128xf32>
    %cst_89 = arith.constant 0.000000e+00 : f32
    %167 = vector.broadcast %cst_89 : f32 to vector<8x128xf32>
    %168 = arith.cmpf one, %166, %167 : vector<8x128xf32>
    %169 = vector.broadcast %164 : vector<1x128xf32> to vector<8x128xf32>
    %170 = arith.mulf %158, %169 : vector<8x128xf32>
    %171 = arith.select %168, %170, %158 : vector<8x128xi1>, vector<8x128xf32>
    %c1_90 = arith.constant 1 : index
    %c0_91 = arith.constant 0 : index
    %c0_92 = arith.constant 0 : index
    %172 = vector.load %arg2[%c1_90, %c0_91, %c0_92] : memref<4x128x128xf32, #tpu.memory_space<vmem>>, vector<1x128x128xf32>
    %173 = vector.shape_cast %172 : vector<1x128x128xf32> to vector<128x128xf32>
    %cst_93 = arith.constant dense<0.000000e+00> : vector<8x128xf32>
    %174 = tpu.matmul %171, %173, %cst_93 {dimension_numbers = #tpu.dot_dimension_numbers<[1], [0], [0], [1], [0, 0, 1, 1], [], []>, precision = #tpu.contract_precision<fp32>} : vector<8x128xf32>, vector<128x128xf32>, vector<8x128xf32> -> vector<8x128xf32>
    %c11 = arith.constant 11 : index
    %c0_94 = arith.constant 0 : index
    %c0_95 = arith.constant 0 : index
    %175 = vector.load %arg1[%c11, %c0_94, %c0_95] : memref<26x8x128xf32, #tpu.memory_space<vmem>>, vector<1x8x128xf32>
    %176 = vector.shape_cast %175 : vector<1x8x128xf32> to vector<8x128xf32>
    %177 = vector.broadcast %159 : vector<1x128xf32> to vector<8x128xf32>
    %178 = arith.mulf %174, %177 : vector<8x128xf32>
    %179 = arith.mulf %176, %178 : vector<8x128xf32>
    %180 = arith.subf %171, %179 : vector<8x128xf32>
    %181 = vector.extract_strided_slice %180 {offsets = [2, 0], sizes = [1, 128], strides = [1, 1]} : vector<8x128xf32> to vector<1x128xf32>
    %182 = tpu.reciprocal %181 {approx = true} : vector<1x128xf32> -> vector<1x128xf32>
    %183 = arith.mulf %181, %182 : vector<1x128xf32>
    %cst_96 = arith.constant 2.000000e+00 : f32
    %184 = vector.broadcast %cst_96 : f32 to vector<1x128xf32>
    %185 = arith.subf %184, %183 : vector<1x128xf32>
    %186 = arith.mulf %182, %185 : vector<1x128xf32>
    %c12 = arith.constant 12 : index
    %c0_97 = arith.constant 0 : index
    %c0_98 = arith.constant 0 : index
    %187 = vector.load %arg1[%c12, %c0_97, %c0_98] : memref<26x8x128xf32, #tpu.memory_space<vmem>>, vector<1x8x128xf32>
    %188 = vector.shape_cast %187 : vector<1x8x128xf32> to vector<8x128xf32>
    %cst_99 = arith.constant 0.000000e+00 : f32
    %189 = vector.broadcast %cst_99 : f32 to vector<8x128xf32>
    %190 = arith.cmpf one, %188, %189 : vector<8x128xf32>
    %191 = vector.broadcast %186 : vector<1x128xf32> to vector<8x128xf32>
    %192 = arith.mulf %180, %191 : vector<8x128xf32>
    %193 = arith.select %190, %192, %180 : vector<8x128xi1>, vector<8x128xf32>
    %c2_100 = arith.constant 2 : index
    %c0_101 = arith.constant 0 : index
    %c0_102 = arith.constant 0 : index
    %194 = vector.load %arg2[%c2_100, %c0_101, %c0_102] : memref<4x128x128xf32, #tpu.memory_space<vmem>>, vector<1x128x128xf32>
    %195 = vector.shape_cast %194 : vector<1x128x128xf32> to vector<128x128xf32>
    %cst_103 = arith.constant dense<0.000000e+00> : vector<8x128xf32>
    %196 = tpu.matmul %193, %195, %cst_103 {dimension_numbers = #tpu.dot_dimension_numbers<[1], [0], [0], [1], [0, 0, 1, 1], [], []>, precision = #tpu.contract_precision<fp32>} : vector<8x128xf32>, vector<128x128xf32>, vector<8x128xf32> -> vector<8x128xf32>
    %c13 = arith.constant 13 : index
    %c0_104 = arith.constant 0 : index
    %c0_105 = arith.constant 0 : index
    %197 = vector.load %arg1[%c13, %c0_104, %c0_105] : memref<26x8x128xf32, #tpu.memory_space<vmem>>, vector<1x8x128xf32>
    %198 = vector.shape_cast %197 : vector<1x8x128xf32> to vector<8x128xf32>
    %199 = vector.broadcast %181 : vector<1x128xf32> to vector<8x128xf32>
    %200 = arith.mulf %196, %199 : vector<8x128xf32>
    %201 = arith.mulf %198, %200 : vector<8x128xf32>
    %202 = arith.subf %193, %201 : vector<8x128xf32>
    %203 = vector.extract_strided_slice %202 {offsets = [3, 0], sizes = [1, 128], strides = [1, 1]} : vector<8x128xf32> to vector<1x128xf32>
    %204 = tpu.reciprocal %203 {approx = true} : vector<1x128xf32> -> vector<1x128xf32>
    %205 = arith.mulf %203, %204 : vector<1x128xf32>
    %cst_106 = arith.constant 2.000000e+00 : f32
    %206 = vector.broadcast %cst_106 : f32 to vector<1x128xf32>
    %207 = arith.subf %206, %205 : vector<1x128xf32>
    %208 = arith.mulf %204, %207 : vector<1x128xf32>
    %c14 = arith.constant 14 : index
    %c0_107 = arith.constant 0 : index
    %c0_108 = arith.constant 0 : index
    %209 = vector.load %arg1[%c14, %c0_107, %c0_108] : memref<26x8x128xf32, #tpu.memory_space<vmem>>, vector<1x8x128xf32>
    %210 = vector.shape_cast %209 : vector<1x8x128xf32> to vector<8x128xf32>
    %cst_109 = arith.constant 0.000000e+00 : f32
    %211 = vector.broadcast %cst_109 : f32 to vector<8x128xf32>
    %212 = arith.cmpf one, %210, %211 : vector<8x128xf32>
    %213 = vector.broadcast %208 : vector<1x128xf32> to vector<8x128xf32>
    %214 = arith.mulf %202, %213 : vector<8x128xf32>
    %215 = arith.select %212, %214, %202 : vector<8x128xi1>, vector<8x128xf32>
    %c3_110 = arith.constant 3 : index
    %c0_111 = arith.constant 0 : index
    %c0_112 = arith.constant 0 : index
    %216 = vector.load %arg2[%c3_110, %c0_111, %c0_112] : memref<4x128x128xf32, #tpu.memory_space<vmem>>, vector<1x128x128xf32>
    %217 = vector.shape_cast %216 : vector<1x128x128xf32> to vector<128x128xf32>
    %cst_113 = arith.constant dense<0.000000e+00> : vector<8x128xf32>
    %218 = tpu.matmul %215, %217, %cst_113 {dimension_numbers = #tpu.dot_dimension_numbers<[1], [0], [0], [1], [0, 0, 1, 1], [], []>, precision = #tpu.contract_precision<fp32>} : vector<8x128xf32>, vector<128x128xf32>, vector<8x128xf32> -> vector<8x128xf32>
    %c15 = arith.constant 15 : index
    %c0_114 = arith.constant 0 : index
    %c0_115 = arith.constant 0 : index
    %219 = vector.load %arg1[%c15, %c0_114, %c0_115] : memref<26x8x128xf32, #tpu.memory_space<vmem>>, vector<1x8x128xf32>
    %220 = vector.shape_cast %219 : vector<1x8x128xf32> to vector<8x128xf32>
    %221 = vector.broadcast %203 : vector<1x128xf32> to vector<8x128xf32>
    %222 = arith.mulf %218, %221 : vector<8x128xf32>
    %223 = arith.mulf %220, %222 : vector<8x128xf32>
    %224 = arith.subf %215, %223 : vector<8x128xf32>
    %cst_116 = arith.constant 0.000000e+00 : f32
    %225 = vector.broadcast %cst_116 : f32 to vector<8x128xf32>
    %c5_117 = arith.constant 5 : index
    %c0_118 = arith.constant 0 : index
    %c0_119 = arith.constant 0 : index
    %226 = vector.load %arg3[%c5_117, %c0_118, %c0_119] : memref<6x128x128xf32, #tpu.memory_space<vmem>>, vector<1x128x128xf32>
    %227 = vector.shape_cast %226 : vector<1x128x128xf32> to vector<128x128xf32>
    %cst_120 = arith.constant dense<0.000000e+00> : vector<8x128xf32>
    %228 = tpu.matmul %224, %227, %cst_120 {dimension_numbers = #tpu.dot_dimension_numbers<[1], [0], [0], [1], [0, 0, 1, 1], [], []>, precision = #tpu.contract_precision<fp32>} : vector<8x128xf32>, vector<128x128xf32>, vector<8x128xf32> -> vector<8x128xf32>
    %c24_121 = arith.constant 24 : index
    %c0_122 = arith.constant 0 : index
    %c0_123 = arith.constant 0 : index
    %229 = vector.load %arg1[%c24_121, %c0_122, %c0_123] : memref<26x8x128xf32, #tpu.memory_space<vmem>>, vector<1x8x128xf32>
    %230 = vector.shape_cast %229 : vector<1x8x128xf32> to vector<8x128xf32>
    %231 = vector.extract_strided_slice %228 {offsets = [1, 0], sizes = [1, 128], strides = [1, 1]} : vector<8x128xf32> to vector<1x128xf32>
    %232 = vector.broadcast %231 : vector<1x128xf32> to vector<8x128xf32>
    %233 = arith.mulf %230, %232 : vector<8x128xf32>
    %234 = arith.addf %225, %233 : vector<8x128xf32>
    %235 = arith.subf %224, %234 : vector<8x128xf32>
    %236 = vector.extract_strided_slice %235 {offsets = [0, 0], sizes = [1, 128], strides = [1, 1]} : vector<8x128xf32> to vector<1x128xf32>
    %237 = tpu.reciprocal %236 {approx = true} : vector<1x128xf32> -> vector<1x128xf32>
    %238 = arith.mulf %236, %237 : vector<1x128xf32>
    %cst_124 = arith.constant 2.000000e+00 : f32
    %239 = vector.broadcast %cst_124 : f32 to vector<1x128xf32>
    %240 = arith.subf %239, %238 : vector<1x128xf32>
    %241 = arith.mulf %237, %240 : vector<1x128xf32>
    %c16 = arith.constant 16 : index
    %c0_125 = arith.constant 0 : index
    %c0_126 = arith.constant 0 : index
    %242 = vector.load %arg1[%c16, %c0_125, %c0_126] : memref<26x8x128xf32, #tpu.memory_space<vmem>>, vector<1x8x128xf32>
    %243 = vector.shape_cast %242 : vector<1x8x128xf32> to vector<8x128xf32>
    %cst_127 = arith.constant 0.000000e+00 : f32
    %244 = vector.broadcast %cst_127 : f32 to vector<8x128xf32>
    %245 = arith.cmpf one, %243, %244 : vector<8x128xf32>
    %246 = vector.broadcast %241 : vector<1x128xf32> to vector<8x128xf32>
    %247 = arith.mulf %235, %246 : vector<8x128xf32>
    %248 = arith.select %245, %247, %235 : vector<8x128xi1>, vector<8x128xf32>
    %c0_128 = arith.constant 0 : index
    %c0_129 = arith.constant 0 : index
    %c0_130 = arith.constant 0 : index
    %249 = vector.load %arg2[%c0_128, %c0_129, %c0_130] : memref<4x128x128xf32, #tpu.memory_space<vmem>>, vector<1x128x128xf32>
    %250 = vector.shape_cast %249 : vector<1x128x128xf32> to vector<128x128xf32>
    %cst_131 = arith.constant dense<0.000000e+00> : vector<8x128xf32>
    %251 = tpu.matmul %248, %250, %cst_131 {dimension_numbers = #tpu.dot_dimension_numbers<[1], [0], [0], [1], [0, 0, 1, 1], [], []>, precision = #tpu.contract_precision<fp32>} : vector<8x128xf32>, vector<128x128xf32>, vector<8x128xf32> -> vector<8x128xf32>
    %c17 = arith.constant 17 : index
    %c0_132 = arith.constant 0 : index
    %c0_133 = arith.constant 0 : index
    %252 = vector.load %arg1[%c17, %c0_132, %c0_133] : memref<26x8x128xf32, #tpu.memory_space<vmem>>, vector<1x8x128xf32>
    %253 = vector.shape_cast %252 : vector<1x8x128xf32> to vector<8x128xf32>
    %254 = vector.broadcast %236 : vector<1x128xf32> to vector<8x128xf32>
    %255 = arith.mulf %251, %254 : vector<8x128xf32>
    %256 = arith.mulf %253, %255 : vector<8x128xf32>
    %257 = arith.subf %248, %256 : vector<8x128xf32>
    %258 = vector.extract_strided_slice %257 {offsets = [1, 0], sizes = [1, 128], strides = [1, 1]} : vector<8x128xf32> to vector<1x128xf32>
    %259 = tpu.reciprocal %258 {approx = true} : vector<1x128xf32> -> vector<1x128xf32>
    %260 = arith.mulf %258, %259 : vector<1x128xf32>
    %cst_134 = arith.constant 2.000000e+00 : f32
    %261 = vector.broadcast %cst_134 : f32 to vector<1x128xf32>
    %262 = arith.subf %261, %260 : vector<1x128xf32>
    %263 = arith.mulf %259, %262 : vector<1x128xf32>
    %c18 = arith.constant 18 : index
    %c0_135 = arith.constant 0 : index
    %c0_136 = arith.constant 0 : index
    %264 = vector.load %arg1[%c18, %c0_135, %c0_136] : memref<26x8x128xf32, #tpu.memory_space<vmem>>, vector<1x8x128xf32>
    %265 = vector.shape_cast %264 : vector<1x8x128xf32> to vector<8x128xf32>
    %cst_137 = arith.constant 0.000000e+00 : f32
    %266 = vector.broadcast %cst_137 : f32 to vector<8x128xf32>
    %267 = arith.cmpf one, %265, %266 : vector<8x128xf32>
    %268 = vector.broadcast %263 : vector<1x128xf32> to vector<8x128xf32>
    %269 = arith.mulf %257, %268 : vector<8x128xf32>
    %270 = arith.select %267, %269, %257 : vector<8x128xi1>, vector<8x128xf32>
    %c1_138 = arith.constant 1 : index
    %c0_139 = arith.constant 0 : index
    %c0_140 = arith.constant 0 : index
    %271 = vector.load %arg2[%c1_138, %c0_139, %c0_140] : memref<4x128x128xf32, #tpu.memory_space<vmem>>, vector<1x128x128xf32>
    %272 = vector.shape_cast %271 : vector<1x128x128xf32> to vector<128x128xf32>
    %cst_141 = arith.constant dense<0.000000e+00> : vector<8x128xf32>
    %273 = tpu.matmul %270, %272, %cst_141 {dimension_numbers = #tpu.dot_dimension_numbers<[1], [0], [0], [1], [0, 0, 1, 1], [], []>, precision = #tpu.contract_precision<fp32>} : vector<8x128xf32>, vector<128x128xf32>, vector<8x128xf32> -> vector<8x128xf32>
    %c19 = arith.constant 19 : index
    %c0_142 = arith.constant 0 : index
    %c0_143 = arith.constant 0 : index
    %274 = vector.load %arg1[%c19, %c0_142, %c0_143] : memref<26x8x128xf32, #tpu.memory_space<vmem>>, vector<1x8x128xf32>
    %275 = vector.shape_cast %274 : vector<1x8x128xf32> to vector<8x128xf32>
    %276 = vector.broadcast %258 : vector<1x128xf32> to vector<8x128xf32>
    %277 = arith.mulf %273, %276 : vector<8x128xf32>
    %278 = arith.mulf %275, %277 : vector<8x128xf32>
    %279 = arith.subf %270, %278 : vector<8x128xf32>
    %280 = vector.extract_strided_slice %279 {offsets = [2, 0], sizes = [1, 128], strides = [1, 1]} : vector<8x128xf32> to vector<1x128xf32>
    %281 = tpu.reciprocal %280 {approx = true} : vector<1x128xf32> -> vector<1x128xf32>
    %282 = arith.mulf %280, %281 : vector<1x128xf32>
    %cst_144 = arith.constant 2.000000e+00 : f32
    %283 = vector.broadcast %cst_144 : f32 to vector<1x128xf32>
    %284 = arith.subf %283, %282 : vector<1x128xf32>
    %285 = arith.mulf %281, %284 : vector<1x128xf32>
    %c20 = arith.constant 20 : index
    %c0_145 = arith.constant 0 : index
    %c0_146 = arith.constant 0 : index
    %286 = vector.load %arg1[%c20, %c0_145, %c0_146] : memref<26x8x128xf32, #tpu.memory_space<vmem>>, vector<1x8x128xf32>
    %287 = vector.shape_cast %286 : vector<1x8x128xf32> to vector<8x128xf32>
    %cst_147 = arith.constant 0.000000e+00 : f32
    %288 = vector.broadcast %cst_147 : f32 to vector<8x128xf32>
    %289 = arith.cmpf one, %287, %288 : vector<8x128xf32>
    %290 = vector.broadcast %285 : vector<1x128xf32> to vector<8x128xf32>
    %291 = arith.mulf %279, %290 : vector<8x128xf32>
    %292 = arith.select %289, %291, %279 : vector<8x128xi1>, vector<8x128xf32>
    %c2_148 = arith.constant 2 : index
    %c0_149 = arith.constant 0 : index
    %c0_150 = arith.constant 0 : index
    %293 = vector.load %arg2[%c2_148, %c0_149, %c0_150] : memref<4x128x128xf32, #tpu.memory_space<vmem>>, vector<1x128x128xf32>
    %294 = vector.shape_cast %293 : vector<1x128x128xf32> to vector<128x128xf32>
    %cst_151 = arith.constant dense<0.000000e+00> : vector<8x128xf32>
    %295 = tpu.matmul %292, %294, %cst_151 {dimension_numbers = #tpu.dot_dimension_numbers<[1], [0], [0], [1], [0, 0, 1, 1], [], []>, precision = #tpu.contract_precision<fp32>} : vector<8x128xf32>, vector<128x128xf32>, vector<8x128xf32> -> vector<8x128xf32>
    %c21 = arith.constant 21 : index
    %c0_152 = arith.constant 0 : index
    %c0_153 = arith.constant 0 : index
    %296 = vector.load %arg1[%c21, %c0_152, %c0_153] : memref<26x8x128xf32, #tpu.memory_space<vmem>>, vector<1x8x128xf32>
    %297 = vector.shape_cast %296 : vector<1x8x128xf32> to vector<8x128xf32>
    %298 = vector.broadcast %280 : vector<1x128xf32> to vector<8x128xf32>
    %299 = arith.mulf %295, %298 : vector<8x128xf32>
    %300 = arith.mulf %297, %299 : vector<8x128xf32>
    %301 = arith.subf %292, %300 : vector<8x128xf32>
    %302 = vector.extract_strided_slice %301 {offsets = [3, 0], sizes = [1, 128], strides = [1, 1]} : vector<8x128xf32> to vector<1x128xf32>
    %303 = tpu.reciprocal %302 {approx = true} : vector<1x128xf32> -> vector<1x128xf32>
    %304 = arith.mulf %302, %303 : vector<1x128xf32>
    %cst_154 = arith.constant 2.000000e+00 : f32
    %305 = vector.broadcast %cst_154 : f32 to vector<1x128xf32>
    %306 = arith.subf %305, %304 : vector<1x128xf32>
    %307 = arith.mulf %303, %306 : vector<1x128xf32>
    %c22 = arith.constant 22 : index
    %c0_155 = arith.constant 0 : index
    %c0_156 = arith.constant 0 : index
    %308 = vector.load %arg1[%c22, %c0_155, %c0_156] : memref<26x8x128xf32, #tpu.memory_space<vmem>>, vector<1x8x128xf32>
    %309 = vector.shape_cast %308 : vector<1x8x128xf32> to vector<8x128xf32>
    %cst_157 = arith.constant 0.000000e+00 : f32
    %310 = vector.broadcast %cst_157 : f32 to vector<8x128xf32>
    %311 = arith.cmpf one, %309, %310 : vector<8x128xf32>
    %312 = vector.broadcast %307 : vector<1x128xf32> to vector<8x128xf32>
    %313 = arith.mulf %301, %312 : vector<8x128xf32>
    %314 = arith.select %311, %313, %301 : vector<8x128xi1>, vector<8x128xf32>
    %c3_158 = arith.constant 3 : index
    %c0_159 = arith.constant 0 : index
    %c0_160 = arith.constant 0 : index
    %315 = vector.load %arg2[%c3_158, %c0_159, %c0_160] : memref<4x128x128xf32, #tpu.memory_space<vmem>>, vector<1x128x128xf32>
    %316 = vector.shape_cast %315 : vector<1x128x128xf32> to vector<128x128xf32>
    %cst_161 = arith.constant dense<0.000000e+00> : vector<8x128xf32>
    %317 = tpu.matmul %314, %316, %cst_161 {dimension_numbers = #tpu.dot_dimension_numbers<[1], [0], [0], [1], [0, 0, 1, 1], [], []>, precision = #tpu.contract_precision<fp32>} : vector<8x128xf32>, vector<128x128xf32>, vector<8x128xf32> -> vector<8x128xf32>
    %c23 = arith.constant 23 : index
    %c0_162 = arith.constant 0 : index
    %c0_163 = arith.constant 0 : index
    %318 = vector.load %arg1[%c23, %c0_162, %c0_163] : memref<26x8x128xf32, #tpu.memory_space<vmem>>, vector<1x8x128xf32>
    %319 = vector.shape_cast %318 : vector<1x8x128xf32> to vector<8x128xf32>
    %320 = vector.broadcast %302 : vector<1x128xf32> to vector<8x128xf32>
    %321 = arith.mulf %317, %320 : vector<8x128xf32>
    %322 = arith.mulf %319, %321 : vector<8x128xf32>
    %323 = arith.subf %314, %322 : vector<8x128xf32>
    %c0_164 = arith.constant 0 : index
    %c0_165 = arith.constant 0 : index
    %c0_166 = arith.constant 0 : index
    %324 = vector.load %arg5[%c0_164, %c0_165, %c0_166] : memref<1x8x128xf32, #tpu.memory_space<vmem>>, vector<1x8x128xf32>
    %325 = vector.shape_cast %324 : vector<1x8x128xf32> to vector<8x128xf32>
    %326 = vector.shape_cast %323 : vector<8x128xf32> to vector<1x8x128xf32>
    tpu.vector_store %arg5[%c0_164, %c0_165, %c0_166], %326 {strides = array<i32>} : memref<1x8x128xf32, #tpu.memory_space<vmem>>, vector<1x8x128xf32>,
    return
  }
  func.func @transform_0(%arg0: i32) -> (i32, i32, i32) {
    %c0_i32 = arith.constant 0 : i32
    %c0_i32_0 = arith.constant 0 : i32
    %c0_i32_1 = arith.constant 0 : i32
    %c0_i32_2 = arith.constant 0 : i32
    return %c0_i32, %c0_i32_0, %c0_i32_1 : i32, i32, i32
  }
  func.func @transform_1(%arg0: i32) -> (i32, i32, i32) {
    %c0_i32 = arith.constant 0 : i32
    %c0_i32_0 = arith.constant 0 : i32
    %c0_i32_1 = arith.constant 0 : i32
    %c0_i32_2 = arith.constant 0 : i32
    return %c0_i32, %c0_i32_0, %c0_i32_1 : i32, i32, i32
  }
  func.func @transform_2(%arg0: i32) -> (i32, i32, i32) {
    %c0_i32 = arith.constant 0 : i32
    %c0_i32_0 = arith.constant 0 : i32
    %c0_i32_1 = arith.constant 0 : i32
    %c0_i32_2 = arith.constant 0 : i32
    return %c0_i32, %c0_i32_0, %c0_i32_1 : i32, i32, i32
  }
  func.func @transform_3(%arg0: i32) -> (i32, i32, i32) {
    %c0_i32 = arith.constant 0 : i32
    %c0_i32_0 = arith.constant 0 : i32
    %c0_i32_1 = arith.constant 0 : i32
    return %arg0, %c0_i32, %c0_i32_0 : i32, i32, i32
  }
  func.func @transform_4(%arg0: i32) -> (i32, i32, i32) {
    %c0_i32 = arith.constant 0 : i32
    %c0_i32_0 = arith.constant 0 : i32
    %c0_i32_1 = arith.constant 0 : i32
    return %arg0, %c0_i32, %c0_i32_0 : i32, i32, i32
  }
}

</mosaic_0001>

<bundles_post_ra>
// kernel: _lu_batched.1
= control target key start
LH: loop header
LB: loop body
LE: loop exit
PB: predicated region body
PF: predicated region fallthrough
CT: control target
= control target key end

     0   :  { %9 = vsyncpa [#allocation3], 0  ;;  %s24259_s0 = inlined_call_operand.hbm [shape: f32[26,8,128], index: 0, kind: input, shape index: {}]   ;;  %s24260_s1 = inlined_call_operand.hbm [shape: f32[4,128,128], index: 1, kind: input, shape index: {}]   ;;  %s24261_s2 = inlined_call_operand.vmem [shape: f32[6,128,128], index: 2, kind: input, shape index: {}]   ;;  %s24262_s3 = inlined_call_operand.vmem [shape: f32[2,8,128], index: 3, kind: input, shape index: {}, may-alias: {3,4}]   ;;  %s24263_s4 = inlined_call_operand.vmem [shape: f32[2,8,128], index: 4, kind: output, shape index: {}, may-alias: {3,4}]  }
   0x1   :  { %10 = vsyncpa [#allocation5], 0  ;;  %s18177_s15 = smov 0  }
   0x2 LB: > { %s18183_s16 = sadd.s32 4294967295, %s18144_s15   ;;  %p12313_p0 = scmp.ge.s32.totalorder %s18144_s15, 1  ;;  %s18144_s15 = sphi %s18177_s15, %s16_s15  }
   0x3   : > { %p136_p1 = scmp.lt.s32.totalorder %s18144_s15, 3  ;;  %s18146_s17 = smov [#allocation2]  }
   0x4   : > { %s148_s18 = sshll.u32 %s18146_s17, 4  ;;  %p18035_p3 = scmp.eq.s32.totalorder %s18183_s16, 0  ;;  %s149_s18 = int_to_ptr.vmem [resolvable:$true] %s148_s18 }
   0x5   : > { %p18187_p2 = pnand %p12313_p0, %p136_p1  ;;  %s18147_s20 = smov [#allocation4]  }
   0x6   : > { %s161_s21 = sshll.u32 %s18147_s20, 4  ;;  %s18089_s23 = scalar_lea.vmem %s149_s18, 3328  ;;  %s162_s21 = int_to_ptr.vmem [resolvable:$true] %s161_s21 }
   0x7   : > { %p18028_p4 = pneg %p18187_p2  ;;  %p18090_p7 = scmp.ne.s32.totalorder %s149_s18, %s18089_s23 }
   0x8   : > { %p18097_p10 = scmp.lt.s32.totalorder %s149_s18, %s149_s18  ;;  %p18098_p11 = scmp.lt.s32.totalorder %s18089_s23, %s18089_s23 }
   0x9   : > { %p18196_p5 = pnand %p18035_p3, %p18028_p4 }
   0xa   : > { %p18099_p12 = por %p18098_p11, %p18097_p10 }
   0xb   : > { %p18080_p6 = pneg %p18196_p5 }
   0xd   : > { %p18092_p8 = pnand %p18090_p7, %p18080_p6 }
   0xf   : > { %p18093_p9 = pneg %p18092_p8 }
  0x11   : > { %p18100_p13 = pnand %p18099_p12, %p18093_p9 }
  0x13   : > { %18103 = shalt.err (!%p18100_p13)
}
  0x14   : > { %s18148_s24 = smov 128   ;;  %s18149_s25 = smov 8  }
  0x15   : > { %18031 = dma.hbm_to_vmem [thread:$0]  (!%p18196_p5), %s24259_s0, 3328, %s149_s18, [#allocation3], %s18148_s24, %s18148_s24, %s18149_s25  }
  0x16   : > { %s18115_s28 = scalar_lea.vmem %s162_s21, 8192  ;;  %p18123_p7 = scmp.lt.s32.totalorder %s162_s21, %s162_s21 }
  0x17   : > { %p18116_p0 = scmp.ne.s32.totalorder %s162_s21, %s18115_s28  ;;  %p18124_p8 = scmp.lt.s32.totalorder %s18115_s28, %s18115_s28 }
  0x19   : > { %p18118_p1 = pnand %p18116_p0, %p18080_p6  ;;  %p18125_p10 = por %p18124_p8, %p18123_p7 }
  0x1b   : > { %p18119_p4 = pneg %p18118_p1 }
  0x1d   : > { %p18126_p9 = pnand %p18125_p10, %p18119_p4 }
  0x1f   : > { %18129 = shalt.err (!%p18126_p9)
}
  0x20   : > { %18034 = dma.hbm_to_vmem [thread:$0]  (!%p18196_p5), %s24260_s1, 8192, %s162_s21, [#allocation5], %s18148_s24, %s18148_s24, %s18149_s25  }
  0x21   : > { %187 = sbr.rel (%p18187_p2) target bundleno = 4670 (0x123e), region = 36 }
  0x26   : > { %18135 = dma.done.wait (%p18035_p3), [#allocation3], 3328  }
  0x27   : > { %18137 = vsyncadd (%p18035_p3), [#allocation3], 4294963968 }
  0x28   : > { %18139 = dma.done.wait (%p18035_p3), [#allocation5], 8192  }
  0x29   : > { %18141 = vsyncadd (%p18035_p3), [#allocation5], 4294959104  ;;  %v24436_v0 = vmov 0.0   ;;  %vm18151_vm0 = vmmov 0   ;;  %p215_p2 = scmp.lt.s32.totalorder %s18183_s16, 1  ;;  %v251_v1 = vld [vmem:[#allocation4 + $0x78] sm:$0xff] }
  0x2a   : > { %14240 = vmatprep.subr.mxu0 %v24436_v0  ;;  %14275 = vmatprep.subr.mxu1 %v24436_v0  ;;  %v250_v2 = vld [vmem:[#allocation4 + $0x70] sm:$0xff]  ;;  %v249_v3 = vld [vmem:[#allocation4 + $0x68] sm:$0xff]  ;;  %v18235_v4 = vand.u32 4294901760, %v251_v1  ;;  %v248_v7 = vld [vmem:[#allocation4 + $0x60] sm:$0xff] }
  0x2b   : > { %14272 = vmatprep.mubr.msk.f32.mxu0 %vm18151_vm0, %v24436_v0  ;;  %14307 = vmatprep.mubr.msk.f32.mxu1 %vm18151_vm0, %v24436_v0  ;;  %v18237_v5 = vand.u32 4294901760, %v250_v2  ;;  %v18239_v6 = vand.u32 4294901760, %v249_v3  ;;  %v247_v8 = vld [vmem:[#allocation4 + $0x58] sm:$0xff]  ;;  %v246_v9 = vld [vmem:[#allocation4 + $0x50] sm:$0xff]  ;;  %v18241_v10 = vand.u32 4294901760, %v248_v7  ;;  %v245_v13 = vld [vmem:[#allocation4 + $0x48] sm:$0xff] }
  0x2c   : > { %24909 = vst [vmem:[#allocation8_spill] sm:$0xff] %v18235_v4  ;;  %v18243_v11 = vand.u32 4294901760, %v247_v8  ;;  %v18245_v12 = vand.u32 4294901760, %v246_v9  ;;  %s25768_s16 = smov (!%p215_p2, %s18183_s16), 1  ;;  %14241 = vmatpush3.msra.mxu0 %v18235_v4  ;;  %v18254_v14 = vsub.f32 %v251_v1, %v18235_v4  ;;  %v18262_v17 = vand.u32 4294901760, %v245_v13  ;;  %v244_v18 = vld [vmem:[#allocation4 + $0x40] sm:$0xff] }
  0x2d   : > { %24910 = vst [vmem:[#allocation9_spill] sm:$0xff] %v18237_v5  ;;  %24911 = vst [vmem:[#allocation10_spill] sm:$0xff] %v18239_v6  ;;  %v18257_v15 = vsub.f32 %v250_v2, %v18237_v5  ;;  %v18260_v16 = vsub.f32 %v249_v3, %v18239_v6  ;;  %14242 = vmatprep.subr.mxu0 %v24436_v0  ;;  %v18266_v19 = vsub.f32 %v248_v7, %v18241_v10  ;;  %v243_v21 = vld [vmem:[#allocation4 + $0x38] sm:$0xff]  ;;  %v242_v29 = vld [vmem:[#allocation4 + $0x30] sm:$0xff]  ;;  %s12320_s5 = sshll.u32 %s25768_s16, 3 }
  0x2e   : > { %24912 = vst [vmem:[#allocation11_spill] sm:$0xff] %v18241_v10  ;;  %24913 = vst [vmem:[#allocation12_spill] sm:$0xff] %v18243_v11  ;;  %v18269_v20 = vsub.f32 %v247_v8, %v18243_v11  ;;  %14243 = vmatpush3.msra.mxu0 %v18237_v5  ;;  %v18273_v22 = vand.u32 4294901760, %v18254_v14  ;;  %v18282_v25 = vsub.f32 %v246_v9, %v18245_v12  ;;  %v18288_v27 = vand.u32 4294901760, %v244_v18  ;;  %v241_v36 = vld [vmem:[#allocation4 + $0x28] sm:$0xff]  ;;  %s218_s8 = scalar_lea.vmem %s24262_s3, %s12320_s5  ;;  %v240_v44 = vld [vmem:[#allocation4 + $0x20] sm:$0xff]  ;;  %s222_s21 = scalar_lea.vmem %s24263_s4, %s12320_s5 }
  0x2f   : > { %24914 = vst [vmem:[#allocation13_spill] sm:$0xff] %v18245_v12  ;;  %24915 = vst [vmem:[#allocation14_spill] sm:$0xff] %v18254_v14  ;;  %v18276_v23 = vand.u32 4294901760, %v18257_v15  ;;  %v18279_v24 = vand.u32 4294901760, %v18260_v16  ;;  %14244 = vmatprep.subr.mxu0 %v24436_v0  ;;  %v18286_v26 = vand.u32 4294901760, %v18266_v19  ;;  %v18294_v30 = vsub.f32 %v245_v13, %v18262_v17  ;;  %v239_v49 = vld [vmem:[#allocation4 + $0x18] sm:$0xff] }
  0x30   : > { %24916 = vst [vmem:[#allocation15_spill] sm:$0xff] %v18257_v15  ;;  %24917 = vst [vmem:[#allocation16_spill] sm:$0xff] %v18260_v16  ;;  %v18291_v28 = vand.u32 4294901760, %v18269_v20  ;;  %14245 = vmatpush3.msra.mxu0 %v18239_v6  ;;  %v347_v31 = vsub.f32 %v18254_v14, %v18273_v22  ;;  %v18304_v34 = vand.u32 4294901760, %v243_v21  ;;  %v18308_v35 = vand.u32 4294901760, %v18282_v25  ;;  %v18346_v50 = vld [vmem:[%s218_s8] sm:$0xff] }
  0x31   : > { %24918 = vst [vmem:[#allocation17_spill] sm:$0xff] %v18262_v17  ;;  %24919 = vst [vmem:[#allocation18_spill] sm:$0xff] %v18266_v19  ;;  %v354_v32 = vsub.f32 %v18257_v15, %v18276_v23  ;;  %v361_v33 = vsub.f32 %v18260_v16, %v18279_v24  ;;  %14246 = vmatprep.subr.mxu0 %v24436_v0  ;;  %v368_v39 = vsub.f32 %v18266_v19, %v18286_v26  ;;  %v238_v57 = vld [vmem:[#allocation4 + $0x10] sm:$0xff]  ;;  %v237_v62 = vld [vmem:[#allocation4 + $0x8] sm:$0xff] }
  0x32   : > { %24920 = vst [vmem:[#allocation19_spill] sm:$0xff] %v18269_v20  ;;  %24921 = vst [vmem:[#allocation20_spill] sm:$0xff] %v18273_v22  ;;  %14247 = vmatpush3.msra.mxu0 %v18241_v10  ;;  %v18311_v37 = vand.u32 4294901760, %v347_v31  ;;  %v18317_v40 = vand.u32 4294901760, %v242_v29  ;;  %v375_v41 = vsub.f32 %v18269_v20, %v18291_v28  ;;  %v18328_v42 = vand.u32 4294901760, %v18294_v30  ;;  %v236_v7 = vld [vmem:[#allocation4] sm:$0xff] }
  0x33   : > { %24922 = vst [vmem:[#allocation21_spill] sm:$0xff] %v18276_v23  ;;  %24923 = vst [vmem:[#allocation22_spill] sm:$0xff] %v18279_v24  ;;  %v18313_v38 = vand.u32 4294901760, %v354_v32  ;;  %14248 = vmatprep.subr.mxu0 %v24436_v0  ;;  %v18331_v43 = vsub.f32 %v244_v18, %v18288_v27  ;;  %v18335_v45 = vand.u32 4294901760, %v361_v33  ;;  %v18337_v46 = vand.u32 4294901760, %v241_v36 }
  0x34   : > { %24924 = vst [vmem:[#allocation23_spill] sm:$0xff] %v18282_v25  ;;  %24925 = vst [vmem:[#allocation24_spill] sm:$0xff] %v18286_v26  ;;  %14276 = vmatpush3.msra.mxu1 %v18311_v37  ;;  %14249 = vmatpush3.msra.mxu0 %v18243_v11  ;;  %v18340_v47 = vsub.f32 %v243_v21, %v18304_v34  ;;  %v382_v48 = vsub.f32 %v18282_v25, %v18308_v35  ;;  %v18350_v51 = vand.u32 4294901760, %v368_v39  ;;  %v230_v39 = vlaneseq }
  0x35   : > { %24926 = vst [vmem:[#allocation25_spill] sm:$0xff] %v18288_v27  ;;  %24927 = vst [vmem:[#allocation26_spill] sm:$0xff] %v18291_v28  ;;  %14277 = vmatprep.subr.mxu1 %v24436_v0  ;;  %14250 = vmatprep.subr.mxu0 %v24436_v0  ;;  %v18353_v52 = vand.u32 4294901760, %v18331_v43  ;;  %v18355_v53 = vand.u32 4294901760, %v240_v44  ;;  %v18358_v54 = vsub.f32 %v242_v29, %v18317_v40  ;;  %v18362_v55 = vand.u32 4294901760, %v375_v41 }
  0x36   : > { %24928 = vst [vmem:[#allocation27_spill] sm:$0xff] %v18294_v30  ;;  %24929 = vst [vmem:[#allocation28_spill] sm:$0xff] %v18304_v34  ;;  %14278 = vmatpush3.msra.mxu1 %v18313_v38  ;;  %14251 = vmatpush3.msra.mxu0 %v18245_v12  ;;  %v389_v56 = vsub.f32 %v18294_v30, %v18328_v42  ;;  %v18369_v58 = vand.u32 4294901760, %v18340_v47  ;;  %v18371_v59 = vand.u32 4294901760, %v239_v49  ;;  %18053 = vrcp.f32 %v18346_v50 }
  0x37   : > { %24930 = vst [vmem:[#allocation29_spill] sm:$0xff] %v18308_v35  ;;  %24931 = vst [vmem:[#allocation30_spill] sm:$0xff] %v18311_v37  ;;  %14279 = vmatprep.subr.mxu1 %v24436_v0  ;;  %14252 = vmatprep.subr.mxu0 %v24436_v0  ;;  %v18374_v60 = vsub.f32 %v241_v36, %v18337_v46  ;;  %v18379_v61 = vand.u32 4294901760, %v382_v48  ;;  %v396_v63 = vsub.f32 %v18331_v43, %v18353_v52 }
  0x38   : > { %24932 = vst [vmem:[#allocation31_spill] sm:$0xff] %v18313_v38  ;;  %24933 = vst [vmem:[#allocation32_spill] sm:$0xff] %v18317_v40  ;;  %14280 = vmatpush3.msra.mxu1 %v18335_v45  ;;  %14253 = vmatpush3.msra.mxu0 %v18262_v17  ;;  %v18386_v1 = vand.u32 4294901760, %v18358_v54  ;;  %v18388_v2 = vand.u32 4294901760, %v238_v57  ;;  %v18391_v3 = vsub.f32 %v240_v44, %v18355_v53  ;;  %v18395_v8 = vand.u32 4294901760, %v389_v56 }
  0x39   : > { %24934 = vst [vmem:[#allocation33_spill] sm:$0xff] %v18328_v42  ;;  %24935 = vst [vmem:[#allocation34_spill] sm:$0xff] %v18331_v43  ;;  %14281 = vmatprep.subr.mxu1 %v24436_v0  ;;  %14254 = vmatprep.subr.mxu0 %v24436_v0  ;;  %v403_v9 = vsub.f32 %v18340_v47, %v18369_v58  ;;  %v18402_v13 = vand.u32 4294901760, %v18374_v60  ;;  %v18404_v18 = vand.u32 4294901760, %v237_v62  ;;  %v18411_v29 = vand.u32 4294901760, %v236_v7 }
  0x3a   : > { %24936 = vst [vmem:[#allocation35_spill] sm:$0xff] %v18335_v45  ;;  %24937 = vst [vmem:[#allocation36_spill] sm:$0xff] %v18337_v46  ;;  %14282 = vmatpush3.msra.mxu1 %v18350_v51  ;;  %14255 = vmatpush3.msra.mxu0 %v18288_v27  ;;  %v18407_v21 = vsub.f32 %v239_v49, %v18371_v59  ;;  %v18415_v31 = vand.u32 4294901760, %v396_v63  ;;  %v410_v32 = vsub.f32 %v18358_v54, %v18386_v1  ;;  %v228_v45 = vld [vmem:[#allocation2] sm:$0xff] }
  0x3b   : > { %24938 = vst [vmem:[#allocation37_spill] sm:$0xff] %v18340_v47  ;;  %24939 = vst [vmem:[#allocation38_spill] sm:$0xff] %v18350_v51  ;;  %14283 = vmatprep.subr.mxu1 %v24436_v0  ;;  %14256 = vmatprep.subr.mxu0 %v24436_v0  ;;  %v18420_v33 = vand.u32 4294901760, %v18391_v3  ;;  %v18423_v36 = vsub.f32 %v238_v57, %v18388_v2  ;;  %v18429_v41 = vand.u32 4294901760, %v403_v9  ;;  %vm229_vm1 = vcmp.ne.f32.partialorder %v228_v45, 0.0 }
  0x3c   : > { %24940 = vst [vmem:[#allocation39_spill] sm:$0xff] %v18353_v52  ;;  %24941 = vst [vmem:[#allocation40_spill] sm:$0xff] %v18355_v53  ;;  %14284 = vmatpush3.msra.mxu1 %v18362_v55  ;;  %14257 = vmatpush3.msra.mxu0 %v18304_v34  ;;  %v417_v44 = vsub.f32 %v18374_v60, %v18402_v13  ;;  %v18434_v48 = vand.u32 4294901760, %v18407_v21  ;;  %v18437_v49 = vsub.f32 %v237_v62, %v18404_v18 }
  0x3d   : > { %24942 = vst [vmem:[#allocation41_spill] sm:$0xff] %v18358_v54  ;;  %24943 = vst [vmem:[#allocation42_spill] sm:$0xff] %v18362_v55  ;;  %14285 = vmatprep.subr.mxu1 %v24436_v0  ;;  %14258 = vmatprep.subr.mxu0 %v24436_v0  ;;  %v18443_v56 = vand.u32 4294901760, %v410_v32  ;;  %v424_v57 = vsub.f32 %v18391_v3, %v18420_v33  ;;  %v18448_v63 = vand.u32 4294901760, %v18423_v36 }
  0x3e   : > { %24944 = vst [vmem:[#allocation43_spill] sm:$0xff] %v18369_v58  ;;  %24945 = vst [vmem:[#allocation44_spill] sm:$0xff] %v18371_v59  ;;  %14286 = vmatpush3.msra.mxu1 %v18379_v61  ;;  %14259 = vmatpush3.msra.mxu0 %v18317_v40  ;;  %v18451_v9 = vsub.f32 %v236_v7, %v18411_v29  ;;  %v18457_v62 = vand.u32 4294901760, %v417_v44  ;;  %v431_v32 = vsub.f32 %v18407_v21, %v18434_v48 }
  0x3f   : > { %24946 = vst [vmem:[#allocation45_spill] sm:$0xff] %v18374_v60  ;;  %24947 = vst [vmem:[#allocation46_spill] sm:$0xff] %v18379_v61  ;;  %14287 = vmatprep.subr.mxu1 %v24436_v0  ;;  %14260 = vmatprep.subr.mxu0 %v24436_v0 }
  0x40   : > { %24948 = vst [vmem:[#allocation47_spill] sm:$0xff] %v18386_v1  ;;  %24949 = vst [vmem:[#allocation48_spill] sm:$0xff] %v18388_v2  ;;  %14288 = vmatpush3.msra.mxu1 %v18395_v8  ;;  %14261 = vmatpush3.msra.mxu0 %v18337_v46  ;;  %v18476_v61 = vand.u32 4294901760, %v18451_v9 }
  0x41   : > { %24950 = vst [vmem:[#allocation49_spill] sm:$0xff] %v18391_v3  ;;  %24951 = vst [vmem:[#allocation50_spill] sm:$0xff] %v18395_v8  ;;  %14289 = vmatprep.subr.mxu1 %v24436_v0  ;;  %14262 = vmatprep.subr.mxu0 %v24436_v0  ;;  %v18464_v8 = vand.u32 4294901760, %v18437_v49 }
  0x42   : > { %24952 = vst [vmem:[#allocation51_spill] sm:$0xff] %v18402_v13  ;;  %24953 = vst [vmem:[#allocation52_spill] sm:$0xff] %v18404_v18  ;;  %14290 = vmatpush3.msra.mxu1 %v18415_v31  ;;  %14263 = vmatpush3.msra.mxu0 %v18355_v53 }
  0x43   : > { %24954 = vst [vmem:[#allocation53_spill] sm:$0xff] %v18407_v21  ;;  %24955 = vst [vmem:[#allocation54_spill] sm:$0xff] %v18411_v29  ;;  %14291 = vmatprep.subr.mxu1 %v24436_v0  ;;  %14264 = vmatprep.subr.mxu0 %v24436_v0  ;;  %v18054_v7 = vpop.eup %18053  ;;  %v445_v51 = vsub.f32 %v18437_v49, %v18464_v8 }
  0x44   : > { %24956 = vst [vmem:[#allocation55_spill] sm:$0xff] %v18415_v31  ;;  %24957 = vst [vmem:[#allocation56_spill] sm:$0xff] %v18420_v33  ;;  %14292 = vmatpush3.msra.mxu1 %v18429_v41  ;;  %14265 = vmatpush3.msra.mxu0 %v18371_v59  ;;  %v18461_v31 = vshrl.u32 %v230_v39, 7  ;;  %v225_v44 = vmul.f32 %v18054_v7, %v18346_v50  ;;  %v438_v39 = vsub.f32 %v18423_v36, %v18448_v63 }
  0x45   : > { %24958 = vst [vmem:[#allocation57_spill] sm:$0xff] %v18423_v36  ;;  %24959 = vst [vmem:[#allocation58_spill] sm:$0xff] %v18429_v41  ;;  %14293 = vmatprep.subr.mxu1 %v24436_v0  ;;  %14266 = vmatprep.subr.mxu0 %v24436_v0  ;;  %v18470_v41 = vand.u32 4294901760, %v424_v57  ;;  %v18501_v37 = vand.u32 4294901760, %v445_v51 }
  0x46   : > { %24960 = vst [vmem:[#allocation59_spill] sm:$0xff] %v18434_v48  ;;  %24961 = vst [vmem:[#allocation60_spill] sm:$0xff] %v18437_v49  ;;  %14294 = vmatpush3.msra.mxu1 %v18443_v56  ;;  %14267 = vmatpush3.msra.mxu0 %v18388_v2  ;;  %v226_v57 = vsub.f32 2.0, %v225_v44  ;;  %v18485_v55 = vsub.s32 0, %v18461_v31  ;;  %v18493_v38 = vand.u32 4294901760, %v438_v39 }
  0x47   : > { %24962 = vst [vmem:[#allocation61_spill] sm:$0xff] %v18443_v56  ;;  %24963 = vst [vmem:[#allocation62_spill] sm:$0xff] %v18448_v63  ;;  %14295 = vmatprep.subr.mxu1 %v24436_v0  ;;  %14268 = vmatprep.subr.mxu0 %v24436_v0  ;;  %v18482_v56 = vand.u32 4294901760, %v431_v32  ;;  %v452_v32 = vsub.f32 %v18451_v9, %v18476_v61 }
  0x48   : > { %24964 = vst [vmem:[#allocation63_spill] sm:$0xff] %v18451_v9  ;;  %24965 = vst [vmem:[#allocation64_spill] sm:$0xff] %v18457_v62  ;;  %14296 = vmatpush3.msra.mxu1 %v18457_v62  ;;  %14269 = vmatpush3.msra.mxu0 %v18404_v18  ;;  %v227_v62 = vmul.f32 %v18054_v7, %v226_v57 }
  0x49   : > { %24966 = vst [vmem:[#allocation65_spill] sm:$0xff] %v18464_v8  ;;  %24967 = vst [vmem:[#allocation66_spill] sm:$0xff] %v18470_v41  ;;  %14297 = vmatprep.subr.mxu1 %v24436_v0  ;;  %14270 = vmatprep.subr.mxu0 %v24436_v0  ;;  %v18506_v39 = vand.u32 4294901760, %v452_v32 }
  0x4a   : > { %24968 = vst [vmem:[#allocation67_spill] sm:$0xff] %v18476_v61  ;;  %24969 = vst [vmem:[#allocation68_spill] sm:$0xff] %v18482_v56  ;;  %14298 = vmatpush3.msra.mxu1 %v18470_v41  ;;  %14271 = vmatpush3.msra.mxu0 %v18411_v29  ;;  %v233_v44 = vrot.slane %v227_v62, %v18485_v55 }
  0x4b   : > { %24970 = vst [vmem:[#allocation69_spill] sm:$0xff] %v18485_v55  ;;  %24971 = vst [vmem:[#allocation70_spill] sm:$0xff] %v18493_v38  ;;  %14299 = vmatprep.subr.mxu1 %v24436_v0  ;;  %14310 = vmatprep.subr.mxu0 %v24436_v0 }
  0x4c   : > { %14300 = vmatpush3.msra.mxu1 %v18482_v56  ;;  %24972 = vst [vmem:[#allocation71_spill] sm:$0xff] %v18501_v37  ;;  %v234_v7 = vmul.f32 %v233_v44, %v18346_v50  ;;  %24973 = vst [vmem:[#allocation72_spill] sm:$0xff] %v18506_v39 }
  0x4d   : > { %14301 = vmatprep.subr.mxu1 %v24436_v0 }
  0x4e   : > { %14302 = vmatpush3.msra.mxu1 %v18493_v38  ;;  %v18510_v57 = vsel %vm229_vm1, %v234_v7, %v18346_v50  ;;  %v931_v7 = vld [vmem:[#allocation4 + $0xf8] sm:$0xff] }
  0x4f   : > { %14303 = vmatprep.subr.mxu1 %v24436_v0  ;;  %v18514_v62 = vand.u32 4294901760, %v18510_v57 }
  0x50   : > { %14304 = vmatpush3.msra.mxu1 %v18501_v37 }
  0x51   : > { %14305 = vmatprep.subr.mxu1 %v24436_v0  ;;  %v18520_v45 = vsub.f32 %v18510_v57, %v18514_v62 }
  0x52   : > { %14306 = vmatpush3.msra.mxu1 %v18506_v39  ;;  %v918_v39 = vld [vmem:[#allocation4 + $0x90] sm:$0xff] }
  0x53   : > { %14308 = vmatmul.mubr.f32.vlgmr.msra.gmra.mxu1 %v18514_v62  ;;  %14345 = vmatprep.subr.mxu1 %v24436_v0  ;;  %v335_v51 = vand.u32 4294901760, %v18520_v45  ;;  %v18849_v37 = vand.u32 4294901760, %v918_v39 }
  0x54   : > { %14346 = vmatpush3.msra.mxu1 %v18235_v4  ;;  %14377 = vmatprep.mubr.msk.f32.mxu1 %vm18151_vm0, %v24436_v0 }
  0x55   : > { %14347 = vmatprep.subr.mxu1 %v24436_v0  ;;  %v336_v32 = vsub.f32 %v18520_v45, %v335_v51  ;;  %25021 = vst [vmem:[#allocation120_spill] sm:$0xff] %v18849_v37 }
  0x56   : > { %14348 = vmatpush3.msra.mxu1 %v18237_v5 }
  0x57   : > { %14349 = vmatprep.subr.mxu1 %v24436_v0  ;;  %v337_v44 = vand.u32 4294901760, %v336_v32 }
  0x58   : > { %14350 = vmatpush3.msra.mxu1 %v18239_v6 }
  0x59   : > { %14351 = vmatprep.subr.mxu1 %v24436_v0  ;;  %14273 = vmatmul.mubr.f32.vlgmr.msra.gmra.mxu0 %v337_v44 }
  0x5a   : > { %14352 = vmatpush3.msra.mxu1 %v18241_v10  ;;  %14311 = vmatpush3.msra.mxu0 %v18254_v14 }
  0x5b   : > { %14353 = vmatprep.subr.mxu1 %v24436_v0  ;;  %14312 = vmatprep.subr.mxu0 %v24436_v0 }
  0x5c   : > { %14354 = vmatpush3.msra.mxu1 %v18243_v11  ;;  %14313 = vmatpush3.msra.mxu0 %v18257_v15  ;;  %v920_v15 = vld [vmem:[#allocation4 + $0xa0] sm:$0xff] }
  0x5d   : > { %14355 = vmatprep.subr.mxu1 %v24436_v0  ;;  %14314 = vmatprep.subr.mxu0 %v24436_v0 }
  0x5e   : > { %14356 = vmatpush3.msra.mxu1 %v18245_v12  ;;  %14315 = vmatpush3.msra.mxu0 %v18260_v16 }
  0x5f   : > { %14357 = vmatprep.subr.mxu1 %v24436_v0  ;;  %14316 = vmatprep.subr.mxu0 %v24436_v0 }
  0x60   : > { %14358 = vmatpush3.msra.mxu1 %v18262_v17  ;;  %14317 = vmatpush3.msra.mxu0 %v18266_v19 }
  0x61   : > { %14359 = vmatprep.subr.mxu1 %v24436_v0  ;;  %14318 = vmatprep.subr.mxu0 %v24436_v0 }
  0x62   : > { %14360 = vmatpush3.msra.mxu1 %v18288_v27  ;;  %14319 = vmatpush3.msra.mxu0 %v18269_v20  ;;  %v921_v20 = vld [vmem:[#allocation4 + $0xa8] sm:$0xff] }
  0x63   : > { %14361 = vmatprep.subr.mxu1 %v24436_v0  ;;  %14320 = vmatprep.subr.mxu0 %v24436_v0 }
  0x64   : > { %14362 = vmatpush3.msra.mxu1 %v18304_v34  ;;  %14321 = vmatpush3.msra.mxu0 %v18282_v25 }
  0x65   : > { %14363 = vmatprep.subr.mxu1 %v24436_v0  ;;  %14322 = vmatprep.subr.mxu0 %v24436_v0 }
  0x66   : > { %14364 = vmatpush3.msra.mxu1 %v18317_v40  ;;  %14323 = vmatpush3.msra.mxu0 %v18294_v30 }
  0x67   : > { %14365 = vmatprep.subr.mxu1 %v24436_v0  ;;  %14324 = vmatprep.subr.mxu0 %v24436_v0 }
  0x68   : > { %14366 = vmatpush3.msra.mxu1 %v18337_v46  ;;  %14325 = vmatpush3.msra.mxu0 %v18331_v43  ;;  %v922_v43 = vld [vmem:[#allocation4 + $0xb0] sm:$0xff] }
  0x69   : > { %14367 = vmatprep.subr.mxu1 %v24436_v0  ;;  %14326 = vmatprep.subr.mxu0 %v24436_v0 }
  0x6a   : > { %14368 = vmatpush3.msra.mxu1 %v18355_v53  ;;  %14342 = vmatprep.mubr.msk.f32.mxu0 %vm18151_vm0, %v24436_v0 }
  0x6b   : > { %14327 = vmatpush3.msra.mxu0 %v18340_v47  ;;  %14369 = vmatprep.subr.mxu1 %v24436_v0 }
  0x6c   : > { %14328 = vmatprep.subr.mxu0 %v24436_v0  ;;  %14370 = vmatpush3.msra.mxu1 %v18371_v59 }
  0x6d   : > { %14329 = vmatpush3.msra.mxu0 %v18358_v54  ;;  %14371 = vmatprep.subr.mxu1 %v24436_v0 }
  0x6e   : > { %14330 = vmatprep.subr.mxu0 %v24436_v0  ;;  %14372 = vmatpush3.msra.mxu1 %v18388_v2 }
  0x6f   : > { %14331 = vmatpush3.msra.mxu0 %v18374_v60  ;;  %14373 = vmatprep.subr.mxu1 %v24436_v0  ;;  %v923_v60 = vld [vmem:[#allocation4 + $0xb8] sm:$0xff] }
  0x70   : > { %14332 = vmatprep.subr.mxu0 %v24436_v0  ;;  %14374 = vmatpush3.msra.mxu1 %v18404_v18  ;;  %v18770_v54 = vand.u32 4294901760, %v923_v60 }
  0x71   : > { %14333 = vmatpush3.msra.mxu0 %v18391_v3  ;;  %14375 = vmatprep.subr.mxu1 %v24436_v0 }
  0x72   : > { %14334 = vmatprep.subr.mxu0 %v24436_v0  ;;  %14376 = vmatpush3.msra.mxu1 %v18411_v29  ;;  %25001 = vst [vmem:[#allocation100_spill] sm:$0xff] %v18770_v54 }
  0x73   : > { %14335 = vmatpush3.msra.mxu0 %v18407_v21  ;;  %14378 = vmatmul.mubr.f32.vlgmr.msra.gmra.mxu1 %v335_v51  ;;  %v930_v51 = vld [vmem:[#allocation4 + $0xf0] sm:$0xff] }
  0x74   : > { %14336 = vmatprep.subr.mxu0 %v24436_v0  ;;  %14415 = vmatprep.subr.mxu1 %v24436_v0  ;;  %v18674_v44 = vand.u32 4294901760, %v930_v51 }
  0x75   : > { %14337 = vmatpush3.msra.mxu0 %v18423_v36  ;;  %14416 = vmatpush3.msra.mxu1 %v18235_v4  ;;  %v924_v36 = vld [vmem:[#allocation4 + $0xc0] sm:$0xff] }
  0x76   : > { %14338 = vmatprep.subr.mxu0 %v24436_v0  ;;  %14417 = vmatprep.subr.mxu1 %v24436_v0  ;;  %24976 = vst [vmem:[#allocation75_spill] sm:$0xff] %v18674_v44  ;;  %v18754_v21 = vand.u32 4294901760, %v924_v36 }
  0x77   : > { %14339 = vmatpush3.msra.mxu0 %v18437_v49  ;;  %14418 = vmatpush3.msra.mxu1 %v18237_v5 }
  0x78   : > { %14340 = vmatprep.subr.mxu0 %v24436_v0  ;;  %14419 = vmatprep.subr.mxu1 %v24436_v0  ;;  %24998 = vst [vmem:[#allocation97_spill] sm:$0xff] %v18754_v21 }
  0x79   : > { %14341 = vmatpush3.msra.mxu0 %v18451_v9  ;;  %14420 = vmatpush3.msra.mxu1 %v18239_v6 }
  0x7a   : > { %14343 = vmatmul.mubr.f32.vlgmr.msra.gmra.mxu0 %v18520_v45  ;;  %14380 = vmatprep.subr.mxu0 %v24436_v0  ;;  %v18669_v45 = vand.u32 4294901760, %v931_v7 }
  0x7b   : > { %14381 = vmatpush3.msra.mxu0 %v18273_v22  ;;  %14421 = vmatprep.subr.mxu1 %v24436_v0  ;;  %v925_v22 = vld [vmem:[#allocation4 + $0xc8] sm:$0xff] }
  0x7c   : > { %14382 = vmatprep.subr.mxu0 %v24436_v0  ;;  %14422 = vmatpush3.msra.mxu1 %v18241_v10  ;;  %24974 = vst [vmem:[#allocation73_spill] sm:$0xff] %v18669_v45  ;;  %v18672_v32 = vsub.f32 %v931_v7, %v18669_v45  ;;  %v18737_v49 = vand.u32 4294901760, %v925_v22 }
  0x7d   : > { %14383 = vmatpush3.msra.mxu0 %v18276_v23  ;;  %14423 = vmatprep.subr.mxu1 %v24436_v0 }
  0x7e   : > { %14384 = vmatprep.subr.mxu0 %v24436_v0  ;;  %14424 = vmatpush3.msra.mxu1 %v18243_v11  ;;  %24975 = vst [vmem:[#allocation74_spill] sm:$0xff] %v18672_v32  ;;  %24993 = vst [vmem:[#allocation92_spill] sm:$0xff] %v18737_v49 }
  0x7f   : > { %14385 = vmatpush3.msra.mxu0 %v18279_v24  ;;  %14425 = vmatprep.subr.mxu1 %v24436_v0 }
  0x80   : > { %14386 = vmatprep.subr.mxu0 %v24436_v0  ;;  %14426 = vmatpush3.msra.mxu1 %v18245_v12 }
  0x81   : > { %14387 = vmatpush3.msra.mxu0 %v18286_v26  ;;  %14427 = vmatprep.subr.mxu1 %v24436_v0 }
  0x82   : > { %14388 = vmatprep.subr.mxu0 %v24436_v0  ;;  %14428 = vmatpush3.msra.mxu1 %v18262_v17 }
  0x83   : > { %14389 = vmatpush3.msra.mxu0 %v18291_v28  ;;  %14429 = vmatprep.subr.mxu1 %v24436_v0  ;;  %v926_v28 = vld [vmem:[#allocation4 + $0xd0] sm:$0xff] }
  0x84   : > { %14390 = vmatprep.subr.mxu0 %v24436_v0  ;;  %14430 = vmatpush3.msra.mxu1 %v18288_v27  ;;  %v18722_v23 = vand.u32 4294901760, %v926_v28 }
  0x85   : > { %14391 = vmatpush3.msra.mxu0 %v18308_v35  ;;  %14431 = vmatprep.subr.mxu1 %v24436_v0 }
  0x86   : > { %14392 = vmatprep.subr.mxu0 %v24436_v0  ;;  %14432 = vmatpush3.msra.mxu1 %v18304_v34  ;;  %24989 = vst [vmem:[#allocation88_spill] sm:$0xff] %v18722_v23  ;;  %v18735_v9 = vsub.f32 %v926_v28, %v18722_v23  ;;  %v18752_v28 = vsub.f32 %v925_v22, %v18737_v49 }
  0x87   : > { %14393 = vmatpush3.msra.mxu0 %v18328_v42  ;;  %14433 = vmatprep.subr.mxu1 %v24436_v0 }
  0x88   : > { %14394 = vmatprep.subr.mxu0 %v24436_v0  ;;  %14434 = vmatpush3.msra.mxu1 %v18317_v40  ;;  %24992 = vst [vmem:[#allocation91_spill] sm:$0xff] %v18735_v9  ;;  %24997 = vst [vmem:[#allocation96_spill] sm:$0xff] %v18752_v28  ;;  %v18765_v22 = vand.u32 4294901760, %v18752_v28 }
  0x89   : > { %14395 = vmatpush3.msra.mxu0 %v18353_v52  ;;  %14435 = vmatprep.subr.mxu1 %v24436_v0 }
  0x8a   : > { %14396 = vmatprep.subr.mxu0 %v24436_v0  ;;  %14436 = vmatpush3.msra.mxu1 %v18337_v46  ;;  %24999 = vst [vmem:[#allocation98_spill] sm:$0xff] %v18765_v22  ;;  %v1069_v30 = vsub.f32 %v18752_v28, %v18765_v22  ;;  %v916_v46 = vld [vmem:[#allocation4 + $0x80] sm:$0xff] }
  0x8b   : > { %14397 = vmatpush3.msra.mxu0 %v18369_v58  ;;  %14437 = vmatprep.subr.mxu1 %v24436_v0  ;;  %v18857_v56 = vand.u32 4294901760, %v916_v46 }
  0x8c   : > { %14398 = vmatprep.subr.mxu0 %v24436_v0  ;;  %14438 = vmatpush3.msra.mxu1 %v18355_v53 }
  0x8d   : > { %14399 = vmatpush3.msra.mxu0 %v18386_v1  ;;  %14412 = vmatprep.mubr.msk.f32.mxu0 %vm18151_vm0, %v24436_v0  ;;  %25024 = vst [vmem:[#allocation123_spill] sm:$0xff] %v18857_v56  ;;  %v18877_v27 = vsub.f32 %v916_v46, %v18857_v56 }
  0x8e   : > { %14400 = vmatprep.subr.mxu0 %v24436_v0  ;;  %14439 = vmatprep.subr.mxu1 %v24436_v0 }
  0x8f   : > { %14401 = vmatpush3.msra.mxu0 %v18402_v13  ;;  %14440 = vmatpush3.msra.mxu1 %v18371_v59  ;;  %25029 = vst [vmem:[#allocation128_spill] sm:$0xff] %v18877_v27  ;;  %v18894_v46 = vand.u32 4294901760, %v18877_v27 }
  0x90   : > { %14402 = vmatprep.subr.mxu0 %v24436_v0  ;;  %14441 = vmatprep.subr.mxu1 %v24436_v0 }
  0x91   : > { %14403 = vmatpush3.msra.mxu0 %v18420_v33  ;;  %14442 = vmatpush3.msra.mxu1 %v18388_v2  ;;  %25033 = vst [vmem:[#allocation132_spill] sm:$0xff] %v18894_v46  ;;  %v1132_v12 = vsub.f32 %v18877_v27, %v18894_v46 }
  0x92   : > { %14404 = vmatprep.subr.mxu0 %v24436_v0  ;;  %14443 = vmatprep.subr.mxu1 %v24436_v0 }
  0x93   : > { %14405 = vmatpush3.msra.mxu0 %v18434_v48  ;;  %14444 = vmatpush3.msra.mxu1 %v18404_v18  ;;  %v928_v48 = vld [vmem:[#allocation4 + $0xe0] sm:$0xff]  ;;  %v18816_v18 = vand.u32 4294901760, %v920_v15 }
  0x94   : > { %14406 = vmatprep.subr.mxu0 %v24436_v0  ;;  %14445 = vmatprep.subr.mxu1 %v24436_v0  ;;  %v18696_v1 = vand.u32 4294901760, %v928_v48 }
  0x95   : > { %14407 = vmatpush3.msra.mxu0 %v18448_v63  ;;  %14446 = vmatpush3.msra.mxu1 %v18411_v29  ;;  %25013 = vst [vmem:[#allocation112_spill] sm:$0xff] %v18816_v18 }
  0x96   : > { %14408 = vmatprep.subr.mxu0 %v24436_v0  ;;  %14447 = vmatprep.mubr.msk.f32.mxu1 %vm18151_vm0, %v24436_v0  ;;  %24982 = vst [vmem:[#allocation81_spill] sm:$0xff] %v18696_v1  ;;  %v18708_v35 = vsub.f32 %v928_v48, %v18696_v1 }
  0x97   : > { %14409 = vmatpush3.msra.mxu0 %v18464_v8  ;;  %14448 = vmatmul.mubr.f32.vlgmr.msra.gmra.mxu1 %v18514_v62  ;;  %v18682_v8 = vsub.f32 %v930_v51, %v18674_v44  ;;  %v927_v51 = vld [vmem:[#allocation4 + $0xd8] sm:$0xff] }
  0x98   : > { %14410 = vmatprep.subr.mxu0 %v24436_v0  ;;  %14485 = vmatprep.subr.mxu1 %v24436_v0  ;;  %24985 = vst [vmem:[#allocation84_spill] sm:$0xff] %v18708_v35  ;;  %v18720_v24 = vand.u32 4294901760, %v18708_v35 }
  0x99   : > { %14411 = vmatpush3.msra.mxu0 %v18476_v61  ;;  %14517 = vmatprep.mubr.msk.f32.mxu1 %vm18151_vm0, %v24436_v0  ;;  %v929_v61 = vld [vmem:[#allocation4 + $0xe8] sm:$0xff]  ;;  %24978 = vst [vmem:[#allocation77_spill] sm:$0xff] %v18682_v8  ;;  %v18691_v33 = vand.u32 4294901760, %v18682_v8 }
  0x9a   : > { %14413 = vmatmul.mubr.f32.vlgmr.msra.gmra.mxu0 %v18514_v62  ;;  %14450 = vmatprep.subr.mxu0 %v24436_v0  ;;  %v18679_v62 = vand.u32 4294901760, %v18672_v32  ;;  %v18684_v63 = vand.u32 4294901760, %v929_v61  ;;  %24988 = vst [vmem:[#allocation87_spill] sm:$0xff] %v18720_v24 }
  0x9b   : > { %14482 = vmatprep.mubr.msk.f32.mxu0 %vm18151_vm0, %v24436_v0  ;;  %14451 = vmatpush3.msra.mxu0 %v18669_v45  ;;  %24980 = vst [vmem:[#allocation79_spill] sm:$0xff] %v18691_v33  ;;  %v1034_v52 = vsub.f32 %v18682_v8, %v18691_v33 }
  0x9c   : > { %14452 = vmatprep.subr.mxu0 %v24436_v0  ;;  %24977 = vst [vmem:[#allocation76_spill] sm:$0xff] %v18679_v62  ;;  %24979 = vst [vmem:[#allocation78_spill] sm:$0xff] %v18684_v63  ;;  %v1027_v7 = vsub.f32 %v18672_v32, %v18679_v62  ;;  %v18694_v13 = vsub.f32 %v929_v61, %v18684_v63  ;;  %v18711_v61 = vand.u32 4294901760, %v927_v51 }
  0x9d   : > { %14453 = vmatpush3.msra.mxu0 %v18674_v44 }
  0x9e   : > { %14454 = vmatprep.subr.mxu0 %v24436_v0  ;;  %24981 = vst [vmem:[#allocation80_spill] sm:$0xff] %v18694_v13  ;;  %v18700_v58 = vand.u32 4294901760, %v1027_v7  ;;  %v18705_v42 = vand.u32 4294901760, %v18694_v13  ;;  %24986 = vst [vmem:[#allocation85_spill] sm:$0xff] %v18711_v61  ;;  %v18715_v7 = vand.u32 4294901760, %v1034_v52  ;;  %v18726_v48 = vsub.f32 %v927_v51, %v18711_v61 }
  0x9f   : > { %14455 = vmatpush3.msra.mxu0 %v18684_v63 }
  0xa0   : > { %14456 = vmatprep.subr.mxu0 %v24436_v0  ;;  %24983 = vst [vmem:[#allocation82_spill] sm:$0xff] %v18700_v58  ;;  %24984 = vst [vmem:[#allocation83_spill] sm:$0xff] %v18705_v42  ;;  %14486 = vmatpush3.msra.mxu1 %v18700_v58  ;;  %v1041_v26 = vsub.f32 %v18694_v13, %v18705_v42  ;;  %v1048_v58 = vsub.f32 %v18708_v35, %v18720_v24  ;;  %v18742_v51 = vand.u32 4294901760, %v18726_v48 }
  0xa1   : > { %14457 = vmatpush3.msra.mxu0 %v18696_v1  ;;  %24987 = vst [vmem:[#allocation86_spill] sm:$0xff] %v18715_v7  ;;  %14487 = vmatprep.subr.mxu1 %v24436_v0  ;;  %24990 = vst [vmem:[#allocation89_spill] sm:$0xff] %v18726_v48 }
  0xa2   : > { %14458 = vmatprep.subr.mxu0 %v24436_v0  ;;  %14488 = vmatpush3.msra.mxu1 %v18715_v7  ;;  %v18730_v52 = vand.u32 4294901760, %v1041_v26  ;;  %24994 = vst [vmem:[#allocation93_spill] sm:$0xff] %v18742_v51  ;;  %v18746_v26 = vand.u32 4294901760, %v1048_v58  ;;  %v18749_v7 = vand.u32 4294901760, %v18735_v9  ;;  %v1055_v3 = vsub.f32 %v18726_v48, %v18742_v51 }
  0xa3   : > { %14459 = vmatpush3.msra.mxu0 %v18711_v61  ;;  %14489 = vmatprep.subr.mxu1 %v24436_v0 }
  0xa4   : > { %24991 = vst [vmem:[#allocation90_spill] sm:$0xff] %v18730_v52  ;;  %14460 = vmatprep.subr.mxu0 %v24436_v0  ;;  %14490 = vmatpush3.msra.mxu1 %v18730_v52  ;;  %24995 = vst [vmem:[#allocation94_spill] sm:$0xff] %v18746_v26  ;;  %v1062_v58 = vsub.f32 %v18735_v9, %v18749_v7  ;;  %v18768_v52 = vsub.f32 %v924_v36, %v18754_v21  ;;  %v18774_v47 = vand.u32 4294901760, %v1055_v3 }
  0xa5   : > { %14461 = vmatpush3.msra.mxu0 %v18722_v23  ;;  %24996 = vst [vmem:[#allocation95_spill] sm:$0xff] %v18749_v7  ;;  %14491 = vmatprep.subr.mxu1 %v24436_v0  ;;  %v18785_v36 = vsub.f32 %v923_v60, %v18770_v54  ;;  %v18789_v3 = vand.u32 4294901760, %v922_v43  ;;  %v18800_v60 = vand.u32 4294901760, %v921_v20 }
  0xa6   : > { %14462 = vmatprep.subr.mxu0 %v24436_v0  ;;  %14492 = vmatpush3.msra.mxu1 %v18746_v26  ;;  %25000 = vst [vmem:[#allocation99_spill] sm:$0xff] %v18768_v52  ;;  %25002 = vst [vmem:[#allocation101_spill] sm:$0xff] %v18774_v47  ;;  %v18777_v26 = vand.u32 4294901760, %v1062_v58  ;;  %v18782_v25 = vand.u32 4294901760, %v18768_v52  ;;  %v18793_v58 = vand.u32 4294901760, %v1069_v30 }
  0xa7   : > { %14463 = vmatpush3.msra.mxu0 %v18737_v49  ;;  %14493 = vmatprep.subr.mxu1 %v24436_v0  ;;  %25005 = vst [vmem:[#allocation104_spill] sm:$0xff] %v18785_v36  ;;  %25006 = vst [vmem:[#allocation105_spill] sm:$0xff] %v18789_v3  ;;  %v18798_v16 = vand.u32 4294901760, %v18785_v36  ;;  %v18814_v29 = vsub.f32 %v921_v20, %v18800_v60  ;;  %v18831_v20 = vsub.f32 %v920_v15, %v18816_v18 }
  0xa8   : > { %14464 = vmatprep.subr.mxu0 %v24436_v0  ;;  %25003 = vst [vmem:[#allocation102_spill] sm:$0xff] %v18777_v26  ;;  %25004 = vst [vmem:[#allocation103_spill] sm:$0xff] %v18782_v25  ;;  %14494 = vmatpush3.msra.mxu1 %v18774_v47  ;;  %v1076_v19 = vsub.f32 %v18768_v52, %v18782_v25  ;;  %v18805_v47 = vsub.f32 %v922_v43, %v18789_v3 }
  0xa9   : > { %14465 = vmatpush3.msra.mxu0 %v18754_v21  ;;  %14495 = vmatprep.subr.mxu1 %v24436_v0  ;;  %25007 = vst [vmem:[#allocation106_spill] sm:$0xff] %v18793_v58  ;;  %25008 = vst [vmem:[#allocation107_spill] sm:$0xff] %v18798_v16  ;;  %v1083_v14 = vsub.f32 %v18785_v36, %v18798_v16  ;;  %v18828_v2 = vand.u32 4294901760, %v18814_v29  ;;  %v18844_v15 = vand.u32 4294901760, %v18831_v20 }
  0xaa   : > { %14466 = vmatprep.subr.mxu0 %v24436_v0  ;;  %25009 = vst [vmem:[#allocation108_spill] sm:$0xff] %v18800_v60  ;;  %14496 = vmatpush3.msra.mxu1 %v18777_v26  ;;  %25010 = vst [vmem:[#allocation109_spill] sm:$0xff] %v18805_v47  ;;  %v18809_v30 = vand.u32 4294901760, %v1076_v19  ;;  %v18821_v43 = vand.u32 4294901760, %v18805_v47  ;;  %v919_v26 = vld [vmem:[#allocation4 + $0x98] sm:$0xff] }
  0xab   : > { %14467 = vmatpush3.msra.mxu0 %v18770_v54  ;;  %14497 = vmatprep.subr.mxu1 %v24436_v0  ;;  %25012 = vst [vmem:[#allocation111_spill] sm:$0xff] %v18814_v29  ;;  %v18825_v19 = vand.u32 4294901760, %v1083_v14  ;;  %25016 = vst [vmem:[#allocation115_spill] sm:$0xff] %v18828_v2  ;;  %v18833_v59 = vand.u32 4294901760, %v919_v26  ;;  %v1097_v14 = vsub.f32 %v18814_v29, %v18828_v2 }
  0xac   : > { %14468 = vmatprep.subr.mxu0 %v24436_v0  ;;  %25011 = vst [vmem:[#allocation110_spill] sm:$0xff] %v18809_v30  ;;  %14498 = vmatpush3.msra.mxu1 %v18793_v58  ;;  %25014 = vst [vmem:[#allocation113_spill] sm:$0xff] %v18821_v43  ;;  %v1090_v58 = vsub.f32 %v18805_v47, %v18821_v43  ;;  %v1104_v34 = vsub.f32 %v18831_v20, %v18844_v15  ;;  %v894_v43 = vld [vmem:[#allocation2 + $0x8] sm:$0xff] }
  0xad   : > { %14469 = vmatpush3.msra.mxu0 %v18789_v3  ;;  %14499 = vmatprep.subr.mxu1 %v24436_v0  ;;  %25015 = vst [vmem:[#allocation114_spill] sm:$0xff] %v18825_v19  ;;  %25017 = vst [vmem:[#allocation116_spill] sm:$0xff] %v18831_v20  ;;  %v18847_v53 = vsub.f32 %v919_v26, %v18833_v59  ;;  %v18861_v26 = vand.u32 4294901760, %v1097_v14 }
  0xae   : > { %14470 = vmatprep.subr.mxu0 %v24436_v0  ;;  %25018 = vst [vmem:[#allocation117_spill] sm:$0xff] %v18833_v59  ;;  %14500 = vmatpush3.msra.mxu1 %v18809_v30  ;;  %25019 = vst [vmem:[#allocation118_spill] sm:$0xff] %v18844_v15  ;;  %v917_v30 = vld [vmem:[#allocation4 + $0x88] sm:$0xff]  ;;  %v18853_v38 = vand.u32 4294901760, %v1090_v58  ;;  %v18881_v14 = vand.u32 4294901760, %v1104_v34 }
  0xaf   : > { %14471 = vmatpush3.msra.mxu0 %v18800_v60  ;;  %14501 = vmatprep.subr.mxu1 %v24436_v0  ;;  %25020 = vst [vmem:[#allocation119_spill] sm:$0xff] %v18847_v53  ;;  %v18855_v40 = vand.u32 4294901760, %v917_v30  ;;  %25025 = vst [vmem:[#allocation124_spill] sm:$0xff] %v18861_v26  ;;  %v18866_v41 = vand.u32 4294901760, %v18847_v53 }
  0xb0   : > { %14472 = vmatprep.subr.mxu0 %v24436_v0  ;;  %14502 = vmatpush3.msra.mxu1 %v18825_v19  ;;  %25022 = vst [vmem:[#allocation121_spill] sm:$0xff] %v18853_v38  ;;  %v18869_v19 = vsub.f32 %v918_v39, %v18849_v37  ;;  %25030 = vst [vmem:[#allocation129_spill] sm:$0xff] %v18881_v14 }
  0xb1   : > { %14473 = vmatpush3.msra.mxu0 %v18816_v18  ;;  %25023 = vst [vmem:[#allocation122_spill] sm:$0xff] %v18855_v40  ;;  %14503 = vmatprep.subr.mxu1 %v24436_v0  ;;  %25026 = vst [vmem:[#allocation125_spill] sm:$0xff] %v18866_v41  ;;  %v18874_v58 = vsub.f32 %v917_v30, %v18855_v40  ;;  %v1111_v39 = vsub.f32 %v18847_v53, %v18866_v41 }
  0xb2   : > { %14474 = vmatprep.subr.mxu0 %v24436_v0  ;;  %25027 = vst [vmem:[#allocation126_spill] sm:$0xff] %v18869_v19  ;;  %14504 = vmatpush3.msra.mxu1 %v18853_v38  ;;  %v18886_v17 = vand.u32 4294901760, %v18869_v19 }
  0xb3   : > { %14475 = vmatpush3.msra.mxu0 %v18833_v59  ;;  %25028 = vst [vmem:[#allocation127_spill] sm:$0xff] %v18874_v58  ;;  %14505 = vmatprep.subr.mxu1 %v24436_v0  ;;  %v18891_v30 = vand.u32 4294901760, %v18874_v58  ;;  %v18898_v34 = vand.u32 4294901760, %v1111_v39 }
  0xb4   : > { %14476 = vmatprep.subr.mxu0 %v24436_v0  ;;  %25031 = vst [vmem:[#allocation130_spill] sm:$0xff] %v18886_v17  ;;  %14506 = vmatpush3.msra.mxu1 %v18861_v26  ;;  %v1118_v38 = vsub.f32 %v18869_v19, %v18886_v17 }
  0xb5   : > { %14477 = vmatpush3.msra.mxu0 %v18849_v37  ;;  %25032 = vst [vmem:[#allocation131_spill] sm:$0xff] %v18891_v30  ;;  %14507 = vmatprep.subr.mxu1 %v24436_v0  ;;  %25034 = vst [vmem:[#allocation133_spill] sm:$0xff] %v18898_v34  ;;  %v1125_v26 = vsub.f32 %v18874_v58, %v18891_v30 }
  0xb6   : > { %14478 = vmatprep.subr.mxu0 %v24436_v0  ;;  %14508 = vmatpush3.msra.mxu1 %v18881_v14  ;;  %v18910_v11 = vand.u32 4294901760, %v1118_v38  ;;  %v18918_v14 = vand.u32 4294901760, %v1132_v12 }
  0xb7   : > { %14479 = vmatpush3.msra.mxu0 %v18855_v40  ;;  %14509 = vmatprep.subr.mxu1 %v24436_v0  ;;  %v18914_v39 = vand.u32 4294901760, %v1125_v26 }
  0xb8   : > { %14480 = vmatprep.subr.mxu0 %v24436_v0  ;;  %25035 = vst [vmem:[#allocation134_spill] sm:$0xff] %v18910_v11  ;;  %14510 = vmatpush3.msra.mxu1 %v18898_v34  ;;  %25037 = vst [vmem:[#allocation136_spill] sm:$0xff] %v18918_v14 }
  0xb9   : > { %14481 = vmatpush3.msra.mxu0 %v18857_v56  ;;  %25036 = vst [vmem:[#allocation135_spill] sm:$0xff] %v18914_v39  ;;  %14511 = vmatprep.subr.mxu1 %v24436_v0 }
  0xba   : > { %14520 = vmatprep.subr.mxu0 %v24436_v0  ;;  %14512 = vmatpush3.msra.mxu1 %v18910_v11 }
  0xbb   : > { %14513 = vmatprep.subr.mxu1 %v24436_v0 }
  0xbc   : > { %14514 = vmatpush3.msra.mxu1 %v18914_v39 }
  0xbd   : > { %14515 = vmatprep.subr.mxu1 %v24436_v0 }
  0xbe   : > { %14516 = vmatpush3.msra.mxu1 %v18918_v14  ;;  %v898_v14 = vrot.slane %v18346_v50, %v18485_v55 }
  0xbf   : > { %14555 = vmatprep.subr.mxu1 %v24436_v0 }
 0x113   : > { %v490_v38 = vpop.f32.mrf.mxu1 }
 0x115   : > { %v14309_v34 = vpop.f32.mrf.mxu1 }
 0x119   : > { %v339_v26 = vpop.f32.mrf.mxu0 }
 0x11a   : > { %v491_v12 = vadd.f32 %v490_v38, %v339_v26  ;;  %v25042_v38 = vld [vmem:[#allocation115_spill] sm:$0xff]  ;;  %v25043_v26 = vld [vmem:[#allocation118_spill] sm:$0xff] }
 0x11b   : > { %v14274_v10 = vpop.f32.mrf.mxu0 }
 0x133   : > { %v683_v6 = vpop.f32.mrf.mxu1 }
 0x135   : > { %v14379_v5 = vpop.f32.mrf.mxu1 }
 0x13a   : > { %v594_v4 = vpop.f32.mrf.mxu0 }
 0x13b   : > { %v595_v46 = vadd.f32 %v594_v4, %v491_v12  ;;  %v25044_v12 = vld [vmem:[#allocation125_spill] sm:$0xff] }
 0x13c   : > { %v14344_v11 = vpop.f32.mrf.mxu0 }
 0x13d   : > { %v684_v17 = vadd.f32 %v683_v6, %v595_v46  ;;  %v25040_v46 = vld [vmem:[#allocation107_spill] sm:$0xff] }
 0x157   : > { %v889_v30 = vpop.f32.mrf.mxu1 }
 0x159   : > { %v14449_v41 = vpop.f32.mrf.mxu1 }
 0x15a   : > { %v802_v39 = vpop.f32.mrf.mxu0  ;;  %v907_v41 = vld [vmem:[#allocation2 + $0x10] sm:$0xff] }
 0x15b   : > { %v803_v15 = vadd.f32 %v802_v39, %v684_v17  ;;  %v18933_v17 = vsub.s32 1, %v18461_v31  ;;  %vm908_vm2 = vcmp.ne.f32.partialorder %v907_v41, 0.0  ;;  %v25041_v39 = vld [vmem:[#allocation113_spill] sm:$0xff]  ;;  %v1610_v41 = vld [vmem:[#allocation4 + $0x170] sm:$0xff] }
 0x15c   : > { %v14414_v2 = vpop.f32.mrf.mxu0 }
 0x15d   : > { %v890_v0 = vadd.f32 %v889_v30, %v803_v15  ;;  %25038 = vst [vmem:[#allocation137_spill] sm:$0xff] %v18933_v17 }
 0x15f   : > { %v899_v34 = vmul.f32 %v898_v14, %v890_v0 }
 0x161   : > { %v900_v16 = vmul.f32 %v899_v34, %v894_v43  ;;  %v25039_v43 = vmov 0.0   ;;  %v25045_v34 = vld [vmem:[#allocation130_spill] sm:$0xff] }
 0x163   : > { %v18928_v10 = vsub.f32 %v18510_v57, %v900_v16 }
 0x165   : > { %18055 = vrcp.f32 %v18928_v10 }
 0x172   : > { %v18056_v5 = vpop.eup %18055 }
 0x173   : > { %v903_v4 = vmul.f32 %v18056_v5, %v18928_v10 }
 0x175   : > { %v904_v6 = vsub.f32 2.0, %v903_v4  ;;  %v25047_v4 = vld [vmem:[#allocation132_spill] sm:$0xff] }
 0x177   : > { %v905_v11 = vmul.f32 %v18056_v5, %v904_v6  ;;  %v25046_v5 = vld [vmem:[#allocation131_spill] sm:$0xff] }
 0x178   : > { %v1611_v6 = vld [vmem:[#allocation4 + $0x178] sm:$0xff] }
 0x179   : > { %v912_v50 = vrot.slane %v905_v11, %v18933_v17  ;;  %v19093_v11 = vand.u32 4294901760, %v1611_v6 }
 0x17b   : > { %v913_v0 = vmul.f32 %v912_v50, %v18928_v10  ;;  %25048 = vst [vmem:[#allocation138_spill] sm:$0xff] %v19093_v11  ;;  %v19096_v50 = vsub.f32 %v1611_v6, %v19093_v11 }
 0x17d   : > { %v18938_v2 = vsel %vm908_vm2, %v913_v0, %v18928_v10  ;;  %25049 = vst [vmem:[#allocation139_spill] sm:$0xff] %v19096_v50  ;;  %v19098_v0 = vand.u32 4294901760, %v1610_v41 }
 0x17e   : > { %v18941_v16 = vand.u32 4294901760, %v18938_v2 }
 0x17f   : > { %25050 = vst [vmem:[#allocation140_spill] sm:$0xff] %v19098_v0 }
 0x180   : > { %v18945_v57 = vsub.f32 %v18938_v2, %v18941_v16  ;;  %14518 = vmatmul.mubr.f32.vlgmr.msra.gmra.mxu1 %v18941_v16 }
 0x181   : > { %14556 = vmatpush3.msra.mxu1 %v18669_v45  ;;  %14587 = vmatprep.mubr.msk.f32.mxu1 %vm18151_vm0, %v25039_v43 }
 0x182   : > { %14557 = vmatprep.subr.mxu1 %v25039_v43  ;;  %v1015_v15 = vand.u32 4294901760, %v18945_v57 }
 0x183   : > { %14558 = vmatpush3.msra.mxu1 %v18674_v44 }
 0x184   : > { %14559 = vmatprep.subr.mxu1 %v25039_v43  ;;  %v1016_v14 = vsub.f32 %v18945_v57, %v1015_v15 }
 0x185   : > { %14560 = vmatpush3.msra.mxu1 %v18684_v63 }
 0x186   : > { %14561 = vmatprep.subr.mxu1 %v25039_v43  ;;  %v1017_v30 = vand.u32 4294901760, %v1016_v14 }
 0x187   : > { %14562 = vmatpush3.msra.mxu1 %v18696_v1 }
 0x188   : > { %14563 = vmatprep.subr.mxu1 %v25039_v43  ;;  %14483 = vmatmul.mubr.f32.vlgmr.msra.gmra.mxu0 %v1017_v30  ;;  %v1608_v30 = vld [vmem:[#allocation4 + $0x160] sm:$0xff] }
 0x189   : > { %14521 = vmatpush3.msra.mxu0 %v18672_v32  ;;  %14564 = vmatpush3.msra.mxu1 %v18711_v61 }
 0x18a   : > { %14522 = vmatprep.subr.mxu0 %v25039_v43  ;;  %14565 = vmatprep.subr.mxu1 %v25039_v43 }
 0x18b   : > { %14523 = vmatpush3.msra.mxu0 %v18682_v8  ;;  %14566 = vmatpush3.msra.mxu1 %v18722_v23 }
 0x18c   : > { %14524 = vmatprep.subr.mxu0 %v25039_v43  ;;  %14567 = vmatprep.subr.mxu1 %v25039_v43 }
 0x18d   : > { %14525 = vmatpush3.msra.mxu0 %v18694_v13  ;;  %14568 = vmatpush3.msra.mxu1 %v18737_v49 }
 0x18e   : > { %14526 = vmatprep.subr.mxu0 %v25039_v43  ;;  %14569 = vmatprep.subr.mxu1 %v25039_v43 }
 0x18f   : > { %14527 = vmatpush3.msra.mxu0 %v18708_v35  ;;  %14570 = vmatpush3.msra.mxu1 %v18754_v21 }
 0x190   : > { %14528 = vmatprep.subr.mxu0 %v25039_v43  ;;  %14571 = vmatprep.subr.mxu1 %v25039_v43 }
 0x191   : > { %14529 = vmatpush3.msra.mxu0 %v18726_v48  ;;  %14572 = vmatpush3.msra.mxu1 %v18770_v54 }
 0x192   : > { %14530 = vmatprep.subr.mxu0 %v25039_v43  ;;  %14573 = vmatprep.subr.mxu1 %v25039_v43 }
 0x193   : > { %14531 = vmatpush3.msra.mxu0 %v18735_v9  ;;  %14574 = vmatpush3.msra.mxu1 %v18789_v3 }
 0x194   : > { %14532 = vmatprep.subr.mxu0 %v25039_v43  ;;  %14575 = vmatprep.subr.mxu1 %v25039_v43 }
 0x195   : > { %14533 = vmatpush3.msra.mxu0 %v18752_v28  ;;  %14576 = vmatpush3.msra.mxu1 %v18800_v60  ;;  %v1599_v28 = vld [vmem:[#allocation4 + $0x118] sm:$0xff] }
 0x196   : > { %14534 = vmatprep.subr.mxu0 %v25039_v43  ;;  %14577 = vmatprep.subr.mxu1 %v25039_v43  ;;  %v19238_v32 = vand.u32 4294901760, %v1599_v28 }
 0x197   : > { %14535 = vmatpush3.msra.mxu0 %v18768_v52  ;;  %14578 = vmatpush3.msra.mxu1 %v18816_v18 }
 0x198   : > { %14536 = vmatprep.subr.mxu0 %v25039_v43  ;;  %14579 = vmatprep.subr.mxu1 %v25039_v43  ;;  %25089 = vst [vmem:[#allocation179_spill] sm:$0xff] %v19238_v32 }
 0x199   : > { %14537 = vmatpush3.msra.mxu0 %v18785_v36  ;;  %14580 = vmatpush3.msra.mxu1 %v18833_v59 }
 0x19a   : > { %14538 = vmatprep.subr.mxu0 %v25039_v43  ;;  %14581 = vmatprep.subr.mxu1 %v25039_v43 }
 0x19b   : > { %14539 = vmatpush3.msra.mxu0 %v18805_v47  ;;  %14582 = vmatpush3.msra.mxu1 %v18849_v37 }
 0x19c   : > { %14540 = vmatprep.subr.mxu0 %v25039_v43  ;;  %14583 = vmatprep.subr.mxu1 %v25039_v43 }
 0x19d   : > { %14541 = vmatpush3.msra.mxu0 %v18814_v29  ;;  %14584 = vmatpush3.msra.mxu1 %v18855_v40 }
 0x19e   : > { %14542 = vmatprep.subr.mxu0 %v25039_v43  ;;  %14585 = vmatprep.subr.mxu1 %v25039_v43 }
 0x19f   : > { %14543 = vmatpush3.msra.mxu0 %v18831_v20  ;;  %14586 = vmatpush3.msra.mxu1 %v18857_v56 }
 0x1a0   : > { %14544 = vmatprep.subr.mxu0 %v25039_v43  ;;  %14588 = vmatmul.mubr.f32.vlgmr.msra.gmra.mxu1 %v1015_v15  ;;  %v19106_v15 = vsub.f32 %v1610_v41, %v19098_v0  ;;  %v1607_v41 = vld [vmem:[#allocation4 + $0x158] sm:$0xff] }
 0x1a1   : > { %14625 = vmatprep.subr.mxu1 %v25039_v43  ;;  %14545 = vmatpush3.msra.mxu0 %v18847_v53  ;;  %v1600_v53 = vld [vmem:[#allocation4 + $0x120] sm:$0xff] }
 0x1a2   : > { %14626 = vmatpush3.msra.mxu1 %v18669_v45  ;;  %14546 = vmatprep.subr.mxu0 %v25039_v43  ;;  %25052 = vst [vmem:[#allocation142_spill] sm:$0xff] %v19106_v15  ;;  %v19201_v52 = vand.u32 4294901760, %v1600_v53 }
 0x1a3   : > { %14627 = vmatprep.subr.mxu1 %v25039_v43  ;;  %14547 = vmatpush3.msra.mxu0 %v18869_v19  ;;  %v1601_v19 = vld [vmem:[#allocation4 + $0x128] sm:$0xff] }
 0x1a4   : > { %14628 = vmatpush3.msra.mxu1 %v18674_v44  ;;  %14548 = vmatprep.subr.mxu0 %v25039_v43  ;;  %v19189_v29 = vand.u32 4294901760, %v1601_v19  ;;  %25078 = vst [vmem:[#allocation168_spill] sm:$0xff] %v19201_v52 }
 0x1a5   : > { %14629 = vmatprep.subr.mxu1 %v25039_v43  ;;  %14549 = vmatpush3.msra.mxu0 %v18874_v58 }
 0x1a6   : > { %14630 = vmatpush3.msra.mxu1 %v18684_v63  ;;  %14550 = vmatprep.subr.mxu0 %v25039_v43  ;;  %25075 = vst [vmem:[#allocation165_spill] sm:$0xff] %v19189_v29  ;;  %v19213_v35 = vsub.f32 %v1601_v19, %v19189_v29 }
 0x1a7   : > { %14631 = vmatprep.subr.mxu1 %v25039_v43  ;;  %14551 = vmatpush3.msra.mxu0 %v18877_v27 }
 0x1a8   : > { %14552 = vmatprep.mubr.msk.f32.mxu0 %vm18151_vm0, %v25039_v43  ;;  %14632 = vmatpush3.msra.mxu1 %v18696_v1  ;;  %25082 = vst [vmem:[#allocation172_spill] sm:$0xff] %v19213_v35 }
 0x1a9   : > { %14553 = vmatmul.mubr.f32.vlgmr.msra.gmra.mxu0 %v18945_v57  ;;  %14590 = vmatprep.subr.mxu0 %v25039_v43  ;;  %v1609_v57 = vld [vmem:[#allocation4 + $0x168] sm:$0xff] }
 0x1aa   : > { %14633 = vmatprep.subr.mxu1 %v25039_v43  ;;  %14591 = vmatpush3.msra.mxu0 %v18679_v62  ;;  %v19108_v14 = vand.u32 4294901760, %v1609_v57  ;;  %v1603_v62 = vld [vmem:[#allocation4 + $0x138] sm:$0xff] }
 0x1ab   : > { %14634 = vmatpush3.msra.mxu1 %v18711_v61  ;;  %14592 = vmatprep.subr.mxu0 %v25039_v43 }
 0x1ac   : > { %14635 = vmatprep.subr.mxu1 %v25039_v43  ;;  %14593 = vmatpush3.msra.mxu0 %v18691_v33  ;;  %25053 = vst [vmem:[#allocation143_spill] sm:$0xff] %v19108_v14  ;;  %v1604_v33 = vld [vmem:[#allocation4 + $0x140] sm:$0xff] }
 0x1ad   : > { %14636 = vmatpush3.msra.mxu1 %v18722_v23  ;;  %14594 = vmatprep.subr.mxu0 %v25039_v43  ;;  %v19178_v58 = vand.u32 4294901760, %v1604_v33 }
 0x1ae   : > { %14637 = vmatprep.subr.mxu1 %v25039_v43  ;;  %14595 = vmatpush3.msra.mxu0 %v18705_v42 }
 0x1af   : > { %14638 = vmatpush3.msra.mxu1 %v18737_v49  ;;  %14596 = vmatprep.subr.mxu0 %v25039_v43  ;;  %25072 = vst [vmem:[#allocation162_spill] sm:$0xff] %v19178_v58  ;;  %v19198_v36 = vsub.f32 %v1604_v33, %v19178_v58  ;;  %v1598_v33 = vld [vmem:[#allocation4 + $0x110] sm:$0xff] }
 0x1b0   : > { %14639 = vmatprep.subr.mxu1 %v25039_v43  ;;  %14597 = vmatpush3.msra.mxu0 %v18720_v24 }
 0x1b1   : > { %14640 = vmatpush3.msra.mxu1 %v18754_v21  ;;  %14598 = vmatprep.subr.mxu0 %v25039_v43  ;;  %25077 = vst [vmem:[#allocation167_spill] sm:$0xff] %v19198_v36 }
 0x1b2   : > { %14641 = vmatprep.subr.mxu1 %v25039_v43  ;;  %14599 = vmatpush3.msra.mxu0 %v18742_v51  ;;  %v1605_v51 = vld [vmem:[#allocation4 + $0x148] sm:$0xff] }
 0x1b3   : > { %14642 = vmatpush3.msra.mxu1 %v18770_v54  ;;  %14600 = vmatprep.subr.mxu0 %v25039_v43  ;;  %v19161_v42 = vand.u32 4294901760, %v1605_v51 }
 0x1b4   : > { %14643 = vmatprep.subr.mxu1 %v25039_v43  ;;  %14601 = vmatpush3.msra.mxu0 %v18749_v7 }
 0x1b5   : > { %14644 = vmatpush3.msra.mxu1 %v18789_v3  ;;  %14602 = vmatprep.subr.mxu0 %v25039_v43  ;;  %25067 = vst [vmem:[#allocation157_spill] sm:$0xff] %v19161_v42  ;;  %v19176_v27 = vsub.f32 %v1605_v51, %v19161_v42 }
 0x1b6   : > { %14645 = vmatprep.subr.mxu1 %v25039_v43  ;;  %14603 = vmatpush3.msra.mxu0 %v18765_v22 }
 0x1b7   : > { %14646 = vmatpush3.msra.mxu1 %v18800_v60  ;;  %14604 = vmatprep.subr.mxu0 %v25039_v43  ;;  %25071 = vst [vmem:[#allocation161_spill] sm:$0xff] %v19176_v27  ;;  %v19195_v47 = vand.u32 4294901760, %v19176_v27  ;;  %v1596_v60 = vld [vmem:[#allocation4 + $0x100] sm:$0xff] }
 0x1b8   : > { %14647 = vmatprep.subr.mxu1 %v25039_v43  ;;  %14605 = vmatpush3.msra.mxu0 %v18782_v25 }
 0x1b9   : > { %14648 = vmatpush3.msra.mxu1 %v18816_v18  ;;  %14606 = vmatprep.subr.mxu0 %v25039_v43  ;;  %25076 = vst [vmem:[#allocation166_spill] sm:$0xff] %v19195_v47  ;;  %v1749_v8 = vsub.f32 %v19176_v27, %v19195_v47 }
 0x1ba   : > { %14649 = vmatprep.subr.mxu1 %v25039_v43  ;;  %14607 = vmatpush3.msra.mxu0 %v25040_v46  ;;  %v1606_v46 = vld [vmem:[#allocation4 + $0x150] sm:$0xff] }
 0x1bb   : > { %14650 = vmatpush3.msra.mxu1 %v18833_v59  ;;  %14608 = vmatprep.subr.mxu0 %v25039_v43  ;;  %v19146_v7 = vand.u32 4294901760, %v1606_v46 }
 0x1bc   : > { %14651 = vmatprep.subr.mxu1 %v25039_v43  ;;  %14609 = vmatpush3.msra.mxu0 %v25041_v39 }
 0x1bd   : > { %14652 = vmatpush3.msra.mxu1 %v18849_v37  ;;  %14610 = vmatprep.subr.mxu0 %v25039_v43  ;;  %25063 = vst [vmem:[#allocation153_spill] sm:$0xff] %v19146_v7  ;;  %v19159_v24 = vsub.f32 %v1606_v46, %v19146_v7 }
 0x1be   : > { %14653 = vmatprep.subr.mxu1 %v25039_v43  ;;  %14611 = vmatpush3.msra.mxu0 %v25042_v38 }
 0x1bf   : > { %14654 = vmatpush3.msra.mxu1 %v18855_v40  ;;  %14612 = vmatprep.subr.mxu0 %v25039_v43  ;;  %25066 = vst [vmem:[#allocation156_spill] sm:$0xff] %v19159_v24  ;;  %v19173_v46 = vand.u32 4294901760, %v19159_v24  ;;  %v19246_v40 = vand.u32 4294901760, %v1598_v33 }
 0x1c0   : > { %14655 = vmatprep.subr.mxu1 %v25039_v43  ;;  %14613 = vmatpush3.msra.mxu0 %v25043_v26 }
 0x1c1   : > { %14656 = vmatpush3.msra.mxu1 %v18857_v56  ;;  %14657 = vmatprep.mubr.msk.f32.mxu1 %vm18151_vm0, %v25039_v43  ;;  %25070 = vst [vmem:[#allocation160_spill] sm:$0xff] %v19173_v46  ;;  %v1742_v51 = vsub.f32 %v19159_v24, %v19173_v46  ;;  %v1597_v56 = vld [vmem:[#allocation4 + $0x108] sm:$0xff]  ;;  %25091 = vst [vmem:[#allocation181_spill] sm:$0xff] %v19246_v40 }
 0x1c2   : > { %14614 = vmatprep.subr.mxu0 %v25039_v43  ;;  %14658 = vmatmul.mubr.f32.vlgmr.msra.gmra.mxu1 %v18941_v16  ;;  %v19266_v54 = vand.u32 4294901760, %v1597_v56 }
 0x1c3   : > { %14615 = vmatpush3.msra.mxu0 %v25044_v12  ;;  %14622 = vmatprep.mubr.msk.f32.mxu0 %vm18151_vm0, %v25039_v43  ;;  %v19216_v13 = vand.u32 4294901760, %v1742_v51  ;;  %v19235_v51 = vand.u32 4294901760, %v19213_v35 }
 0x1c4   : > { %14616 = vmatprep.subr.mxu0 %v25039_v43  ;;  %14695 = vmatprep.subr.mxu1 %v25039_v43  ;;  %25096 = vst [vmem:[#allocation186_spill] sm:$0xff] %v19266_v54 }
 0x1c5   : > { %14617 = vmatpush3.msra.mxu0 %v25045_v34  ;;  %14727 = vmatprep.mubr.msk.f32.mxu1 %vm18151_vm0, %v25039_v43  ;;  %v19120_v34 = vand.u32 4294901760, %v1608_v30  ;;  %25083 = vst [vmem:[#allocation173_spill] sm:$0xff] %v19216_v13  ;;  %25088 = vst [vmem:[#allocation178_spill] sm:$0xff] %v19235_v51 }
 0x1c6   : > { %14618 = vmatprep.subr.mxu0 %v25039_v43 }
 0x1c7   : > { %14619 = vmatpush3.msra.mxu0 %v25046_v5  ;;  %v19118_v5 = vsub.f32 %v1609_v57, %v19108_v14  ;;  %25056 = vst [vmem:[#allocation146_spill] sm:$0xff] %v19120_v34  ;;  %v19132_v39 = vsub.f32 %v1608_v30, %v19120_v34  ;;  %v19135_v57 = vand.u32 4294901760, %v1607_v41 }
 0x1c8   : > { %14620 = vmatprep.subr.mxu0 %v25039_v43 }
 0x1c9   : > { %14621 = vmatpush3.msra.mxu0 %v25047_v4  ;;  %v19115_v4 = vand.u32 4294901760, %v19106_v15  ;;  %25055 = vst [vmem:[#allocation145_spill] sm:$0xff] %v19118_v5  ;;  %v19129_v38 = vand.u32 4294901760, %v19118_v5  ;;  %25059 = vst [vmem:[#allocation149_spill] sm:$0xff] %v19132_v39  ;;  %v19144_v22 = vand.u32 4294901760, %v19132_v39  ;;  %v19150_v30 = vsub.f32 %v1607_v41, %v19135_v57 }
 0x1ca   : > { %14623 = vmatmul.mubr.f32.vlgmr.msra.gmra.mxu0 %v18941_v16  ;;  %14660 = vmatprep.subr.mxu0 %v25039_v43  ;;  %v19103_v16 = vand.u32 4294901760, %v19096_v50  ;;  %25060 = vst [vmem:[#allocation150_spill] sm:$0xff] %v19135_v57 }
 0x1cb   : > { %14692 = vmatprep.mubr.msk.f32.mxu0 %vm18151_vm0, %v25039_v43  ;;  %14661 = vmatpush3.msra.mxu0 %v19093_v11  ;;  %25054 = vst [vmem:[#allocation144_spill] sm:$0xff] %v19115_v4  ;;  %v1714_v26 = vsub.f32 %v19106_v15, %v19115_v4  ;;  %25058 = vst [vmem:[#allocation148_spill] sm:$0xff] %v19129_v38  ;;  %v1721_v25 = vsub.f32 %v19118_v5, %v19129_v38  ;;  %v19166_v41 = vand.u32 4294901760, %v19150_v30 }
 0x1cc   : > { %14662 = vmatprep.subr.mxu0 %v25039_v43  ;;  %25051 = vst [vmem:[#allocation141_spill] sm:$0xff] %v19103_v16  ;;  %v1707_v6 = vsub.f32 %v19096_v50, %v19103_v16  ;;  %25062 = vst [vmem:[#allocation152_spill] sm:$0xff] %v19144_v22 }
 0x1cd   : > { %14663 = vmatpush3.msra.mxu0 %v19098_v0  ;;  %25064 = vst [vmem:[#allocation154_spill] sm:$0xff] %v19150_v30  ;;  %25068 = vst [vmem:[#allocation158_spill] sm:$0xff] %v19166_v41  ;;  %v1735_v20 = vsub.f32 %v19150_v30, %v19166_v41 }
 0x1ce   : > { %14664 = vmatprep.subr.mxu0 %v25039_v43  ;;  %v19124_v12 = vand.u32 4294901760, %v1707_v6  ;;  %v19139_v6 = vand.u32 4294901760, %v1714_v26  ;;  %v19154_v26 = vand.u32 4294901760, %v1721_v25  ;;  %v1602_v25 = vld [vmem:[#allocation4 + $0x130] sm:$0xff] }
 0x1cf   : > { %14665 = vmatpush3.msra.mxu0 %v19108_v14  ;;  %v19204_v9 = vand.u32 4294901760, %v1735_v20  ;;  %v19221_v20 = vand.u32 4294901760, %v19198_v36 }
 0x1d0   : > { %14666 = vmatprep.subr.mxu0 %v25039_v43  ;;  %25057 = vst [vmem:[#allocation147_spill] sm:$0xff] %v19124_v12  ;;  %14696 = vmatpush3.msra.mxu1 %v19124_v12  ;;  %25061 = vst [vmem:[#allocation151_spill] sm:$0xff] %v19139_v6  ;;  %v1728_v12 = vsub.f32 %v19132_v39, %v19144_v22 }
 0x1d1   : > { %14667 = vmatpush3.msra.mxu0 %v19120_v34  ;;  %14697 = vmatprep.subr.mxu1 %v25039_v43  ;;  %25065 = vst [vmem:[#allocation155_spill] sm:$0xff] %v19154_v26  ;;  %25079 = vst [vmem:[#allocation169_spill] sm:$0xff] %v19204_v9 }
 0x1d2   : > { %14668 = vmatprep.subr.mxu0 %v25039_v43  ;;  %14698 = vmatpush3.msra.mxu1 %v19139_v6  ;;  %v19170_v6 = vand.u32 4294901760, %v1728_v12  ;;  %v19186_v12 = vand.u32 4294901760, %v1602_v25  ;;  %25084 = vst [vmem:[#allocation174_spill] sm:$0xff] %v19221_v20 }
 0x1d3   : > { %14669 = vmatpush3.msra.mxu0 %v19135_v57  ;;  %14699 = vmatprep.subr.mxu1 %v25039_v43 }
 0x1d4   : > { %14670 = vmatprep.subr.mxu0 %v25039_v43  ;;  %14700 = vmatpush3.msra.mxu1 %v19154_v26  ;;  %25069 = vst [vmem:[#allocation159_spill] sm:$0xff] %v19170_v6  ;;  %v19184_v26 = vand.u32 4294901760, %v1603_v62  ;;  %25074 = vst [vmem:[#allocation164_spill] sm:$0xff] %v19186_v12  ;;  %v19210_v48 = vsub.f32 %v1602_v25, %v19186_v12 }
 0x1d5   : > { %14671 = vmatpush3.msra.mxu0 %v19146_v7  ;;  %14701 = vmatprep.subr.mxu1 %v25039_v43 }
 0x1d6   : > { %14672 = vmatprep.subr.mxu0 %v25039_v43  ;;  %25073 = vst [vmem:[#allocation163_spill] sm:$0xff] %v19184_v26  ;;  %14702 = vmatpush3.msra.mxu1 %v19170_v6  ;;  %v19207_v6 = vsub.f32 %v1603_v62, %v19184_v26  ;;  %25081 = vst [vmem:[#allocation171_spill] sm:$0xff] %v19210_v48  ;;  %v19224_v62 = vsub.f32 %v1600_v53, %v19201_v52  ;;  %v19232_v25 = vand.u32 4294901760, %v19210_v48 }
 0x1d7   : > { %14673 = vmatpush3.msra.mxu0 %v19161_v42  ;;  %14703 = vmatprep.subr.mxu1 %v25039_v43  ;;  %v19241_v53 = vand.u32 4294901760, %v1749_v8  ;;  %v19257_v8 = vsub.f32 %v1599_v28, %v19238_v32  ;;  %v1777_v28 = vsub.f32 %v19213_v35, %v19235_v51 }
 0x1d8   : > { %14674 = vmatprep.subr.mxu0 %v25039_v43  ;;  %25080 = vst [vmem:[#allocation170_spill] sm:$0xff] %v19207_v6  ;;  %25085 = vst [vmem:[#allocation175_spill] sm:$0xff] %v19224_v62  ;;  %14704 = vmatpush3.msra.mxu1 %v19204_v9  ;;  %v19229_v19 = vand.u32 4294901760, %v19207_v6  ;;  %v1756_v9 = vsub.f32 %v19198_v36, %v19221_v20  ;;  %v1770_v59 = vsub.f32 %v19210_v48, %v19232_v25 }
 0x1d9   : > { %14675 = vmatpush3.msra.mxu0 %v19178_v58  ;;  %25087 = vst [vmem:[#allocation177_spill] sm:$0xff] %v19232_v25  ;;  %14705 = vmatprep.subr.mxu1 %v25039_v43  ;;  %25090 = vst [vmem:[#allocation180_spill] sm:$0xff] %v19241_v53  ;;  %v19254_v18 = vand.u32 4294901760, %v19224_v62  ;;  %v19274_v49 = vand.u32 4294901760, %v19257_v8 }
 0x1da   : > { %14676 = vmatprep.subr.mxu0 %v25039_v43  ;;  %25086 = vst [vmem:[#allocation176_spill] sm:$0xff] %v19229_v19  ;;  %14706 = vmatpush3.msra.mxu1 %v19216_v13  ;;  %v1763_v37 = vsub.f32 %v19207_v6, %v19229_v19  ;;  %25093 = vst [vmem:[#allocation183_spill] sm:$0xff] %v19257_v8  ;;  %v19260_v3 = vand.u32 4294901760, %v1756_v9  ;;  %v19264_v13 = vsub.f32 %v1598_v33, %v19246_v40  ;;  %v1574_v19 = vld [vmem:[#allocation2 + $0x18] sm:$0xff] }
 0x1db   : > { %14677 = vmatpush3.msra.mxu0 %v19184_v26  ;;  %25092 = vst [vmem:[#allocation182_spill] sm:$0xff] %v19254_v18  ;;  %14707 = vmatprep.subr.mxu1 %v25039_v43  ;;  %25098 = vst [vmem:[#allocation188_spill] sm:$0xff] %v19274_v49  ;;  %v19280_v9 = vsub.f32 %v1597_v56, %v19266_v54  ;;  %v19282_v33 = vand.u32 4294901760, %v1596_v60 }
 0x1dc   : > { %14678 = vmatprep.subr.mxu0 %v25039_v43  ;;  %25094 = vst [vmem:[#allocation184_spill] sm:$0xff] %v19260_v3  ;;  %25095 = vst [vmem:[#allocation185_spill] sm:$0xff] %v19264_v13  ;;  %14708 = vmatpush3.msra.mxu1 %v19241_v53  ;;  %v19269_v21 = vand.u32 4294901760, %v1763_v37  ;;  %v19285_v37 = vand.u32 4294901760, %v1770_v59  ;;  %v1784_v53 = vsub.f32 %v19224_v62, %v19254_v18  ;;  %v19290_v23 = vand.u32 4294901760, %v19264_v13 }
 0x1dd   : > { %14679 = vmatpush3.msra.mxu0 %v19186_v12  ;;  %14709 = vmatprep.subr.mxu1 %v25039_v43  ;;  %25099 = vst [vmem:[#allocation189_spill] sm:$0xff] %v19280_v9  ;;  %25100 = vst [vmem:[#allocation190_spill] sm:$0xff] %v19282_v33  ;;  %v19296_v56 = vsub.f32 %v1596_v60, %v19282_v33  ;;  %v1791_v59 = vsub.f32 %v19257_v8, %v19274_v49  ;;  %v19304_v61 = vand.u32 4294901760, %v19280_v9 }
 0x1de   : > { %25097 = vst [vmem:[#allocation187_spill] sm:$0xff] %v19269_v21  ;;  %14680 = vmatprep.subr.mxu0 %v25039_v43  ;;  %14710 = vmatpush3.msra.mxu1 %v19260_v3  ;;  %25101 = vst [vmem:[#allocation191_spill] sm:$0xff] %v19285_v37  ;;  %v19299_v3 = vand.u32 4294901760, %v1777_v28  ;;  %v19310_v60 = vand.u32 4294901760, %v1784_v53  ;;  %v1798_v28 = vsub.f32 %v19264_v13, %v19290_v23 }
 0x1df   : > { %14681 = vmatpush3.msra.mxu0 %v19189_v29  ;;  %25102 = vst [vmem:[#allocation192_spill] sm:$0xff] %v19290_v23  ;;  %14711 = vmatprep.subr.mxu1 %v25039_v43  ;;  %25103 = vst [vmem:[#allocation193_spill] sm:$0xff] %v19296_v56  ;;  %v19321_v1 = vand.u32 4294901760, %v1791_v59  ;;  %v1805_v53 = vsub.f32 %v19280_v9, %v19304_v61 }
 0x1e0   : > { %14682 = vmatprep.subr.mxu0 %v25039_v43  ;;  %14712 = vmatpush3.msra.mxu1 %v19269_v21  ;;  %25104 = vst [vmem:[#allocation194_spill] sm:$0xff] %v19299_v3  ;;  %25105 = vst [vmem:[#allocation195_spill] sm:$0xff] %v19304_v61  ;;  %v19315_v21 = vand.u32 4294901760, %v19296_v56 }
 0x1e1   : > { %14683 = vmatpush3.msra.mxu0 %v19201_v52  ;;  %14713 = vmatprep.subr.mxu1 %v25039_v43  ;;  %25106 = vst [vmem:[#allocation196_spill] sm:$0xff] %v19310_v60  ;;  %25108 = vst [vmem:[#allocation198_spill] sm:$0xff] %v19321_v1  ;;  %v19337_v59 = vand.u32 4294901760, %v1805_v53 }
 0x1e2   : > { %14684 = vmatprep.subr.mxu0 %v25039_v43  ;;  %14714 = vmatpush3.msra.mxu1 %v19285_v37  ;;  %25107 = vst [vmem:[#allocation197_spill] sm:$0xff] %v19315_v21  ;;  %v19329_v37 = vand.u32 4294901760, %v1798_v28  ;;  %v1812_v63 = vsub.f32 %v19296_v56, %v19315_v21 }
 0x1e3   : > { %14685 = vmatpush3.msra.mxu0 %v19238_v32  ;;  %14715 = vmatprep.subr.mxu1 %v25039_v43  ;;  %25110 = vst [vmem:[#allocation200_spill] sm:$0xff] %v19337_v59 }
 0x1e4   : > { %14686 = vmatprep.subr.mxu0 %v25039_v43  ;;  %14716 = vmatpush3.msra.mxu1 %v19299_v3  ;;  %25109 = vst [vmem:[#allocation199_spill] sm:$0xff] %v19329_v37  ;;  %v19342_v28 = vand.u32 4294901760, %v1812_v63 }
 0x1e5   : > { %14687 = vmatpush3.msra.mxu0 %v19246_v40  ;;  %14717 = vmatprep.subr.mxu1 %v25039_v43 }
 0x1e6   : > { %14688 = vmatprep.subr.mxu0 %v25039_v43  ;;  %14718 = vmatpush3.msra.mxu1 %v19310_v60  ;;  %25111 = vst [vmem:[#allocation201_spill] sm:$0xff] %v19342_v28 }
 0x1e7   : > { %14689 = vmatpush3.msra.mxu0 %v19266_v54  ;;  %14719 = vmatprep.subr.mxu1 %v25039_v43 }
 0x1e8   : > { %14690 = vmatprep.subr.mxu0 %v25039_v43  ;;  %14720 = vmatpush3.msra.mxu1 %v19321_v1 }
 0x1e9   : > { %14691 = vmatpush3.msra.mxu0 %v19282_v33  ;;  %14721 = vmatprep.subr.mxu1 %v25039_v43 }
 0x1ea   : > { %14730 = vmatprep.subr.mxu0 %v25039_v43  ;;  %14722 = vmatpush3.msra.mxu1 %v19329_v37 }
 0x1eb   : > { %14723 = vmatprep.subr.mxu1 %v25039_v43 }
 0x1ec   : > { %14724 = vmatpush3.msra.mxu1 %v19337_v59 }
 0x1ed   : > { %14725 = vmatprep.subr.mxu1 %v25039_v43 }
 0x1ee   : > { %14726 = vmatpush3.msra.mxu1 %v19342_v28  ;;  %v1578_v28 = vrot.slane %v18928_v10, %v18933_v17 }
 0x1ef   : > { %14765 = vmatprep.subr.mxu1 %v25039_v43 }
 0x240   : > { %v1170_v53 = vpop.f32.mrf.mxu1 }
 0x242   : > { %v14519_v1 = vpop.f32.mrf.mxu1 }
 0x248   : > { %v1019_v60 = vpop.f32.mrf.mxu0 }
 0x249   : > { %v1171_v21 = vadd.f32 %v1170_v53, %v1019_v60  ;;  %v25114_v60 = vld [vmem:[#allocation176_spill] sm:$0xff]  ;;  %v25117_v53 = vld [vmem:[#allocation182_spill] sm:$0xff] }
 0x24a   : > { %v14484_v3 = vpop.f32.mrf.mxu0 }
 0x260   : > { %v1363_v44 = vpop.f32.mrf.mxu1 }
 0x262   : > { %v14589_v45 = vpop.f32.mrf.mxu1 }
 0x269   : > { %v1274_v55 = vpop.f32.mrf.mxu0 }
 0x26a   : > { %v1275_v23 = vadd.f32 %v1274_v55, %v1171_v21  ;;  %v1587_v21 = vld [vmem:[#allocation2 + $0x20] sm:$0xff] }
 0x26b   : > { %v14554_v37 = vpop.f32.mrf.mxu0  ;;  %vm1588_vm3 = vcmp.ne.f32.partialorder %v1587_v21, 0.0  ;;  %v2290_v21 = vld [vmem:[#allocation4 + $0x1f0] sm:$0xff] }
 0x26c   : > { %v1364_v49 = vadd.f32 %v1363_v44, %v1275_v23  ;;  %v25113_v37 = vld [vmem:[#allocation174_spill] sm:$0xff] }
 0x282   : > { %v1569_v63 = vpop.f32.mrf.mxu1 }
 0x284   : > { %v14659_v61 = vpop.f32.mrf.mxu1 }
 0x28a   : > { %v1482_v59 = vpop.f32.mrf.mxu0 }
 0x28b   : > { %v1483_v18 = vadd.f32 %v1482_v59, %v1364_v49  ;;  %v19357_v49 = vsub.s32 2, %v18461_v31  ;;  %v25115_v59 = vld [vmem:[#allocation177_spill] sm:$0xff] }
 0x28c   : > { %v14624_v51 = vpop.f32.mrf.mxu0 }
 0x28d   : > { %v1570_v25 = vadd.f32 %v1569_v63, %v1483_v18  ;;  %25112 = vst [vmem:[#allocation202_spill] sm:$0xff] %v19357_v49  ;;  %v25118_v63 = vld [vmem:[#allocation188_spill] sm:$0xff] }
 0x28f   : > { %v1579_v1 = vmul.f32 %v1578_v28, %v1570_v25  ;;  %v25116_v28 = vld [vmem:[#allocation178_spill] sm:$0xff] }
 0x291   : > { %v1580_v20 = vmul.f32 %v1579_v1, %v1574_v19  ;;  %v25119_v1 = vld [vmem:[#allocation192_spill] sm:$0xff] }
 0x293   : > { %v19352_v3 = vsub.f32 %v18938_v2, %v1580_v20 }
 0x295   : > { %18057 = vrcp.f32 %v19352_v3 }
 0x2a2   : > { %v18058_v45 = vpop.eup %18057 }
 0x2a3   : > { %v1583_v61 = vmul.f32 %v18058_v45, %v19352_v3 }
 0x2a5   : > { %v1584_v55 = vsub.f32 2.0, %v1583_v61  ;;  %v25121_v61 = vld [vmem:[#allocation197_spill] sm:$0xff] }
 0x2a7   : > { %v1585_v23 = vmul.f32 %v18058_v45, %v1584_v55  ;;  %v25120_v45 = vld [vmem:[#allocation195_spill] sm:$0xff] }
 0x2a8   : > { %v2291_v55 = vld [vmem:[#allocation4 + $0x1f8] sm:$0xff] }
 0x2a9   : > { %v1592_v18 = vrot.slane %v1585_v23, %v19357_v49  ;;  %v19517_v23 = vand.u32 4294901760, %v2291_v55 }
 0x2ab   : > { %v1593_v44 = vmul.f32 %v1592_v18, %v19352_v3  ;;  %25122 = vst [vmem:[#allocation203_spill] sm:$0xff] %v19517_v23  ;;  %v19520_v18 = vsub.f32 %v2291_v55, %v19517_v23 }
 0x2ad   : > { %v19362_v10 = vsel %vm1588_vm3, %v1593_v44, %v19352_v3  ;;  %25123 = vst [vmem:[#allocation204_spill] sm:$0xff] %v19520_v18  ;;  %v19522_v44 = vand.u32 4294901760, %v2290_v21 }
 0x2ae   : > { %v19365_v2 = vand.u32 4294901760, %v19362_v10 }
 0x2af   : > { %25124 = vst [vmem:[#allocation205_spill] sm:$0xff] %v19522_v44 }
 0x2b0   : > { %v19369_v20 = vsub.f32 %v19362_v10, %v19365_v2  ;;  %14728 = vmatmul.mubr.f32.vlgmr.msra.gmra.mxu1 %v19365_v2 }
 0x2b1   : > { %14766 = vmatpush3.msra.mxu1 %v19093_v11  ;;  %14797 = vmatprep.mubr.msk.f32.mxu1 %vm18151_vm0, %v25039_v43 }
 0x2b2   : > { %14767 = vmatprep.subr.mxu1 %v25039_v43  ;;  %v1695_v19 = vand.u32 4294901760, %v19369_v20 }
 0x2b3   : > { %14768 = vmatpush3.msra.mxu1 %v19098_v0 }
 0x2b4   : > { %14769 = vmatprep.subr.mxu1 %v25039_v43  ;;  %v1696_v25 = vsub.f32 %v19369_v20, %v1695_v19 }
 0x2b5   : > { %14770 = vmatpush3.msra.mxu1 %v19108_v14 }
 0x2b6   : > { %14771 = vmatprep.subr.mxu1 %v25039_v43  ;;  %v1697_v51 = vand.u32 4294901760, %v1696_v25 }
 0x2b7   : > { %14772 = vmatpush3.msra.mxu1 %v19120_v34 }
 0x2b8   : > { %14773 = vmatprep.subr.mxu1 %v25039_v43  ;;  %14693 = vmatmul.mubr.f32.vlgmr.msra.gmra.mxu0 %v1697_v51  ;;  %v2288_v51 = vld [vmem:[#allocation4 + $0x1e0] sm:$0xff] }
 0x2b9   : > { %14731 = vmatpush3.msra.mxu0 %v19096_v50  ;;  %14774 = vmatpush3.msra.mxu1 %v19135_v57 }
 0x2ba   : > { %14732 = vmatprep.subr.mxu0 %v25039_v43  ;;  %14775 = vmatprep.subr.mxu1 %v25039_v43 }
 0x2bb   : > { %14733 = vmatpush3.msra.mxu0 %v19106_v15  ;;  %14776 = vmatpush3.msra.mxu1 %v19146_v7 }
 0x2bc   : > { %14734 = vmatprep.subr.mxu0 %v25039_v43  ;;  %14777 = vmatprep.subr.mxu1 %v25039_v43 }
 0x2bd   : > { %14735 = vmatpush3.msra.mxu0 %v19118_v5  ;;  %14778 = vmatpush3.msra.mxu1 %v19161_v42 }
 0x2be   : > { %14736 = vmatprep.subr.mxu0 %v25039_v43  ;;  %14779 = vmatprep.subr.mxu1 %v25039_v43 }
 0x2bf   : > { %14737 = vmatpush3.msra.mxu0 %v19132_v39  ;;  %14780 = vmatpush3.msra.mxu1 %v19178_v58 }
 0x2c0   : > { %14738 = vmatprep.subr.mxu0 %v25039_v43  ;;  %14781 = vmatprep.subr.mxu1 %v25039_v43 }
 0x2c1   : > { %14739 = vmatpush3.msra.mxu0 %v19150_v30  ;;  %14782 = vmatpush3.msra.mxu1 %v19184_v26 }
 0x2c2   : > { %14740 = vmatprep.subr.mxu0 %v25039_v43  ;;  %14783 = vmatprep.subr.mxu1 %v25039_v43 }
 0x2c3   : > { %14741 = vmatpush3.msra.mxu0 %v19159_v24  ;;  %14784 = vmatpush3.msra.mxu1 %v19186_v12 }
 0x2c4   : > { %14742 = vmatprep.subr.mxu0 %v25039_v43  ;;  %14785 = vmatprep.subr.mxu1 %v25039_v43 }
 0x2c5   : > { %14743 = vmatpush3.msra.mxu0 %v19176_v27  ;;  %14786 = vmatpush3.msra.mxu1 %v19189_v29 }
 0x2c6   : > { %14744 = vmatprep.subr.mxu0 %v25039_v43  ;;  %14787 = vmatprep.subr.mxu1 %v25039_v43 }
 0x2c7   : > { %14745 = vmatpush3.msra.mxu0 %v19198_v36  ;;  %14788 = vmatpush3.msra.mxu1 %v19201_v52 }
 0x2c8   : > { %14746 = vmatprep.subr.mxu0 %v25039_v43  ;;  %14789 = vmatprep.subr.mxu1 %v25039_v43 }
 0x2c9   : > { %14747 = vmatpush3.msra.mxu0 %v19207_v6  ;;  %14790 = vmatpush3.msra.mxu1 %v19238_v32 }
 0x2ca   : > { %14748 = vmatprep.subr.mxu0 %v25039_v43  ;;  %14791 = vmatprep.subr.mxu1 %v25039_v43 }
 0x2cb   : > { %14749 = vmatpush3.msra.mxu0 %v19210_v48  ;;  %14792 = vmatpush3.msra.mxu1 %v19246_v40  ;;  %v2279_v48 = vld [vmem:[#allocation4 + $0x198] sm:$0xff] }
 0x2cc   : > { %14750 = vmatprep.subr.mxu0 %v25039_v43  ;;  %14793 = vmatprep.subr.mxu1 %v25039_v43  ;;  %v19653_v50 = vand.u32 4294901760, %v2279_v48 }
 0x2cd   : > { %14751 = vmatpush3.msra.mxu0 %v19213_v35  ;;  %14794 = vmatpush3.msra.mxu1 %v19266_v54  ;;  %v2280_v35 = vld [vmem:[#allocation4 + $0x1a0] sm:$0xff] }
 0x2ce   : > { %14752 = vmatprep.subr.mxu0 %v25039_v43  ;;  %14795 = vmatprep.subr.mxu1 %v25039_v43  ;;  %v19629_v27 = vand.u32 4294901760, %v2280_v35  ;;  %25160 = vst [vmem:[#allocation241_spill] sm:$0xff] %v19653_v50 }
 0x2cf   : > { %14753 = vmatpush3.msra.mxu0 %v19224_v62  ;;  %14796 = vmatpush3.msra.mxu1 %v19282_v33 }
 0x2d0   : > { %14754 = vmatprep.subr.mxu0 %v25039_v43  ;;  %14798 = vmatmul.mubr.f32.vlgmr.msra.gmra.mxu1 %v1695_v19  ;;  %v19530_v19 = vsub.f32 %v2290_v21, %v19522_v44  ;;  %v2287_v21 = vld [vmem:[#allocation4 + $0x1d8] sm:$0xff]  ;;  %25153 = vst [vmem:[#allocation234_spill] sm:$0xff] %v19629_v27 }
 0x2d1   : > { %14835 = vmatprep.subr.mxu1 %v25039_v43  ;;  %14755 = vmatpush3.msra.mxu0 %v19257_v8 }
 0x2d2   : > { %14836 = vmatpush3.msra.mxu1 %v19093_v11  ;;  %14756 = vmatprep.subr.mxu0 %v25039_v43  ;;  %25126 = vst [vmem:[#allocation207_spill] sm:$0xff] %v19530_v19 }
 0x2d3   : > { %14837 = vmatprep.subr.mxu1 %v25039_v43  ;;  %14757 = vmatpush3.msra.mxu0 %v19264_v13  ;;  %v2282_v13 = vld [vmem:[#allocation4 + $0x1b0] sm:$0xff] }
 0x2d4   : > { %14838 = vmatpush3.msra.mxu1 %v19098_v0  ;;  %14758 = vmatprep.subr.mxu0 %v25039_v43 }
 0x2d5   : > { %14839 = vmatprep.subr.mxu1 %v25039_v43  ;;  %14759 = vmatpush3.msra.mxu0 %v19280_v9  ;;  %v2283_v9 = vld [vmem:[#allocation4 + $0x1b8] sm:$0xff] }
 0x2d6   : > { %14840 = vmatpush3.msra.mxu1 %v19108_v14  ;;  %14760 = vmatprep.subr.mxu0 %v25039_v43  ;;  %v19618_v62 = vand.u32 4294901760, %v2283_v9 }
 0x2d7   : > { %14841 = vmatprep.subr.mxu1 %v25039_v43  ;;  %14761 = vmatpush3.msra.mxu0 %v19296_v56 }
 0x2d8   : > { %14762 = vmatprep.mubr.msk.f32.mxu0 %vm18151_vm0, %v25039_v43  ;;  %14842 = vmatpush3.msra.mxu1 %v19120_v34  ;;  %25149 = vst [vmem:[#allocation230_spill] sm:$0xff] %v19618_v62 }
 0x2d9   : > { %14763 = vmatmul.mubr.f32.vlgmr.msra.gmra.mxu0 %v19369_v20  ;;  %14800 = vmatprep.subr.mxu0 %v25039_v43  ;;  %v2289_v20 = vld [vmem:[#allocation4 + $0x1e8] sm:$0xff] }
 0x2da   : > { %14843 = vmatprep.subr.mxu1 %v25039_v43  ;;  %14801 = vmatpush3.msra.mxu0 %v19103_v16  ;;  %v19532_v25 = vand.u32 4294901760, %v2289_v20 }
 0x2db   : > { %14844 = vmatpush3.msra.mxu1 %v19135_v57  ;;  %14802 = vmatprep.subr.mxu0 %v25039_v43 }
 0x2dc   : > { %14845 = vmatprep.subr.mxu1 %v25039_v43  ;;  %14803 = vmatpush3.msra.mxu0 %v19115_v4  ;;  %25127 = vst [vmem:[#allocation208_spill] sm:$0xff] %v19532_v25  ;;  %v2284_v4 = vld [vmem:[#allocation4 + $0x1c0] sm:$0xff] }
 0x2dd   : > { %14846 = vmatpush3.msra.mxu1 %v19146_v7  ;;  %14804 = vmatprep.subr.mxu0 %v25039_v43  ;;  %v19602_v16 = vand.u32 4294901760, %v2284_v4 }
 0x2de   : > { %14847 = vmatprep.subr.mxu1 %v25039_v43  ;;  %14805 = vmatpush3.msra.mxu0 %v19129_v38 }
 0x2df   : > { %14848 = vmatpush3.msra.mxu1 %v19161_v42  ;;  %14806 = vmatprep.subr.mxu0 %v25039_v43  ;;  %25146 = vst [vmem:[#allocation227_spill] sm:$0xff] %v19602_v16  ;;  %v19616_v8 = vsub.f32 %v2284_v4, %v19602_v16  ;;  %v2278_v4 = vld [vmem:[#allocation4 + $0x190] sm:$0xff] }
 0x2e0   : > { %14849 = vmatprep.subr.mxu1 %v25039_v43  ;;  %14807 = vmatpush3.msra.mxu0 %v19144_v22 }
 0x2e1   : > { %14850 = vmatpush3.msra.mxu1 %v19178_v58  ;;  %14808 = vmatprep.subr.mxu0 %v25039_v43  ;;  %25148 = vst [vmem:[#allocation229_spill] sm:$0xff] %v19616_v8  ;;  %v19636_v39 = vand.u32 4294901760, %v19616_v8 }
 0x2e2   : > { %14851 = vmatprep.subr.mxu1 %v25039_v43  ;;  %14809 = vmatpush3.msra.mxu0 %v19166_v41  ;;  %v2285_v41 = vld [vmem:[#allocation4 + $0x1c8] sm:$0xff] }
 0x2e3   : > { %14852 = vmatpush3.msra.mxu1 %v19184_v26  ;;  %14810 = vmatprep.subr.mxu0 %v25039_v43  ;;  %v19585_v38 = vand.u32 4294901760, %v2285_v41  ;;  %25155 = vst [vmem:[#allocation236_spill] sm:$0xff] %v19636_v39 }
 0x2e4   : > { %14853 = vmatprep.subr.mxu1 %v25039_v43  ;;  %14811 = vmatpush3.msra.mxu0 %v19173_v46 }
 0x2e5   : > { %14854 = vmatpush3.msra.mxu1 %v19186_v12  ;;  %14812 = vmatprep.subr.mxu0 %v25039_v43  ;;  %25141 = vst [vmem:[#allocation222_spill] sm:$0xff] %v19585_v38 }
 0x2e6   : > { %14855 = vmatprep.subr.mxu1 %v25039_v43  ;;  %14813 = vmatpush3.msra.mxu0 %v19195_v47 }
 0x2e7   : > { %14856 = vmatpush3.msra.mxu1 %v19189_v29  ;;  %14814 = vmatprep.subr.mxu0 %v25039_v43 }
 0x2e8   : > { %14857 = vmatprep.subr.mxu1 %v25039_v43  ;;  %14815 = vmatpush3.msra.mxu0 %v25113_v37 }
 0x2e9   : > { %14858 = vmatpush3.msra.mxu1 %v19201_v52  ;;  %14816 = vmatprep.subr.mxu0 %v25039_v43 }
 0x2ea   : > { %14859 = vmatprep.subr.mxu1 %v25039_v43  ;;  %14817 = vmatpush3.msra.mxu0 %v25114_v60  ;;  %v2286_v60 = vld [vmem:[#allocation4 + $0x1d0] sm:$0xff] }
 0x2eb   : > { %14860 = vmatpush3.msra.mxu1 %v19238_v32  ;;  %14818 = vmatprep.subr.mxu0 %v25039_v43  ;;  %v19570_v46 = vand.u32 4294901760, %v2286_v60  ;;  %v2276_v32 = vld [vmem:[#allocation4 + $0x180] sm:$0xff] }
 0x2ec   : > { %14861 = vmatprep.subr.mxu1 %v25039_v43  ;;  %14819 = vmatpush3.msra.mxu0 %v25115_v59 }
 0x2ed   : > { %14862 = vmatpush3.msra.mxu1 %v19246_v40  ;;  %14820 = vmatprep.subr.mxu0 %v25039_v43  ;;  %25137 = vst [vmem:[#allocation218_spill] sm:$0xff] %v19570_v46  ;;  %v19583_v22 = vsub.f32 %v2286_v60, %v19570_v46  ;;  %v19600_v60 = vsub.f32 %v2285_v41, %v19585_v38 }
 0x2ee   : > { %14863 = vmatprep.subr.mxu1 %v25039_v43  ;;  %14821 = vmatpush3.msra.mxu0 %v25116_v28  ;;  %v19677_v40 = vsub.f32 %v2279_v48, %v19653_v50 }
 0x2ef   : > { %14864 = vmatpush3.msra.mxu1 %v19266_v54  ;;  %14822 = vmatprep.subr.mxu0 %v25039_v43  ;;  %25140 = vst [vmem:[#allocation221_spill] sm:$0xff] %v19583_v22  ;;  %25145 = vst [vmem:[#allocation226_spill] sm:$0xff] %v19600_v60 }
 0x2f0   : > { %14865 = vmatprep.subr.mxu1 %v25039_v43  ;;  %14823 = vmatpush3.msra.mxu0 %v25117_v53  ;;  %25167 = vst [vmem:[#allocation248_spill] sm:$0xff] %v19677_v40 }
 0x2f1   : > { %14866 = vmatpush3.msra.mxu1 %v19282_v33  ;;  %14867 = vmatprep.mubr.msk.f32.mxu1 %vm18151_vm0, %v25039_v43  ;;  %v2277_v33 = vld [vmem:[#allocation4 + $0x188] sm:$0xff] }
 0x2f2   : > { %14824 = vmatprep.subr.mxu0 %v25039_v43  ;;  %14868 = vmatmul.mubr.f32.vlgmr.msra.gmra.mxu1 %v19365_v2  ;;  %v19689_v12 = vand.u32 4294901760, %v2277_v33 }
 0x2f3   : > { %14825 = vmatpush3.msra.mxu0 %v25118_v63  ;;  %14832 = vmatprep.mubr.msk.f32.mxu0 %vm18151_vm0, %v25039_v43 }
 0x2f4   : > { %14826 = vmatprep.subr.mxu0 %v25039_v43  ;;  %14905 = vmatprep.subr.mxu1 %v25039_v43  ;;  %25170 = vst [vmem:[#allocation251_spill] sm:$0xff] %v19689_v12  ;;  %v19704_v58 = vsub.f32 %v2277_v33, %v19689_v12 }
 0x2f5   : > { %14827 = vmatpush3.msra.mxu0 %v25119_v1  ;;  %14937 = vmatprep.mubr.msk.f32.mxu1 %vm18151_vm0, %v25039_v43  ;;  %v19544_v1 = vand.u32 4294901760, %v2288_v51 }
 0x2f6   : > { %14828 = vmatprep.subr.mxu0 %v25039_v43  ;;  %25173 = vst [vmem:[#allocation254_spill] sm:$0xff] %v19704_v58 }
 0x2f7   : > { %14829 = vmatpush3.msra.mxu0 %v25120_v45  ;;  %v19542_v45 = vsub.f32 %v2289_v20, %v19532_v25  ;;  %25130 = vst [vmem:[#allocation211_spill] sm:$0xff] %v19544_v1  ;;  %v19556_v59 = vsub.f32 %v2288_v51, %v19544_v1  ;;  %v19559_v20 = vand.u32 4294901760, %v2287_v21 }
 0x2f8   : > { %14830 = vmatprep.subr.mxu0 %v25039_v43 }
 0x2f9   : > { %14831 = vmatpush3.msra.mxu0 %v25121_v61  ;;  %v19539_v61 = vand.u32 4294901760, %v19530_v19  ;;  %25129 = vst [vmem:[#allocation210_spill] sm:$0xff] %v19542_v45  ;;  %v19553_v28 = vand.u32 4294901760, %v19542_v45  ;;  %25133 = vst [vmem:[#allocation214_spill] sm:$0xff] %v19556_v59  ;;  %v19568_v47 = vand.u32 4294901760, %v19556_v59  ;;  %v19574_v51 = vsub.f32 %v2287_v21, %v19559_v20 }
 0x2fa   : > { %14833 = vmatmul.mubr.f32.vlgmr.msra.gmra.mxu0 %v19365_v2  ;;  %14870 = vmatprep.subr.mxu0 %v25039_v43  ;;  %v19527_v2 = vand.u32 4294901760, %v19520_v18  ;;  %25134 = vst [vmem:[#allocation215_spill] sm:$0xff] %v19559_v20 }
 0x2fb   : > { %14902 = vmatprep.mubr.msk.f32.mxu0 %vm18151_vm0, %v25039_v43  ;;  %14871 = vmatpush3.msra.mxu0 %v19517_v23  ;;  %25128 = vst [vmem:[#allocation209_spill] sm:$0xff] %v19539_v61  ;;  %v2394_v53 = vsub.f32 %v19530_v19, %v19539_v61  ;;  %25132 = vst [vmem:[#allocation213_spill] sm:$0xff] %v19553_v28  ;;  %v2401_v37 = vsub.f32 %v19542_v45, %v19553_v28  ;;  %v19590_v21 = vand.u32 4294901760, %v19574_v51 }
 0x2fc   : > { %14872 = vmatprep.subr.mxu0 %v25039_v43  ;;  %25125 = vst [vmem:[#allocation206_spill] sm:$0xff] %v19527_v2  ;;  %v2387_v55 = vsub.f32 %v19520_v18, %v19527_v2  ;;  %25136 = vst [vmem:[#allocation217_spill] sm:$0xff] %v19568_v47 }
 0x2fd   : > { %14873 = vmatpush3.msra.mxu0 %v19522_v44  ;;  %25138 = vst [vmem:[#allocation219_spill] sm:$0xff] %v19574_v51  ;;  %25142 = vst [vmem:[#allocation223_spill] sm:$0xff] %v19590_v21  ;;  %v2415_v56 = vsub.f32 %v19574_v51, %v19590_v21 }
 0x2fe   : > { %14874 = vmatprep.subr.mxu0 %v25039_v43  ;;  %v19548_v63 = vand.u32 4294901760, %v2387_v55  ;;  %v19563_v55 = vand.u32 4294901760, %v2394_v53  ;;  %v19578_v53 = vand.u32 4294901760, %v2401_v37 }
 0x2ff   : > { %14875 = vmatpush3.msra.mxu0 %v19532_v25  ;;  %v19622_v6 = vand.u32 4294901760, %v2415_v56  ;;  %v19639_v56 = vsub.f32 %v2283_v9, %v19618_v62 }
 0x300   : > { %14876 = vmatprep.subr.mxu0 %v25039_v43  ;;  %25131 = vst [vmem:[#allocation212_spill] sm:$0xff] %v19548_v63  ;;  %14906 = vmatpush3.msra.mxu1 %v19548_v63  ;;  %25135 = vst [vmem:[#allocation216_spill] sm:$0xff] %v19563_v55  ;;  %v2408_v63 = vsub.f32 %v19556_v59, %v19568_v47 }
 0x301   : > { %14877 = vmatpush3.msra.mxu0 %v19544_v1  ;;  %14907 = vmatprep.subr.mxu1 %v25039_v43  ;;  %25139 = vst [vmem:[#allocation220_spill] sm:$0xff] %v19578_v53  ;;  %25150 = vst [vmem:[#allocation231_spill] sm:$0xff] %v19622_v6 }
 0x302   : > { %14878 = vmatprep.subr.mxu0 %v25039_v43  ;;  %14908 = vmatpush3.msra.mxu1 %v19563_v55  ;;  %v19594_v37 = vand.u32 4294901760, %v2408_v63  ;;  %v19597_v55 = vand.u32 4294901760, %v19583_v22  ;;  %v2281_v63 = vld [vmem:[#allocation4 + $0x1a8] sm:$0xff]  ;;  %25156 = vst [vmem:[#allocation237_spill] sm:$0xff] %v19639_v56 }
 0x303   : > { %14879 = vmatpush3.msra.mxu0 %v19559_v20  ;;  %14909 = vmatprep.subr.mxu1 %v25039_v43  ;;  %v19626_v36 = vand.u32 4294901760, %v2281_v63 }
 0x304   : > { %14880 = vmatprep.subr.mxu0 %v25039_v43  ;;  %14910 = vmatpush3.msra.mxu1 %v19578_v53  ;;  %25143 = vst [vmem:[#allocation224_spill] sm:$0xff] %v19594_v37  ;;  %25144 = vst [vmem:[#allocation225_spill] sm:$0xff] %v19597_v55  ;;  %v2422_v41 = vsub.f32 %v19583_v22, %v19597_v55  ;;  %v19613_v53 = vand.u32 4294901760, %v19600_v60 }
 0x305   : > { %14881 = vmatpush3.msra.mxu0 %v19570_v46  ;;  %14911 = vmatprep.subr.mxu1 %v25039_v43  ;;  %25152 = vst [vmem:[#allocation233_spill] sm:$0xff] %v19626_v36  ;;  %v19647_v15 = vsub.f32 %v2281_v63, %v19626_v36  ;;  %v19664_v63 = vand.u32 4294901760, %v2278_v4 }
 0x306   : > { %14882 = vmatprep.subr.mxu0 %v25039_v43  ;;  %14912 = vmatpush3.msra.mxu1 %v19594_v37  ;;  %25147 = vst [vmem:[#allocation228_spill] sm:$0xff] %v19613_v53  ;;  %v19624_v37 = vand.u32 4294901760, %v2282_v13  ;;  %v19631_v24 = vand.u32 4294901760, %v2422_v41  ;;  %v2429_v30 = vsub.f32 %v19600_v60, %v19613_v53  ;;  %v19650_v41 = vsub.f32 %v2280_v35, %v19629_v27 }
 0x307   : > { %14883 = vmatpush3.msra.mxu0 %v19585_v38  ;;  %14913 = vmatprep.subr.mxu1 %v25039_v43  ;;  %25158 = vst [vmem:[#allocation239_spill] sm:$0xff] %v19647_v15  ;;  %25163 = vst [vmem:[#allocation244_spill] sm:$0xff] %v19664_v63  ;;  %v19671_v54 = vand.u32 4294901760, %v19647_v15  ;;  %v19686_v29 = vsub.f32 %v2278_v4, %v19664_v63 }
 0x308   : > { %14884 = vmatprep.subr.mxu0 %v25039_v43  ;;  %25151 = vst [vmem:[#allocation232_spill] sm:$0xff] %v19624_v37  ;;  %25154 = vst [vmem:[#allocation235_spill] sm:$0xff] %v19631_v24  ;;  %14914 = vmatpush3.msra.mxu1 %v19622_v6  ;;  %v19644_v5 = vsub.f32 %v2282_v13, %v19624_v37  ;;  %v19656_v9 = vand.u32 4294901760, %v2429_v30  ;;  %v2436_v6 = vsub.f32 %v19616_v8, %v19636_v39 }
 0x309   : > { %14885 = vmatpush3.msra.mxu0 %v19602_v16  ;;  %25159 = vst [vmem:[#allocation240_spill] sm:$0xff] %v19650_v41  ;;  %14915 = vmatprep.subr.mxu1 %v25039_v43  ;;  %v19661_v13 = vand.u32 4294901760, %v19639_v56  ;;  %25165 = vst [vmem:[#allocation246_spill] sm:$0xff] %v19671_v54  ;;  %v19674_v30 = vand.u32 4294901760, %v19650_v41  ;;  %v2457_v26 = vsub.f32 %v19647_v15, %v19671_v54  ;;  %v19715_v57 = vand.u32 4294901760, %v19686_v29 }
 0x30a   : > { %14886 = vmatprep.subr.mxu0 %v25039_v43  ;;  %25157 = vst [vmem:[#allocation238_spill] sm:$0xff] %v19644_v5  ;;  %25161 = vst [vmem:[#allocation242_spill] sm:$0xff] %v19656_v9  ;;  %14916 = vmatpush3.msra.mxu1 %v19631_v24  ;;  %v19668_v35 = vand.u32 4294901760, %v19644_v5  ;;  %v19681_v52 = vand.u32 4294901760, %v2436_v6  ;;  %v19697_v6 = vand.u32 4294901760, %v19677_v40 }
 0x30b   : > { %14887 = vmatpush3.msra.mxu0 %v19618_v62  ;;  %25162 = vst [vmem:[#allocation243_spill] sm:$0xff] %v19661_v13  ;;  %25166 = vst [vmem:[#allocation247_spill] sm:$0xff] %v19674_v30  ;;  %14917 = vmatprep.subr.mxu1 %v25039_v43  ;;  %v2443_v24 = vsub.f32 %v19639_v56, %v19661_v13  ;;  %v2464_v7 = vsub.f32 %v19650_v41, %v19674_v30  ;;  %v19724_v33 = vand.u32 4294901760, %v2457_v26  ;;  %v2254_v13 = vld [vmem:[#allocation2 + $0x28] sm:$0xff] }
 0x30c   : > { %14888 = vmatprep.subr.mxu0 %v25039_v43  ;;  %25164 = vst [vmem:[#allocation245_spill] sm:$0xff] %v19668_v35  ;;  %25168 = vst [vmem:[#allocation249_spill] sm:$0xff] %v19681_v52  ;;  %14918 = vmatpush3.msra.mxu1 %v19656_v9  ;;  %v2450_v48 = vsub.f32 %v19644_v5, %v19668_v35  ;;  %v19707_v9 = vand.u32 4294901760, %v2276_v32  ;;  %v2478_v26 = vsub.f32 %v19686_v29, %v19715_v57 }
 0x30d   : > { %14889 = vmatpush3.msra.mxu0 %v19624_v37  ;;  %25169 = vst [vmem:[#allocation250_spill] sm:$0xff] %v19686_v29  ;;  %25171 = vst [vmem:[#allocation252_spill] sm:$0xff] %v19697_v6  ;;  %14919 = vmatprep.subr.mxu1 %v25039_v43  ;;  %v19701_v4 = vand.u32 4294901760, %v2443_v24 }
 0x30e   : > { %14890 = vmatprep.subr.mxu0 %v25039_v43  ;;  %25174 = vst [vmem:[#allocation255_spill] sm:$0xff] %v19707_v9  ;;  %14920 = vmatpush3.msra.mxu1 %v19681_v52  ;;  %v19710_v42 = vand.u32 4294901760, %v2450_v48  ;;  %25176 = vst [vmem:[#allocation257_spill] sm:$0xff] %v19715_v57  ;;  %v19720_v24 = vsub.f32 %v2276_v32, %v19707_v9  ;;  %v2471_v48 = vsub.f32 %v19677_v40, %v19697_v6 }
 0x30f   : > { %14891 = vmatpush3.msra.mxu0 %v19626_v36  ;;  %25172 = vst [vmem:[#allocation253_spill] sm:$0xff] %v19701_v4  ;;  %14921 = vmatprep.subr.mxu1 %v25039_v43  ;;  %25178 = vst [vmem:[#allocation259_spill] sm:$0xff] %v19724_v33  ;;  %v19729_v52 = vand.u32 4294901760, %v19704_v58  ;;  %v19735_v32 = vand.u32 4294901760, %v2464_v7 }
 0x310   : > { %14892 = vmatprep.subr.mxu0 %v25039_v43  ;;  %25175 = vst [vmem:[#allocation256_spill] sm:$0xff] %v19710_v42  ;;  %25177 = vst [vmem:[#allocation258_spill] sm:$0xff] %v19720_v24  ;;  %14922 = vmatpush3.msra.mxu1 %v19701_v4  ;;  %v19740_v4 = vand.u32 4294901760, %v19720_v24  ;;  %v19746_v34 = vand.u32 4294901760, %v2471_v48 }
 0x311   : > { %14893 = vmatpush3.msra.mxu0 %v19629_v27  ;;  %25179 = vst [vmem:[#allocation260_spill] sm:$0xff] %v19729_v52  ;;  %14923 = vmatprep.subr.mxu1 %v25039_v43  ;;  %25180 = vst [vmem:[#allocation261_spill] sm:$0xff] %v19735_v32  ;;  %v2485_v7 = vsub.f32 %v19704_v58, %v19729_v52 }
 0x312   : > { %14894 = vmatprep.subr.mxu0 %v25039_v43  ;;  %14924 = vmatpush3.msra.mxu1 %v19710_v42  ;;  %25181 = vst [vmem:[#allocation262_spill] sm:$0xff] %v19740_v4  ;;  %25182 = vst [vmem:[#allocation263_spill] sm:$0xff] %v19746_v34  ;;  %v19754_v42 = vand.u32 4294901760, %v2478_v26  ;;  %v2492_v14 = vsub.f32 %v19720_v24, %v19740_v4 }
 0x313   : > { %14895 = vmatpush3.msra.mxu0 %v19653_v50  ;;  %14925 = vmatprep.subr.mxu1 %v25039_v43  ;;  %v19762_v48 = vand.u32 4294901760, %v2485_v7 }
 0x314   : > { %14896 = vmatprep.subr.mxu0 %v25039_v43  ;;  %14926 = vmatpush3.msra.mxu1 %v19724_v33  ;;  %25183 = vst [vmem:[#allocation264_spill] sm:$0xff] %v19754_v42 }
 0x315   : > { %14897 = vmatpush3.msra.mxu0 %v19664_v63  ;;  %14927 = vmatprep.subr.mxu1 %v25039_v43  ;;  %25184 = vst [vmem:[#allocation265_spill] sm:$0xff] %v19762_v48 }
 0x316   : > { %14898 = vmatprep.subr.mxu0 %v25039_v43  ;;  %14928 = vmatpush3.msra.mxu1 %v19735_v32  ;;  %v19766_v32 = vand.u32 4294901760, %v2492_v14 }
 0x317   : > { %14899 = vmatpush3.msra.mxu0 %v19689_v12  ;;  %14929 = vmatprep.subr.mxu1 %v25039_v43 }
 0x318   : > { %14900 = vmatprep.subr.mxu0 %v25039_v43  ;;  %14930 = vmatpush3.msra.mxu1 %v19746_v34  ;;  %25185 = vst [vmem:[#allocation266_spill] sm:$0xff] %v19766_v32 }
 0x319   : > { %14901 = vmatpush3.msra.mxu0 %v19707_v9  ;;  %14931 = vmatprep.subr.mxu1 %v25039_v43 }
 0x31a   : > { %14940 = vmatprep.subr.mxu0 %v25039_v43  ;;  %14932 = vmatpush3.msra.mxu1 %v19754_v42 }
 0x31b   : > { %14933 = vmatprep.subr.mxu1 %v25039_v43 }
 0x31c   : > { %14934 = vmatpush3.msra.mxu1 %v19762_v48 }
 0x31d   : > { %14935 = vmatprep.subr.mxu1 %v25039_v43 }
 0x31e   : > { %14936 = vmatpush3.msra.mxu1 %v19766_v32  ;;  %v2258_v32 = vrot.slane %v19352_v3, %v19357_v49 }
 0x31f   : > { %14975 = vmatprep.subr.mxu1 %v25039_v43 }
 0x370   : > { %v1850_v26 = vpop.f32.mrf.mxu1 }
 0x372   : > { %v14729_v34 = vpop.f32.mrf.mxu1 }
 0x378   : > { %v1699_v7 = vpop.f32.mrf.mxu0 }
 0x379   : > { %v1851_v4 = vadd.f32 %v1850_v26, %v1699_v7  ;;  %v25189_v26 = vld [vmem:[#allocation246_spill] sm:$0xff]  ;;  %v25190_v7 = vld [vmem:[#allocation247_spill] sm:$0xff] }
 0x37a   : > { %v14694_v33 = vpop.f32.mrf.mxu0 }
 0x390   : > { %v2043_v0 = vpop.f32.mrf.mxu1 }
 0x392   : > { %v14799_v11 = vpop.f32.mrf.mxu1 }
 0x399   : > { %v1954_v17 = vpop.f32.mrf.mxu0 }
 0x39a   : > { %v1955_v57 = vadd.f32 %v1954_v17, %v1851_v4  ;;  %v25186_v4 = vld [vmem:[#allocation236_spill] sm:$0xff] }
 0x39b   : > { %v14764_v42 = vpop.f32.mrf.mxu0 }
 0x39c   : > { %v2044_v6 = vadd.f32 %v2043_v0, %v1955_v57  ;;  %v2267_v0 = vld [vmem:[#allocation2 + $0x30] sm:$0xff] }
 0x39d   : > { %vm2268_vm4 = vcmp.ne.f32.partialorder %v2267_v0, 0.0  ;;  %v2955_v0 = vld [vmem:[%s24261_s2 + $0x68] sm:$0xff] }
 0x3b2   : > { %v2249_v14 = vpop.f32.mrf.mxu1 }
 0x3b4   : > { %v14869_v52 = vpop.f32.mrf.mxu1 }
 0x3ba   : > { %v2162_v48 = vpop.f32.mrf.mxu0 }
 0x3bb   : > { %v2163_v30 = vadd.f32 %v2162_v48, %v2044_v6  ;;  %v25188_v48 = vld [vmem:[#allocation245_spill] sm:$0xff] }
 0x3bc   : > { %v14834_v54 = vpop.f32.mrf.mxu0 }
 0x3bd   : > { %v2250_v35 = vadd.f32 %v2249_v14, %v2163_v30  ;;  %v19781_v54 = vsub.s32 3, %v18461_v31  ;;  %v25191_v14 = vld [vmem:[#allocation252_spill] sm:$0xff] }
 0x3bf   : > { %v2259_v34 = vmul.f32 %v2258_v32, %v2250_v35  ;;  %v25187_v32 = vld [vmem:[#allocation243_spill] sm:$0xff] }
 0x3c1   : > { %v2260_v39 = vmul.f32 %v2259_v34, %v2254_v13  ;;  %v25192_v34 = vld [vmem:[#allocation257_spill] sm:$0xff] }
 0x3c3   : > { %v19776_v33 = vsub.f32 %v19362_v10, %v2260_v39 }
 0x3c5   : > { %18059 = vrcp.f32 %v19776_v33 }
 0x3d2   : > { %v18060_v42 = vpop.eup %18059 }
 0x3d3   : > { %v2263_v52 = vmul.f32 %v18060_v42, %v19776_v33 }
 0x3d5   : > { %v2264_v17 = vsub.f32 2.0, %v2263_v52  ;;  %v25194_v52 = vld [vmem:[#allocation262_spill] sm:$0xff] }
 0x3d7   : > { %v2265_v11 = vmul.f32 %v18060_v42, %v2264_v17  ;;  %v25193_v42 = vld [vmem:[#allocation260_spill] sm:$0xff]  ;;  %v2957_v17 = vld [vmem:[%s24261_s2 + $0x78] sm:$0xff] }
 0x3d9   : > { %v2272_v57 = vrot.slane %v2265_v11, %v19781_v54  ;;  %v2956_v11 = vld [vmem:[%s24261_s2 + $0x70] sm:$0xff] }
 0x3db   : > { %v2273_v3 = vmul.f32 %v2272_v57, %v19776_v33  ;;  %v19950_v57 = vand.u32 4294901760, %v2957_v17 }
 0x3dd   : > { %v19786_v13 = vsel %vm2268_vm4, %v2273_v3, %v19776_v33  ;;  %v19952_v3 = vand.u32 4294901760, %v2956_v11 }
 0x3de   : > { %v19789_v39 = vand.u32 4294901760, %v19786_v13 }
 0x3e0   : > { %v19793_v10 = vsub.f32 %v19786_v13, %v19789_v39  ;;  %14938 = vmatmul.mubr.f32.vlgmr.msra.gmra.mxu1 %v19789_v39 }
 0x3e1   : > { %14976 = vmatpush3.msra.mxu1 %v19517_v23  ;;  %15007 = vmatprep.mubr.msk.f32.mxu1 %vm18151_vm0, %v25039_v43 }
 0x3e2   : > { %14977 = vmatprep.subr.mxu1 %v25039_v43  ;;  %v2375_v35 = vand.u32 4294901760, %v19793_v10 }
 0x3e3   : > { %14978 = vmatpush3.msra.mxu1 %v19522_v44 }
 0x3e4   : > { %14979 = vmatprep.subr.mxu1 %v25039_v43  ;;  %v2376_v30 = vsub.f32 %v19793_v10, %v2375_v35 }
 0x3e5   : > { %14980 = vmatpush3.msra.mxu1 %v19532_v25 }
 0x3e6   : > { %14981 = vmatprep.subr.mxu1 %v25039_v43  ;;  %v2377_v6 = vand.u32 4294901760, %v2376_v30  ;;  %v2952_v30 = vld [vmem:[%s24261_s2 + $0x50] sm:$0xff] }
 0x3e7   : > { %14982 = vmatpush3.msra.mxu1 %v19544_v1 }
 0x3e8   : > { %14983 = vmatprep.subr.mxu1 %v25039_v43  ;;  %14903 = vmatmul.mubr.f32.vlgmr.msra.gmra.mxu0 %v2377_v6 }
 0x3e9   : > { %14941 = vmatpush3.msra.mxu0 %v19520_v18  ;;  %14984 = vmatpush3.msra.mxu1 %v19559_v20 }
 0x3ea   : > { %14942 = vmatprep.subr.mxu0 %v25039_v43  ;;  %14985 = vmatprep.subr.mxu1 %v25039_v43 }
 0x3eb   : > { %14943 = vmatpush3.msra.mxu0 %v19530_v19  ;;  %14986 = vmatpush3.msra.mxu1 %v19570_v46 }
 0x3ec   : > { %14944 = vmatprep.subr.mxu0 %v25039_v43  ;;  %14987 = vmatprep.subr.mxu1 %v25039_v43 }
 0x3ed   : > { %14945 = vmatpush3.msra.mxu0 %v19542_v45  ;;  %14988 = vmatpush3.msra.mxu1 %v19585_v38 }
 0x3ee   : > { %14946 = vmatprep.subr.mxu0 %v25039_v43  ;;  %14989 = vmatprep.subr.mxu1 %v25039_v43 }
 0x3ef   : > { %14947 = vmatpush3.msra.mxu0 %v19556_v59  ;;  %14990 = vmatpush3.msra.mxu1 %v19602_v16 }
 0x3f0   : > { %14948 = vmatprep.subr.mxu0 %v25039_v43  ;;  %14991 = vmatprep.subr.mxu1 %v25039_v43 }
 0x3f1   : > { %14949 = vmatpush3.msra.mxu0 %v19574_v51  ;;  %14992 = vmatpush3.msra.mxu1 %v19618_v62 }
 0x3f2   : > { %14950 = vmatprep.subr.mxu0 %v25039_v43  ;;  %14993 = vmatprep.subr.mxu1 %v25039_v43 }
 0x3f3   : > { %14951 = vmatpush3.msra.mxu0 %v19583_v22  ;;  %14994 = vmatpush3.msra.mxu1 %v19624_v37 }
 0x3f4   : > { %14952 = vmatprep.subr.mxu0 %v25039_v43  ;;  %14995 = vmatprep.subr.mxu1 %v25039_v43 }
 0x3f5   : > { %14953 = vmatpush3.msra.mxu0 %v19600_v60  ;;  %14996 = vmatpush3.msra.mxu1 %v19626_v36 }
 0x3f6   : > { %14954 = vmatprep.subr.mxu0 %v25039_v43  ;;  %14997 = vmatprep.subr.mxu1 %v25039_v43 }
 0x3f7   : > { %14955 = vmatpush3.msra.mxu0 %v19616_v8  ;;  %14998 = vmatpush3.msra.mxu1 %v19629_v27 }
 0x3f8   : > { %14956 = vmatprep.subr.mxu0 %v25039_v43  ;;  %14999 = vmatprep.subr.mxu1 %v25039_v43 }
 0x3f9   : > { %14957 = vmatpush3.msra.mxu0 %v19639_v56  ;;  %15000 = vmatpush3.msra.mxu1 %v19653_v50 }
 0x3fa   : > { %14958 = vmatprep.subr.mxu0 %v25039_v43  ;;  %15001 = vmatprep.subr.mxu1 %v25039_v43 }
 0x3fb   : > { %14959 = vmatpush3.msra.mxu0 %v19644_v5  ;;  %15002 = vmatpush3.msra.mxu1 %v19664_v63 }
 0x3fc   : > { %14960 = vmatprep.subr.mxu0 %v25039_v43  ;;  %15003 = vmatprep.subr.mxu1 %v25039_v43 }
 0x3fd   : > { %14961 = vmatpush3.msra.mxu0 %v19647_v15  ;;  %15004 = vmatpush3.msra.mxu1 %v19689_v12  ;;  %v2945_v15 = vld [vmem:[%s24261_s2 + $0x18] sm:$0xff] }
 0x3fe   : > { %14962 = vmatprep.subr.mxu0 %v25039_v43  ;;  %15005 = vmatprep.subr.mxu1 %v25039_v43  ;;  %v20108_v5 = vand.u32 4294901760, %v2945_v15 }
 0x3ff   : > { %14963 = vmatpush3.msra.mxu0 %v19650_v41  ;;  %15006 = vmatpush3.msra.mxu1 %v19707_v9 }
 0x400   : > { %14964 = vmatprep.subr.mxu0 %v25039_v43  ;;  %15008 = vmatmul.mubr.f32.vlgmr.msra.gmra.mxu1 %v2375_v35  ;;  %v2953_v35 = vld [vmem:[%s24261_s2 + $0x58] sm:$0xff] }
 0x401   : > { %15045 = vmatprep.subr.mxu1 %v25039_v43  ;;  %14965 = vmatpush3.msra.mxu0 %v19677_v40 }
 0x402   : > { %15046 = vmatpush3.msra.mxu1 %v19517_v23  ;;  %14966 = vmatprep.subr.mxu0 %v25039_v43 }
 0x403   : > { %15047 = vmatprep.subr.mxu1 %v25039_v43  ;;  %14967 = vmatpush3.msra.mxu0 %v19686_v29  ;;  %v2946_v29 = vld [vmem:[%s24261_s2 + $0x20] sm:$0xff] }
 0x404   : > { %15048 = vmatpush3.msra.mxu1 %v19522_v44  ;;  %14968 = vmatprep.subr.mxu0 %v25039_v43 }
 0x405   : > { %15049 = vmatprep.subr.mxu1 %v25039_v43  ;;  %14969 = vmatpush3.msra.mxu0 %v19704_v58 }
 0x406   : > { %15050 = vmatpush3.msra.mxu1 %v19532_v25  ;;  %14970 = vmatprep.subr.mxu0 %v25039_v43 }
 0x407   : > { %15051 = vmatprep.subr.mxu1 %v25039_v43  ;;  %14971 = vmatpush3.msra.mxu0 %v19720_v24 }
 0x408   : > { %14972 = vmatprep.mubr.msk.f32.mxu0 %vm18151_vm0, %v25039_v43  ;;  %15052 = vmatpush3.msra.mxu1 %v19544_v1 }
 0x409   : > { %14973 = vmatmul.mubr.f32.vlgmr.msra.gmra.mxu0 %v19793_v10  ;;  %15010 = vmatprep.subr.mxu0 %v25039_v43  ;;  %v2954_v10 = vld [vmem:[%s24261_s2 + $0x60] sm:$0xff] }
 0x40a   : > { %15053 = vmatprep.subr.mxu1 %v25039_v43  ;;  %15011 = vmatpush3.msra.mxu0 %v19527_v2  ;;  %v19965_v6 = vand.u32 4294901760, %v2954_v10 }
 0x40b   : > { %15054 = vmatpush3.msra.mxu1 %v19559_v20  ;;  %15012 = vmatprep.subr.mxu0 %v25039_v43 }
 0x40c   : > { %15055 = vmatprep.subr.mxu1 %v25039_v43  ;;  %15013 = vmatpush3.msra.mxu0 %v19539_v61 }
 0x40d   : > { %15056 = vmatpush3.msra.mxu1 %v19570_v46  ;;  %15014 = vmatprep.subr.mxu0 %v25039_v43 }
 0x40e   : > { %15057 = vmatprep.subr.mxu1 %v25039_v43  ;;  %15015 = vmatpush3.msra.mxu0 %v19553_v28 }
 0x40f   : > { %15058 = vmatpush3.msra.mxu1 %v19585_v38  ;;  %15016 = vmatprep.subr.mxu0 %v25039_v43 }
 0x410   : > { %15059 = vmatprep.subr.mxu1 %v25039_v43  ;;  %15017 = vmatpush3.msra.mxu0 %v19568_v47 }
 0x411   : > { %15060 = vmatpush3.msra.mxu1 %v19602_v16  ;;  %15018 = vmatprep.subr.mxu0 %v25039_v43  ;;  %v2934_v16 = vld [vmem:[#allocation2 + $0x38] sm:$0xff] }
 0x412   : > { %15061 = vmatprep.subr.mxu1 %v25039_v43  ;;  %15019 = vmatpush3.msra.mxu0 %v19590_v21 }
 0x413   : > { %15062 = vmatpush3.msra.mxu1 %v19618_v62  ;;  %15020 = vmatprep.subr.mxu0 %v25039_v43 }
 0x414   : > { %15063 = vmatprep.subr.mxu1 %v25039_v43  ;;  %15021 = vmatpush3.msra.mxu0 %v19597_v55 }
 0x415   : > { %15064 = vmatpush3.msra.mxu1 %v19624_v37  ;;  %15022 = vmatprep.subr.mxu0 %v25039_v43 }
 0x416   : > { %15065 = vmatprep.subr.mxu1 %v25039_v43  ;;  %15023 = vmatpush3.msra.mxu0 %v19613_v53 }
 0x417   : > { %15066 = vmatpush3.msra.mxu1 %v19626_v36  ;;  %15024 = vmatprep.subr.mxu0 %v25039_v43 }
 0x418   : > { %15067 = vmatprep.subr.mxu1 %v25039_v43  ;;  %15025 = vmatpush3.msra.mxu0 %v25186_v4 }
 0x419   : > { %15068 = vmatpush3.msra.mxu1 %v19629_v27  ;;  %15026 = vmatprep.subr.mxu0 %v25039_v43 }
 0x41a   : > { %15069 = vmatprep.subr.mxu1 %v25039_v43  ;;  %15027 = vmatpush3.msra.mxu0 %v25187_v32 }
 0x41b   : > { %15070 = vmatpush3.msra.mxu1 %v19653_v50  ;;  %15028 = vmatprep.subr.mxu0 %v25039_v43 }
 0x41c   : > { %15071 = vmatprep.subr.mxu1 %v25039_v43  ;;  %15029 = vmatpush3.msra.mxu0 %v25188_v48 }
 0x41d   : > { %15072 = vmatpush3.msra.mxu1 %v19664_v63  ;;  %15030 = vmatprep.subr.mxu0 %v25039_v43 }
 0x41e   : > { %15073 = vmatprep.subr.mxu1 %v25039_v43  ;;  %15031 = vmatpush3.msra.mxu0 %v25189_v26  ;;  %v19982_v26 = vsub.f32 %v2954_v10, %v19965_v6 }
 0x41f   : > { %15074 = vmatpush3.msra.mxu1 %v19689_v12  ;;  %15032 = vmatprep.subr.mxu0 %v25039_v43 }
 0x420   : > { %15075 = vmatprep.subr.mxu1 %v25039_v43  ;;  %15033 = vmatpush3.msra.mxu0 %v25190_v7  ;;  %v25195_v21 = vand.u32 4294901760, %v19982_v26 }
 0x421   : > { %15076 = vmatpush3.msra.mxu1 %v19707_v9  ;;  %15077 = vmatprep.mubr.msk.f32.mxu1 %vm18151_vm0, %v25039_v43 }
 0x422   : > { %15034 = vmatprep.subr.mxu0 %v25039_v43  ;;  %15078 = vmatmul.mubr.f32.vlgmr.msra.gmra.mxu1 %v19789_v39 }
 0x423   : > { %15035 = vmatpush3.msra.mxu0 %v25191_v14  ;;  %15042 = vmatprep.mubr.msk.f32.mxu0 %vm18151_vm0, %v25039_v43  ;;  %v19975_v14 = vsub.f32 %v2956_v11, %v19952_v3 }
 0x424   : > { %15036 = vmatprep.subr.mxu0 %v25039_v43  ;;  %15115 = vmatprep.subr.mxu1 %v25039_v43 }
 0x425   : > { %15037 = vmatpush3.msra.mxu0 %v25192_v34  ;;  %15147 = vmatprep.mubr.msk.f32.mxu1 %vm18151_vm0, %v25039_v43  ;;  %v19972_v34 = vsub.f32 %v2957_v17, %v19950_v57  ;;  %v24714_v17 = vand.u32 4294901760, %v19975_v14 }
 0x426   : > { %15038 = vmatprep.subr.mxu0 %v25039_v43 }
 0x427   : > { %15039 = vmatpush3.msra.mxu0 %v25193_v42  ;;  %v19969_v42 = vand.u32 4294901760, %v2952_v30  ;;  %v24710_v32 = vand.u32 4294901760, %v19972_v34 }
 0x428   : > { %15040 = vmatprep.subr.mxu0 %v25039_v43 }
 0x429   : > { %15041 = vmatpush3.msra.mxu0 %v25194_v52  ;;  %v19967_v52 = vand.u32 4294901760, %v2953_v35  ;;  %v3053_v10 = vsub.f32 %v19972_v34, %v24710_v32  ;;  %v3074_v32 = vsub.f32 %v19982_v26, %v25195_v21 }
 0x42a   : > { %15043 = vmatmul.mubr.f32.vlgmr.msra.gmra.mxu0 %v19789_v39  ;;  %15080 = vmatprep.subr.mxu0 %v25039_v43  ;;  %v19954_v39 = vand.u32 4294901760, %v2955_v0 }
 0x42b   : > { %15112 = vmatprep.mubr.msk.f32.mxu0 %vm18151_vm0, %v25039_v43  ;;  %15081 = vmatpush3.msra.mxu0 %v19950_v57  ;;  %v19985_v48 = vsub.f32 %v2953_v35, %v19967_v52  ;;  %v3060_v35 = vsub.f32 %v19975_v14, %v24714_v17  ;;  %v3075_v21 = vand.u32 4294901760, %v3074_v32 }
 0x42c   : > { %v19978_v7 = vsub.f32 %v2955_v0, %v19954_v39  ;;  %15082 = vmatprep.subr.mxu0 %v25039_v43  ;;  %v19993_v0 = vsub.f32 %v2952_v30, %v19969_v42  ;;  %v3054_v30 = vand.u32 4294901760, %v3053_v10 }
 0x42d   : > { %15083 = vmatpush3.msra.mxu0 %v19952_v3  ;;  %v24716_v55 = vand.u32 4294901760, %v19985_v48  ;;  %v3061_v4 = vand.u32 4294901760, %v3060_v35 }
 0x42e   : > { %v24713_v11 = vand.u32 4294901760, %v19978_v7  ;;  %15084 = vmatprep.subr.mxu0 %v25039_v43  ;;  %v24715_v47 = vand.u32 4294901760, %v19993_v0  ;;  %15116 = vmatpush3.msra.mxu1 %v3054_v30 }
 0x42f   : > { %15085 = vmatpush3.msra.mxu0 %v19954_v39  ;;  %v3081_v17 = vsub.f32 %v19985_v48, %v24716_v55  ;;  %15117 = vmatprep.subr.mxu1 %v25039_v43 }
 0x430   : > { %v3067_v53 = vsub.f32 %v19978_v7, %v24713_v11  ;;  %15086 = vmatprep.subr.mxu0 %v25039_v43  ;;  %15118 = vmatpush3.msra.mxu1 %v3061_v4  ;;  %v3088_v10 = vsub.f32 %v19993_v0, %v24715_v47  ;;  %v2950_v4 = vld [vmem:[%s24261_s2 + $0x40] sm:$0xff] }
 0x431   : > { %15087 = vmatpush3.msra.mxu0 %v19965_v6  ;;  %15119 = vmatprep.subr.mxu1 %v25039_v43  ;;  %v3082_v30 = vand.u32 4294901760, %v3081_v17  ;;  %v20039_v47 = vand.u32 4294901760, %v2950_v4 }
 0x432   : > { %15088 = vmatprep.subr.mxu0 %v25039_v43  ;;  %v3068_v11 = vand.u32 4294901760, %v3067_v53  ;;  %v2951_v53 = vld [vmem:[%s24261_s2 + $0x48] sm:$0xff]  ;;  %v3089_v55 = vand.u32 4294901760, %v3088_v10 }
 0x433   : > { %15089 = vmatpush3.msra.mxu0 %v19967_v52  ;;  %v20029_v35 = vand.u32 4294901760, %v2951_v53  ;;  %v20049_v28 = vsub.f32 %v2950_v4, %v20039_v47 }
 0x434   : > { %15090 = vmatprep.subr.mxu0 %v25039_v43  ;;  %15120 = vmatpush3.msra.mxu1 %v3068_v11  ;;  %v2949_v11 = vld [vmem:[%s24261_s2 + $0x38] sm:$0xff] }
 0x435   : > { %15091 = vmatpush3.msra.mxu0 %v19969_v42  ;;  %15121 = vmatprep.subr.mxu1 %v25039_v43  ;;  %v20037_v32 = vsub.f32 %v2951_v53, %v20029_v35  ;;  %v20051_v53 = vand.u32 4294901760, %v2949_v11  ;;  %v24730_v4 = vand.u32 4294901760, %v20049_v28 }
 0x436   : > { %15092 = vmatprep.subr.mxu0 %v25039_v43  ;;  %15122 = vmatpush3.msra.mxu1 %v3075_v21  ;;  %v2948_v21 = vld [vmem:[%s24261_s2 + $0x30] sm:$0xff] }
 0x437   : > { %15093 = vmatpush3.msra.mxu0 %v20029_v35  ;;  %15123 = vmatprep.subr.mxu1 %v25039_v43  ;;  %v24725_v17 = vand.u32 4294901760, %v20037_v32  ;;  %v20064_v61 = vsub.f32 %v2949_v11, %v20051_v53  ;;  %v20066_v2 = vand.u32 4294901760, %v2948_v21 }
 0x438   : > { %15094 = vmatprep.subr.mxu0 %v25039_v43  ;;  %15124 = vmatpush3.msra.mxu1 %v3082_v30  ;;  %v2947_v30 = vld [vmem:[%s24261_s2 + $0x28] sm:$0xff] }
 0x439   : > { %15095 = vmatpush3.msra.mxu0 %v20039_v47  ;;  %15125 = vmatprep.subr.mxu1 %v25039_v43  ;;  %v3095_v10 = vsub.f32 %v20037_v32, %v24725_v17  ;;  %v3102_v17 = vsub.f32 %v20049_v28, %v24730_v4  ;;  %v24737_v11 = vand.u32 4294901760, %v20064_v61  ;;  %v20079_v58 = vsub.f32 %v2948_v21, %v20066_v2 }
 0x43a   : > { %15096 = vmatprep.subr.mxu0 %v25039_v43  ;;  %15126 = vmatpush3.msra.mxu1 %v3089_v55  ;;  %v20082_v55 = vand.u32 4294901760, %v2947_v30  ;;  %v20092_v21 = vand.u32 4294901760, %v2946_v29 }
 0x43b   : > { %15097 = vmatpush3.msra.mxu0 %v20051_v53  ;;  %15127 = vmatprep.subr.mxu1 %v25039_v43  ;;  %v3096_v24 = vand.u32 4294901760, %v3095_v10  ;;  %v3103_v10 = vand.u32 4294901760, %v3102_v17  ;;  %v3109_v4 = vsub.f32 %v20064_v61, %v24737_v11  ;;  %v24740_v40 = vand.u32 4294901760, %v20079_v58 }
 0x43c   : > { %15098 = vmatprep.subr.mxu0 %v25039_v43  ;;  %v20096_v41 = vsub.f32 %v2947_v30, %v20082_v55  ;;  %v20106_v11 = vsub.f32 %v2946_v29, %v20092_v21  ;;  %v20119_v29 = vsub.f32 %v2945_v15, %v20108_v5 }
 0x43d   : > { %15099 = vmatpush3.msra.mxu0 %v20066_v2  ;;  %15128 = vmatpush3.msra.mxu1 %v3096_v24  ;;  %v3110_v24 = vand.u32 4294901760, %v3109_v4  ;;  %v3116_v17 = vsub.f32 %v20079_v58, %v24740_v40 }
 0x43e   : > { %15100 = vmatprep.subr.mxu0 %v25039_v43  ;;  %15129 = vmatprep.subr.mxu1 %v25039_v43  ;;  %v24749_v30 = vand.u32 4294901760, %v20096_v41  ;;  %v24752_v40 = vand.u32 4294901760, %v20106_v11 }
 0x43f   : > { %15101 = vmatpush3.msra.mxu0 %v20082_v55  ;;  %15130 = vmatpush3.msra.mxu1 %v3103_v10  ;;  %v2944_v10 = vld [vmem:[%s24261_s2 + $0x10] sm:$0xff]  ;;  %v3117_v4 = vand.u32 4294901760, %v3116_v17  ;;  %v24757_v17 = vand.u32 4294901760, %v20119_v29 }
 0x440   : > { %15102 = vmatprep.subr.mxu0 %v25039_v43  ;;  %15131 = vmatprep.subr.mxu1 %v25039_v43  ;;  %v20121_v56 = vand.u32 4294901760, %v2944_v10  ;;  %v3123_v8 = vsub.f32 %v20096_v41, %v24749_v30  ;;  %v3130_v15 = vsub.f32 %v20106_v11, %v24752_v40 }
 0x441   : > { %15103 = vmatpush3.msra.mxu0 %v20092_v21  ;;  %15132 = vmatpush3.msra.mxu1 %v3110_v24  ;;  %v2943_v24 = vld [vmem:[%s24261_s2 + $0x8] sm:$0xff]  ;;  %v3137_v40 = vsub.f32 %v20119_v29, %v24757_v17 }
 0x442   : > { %15104 = vmatprep.subr.mxu0 %v25039_v43  ;;  %15133 = vmatprep.subr.mxu1 %v25039_v43  ;;  %v20137_v60 = vsub.f32 %v2944_v10, %v20121_v56  ;;  %v20139_v22 = vand.u32 4294901760, %v2943_v24  ;;  %v3124_v30 = vand.u32 4294901760, %v3123_v8  ;;  %v3131_v51 = vand.u32 4294901760, %v3130_v15 }
 0x443   : > { %15105 = vmatpush3.msra.mxu0 %v20108_v5  ;;  %15134 = vmatpush3.msra.mxu1 %v3117_v4  ;;  %v2942_v4 = vld [vmem:[%s24261_s2] sm:$0xff]  ;;  %v3138_v45 = vand.u32 4294901760, %v3137_v40 }
 0x444   : > { %15106 = vmatprep.subr.mxu0 %v25039_v43  ;;  %15135 = vmatprep.subr.mxu1 %v25039_v43  ;;  %v24758_v10 = vand.u32 4294901760, %v20137_v60  ;;  %v20152_v59 = vsub.f32 %v2943_v24, %v20139_v22  ;;  %v20155_v8 = vand.u32 4294901760, %v2942_v4 }
 0x445   : > { %15107 = vmatpush3.msra.mxu0 %v20121_v56  ;;  %15136 = vmatpush3.msra.mxu1 %v3124_v30 }
 0x446   : > { %15108 = vmatprep.subr.mxu0 %v25039_v43  ;;  %15137 = vmatprep.subr.mxu1 %v25039_v43  ;;  %v3144_v15 = vsub.f32 %v20137_v60, %v24758_v10  ;;  %v24759_v17 = vand.u32 4294901760, %v20152_v59  ;;  %v20165_v24 = vsub.f32 %v2942_v4, %v20155_v8 }
 0x447   : > { %15109 = vmatpush3.msra.mxu0 %v20139_v22  ;;  %15138 = vmatpush3.msra.mxu1 %v3131_v51 }
 0x448   : > { %15110 = vmatprep.subr.mxu0 %v25039_v43  ;;  %15139 = vmatprep.subr.mxu1 %v25039_v43  ;;  %v3145_v30 = vand.u32 4294901760, %v3144_v15  ;;  %v3151_v40 = vsub.f32 %v20152_v59, %v24759_v17  ;;  %v24772_v10 = vand.u32 4294901760, %v20165_v24 }
 0x449   : > { %15111 = vmatpush3.msra.mxu0 %v20155_v8  ;;  %15140 = vmatpush3.msra.mxu1 %v3138_v45 }
 0x44a   : > { %15150 = vmatprep.subr.mxu0 %v25039_v43  ;;  %15141 = vmatprep.subr.mxu1 %v25039_v43  ;;  %v3152_v51 = vand.u32 4294901760, %v3151_v40  ;;  %v3158_v4 = vsub.f32 %v20165_v24, %v24772_v10 }
 0x44b   : > { %15142 = vmatpush3.msra.mxu1 %v3145_v30 }
 0x44c   : > { %15143 = vmatprep.subr.mxu1 %v25039_v43  ;;  %v3159_v15 = vand.u32 4294901760, %v3158_v4 }
 0x44d   : > { %15144 = vmatpush3.msra.mxu1 %v3152_v51 }
 0x44e   : > { %15145 = vmatprep.subr.mxu1 %v25039_v43 }
 0x44f   : > { %15146 = vmatpush3.msra.mxu1 %v3159_v15  ;;  %v2938_v15 = vrot.slane %v19776_v33, %v19781_v54 }
 0x450   : > { %15185 = vmatprep.subr.mxu1 %v25039_v43 }
 0x4a0   : > { %v2530_v45 = vpop.f32.mrf.mxu1 }
 0x4a2   : > { %v14939_v17 = vpop.f32.mrf.mxu1 }
 0x4a8   : > { %v2379_v19 = vpop.f32.mrf.mxu0 }
 0x4a9   : > { %v2531_v50 = vadd.f32 %v2530_v45, %v2379_v19  ;;  %v12337_v19 = vld [vmem:[%s24261_s2 + $0xf8] sm:$0xff] }
 0x4aa   : > { %v14904_v18 = vpop.f32.mrf.mxu0  ;;  %v20303_v33 = vand.u32 4294901760, %v12337_v19 }
 0x4c0   : > { %v2723_v9 = vpop.f32.mrf.mxu1 }
 0x4c2   : > { %v15009_v40 = vpop.f32.mrf.mxu1 }
 0x4c9   : > { %v2634_v30 = vpop.f32.mrf.mxu0 }
 0x4ca   : > { %v2635_v27 = vadd.f32 %v2634_v30, %v2531_v50 }
 0x4cb   : > { %v14974_v12 = vpop.f32.mrf.mxu0 }
 0x4cc   : > { %v2724_v36 = vadd.f32 %v2723_v9, %v2635_v27  ;;  %v12336_v9 = vld [vmem:[%s24261_s2 + $0xf0] sm:$0xff] }
 0x4e2   : > { %v2929_v63 = vpop.f32.mrf.mxu1 }
 0x4e4   : > { %v15079_v10 = vpop.f32.mrf.mxu1 }
 0x4e5   : > { %v12330_v10 = vld [vmem:[%s24261_s2 + $0xc0] sm:$0xff] }
 0x4ea   : > { %v2842_v51 = vpop.f32.mrf.mxu0 }
 0x4eb   : > { %v2843_v4 = vadd.f32 %v2842_v51, %v2724_v36 }
 0x4ec   : > { %v15044_v37 = vpop.f32.mrf.mxu0 }
 0x4ed   : > { %v2930_v62 = vadd.f32 %v2929_v63, %v2843_v4  ;;  %v25198_v37 = vand.u32 4294901760, %v19978_v7  ;;  %v25199_v63 = vand.u32 4294901760, %v19982_v26 }
 0x4ef   : > { %v2939_v17 = vmul.f32 %v2938_v15, %v2930_v62  ;;  %v25197_v62 = vand.u32 4294901760, %v19975_v14  ;;  %v20395_v15 = vand.u32 4294901760, %v12330_v10 }
 0x4f1   : > { %v2940_v38 = vmul.f32 %v2939_v17, %v2934_v16  ;;  %v25196_v16 = vand.u32 4294901760, %v19972_v34 }
 0x4f3   : > { %v20184_v18 = vsub.f32 %v19786_v13, %v2940_v38  ;;  %v12335_v13 = vld [vmem:[%s24261_s2 + $0xe8] sm:$0xff] }
 0x4f5   : > { %v20187_v12 = vand.u32 4294901760, %v20184_v18 }
 0x4f7   : > { %v20191_v50 = vsub.f32 %v20184_v18, %v20187_v12  ;;  %15148 = vmatmul.mubr.f32.vlgmr.msra.gmra.mxu1 %v20187_v12 }
 0x4f8   : > { %15186 = vmatpush3.msra.mxu1 %v19950_v57  ;;  %15217 = vmatprep.mubr.msk.f32.mxu1 %vm18151_vm0, %v25039_v43 }
 0x4f9   : > { %15187 = vmatprep.subr.mxu1 %v25039_v43  ;;  %v20199_v27 = vand.u32 4294901760, %v20191_v50 }
 0x4fa   : > { %15188 = vmatpush3.msra.mxu1 %v19952_v3 }
 0x4fb   : > { %15189 = vmatprep.subr.mxu1 %v25039_v43  ;;  %v3042_v36 = vsub.f32 %v20191_v50, %v20199_v27 }
 0x4fc   : > { %15190 = vmatpush3.msra.mxu1 %v19954_v39 }
 0x4fd   : > { %15191 = vmatprep.subr.mxu1 %v25039_v43  ;;  %v20207_v38 = vand.u32 4294901760, %v3042_v36 }
 0x4fe   : > { %15192 = vmatpush3.msra.mxu1 %v19965_v6 }
 0x4ff   : > { %15193 = vmatprep.subr.mxu1 %v25039_v43  ;;  %15113 = vmatmul.mubr.f32.vlgmr.msra.gmra.mxu0 %v20207_v38 }
 0x500   : > { %15151 = vmatpush3.msra.mxu0 %v19972_v34  ;;  %15194 = vmatpush3.msra.mxu1 %v19967_v52  ;;  %v20324_v34 = vsub.f32 %v12337_v19, %v20303_v33 }
 0x501   : > { %15152 = vmatprep.subr.mxu0 %v25039_v43  ;;  %15195 = vmatprep.subr.mxu1 %v25039_v43 }
 0x502   : > { %15153 = vmatpush3.msra.mxu0 %v19975_v14  ;;  %15196 = vmatpush3.msra.mxu1 %v19969_v42  ;;  %v20313_v14 = vand.u32 4294901760, %v12336_v9 }
 0x503   : > { %15154 = vmatprep.subr.mxu0 %v25039_v43  ;;  %15197 = vmatprep.subr.mxu1 %v25039_v43 }
 0x504   : > { %15155 = vmatpush3.msra.mxu0 %v19978_v7  ;;  %15198 = vmatpush3.msra.mxu1 %v20029_v35  ;;  %v25200_v7 = vand.u32 4294901760, %v19985_v48 }
 0x505   : > { %15156 = vmatprep.subr.mxu0 %v25039_v43  ;;  %15199 = vmatprep.subr.mxu1 %v25039_v43 }
 0x506   : > { %15157 = vmatpush3.msra.mxu0 %v19982_v26  ;;  %15200 = vmatpush3.msra.mxu1 %v20039_v47  ;;  %v25201_v26 = vand.u32 4294901760, %v19993_v0 }
 0x507   : > { %15158 = vmatprep.subr.mxu0 %v25039_v43  ;;  %15201 = vmatprep.subr.mxu1 %v25039_v43 }
 0x508   : > { %15159 = vmatpush3.msra.mxu0 %v19985_v48  ;;  %15202 = vmatpush3.msra.mxu1 %v20051_v53  ;;  %v20326_v48 = vand.u32 4294901760, %v12335_v13 }
 0x509   : > { %15160 = vmatprep.subr.mxu0 %v25039_v43  ;;  %15203 = vmatprep.subr.mxu1 %v25039_v43 }
 0x50a   : > { %15161 = vmatpush3.msra.mxu0 %v19993_v0  ;;  %15204 = vmatpush3.msra.mxu1 %v20066_v2  ;;  %v12332_v0 = vld [vmem:[%s24261_s2 + $0xd0] sm:$0xff] }
 0x50b   : > { %15162 = vmatprep.subr.mxu0 %v25039_v43  ;;  %15205 = vmatprep.subr.mxu1 %v25039_v43 }
 0x50c   : > { %15163 = vmatpush3.msra.mxu0 %v20037_v32  ;;  %15206 = vmatpush3.msra.mxu1 %v20082_v55 }
 0x50d   : > { %15164 = vmatprep.subr.mxu0 %v25039_v43  ;;  %15207 = vmatprep.subr.mxu1 %v25039_v43 }
 0x50e   : > { %15165 = vmatpush3.msra.mxu0 %v20049_v28  ;;  %15208 = vmatpush3.msra.mxu1 %v20092_v21 }
 0x50f   : > { %15166 = vmatprep.subr.mxu0 %v25039_v43  ;;  %15209 = vmatprep.subr.mxu1 %v25039_v43 }
 0x510   : > { %15167 = vmatpush3.msra.mxu0 %v20064_v61  ;;  %15210 = vmatpush3.msra.mxu1 %v20108_v5 }
 0x511   : > { %15168 = vmatprep.subr.mxu0 %v25039_v43  ;;  %15211 = vmatprep.subr.mxu1 %v25039_v43 }
 0x512   : > { %15169 = vmatpush3.msra.mxu0 %v20079_v58  ;;  %15212 = vmatpush3.msra.mxu1 %v20121_v56 }
 0x513   : > { %15170 = vmatprep.subr.mxu0 %v25039_v43  ;;  %15213 = vmatprep.subr.mxu1 %v25039_v43 }
 0x514   : > { %15171 = vmatpush3.msra.mxu0 %v20096_v41  ;;  %15214 = vmatpush3.msra.mxu1 %v20139_v22 }
 0x515   : > { %15172 = vmatprep.subr.mxu0 %v25039_v43  ;;  %15215 = vmatprep.subr.mxu1 %v25039_v43 }
 0x516   : > { %15173 = vmatpush3.msra.mxu0 %v20106_v11  ;;  %15216 = vmatpush3.msra.mxu1 %v20155_v8 }
 0x517   : > { %15174 = vmatprep.subr.mxu0 %v25039_v43  ;;  %15218 = vmatmul.mubr.f32.vlgmr.msra.gmra.mxu1 %v20199_v27 }
 0x518   : > { %15255 = vmatprep.subr.mxu1 %v25039_v43  ;;  %15175 = vmatpush3.msra.mxu0 %v20119_v29 }
 0x519   : > { %15256 = vmatpush3.msra.mxu1 %v19950_v57  ;;  %15176 = vmatprep.subr.mxu0 %v25039_v43 }
 0x51a   : > { %15257 = vmatprep.subr.mxu1 %v25039_v43  ;;  %15177 = vmatpush3.msra.mxu0 %v20137_v60 }
 0x51b   : > { %15258 = vmatpush3.msra.mxu1 %v19952_v3  ;;  %15178 = vmatprep.subr.mxu0 %v25039_v43  ;;  %v12333_v3 = vld [vmem:[%s24261_s2 + $0xd8] sm:$0xff] }
 0x51c   : > { %15259 = vmatprep.subr.mxu1 %v25039_v43  ;;  %15179 = vmatpush3.msra.mxu0 %v20152_v59 }
 0x51d   : > { %15260 = vmatpush3.msra.mxu1 %v19954_v39  ;;  %15180 = vmatprep.subr.mxu0 %v25039_v43  ;;  %v3718_v39 = vand.u32 4294901760, %v20324_v34 }
 0x51e   : > { %15261 = vmatprep.subr.mxu1 %v25039_v43  ;;  %15181 = vmatpush3.msra.mxu0 %v20165_v24 }
 0x51f   : > { %15182 = vmatprep.mubr.msk.f32.mxu0 %vm18151_vm0, %v25039_v43  ;;  %15262 = vmatpush3.msra.mxu1 %v19965_v6  ;;  %v20348_v6 = vsub.f32 %v12335_v13, %v20326_v48  ;;  %v3719_v45 = vsub.f32 %v20324_v34, %v3718_v39  ;;  %v25208_v13 = vand.u32 4294901760, %v20119_v29 }
 0x520   : > { %15183 = vmatmul.mubr.f32.vlgmr.msra.gmra.mxu0 %v20191_v50  ;;  %15220 = vmatprep.subr.mxu0 %v25039_v43 }
 0x521   : > { %15263 = vmatprep.subr.mxu1 %v25039_v43  ;;  %15221 = vmatpush3.msra.mxu0 %v25196_v16  ;;  %v3732_v40 = vand.u32 4294901760, %v20348_v6  ;;  %v3720_v36 = vand.u32 4294901760, %v3719_v45 }
 0x522   : > { %15264 = vmatpush3.msra.mxu1 %v19967_v52  ;;  %15222 = vmatprep.subr.mxu0 %v25039_v43  ;;  %v20334_v52 = vsub.f32 %v12336_v9, %v20313_v14 }
 0x523   : > { %15265 = vmatprep.subr.mxu1 %v25039_v43  ;;  %15223 = vmatpush3.msra.mxu0 %v25197_v62  ;;  %v3733_v16 = vsub.f32 %v20348_v6, %v3732_v40 }
 0x524   : > { %15266 = vmatpush3.msra.mxu1 %v19969_v42  ;;  %15224 = vmatprep.subr.mxu0 %v25039_v43  ;;  %v25202_v42 = vand.u32 4294901760, %v20037_v32  ;;  %v25204_v32 = vand.u32 4294901760, %v20064_v61  ;;  %v25205_v61 = vand.u32 4294901760, %v20079_v58  ;;  %v25206_v58 = vand.u32 4294901760, %v20096_v41 }
 0x525   : > { %15267 = vmatprep.subr.mxu1 %v25039_v43  ;;  %15225 = vmatpush3.msra.mxu0 %v25198_v37  ;;  %v25207_v41 = vand.u32 4294901760, %v20106_v11 }
 0x526   : > { %15268 = vmatpush3.msra.mxu1 %v20029_v35  ;;  %15226 = vmatprep.subr.mxu0 %v25039_v43  ;;  %v20355_v35 = vand.u32 4294901760, %v12333_v3 }
 0x527   : > { %15269 = vmatprep.subr.mxu1 %v25039_v43  ;;  %15227 = vmatpush3.msra.mxu0 %v25199_v63  ;;  %v20429_v63 = vsub.f32 %v12330_v10, %v20395_v15 }
 0x528   : > { %15270 = vmatpush3.msra.mxu1 %v20039_v47  ;;  %15228 = vmatprep.subr.mxu0 %v25039_v43  ;;  %v12334_v47 = vld [vmem:[%s24261_s2 + $0xe0] sm:$0xff]  ;;  %v20386_v30 = vsub.f32 %v12333_v3, %v20355_v35 }
 0x529   : > { %15271 = vmatprep.subr.mxu1 %v25039_v43  ;;  %15229 = vmatpush3.msra.mxu0 %v25200_v7  ;;  %v20336_v57 = vand.u32 4294901760, %v12334_v47  ;;  %v12326_v3 = vld [vmem:[%s24261_s2 + $0xa0] sm:$0xff]  ;;  %v24786_v10 = vand.u32 4294901760, %v20429_v63 }
 0x52a   : > { %15272 = vmatpush3.msra.mxu1 %v20051_v53  ;;  %15230 = vmatprep.subr.mxu0 %v25039_v43  ;;  %v3725_v53 = vand.u32 4294901760, %v20334_v52  ;;  %v3746_v11 = vand.u32 4294901760, %v20386_v30 }
 0x52b   : > { %15273 = vmatprep.subr.mxu1 %v25039_v43  ;;  %15231 = vmatpush3.msra.mxu0 %v25201_v26  ;;  %v3734_v26 = vand.u32 4294901760, %v3733_v16 }
 0x52c   : > { %15274 = vmatpush3.msra.mxu1 %v20066_v2  ;;  %15232 = vmatprep.subr.mxu0 %v25039_v43  ;;  %v25203_v2 = vand.u32 4294901760, %v20049_v28  ;;  %v12331_v28 = vld [vmem:[%s24261_s2 + $0xc8] sm:$0xff]  ;;  %v3726_v51 = vsub.f32 %v20334_v52, %v3725_v53  ;;  %v3747_v29 = vsub.f32 %v20386_v30, %v3746_v11 }
 0x52d   : > { %15275 = vmatprep.subr.mxu1 %v25039_v43  ;;  %15233 = vmatpush3.msra.mxu0 %v25202_v42 }
 0x52e   : > { %15276 = vmatpush3.msra.mxu1 %v20082_v55  ;;  %15234 = vmatprep.subr.mxu0 %v25039_v43  ;;  %v20365_v55 = vsub.f32 %v12334_v47, %v20336_v57  ;;  %v3727_v37 = vand.u32 4294901760, %v3726_v51  ;;  %v20470_v51 = vand.u32 4294901760, %v12326_v3 }
 0x52f   : > { %15277 = vmatprep.subr.mxu1 %v25039_v43  ;;  %15235 = vmatpush3.msra.mxu0 %v25203_v2  ;;  %v25209_v2 = vand.u32 4294901760, %v20137_v60  ;;  %v12325_v60 = vld [vmem:[%s24261_s2 + $0x98] sm:$0xff] }
 0x530   : > { %15278 = vmatpush3.msra.mxu1 %v20092_v21  ;;  %15236 = vmatprep.subr.mxu0 %v25039_v43  ;;  %v20369_v21 = vand.u32 4294901760, %v12332_v0  ;;  %v3739_v4 = vand.u32 4294901760, %v20365_v55 }
 0x531   : > { %15279 = vmatprep.subr.mxu1 %v25039_v43  ;;  %15237 = vmatpush3.msra.mxu0 %v25204_v32 }
 0x532   : > { %15280 = vmatpush3.msra.mxu1 %v20108_v5  ;;  %15238 = vmatprep.subr.mxu0 %v25039_v43  ;;  %v20381_v5 = vand.u32 4294901760, %v12331_v28  ;;  %v20403_v17 = vsub.f32 %v12332_v0, %v20369_v21  ;;  %v3740_v9 = vsub.f32 %v20365_v55, %v3739_v4 }
 0x533   : > { %15281 = vmatprep.subr.mxu1 %v25039_v43  ;;  %15239 = vmatpush3.msra.mxu0 %v25205_v61  ;;  %v25210_v61 = vand.u32 4294901760, %v20152_v59  ;;  %v12324_v59 = vld [vmem:[%s24261_s2 + $0x90] sm:$0xff] }
 0x534   : > { %15282 = vmatpush3.msra.mxu1 %v20121_v56  ;;  %15240 = vmatprep.subr.mxu0 %v25039_v43  ;;  %v12329_v56 = vld [vmem:[%s24261_s2 + $0xb8] sm:$0xff]  ;;  %v20412_v62 = vsub.f32 %v12331_v28, %v20381_v5  ;;  %v3753_v7 = vand.u32 4294901760, %v20403_v17  ;;  %v3741_v32 = vand.u32 4294901760, %v3740_v9  ;;  %v3768_v9 = vsub.f32 %v20429_v63, %v24786_v10 }
 0x535   : > { %15283 = vmatprep.subr.mxu1 %v25039_v43  ;;  %15241 = vmatpush3.msra.mxu0 %v25206_v58  ;;  %v20421_v19 = vand.u32 4294901760, %v12329_v56 }
 0x536   : > { %15284 = vmatpush3.msra.mxu1 %v20139_v22  ;;  %15242 = vmatprep.subr.mxu0 %v25039_v43  ;;  %v12328_v22 = vld [vmem:[%s24261_s2 + $0xb0] sm:$0xff]  ;;  %v24788_v42 = vand.u32 4294901760, %v20412_v62  ;;  %v3754_v45 = vsub.f32 %v20403_v17, %v3753_v7 }
 0x537   : > { %15285 = vmatprep.subr.mxu1 %v25039_v43  ;;  %15243 = vmatpush3.msra.mxu0 %v25207_v41  ;;  %v20438_v47 = vand.u32 4294901760, %v12328_v22  ;;  %v20452_v0 = vsub.f32 %v12329_v56, %v20421_v19  ;;  %v25211_v41 = vand.u32 4294901760, %v20165_v24  ;;  %v12323_v24 = vld [vmem:[%s24261_s2 + $0x88] sm:$0xff] }
 0x538   : > { %15286 = vmatpush3.msra.mxu1 %v20155_v8  ;;  %15287 = vmatprep.mubr.msk.f32.mxu1 %vm18151_vm0, %v25039_v43  ;;  %v12327_v8 = vld [vmem:[%s24261_s2 + $0xa8] sm:$0xff]  ;;  %v3761_v56 = vsub.f32 %v20412_v62, %v24788_v42 }
 0x539   : > { %15244 = vmatprep.subr.mxu0 %v25039_v43  ;;  %15288 = vmatmul.mubr.f32.vlgmr.msra.gmra.mxu1 %v20187_v12  ;;  %v20454_v28 = vand.u32 4294901760, %v12327_v8  ;;  %v20468_v58 = vsub.f32 %v12328_v22, %v20438_v47  ;;  %v24785_v16 = vand.u32 4294901760, %v20452_v0 }
 0x53a   : > { %15325 = vmatprep.subr.mxu1 %v25039_v43  ;;  %15245 = vmatpush3.msra.mxu0 %v25208_v13 }
 0x53b   : > { %15326 = vmatpush3.msra.mxu1 %v3720_v36  ;;  %15246 = vmatprep.subr.mxu0 %v25039_v43  ;;  %v3748_v36 = vand.u32 4294901760, %v3747_v29  ;;  %v20484_v22 = vsub.f32 %v12327_v8, %v20454_v28  ;;  %v3755_v8 = vand.u32 4294901760, %v3754_v45  ;;  %v24787_v13 = vand.u32 4294901760, %v20468_v58 }
 0x53c   : > { %15327 = vmatprep.subr.mxu1 %v25039_v43  ;;  %15247 = vmatpush3.msra.mxu0 %v25209_v2  ;;  %v20502_v2 = vand.u32 4294901760, %v12324_v59  ;;  %v3762_v29 = vand.u32 4294901760, %v3761_v56  ;;  %v3769_v56 = vand.u32 4294901760, %v3768_v9 }
 0x53d   : > { %15328 = vmatpush3.msra.mxu1 %v3727_v37  ;;  %15248 = vmatprep.subr.mxu0 %v25039_v43  ;;  %v20486_v37 = vand.u32 4294901760, %v12325_v60 }
 0x53e   : > { %15329 = vmatprep.subr.mxu1 %v25039_v43  ;;  %15249 = vmatpush3.msra.mxu0 %v25210_v61  ;;  %v3775_v61 = vsub.f32 %v20452_v0, %v24785_v16  ;;  %v20527_v10 = vsub.f32 %v12324_v59, %v20502_v2 }
 0x53f   : > { %15330 = vmatpush3.msra.mxu1 %v3734_v26  ;;  %15250 = vmatprep.subr.mxu0 %v25039_v43  ;;  %v20500_v26 = vsub.f32 %v12326_v3, %v20470_v51  ;;  %v24789_v3 = vand.u32 4294901760, %v20484_v22  ;;  %v20515_v45 = vsub.f32 %v12325_v60, %v20486_v37 }
 0x540   : > { %15331 = vmatprep.subr.mxu1 %v25039_v43  ;;  %15251 = vmatpush3.msra.mxu0 %v25211_v41  ;;  %v20517_v41 = vand.u32 4294901760, %v12323_v24  ;;  %v3776_v9 = vand.u32 4294901760, %v3775_v61  ;;  %v24791_v61 = vand.u32 4294901760, %v20527_v10 }
 0x541   : > { %15252 = vmatprep.mubr.msk.f32.mxu0 %vm18151_vm0, %v25039_v43  ;;  %15332 = vmatpush3.msra.mxu1 %v3741_v32  ;;  %v12322_v32 = vld [vmem:[%s24261_s2 + $0x80] sm:$0xff]  ;;  %v3795_v16 = vand.u32 4294901760, %v20500_v26 }
 0x542   : > { %15253 = vmatmul.mubr.f32.vlgmr.msra.gmra.mxu0 %v20187_v12  ;;  %15290 = vmatprep.subr.mxu0 %v25039_v43  ;;  %v20529_v60 = vand.u32 4294901760, %v12322_v32  ;;  %v20539_v42 = vsub.f32 %v12323_v24, %v20517_v41 }
 0x543   : > { %15333 = vmatprep.subr.mxu1 %v25039_v43  ;;  %15291 = vmatpush3.msra.mxu0 %v20303_v33 }
 0x544   : > { %15334 = vmatpush3.msra.mxu1 %v3748_v36  ;;  %15292 = vmatprep.subr.mxu0 %v25039_v43  ;;  %v3782_v36 = vsub.f32 %v20468_v58, %v24787_v13  ;;  %v24790_v13 = vand.u32 4294901760, %v20515_v45 }
 0x545   : > { %15335 = vmatprep.subr.mxu1 %v25039_v43  ;;  %15293 = vmatpush3.msra.mxu0 %v20313_v14 }
 0x546   : > { %15336 = vmatpush3.msra.mxu1 %v3755_v8  ;;  %15294 = vmatprep.subr.mxu0 %v25039_v43  ;;  %v3789_v8 = vsub.f32 %v20484_v22, %v24789_v3  ;;  %v3783_v59 = vand.u32 4294901760, %v3782_v36  ;;  %v20549_v3 = vsub.f32 %v12322_v32, %v20529_v60  ;;  %v3816_v36 = vand.u32 4294901760, %v20539_v42 }
 0x547   : > { %15337 = vmatprep.subr.mxu1 %v25039_v43  ;;  %15295 = vmatpush3.msra.mxu0 %v20326_v48 }
 0x548   : > { %15338 = vmatpush3.msra.mxu1 %v3762_v29  ;;  %15296 = vmatprep.subr.mxu0 %v25039_v43  ;;  %v3796_v29 = vsub.f32 %v20500_v26, %v3795_v16  ;;  %v3790_v24 = vand.u32 4294901760, %v3789_v8  ;;  %v3823_v8 = vand.u32 4294901760, %v20549_v3 }
 0x549   : > { %15339 = vmatprep.subr.mxu1 %v25039_v43  ;;  %15297 = vmatpush3.msra.mxu0 %v20336_v57 }
 0x54a   : > { %15340 = vmatpush3.msra.mxu1 %v3769_v56  ;;  %15298 = vmatprep.subr.mxu0 %v25039_v43  ;;  %v3803_v56 = vsub.f32 %v20515_v45, %v24790_v13  ;;  %v3797_v32 = vand.u32 4294901760, %v3796_v29 }
 0x54b   : > { %15341 = vmatprep.subr.mxu1 %v25039_v43  ;;  %15299 = vmatpush3.msra.mxu0 %v20355_v35 }
 0x54c   : > { %15342 = vmatpush3.msra.mxu1 %v3776_v9  ;;  %15300 = vmatprep.subr.mxu0 %v25039_v43  ;;  %v3810_v9 = vsub.f32 %v20527_v10, %v24791_v61  ;;  %v3804_v13 = vand.u32 4294901760, %v3803_v56  ;;  %v3824_v61 = vsub.f32 %v20549_v3, %v3823_v8 }
 0x54d   : > { %15343 = vmatprep.subr.mxu1 %v25039_v43  ;;  %15301 = vmatpush3.msra.mxu0 %v20369_v21 }
 0x54e   : > { %15344 = vmatpush3.msra.mxu1 %v3783_v59  ;;  %15302 = vmatprep.subr.mxu0 %v25039_v43  ;;  %v3817_v59 = vsub.f32 %v20539_v42, %v3816_v36  ;;  %v3811_v29 = vand.u32 4294901760, %v3810_v9  ;;  %v3825_v56 = vand.u32 4294901760, %v3824_v61 }
 0x54f   : > { %15345 = vmatprep.subr.mxu1 %v25039_v43  ;;  %15303 = vmatpush3.msra.mxu0 %v20381_v5 }
 0x550   : > { %15346 = vmatpush3.msra.mxu1 %v3790_v24  ;;  %15304 = vmatprep.subr.mxu0 %v25039_v43  ;;  %v3818_v24 = vand.u32 4294901760, %v3817_v59 }
 0x551   : > { %15347 = vmatprep.subr.mxu1 %v25039_v43  ;;  %15305 = vmatpush3.msra.mxu0 %v20395_v15 }
 0x552   : > { %15348 = vmatpush3.msra.mxu1 %v3797_v32  ;;  %15306 = vmatprep.subr.mxu0 %v25039_v43 }
 0x553   : > { %15349 = vmatprep.subr.mxu1 %v25039_v43  ;;  %15307 = vmatpush3.msra.mxu0 %v20421_v19 }
 0x554   : > { %15350 = vmatpush3.msra.mxu1 %v3804_v13  ;;  %15308 = vmatprep.subr.mxu0 %v25039_v43 }
 0x555   : > { %15351 = vmatprep.subr.mxu1 %v25039_v43  ;;  %15309 = vmatpush3.msra.mxu0 %v20438_v47 }
 0x556   : > { %15352 = vmatpush3.msra.mxu1 %v3811_v29  ;;  %15310 = vmatprep.subr.mxu0 %v25039_v43 }
 0x557   : > { %15353 = vmatprep.subr.mxu1 %v25039_v43  ;;  %15311 = vmatpush3.msra.mxu0 %v20454_v28 }
 0x558   : > { %15354 = vmatpush3.msra.mxu1 %v3818_v24  ;;  %15312 = vmatprep.subr.mxu0 %v25039_v43 }
 0x559   : > { %15355 = vmatprep.subr.mxu1 %v25039_v43  ;;  %15313 = vmatpush3.msra.mxu0 %v20470_v51 }
 0x55a   : > { %15356 = vmatpush3.msra.mxu1 %v3825_v56  ;;  %15357 = vmatprep.mubr.msk.f32.mxu1 %vm18151_vm0, %v25039_v43 }
 0x55b   : > { %15314 = vmatprep.subr.mxu0 %v25039_v43  ;;  %15358 = vmatmul.mubr.f32.vlgmr.msra.gmra.mxu1 %v20187_v12 }
 0x55c   : > { %15395 = vmatprep.subr.mxu1 %v25039_v43  ;;  %15315 = vmatpush3.msra.mxu0 %v20486_v37 }
 0x55d   : > { %15396 = vmatpush3.msra.mxu1 %v20303_v33  ;;  %15316 = vmatprep.subr.mxu0 %v25039_v43 }
 0x55e   : > { %15397 = vmatprep.subr.mxu1 %v25039_v43  ;;  %15317 = vmatpush3.msra.mxu0 %v20502_v2 }
 0x55f   : > { %15398 = vmatpush3.msra.mxu1 %v20313_v14  ;;  %15318 = vmatprep.subr.mxu0 %v25039_v43 }
 0x560   : > { %15399 = vmatprep.subr.mxu1 %v25039_v43  ;;  %15319 = vmatpush3.msra.mxu0 %v20517_v41 }
 0x561   : > { %15400 = vmatpush3.msra.mxu1 %v20326_v48  ;;  %15320 = vmatprep.subr.mxu0 %v25039_v43 }
 0x562   : > { %15401 = vmatprep.subr.mxu1 %v25039_v43  ;;  %15321 = vmatpush3.msra.mxu0 %v20529_v60 }
 0x563   : > { %15322 = vmatprep.mubr.msk.f32.mxu0 %vm18151_vm0, %v25039_v43  ;;  %15402 = vmatpush3.msra.mxu1 %v20336_v57 }
 0x564   : > { %15323 = vmatmul.mubr.f32.vlgmr.msra.gmra.mxu0 %v20207_v38  ;;  %15360 = vmatprep.subr.mxu0 %v25039_v43 }
 0x565   : > { %15403 = vmatprep.subr.mxu1 %v25039_v43  ;;  %15361 = vmatpush3.msra.mxu0 %v20324_v34 }
 0x566   : > { %15404 = vmatpush3.msra.mxu1 %v20355_v35  ;;  %15362 = vmatprep.subr.mxu0 %v25039_v43 }
 0x567   : > { %15405 = vmatprep.subr.mxu1 %v25039_v43  ;;  %15363 = vmatpush3.msra.mxu0 %v20334_v52 }
 0x568   : > { %15406 = vmatpush3.msra.mxu1 %v20369_v21  ;;  %15364 = vmatprep.subr.mxu0 %v25039_v43 }
 0x569   : > { %15407 = vmatprep.subr.mxu1 %v25039_v43  ;;  %15365 = vmatpush3.msra.mxu0 %v20348_v6 }
 0x56a   : > { %15408 = vmatpush3.msra.mxu1 %v20381_v5  ;;  %15366 = vmatprep.subr.mxu0 %v25039_v43 }
 0x56b   : > { %15409 = vmatprep.subr.mxu1 %v25039_v43  ;;  %15367 = vmatpush3.msra.mxu0 %v20365_v55 }
 0x56c   : > { %15410 = vmatpush3.msra.mxu1 %v20395_v15  ;;  %15368 = vmatprep.subr.mxu0 %v25039_v43 }
 0x56d   : > { %15411 = vmatprep.subr.mxu1 %v25039_v43  ;;  %15369 = vmatpush3.msra.mxu0 %v20386_v30 }
 0x56e   : > { %15412 = vmatpush3.msra.mxu1 %v20421_v19  ;;  %15370 = vmatprep.subr.mxu0 %v25039_v43 }
 0x56f   : > { %15413 = vmatprep.subr.mxu1 %v25039_v43  ;;  %15371 = vmatpush3.msra.mxu0 %v20403_v17  ;;  %v12347_v17 = vld [vmem:[%s24261_s2 + $0x148] sm:$0xff] }
 0x570   : > { %15414 = vmatpush3.msra.mxu1 %v20438_v47  ;;  %15372 = vmatprep.subr.mxu0 %v25039_v43 }
 0x571   : > { %15415 = vmatprep.subr.mxu1 %v25039_v43  ;;  %15373 = vmatpush3.msra.mxu0 %v20412_v62 }
 0x572   : > { %15416 = vmatpush3.msra.mxu1 %v20454_v28  ;;  %15374 = vmatprep.subr.mxu0 %v25039_v43 }
 0x573   : > { %15417 = vmatprep.subr.mxu1 %v25039_v43  ;;  %15375 = vmatpush3.msra.mxu0 %v20429_v63 }
 0x574   : > { %15418 = vmatpush3.msra.mxu1 %v20470_v51  ;;  %15376 = vmatprep.subr.mxu0 %v25039_v43 }
 0x575   : > { %15419 = vmatprep.subr.mxu1 %v25039_v43  ;;  %15377 = vmatpush3.msra.mxu0 %v20452_v0 }
 0x576   : > { %15420 = vmatpush3.msra.mxu1 %v20486_v37  ;;  %15378 = vmatprep.subr.mxu0 %v25039_v43 }
 0x577   : > { %15421 = vmatprep.subr.mxu1 %v25039_v43  ;;  %15379 = vmatpush3.msra.mxu0 %v20468_v58 }
 0x578   : > { %15422 = vmatpush3.msra.mxu1 %v20502_v2  ;;  %15380 = vmatprep.subr.mxu0 %v25039_v43 }
 0x579   : > { %15423 = vmatprep.subr.mxu1 %v25039_v43  ;;  %15381 = vmatpush3.msra.mxu0 %v20484_v22 }
 0x57a   : > { %15424 = vmatpush3.msra.mxu1 %v20517_v41  ;;  %15382 = vmatprep.subr.mxu0 %v25039_v43 }
 0x57b   : > { %15425 = vmatprep.subr.mxu1 %v25039_v43  ;;  %15383 = vmatpush3.msra.mxu0 %v20500_v26 }
 0x57c   : > { %15426 = vmatpush3.msra.mxu1 %v20529_v60  ;;  %15427 = vmatprep.mubr.msk.f32.mxu1 %vm18151_vm0, %v25039_v43 }
 0x57d   : > { %15384 = vmatprep.subr.mxu0 %v25039_v43  ;;  %15428 = vmatmul.mubr.f32.vlgmr.msra.gmra.mxu1 %v20199_v27 }
 0x57e   : > { %15465 = vmatprep.subr.mxu1 %v25039_v43  ;;  %15385 = vmatpush3.msra.mxu0 %v20515_v45 }
 0x57f   : > { %15466 = vmatpush3.msra.mxu1 %v20303_v33  ;;  %15386 = vmatprep.subr.mxu0 %v25039_v43  ;;  %v12353_v33 = vld [vmem:[%s24261_s2 + $0x178] sm:$0xff] }
 0x580   : > { %15467 = vmatprep.subr.mxu1 %v25039_v43  ;;  %15387 = vmatpush3.msra.mxu0 %v20527_v10  ;;  %v20705_v34 = vand.u32 4294901760, %v12353_v33 }
 0x581   : > { %15468 = vmatpush3.msra.mxu1 %v20313_v14  ;;  %15388 = vmatprep.subr.mxu0 %v25039_v43  ;;  %v12352_v14 = vld [vmem:[%s24261_s2 + $0x170] sm:$0xff] }
 0x582   : > { %15469 = vmatprep.subr.mxu1 %v25039_v43  ;;  %15389 = vmatpush3.msra.mxu0 %v20539_v42  ;;  %v20715_v52 = vand.u32 4294901760, %v12352_v14  ;;  %v12340_v42 = vld [vmem:[%s24261_s2 + $0x110] sm:$0xff] }
 0x583   : > { %15470 = vmatpush3.msra.mxu1 %v20326_v48  ;;  %15390 = vmatprep.subr.mxu0 %v25039_v43  ;;  %v12351_v48 = vld [vmem:[%s24261_s2 + $0x168] sm:$0xff] }
 0x584   : > { %15471 = vmatprep.subr.mxu1 %v25039_v43  ;;  %15391 = vmatpush3.msra.mxu0 %v20549_v3  ;;  %v20728_v6 = vand.u32 4294901760, %v12351_v48  ;;  %v12339_v3 = vld [vmem:[%s24261_s2 + $0x108] sm:$0xff] }
 0x585   : > { %15392 = vmatprep.mubr.msk.f32.mxu0 %vm18151_vm0, %v25039_v43  ;;  %15472 = vmatpush3.msra.mxu1 %v20336_v57  ;;  %v12350_v57 = vld [vmem:[%s24261_s2 + $0x160] sm:$0xff] }
 0x586   : > { %15393 = vmatmul.mubr.f32.vlgmr.msra.gmra.mxu0 %v20191_v50  ;;  %15430 = vmatprep.subr.mxu0 %v25039_v43  ;;  %v20738_v55 = vand.u32 4294901760, %v12350_v57  ;;  %v20750_v30 = vsub.f32 %v12351_v48, %v20728_v6 }
 0x587   : > { %15473 = vmatprep.subr.mxu1 %v25039_v43  ;;  %15431 = vmatpush3.msra.mxu0 %v3718_v39  ;;  %v20726_v39 = vsub.f32 %v12353_v33, %v20705_v34 }
 0x588   : > { %15474 = vmatpush3.msra.mxu1 %v20355_v35  ;;  %15432 = vmatprep.subr.mxu0 %v25039_v43  ;;  %v25212_v35 = vand.u32 4294901760, %v20412_v62  ;;  %v25214_v62 = vand.u32 4294901760, %v20452_v0 }
 0x589   : > { %15475 = vmatprep.subr.mxu1 %v25039_v43  ;;  %15433 = vmatpush3.msra.mxu0 %v3725_v53  ;;  %v20736_v53 = vsub.f32 %v12352_v14, %v20715_v52  ;;  %v25217_v14 = vand.u32 4294901760, %v20515_v45 }
 0x58a   : > { %15476 = vmatpush3.msra.mxu1 %v20369_v21  ;;  %15434 = vmatprep.subr.mxu0 %v25039_v43  ;;  %v12349_v21 = vld [vmem:[%s24261_s2 + $0x158] sm:$0xff] }
 0x58b   : > { %15477 = vmatprep.subr.mxu1 %v25039_v43  ;;  %15435 = vmatpush3.msra.mxu0 %v3732_v40  ;;  %v25213_v40 = vand.u32 4294901760, %v20429_v63 }
 0x58c   : > { %15478 = vmatpush3.msra.mxu1 %v20381_v5  ;;  %15436 = vmatprep.subr.mxu0 %v25039_v43  ;;  %v4382_v5 = vand.u32 4294901760, %v20726_v39 }
 0x58d   : > { %15479 = vmatprep.subr.mxu1 %v25039_v43  ;;  %15437 = vmatpush3.msra.mxu0 %v3739_v4  ;;  %v12348_v4 = vld [vmem:[%s24261_s2 + $0x150] sm:$0xff] }
 0x58e   : > { %15480 = vmatpush3.msra.mxu1 %v20395_v15  ;;  %15438 = vmatprep.subr.mxu0 %v25039_v43  ;;  %v20757_v15 = vand.u32 4294901760, %v12349_v21  ;;  %v20771_v63 = vand.u32 4294901760, %v12348_v4  ;;  %v4383_v0 = vsub.f32 %v20726_v39, %v4382_v5 }
 0x58f   : > { %15481 = vmatprep.subr.mxu1 %v25039_v43  ;;  %15439 = vmatpush3.msra.mxu0 %v3746_v11  ;;  %v4389_v11 = vand.u32 4294901760, %v20736_v53 }
 0x590   : > { %15482 = vmatpush3.msra.mxu1 %v20421_v19  ;;  %15440 = vmatprep.subr.mxu0 %v25039_v43  ;;  %v20767_v19 = vsub.f32 %v12350_v57, %v20738_v55  ;;  %v20805_v9 = vsub.f32 %v12348_v4, %v20771_v63  ;;  %v25218_v4 = vand.u32 4294901760, %v20527_v10  ;;  %v12341_v10 = vld [vmem:[%s24261_s2 + $0x118] sm:$0xff] }
 0x591   : > { %15483 = vmatprep.subr.mxu1 %v25039_v43  ;;  %15441 = vmatpush3.msra.mxu0 %v3753_v7  ;;  %v12346_v7 = vld [vmem:[%s24261_s2 + $0x140] sm:$0xff]  ;;  %v4390_v13 = vsub.f32 %v20736_v53, %v4389_v11 }
 0x592   : > { %15484 = vmatpush3.msra.mxu1 %v20438_v47  ;;  %15442 = vmatprep.subr.mxu0 %v25039_v43  ;;  %v25215_v47 = vand.u32 4294901760, %v20468_v58  ;;  %v25216_v58 = vand.u32 4294901760, %v20484_v22  ;;  %v4403_v61 = vand.u32 4294901760, %v20767_v19  ;;  %v20797_v32 = vand.u32 4294901760, %v12346_v7 }
 0x593   : > { %15485 = vmatprep.subr.mxu1 %v25039_v43  ;;  %15443 = vmatpush3.msra.mxu0 %v25212_v35  ;;  %v4384_v22 = vand.u32 4294901760, %v4383_v0  ;;  %v4391_v24 = vand.u32 4294901760, %v4390_v13  ;;  %v4417_v48 = vand.u32 4294901760, %v20805_v9 }
 0x594   : > { %15486 = vmatpush3.msra.mxu1 %v20454_v28  ;;  %15444 = vmatprep.subr.mxu0 %v25039_v43  ;;  %v4396_v28 = vand.u32 4294901760, %v20750_v30  ;;  %v4404_v56 = vsub.f32 %v20767_v19, %v4403_v61  ;;  %v20831_v33 = vsub.f32 %v12346_v7, %v20797_v32 }
 0x595   : > { %15487 = vmatprep.subr.mxu1 %v25039_v43  ;;  %15445 = vmatpush3.msra.mxu0 %v25213_v40  ;;  %v12342_v40 = vld [vmem:[%s24261_s2 + $0x120] sm:$0xff]  ;;  %v4418_v0 = vsub.f32 %v20805_v9, %v4417_v48 }
 0x596   : > { %15488 = vmatpush3.msra.mxu1 %v20470_v51  ;;  %15446 = vmatprep.subr.mxu0 %v25039_v43  ;;  %v20783_v51 = vand.u32 4294901760, %v12347_v17  ;;  %v4397_v59 = vsub.f32 %v20750_v30, %v4396_v28  ;;  %v4405_v7 = vand.u32 4294901760, %v4404_v56  ;;  %v20872_v13 = vand.u32 4294901760, %v12342_v40 }
 0x597   : > { %15489 = vmatprep.subr.mxu1 %v25039_v43  ;;  %15447 = vmatpush3.msra.mxu0 %v25214_v62 }
 0x598   : > { %15490 = vmatpush3.msra.mxu1 %v20486_v37  ;;  %15448 = vmatprep.subr.mxu0 %v25039_v43  ;;  %v20788_v37 = vsub.f32 %v12349_v21, %v20757_v15  ;;  %v20814_v29 = vsub.f32 %v12347_v17, %v20783_v51  ;;  %v4398_v35 = vand.u32 4294901760, %v4397_v59 }
 0x599   : > { %15491 = vmatprep.subr.mxu1 %v25039_v43  ;;  %15449 = vmatpush3.msra.mxu0 %v25215_v47  ;;  %v24793_v47 = vand.u32 4294901760, %v20831_v33 }
 0x59a   : > { %15492 = vmatpush3.msra.mxu1 %v20502_v2  ;;  %15450 = vmatprep.subr.mxu0 %v25039_v43  ;;  %v12345_v2 = vld [vmem:[%s24261_s2 + $0x138] sm:$0xff]  ;;  %v4410_v26 = vand.u32 4294901760, %v20788_v37  ;;  %v24795_v21 = vand.u32 4294901760, %v20814_v29 }
 0x59b   : > { %15493 = vmatprep.subr.mxu1 %v25039_v43  ;;  %15451 = vmatpush3.msra.mxu0 %v25216_v58 }
 0x59c   : > { %15494 = vmatpush3.msra.mxu1 %v20517_v41  ;;  %15452 = vmatprep.subr.mxu0 %v25039_v43  ;;  %v12344_v41 = vld [vmem:[%s24261_s2 + $0x130] sm:$0xff]  ;;  %v4411_v45 = vsub.f32 %v20788_v37, %v4410_v26 }
 0x59d   : > { %15495 = vmatprep.subr.mxu1 %v25039_v43  ;;  %15453 = vmatpush3.msra.mxu0 %v3795_v16  ;;  %v20823_v16 = vand.u32 4294901760, %v12345_v2  ;;  %v20840_v57 = vand.u32 4294901760, %v12344_v41 }
 0x59e   : > { %15496 = vmatpush3.msra.mxu1 %v20529_v60  ;;  %15497 = vmatprep.mubr.msk.f32.mxu1 %vm18151_vm0, %v25039_v43  ;;  %v12343_v60 = vld [vmem:[%s24261_s2 + $0x128] sm:$0xff] }
 0x59f   : > { %15454 = vmatprep.subr.mxu0 %v25039_v43  ;;  %15498 = vmatmul.mubr.f32.vlgmr.msra.gmra.mxu1 %v20187_v12  ;;  %v20854_v17 = vsub.f32 %v12345_v2, %v20823_v16  ;;  %v20856_v62 = vand.u32 4294901760, %v12343_v60  ;;  %v20870_v58 = vsub.f32 %v12344_v41, %v20840_v57  ;;  %v4425_v2 = vsub.f32 %v20814_v29, %v24795_v21 }
 0x5a0   : > { %15535 = vmatprep.subr.mxu1 %v25039_v43  ;;  %15455 = vmatpush3.msra.mxu0 %v25217_v14  ;;  %v20888_v41 = vand.u32 4294901760, %v12341_v10  ;;  %v20904_v14 = vand.u32 4294901760, %v12340_v42 }
 0x5a1   : > { %15536 = vmatpush3.msra.mxu1 %v4384_v22  ;;  %15456 = vmatprep.subr.mxu0 %v25039_v43  ;;  %v24792_v22 = vand.u32 4294901760, %v20854_v17  ;;  %v20886_v59 = vsub.f32 %v12343_v60, %v20856_v62  ;;  %v24794_v56 = vand.u32 4294901760, %v20870_v58  ;;  %v20902_v60 = vsub.f32 %v12342_v40, %v20872_v13 }
 0x5a2   : > { %15537 = vmatprep.subr.mxu1 %v25039_v43  ;;  %15457 = vmatpush3.msra.mxu0 %v25218_v4  ;;  %v12338_v4 = vld [vmem:[%s24261_s2 + $0x100] sm:$0xff] }
 0x5a3   : > { %15538 = vmatpush3.msra.mxu1 %v4391_v24  ;;  %15458 = vmatprep.subr.mxu0 %v25039_v43  ;;  %v4432_v24 = vsub.f32 %v20831_v33, %v24793_v47  ;;  %v24796_v40 = vand.u32 4294901760, %v20886_v59  ;;  %v20929_v47 = vsub.f32 %v12340_v42, %v20904_v14 }
 0x5a4   : > { %15539 = vmatprep.subr.mxu1 %v25039_v43  ;;  %15459 = vmatpush3.msra.mxu0 %v3816_v36  ;;  %v4412_v36 = vand.u32 4294901760, %v4411_v45  ;;  %v4439_v45 = vsub.f32 %v20854_v17, %v24792_v22  ;;  %v4459_v22 = vand.u32 4294901760, %v20902_v60 }
 0x5a5   : > { %15540 = vmatpush3.msra.mxu1 %v4398_v35  ;;  %15460 = vmatprep.subr.mxu0 %v25039_v43  ;;  %v4426_v35 = vand.u32 4294901760, %v4425_v2  ;;  %v4433_v2 = vand.u32 4294901760, %v4432_v24 }
 0x5a6   : > { %15541 = vmatprep.subr.mxu1 %v25039_v43  ;;  %15461 = vmatpush3.msra.mxu0 %v3823_v8  ;;  %v4419_v8 = vand.u32 4294901760, %v4418_v0  ;;  %v20919_v0 = vand.u32 4294901760, %v12339_v3  ;;  %v4440_v24 = vand.u32 4294901760, %v4439_v45  ;;  %v24798_v45 = vand.u32 4294901760, %v20929_v47 }
 0x5a7   : > { %15462 = vmatprep.mubr.msk.f32.mxu0 %vm18151_vm0, %v25039_v43  ;;  %15542 = vmatpush3.msra.mxu1 %v4405_v7  ;;  %v20917_v7 = vsub.f32 %v12341_v10, %v20888_v41  ;;  %v20931_v10 = vand.u32 4294901760, %v12338_v4 }
 0x5a8   : > { %15463 = vmatmul.mubr.f32.vlgmr.msra.gmra.mxu0 %v20187_v12  ;;  %15500 = vmatprep.subr.mxu0 %v25039_v43  ;;  %v20941_v21 = vsub.f32 %v12339_v3, %v20919_v0 }
 0x5a9   : > { %15543 = vmatprep.subr.mxu1 %v25039_v43  ;;  %15501 = vmatpush3.msra.mxu0 %v20705_v34 }
 0x5aa   : > { %15544 = vmatpush3.msra.mxu1 %v4412_v36  ;;  %15502 = vmatprep.subr.mxu0 %v25039_v43  ;;  %v4446_v36 = vsub.f32 %v20870_v58, %v24794_v56  ;;  %v24797_v56 = vand.u32 4294901760, %v20917_v7 }
 0x5ab   : > { %15545 = vmatprep.subr.mxu1 %v25039_v43  ;;  %15503 = vmatpush3.msra.mxu0 %v20715_v52 }
 0x5ac   : > { %15546 = vmatpush3.msra.mxu1 %v4419_v8  ;;  %15504 = vmatprep.subr.mxu0 %v25039_v43  ;;  %v4453_v8 = vsub.f32 %v20886_v59, %v24796_v40  ;;  %v4447_v42 = vand.u32 4294901760, %v4446_v36  ;;  %v20951_v40 = vsub.f32 %v12338_v4, %v20931_v10  ;;  %v24799_v36 = vand.u32 4294901760, %v20941_v21 }
 0x5ad   : > { %15547 = vmatprep.subr.mxu1 %v25039_v43  ;;  %15505 = vmatpush3.msra.mxu0 %v20728_v6 }
 0x5ae   : > { %15548 = vmatpush3.msra.mxu1 %v4426_v35  ;;  %15506 = vmatprep.subr.mxu0 %v25039_v43  ;;  %v4460_v35 = vsub.f32 %v20902_v60, %v4459_v22  ;;  %v4454_v3 = vand.u32 4294901760, %v4453_v8  ;;  %v4487_v8 = vand.u32 4294901760, %v20951_v40 }
 0x5af   : > { %15549 = vmatprep.subr.mxu1 %v25039_v43  ;;  %15507 = vmatpush3.msra.mxu0 %v20738_v55 }
 0x5b0   : > { %15550 = vmatpush3.msra.mxu1 %v4433_v2  ;;  %15508 = vmatprep.subr.mxu0 %v25039_v43  ;;  %v4467_v2 = vsub.f32 %v20917_v7, %v24797_v56  ;;  %v4461_v4 = vand.u32 4294901760, %v4460_v35 }
 0x5b1   : > { %15551 = vmatprep.subr.mxu1 %v25039_v43  ;;  %15509 = vmatpush3.msra.mxu0 %v20757_v15 }
 0x5b2   : > { %15552 = vmatpush3.msra.mxu1 %v4440_v24  ;;  %15510 = vmatprep.subr.mxu0 %v25039_v43  ;;  %v4474_v24 = vsub.f32 %v20929_v47, %v24798_v45  ;;  %v4468_v56 = vand.u32 4294901760, %v4467_v2 }
 0x5b3   : > { %15553 = vmatprep.subr.mxu1 %v25039_v43  ;;  %15511 = vmatpush3.msra.mxu0 %v20771_v63 }
 0x5b4   : > { %15554 = vmatpush3.msra.mxu1 %v4447_v42  ;;  %15512 = vmatprep.subr.mxu0 %v25039_v43  ;;  %v4481_v42 = vsub.f32 %v20941_v21, %v24799_v36  ;;  %v4475_v45 = vand.u32 4294901760, %v4474_v24 }
 0x5b5   : > { %15555 = vmatprep.subr.mxu1 %v25039_v43  ;;  %15513 = vmatpush3.msra.mxu0 %v20783_v51 }
 0x5b6   : > { %15556 = vmatpush3.msra.mxu1 %v4454_v3  ;;  %15514 = vmatprep.subr.mxu0 %v25039_v43  ;;  %v4488_v3 = vsub.f32 %v20951_v40, %v4487_v8  ;;  %v4482_v36 = vand.u32 4294901760, %v4481_v42 }
 0x5b7   : > { %15557 = vmatprep.subr.mxu1 %v25039_v43  ;;  %15515 = vmatpush3.msra.mxu0 %v20797_v32  ;;  %v3196_v35 = vpop.f32.mrf.mxu1 }
 0x5b8   : > { %15558 = vmatpush3.msra.mxu1 %v4461_v4  ;;  %15516 = vmatprep.subr.mxu0 %v25039_v43  ;;  %v4489_v4 = vand.u32 4294901760, %v4488_v3 }
 0x5b9   : > { %15559 = vmatprep.subr.mxu1 %v25039_v43  ;;  %15517 = vmatpush3.msra.mxu0 %v20823_v16  ;;  %v15149_v2 = vpop.f32.mrf.mxu1 }
 0x5ba   : > { %15560 = vmatpush3.msra.mxu1 %v4468_v56  ;;  %15518 = vmatprep.subr.mxu0 %v25039_v43 }
 0x5bb   : > { %15561 = vmatprep.subr.mxu1 %v25039_v43  ;;  %15519 = vmatpush3.msra.mxu0 %v20840_v57 }
 0x5bc   : > { %15562 = vmatpush3.msra.mxu1 %v4475_v45  ;;  %15520 = vmatprep.subr.mxu0 %v25039_v43 }
 0x5bd   : > { %15563 = vmatprep.subr.mxu1 %v25039_v43  ;;  %15521 = vmatpush3.msra.mxu0 %v20856_v62 }
 0x5be   : > { %15564 = vmatpush3.msra.mxu1 %v4482_v36  ;;  %15522 = vmatprep.subr.mxu0 %v25039_v43 }
 0x5bf   : > { %15565 = vmatprep.subr.mxu1 %v25039_v43  ;;  %15523 = vmatpush3.msra.mxu0 %v20872_v13  ;;  %v3045_v56 = vpop.f32.mrf.mxu0 }
 0x5c0   : > { %15566 = vmatpush3.msra.mxu1 %v4489_v4  ;;  %15567 = vmatprep.mubr.msk.f32.mxu1 %vm18151_vm0, %v25039_v43  ;;  %v20992_v45 = vadd.f32 %v3196_v35, %v3045_v56 }
 0x5c1   : > { %15524 = vmatprep.subr.mxu0 %v25039_v43  ;;  %15568 = vmatmul.mubr.f32.vlgmr.msra.gmra.mxu1 %v20187_v12  ;;  %v15114_v24 = vpop.f32.mrf.mxu0 }
 0x5c2   : > { %15605 = vmatprep.subr.mxu1 %v25039_v43  ;;  %15525 = vmatpush3.msra.mxu0 %v20888_v41 }
 0x5c3   : > { %15606 = vmatpush3.msra.mxu1 %v20705_v34  ;;  %15526 = vmatprep.subr.mxu0 %v25039_v43 }
 0x5c4   : > { %15607 = vmatprep.subr.mxu1 %v25039_v43  ;;  %15527 = vmatpush3.msra.mxu0 %v20904_v14 }
 0x5c5   : > { %15608 = vmatpush3.msra.mxu1 %v20715_v52  ;;  %15528 = vmatprep.subr.mxu0 %v25039_v43 }
 0x5c6   : > { %15609 = vmatprep.subr.mxu1 %v25039_v43  ;;  %15529 = vmatpush3.msra.mxu0 %v20919_v0 }
 0x5c7   : > { %15610 = vmatpush3.msra.mxu1 %v20728_v6  ;;  %15530 = vmatprep.subr.mxu0 %v25039_v43 }
 0x5c8   : > { %15611 = vmatprep.subr.mxu1 %v25039_v43  ;;  %15531 = vmatpush3.msra.mxu0 %v20931_v10 }
 0x5c9   : > { %15532 = vmatprep.mubr.msk.f32.mxu0 %vm18151_vm0, %v25039_v43  ;;  %15612 = vmatpush3.msra.mxu1 %v20738_v55 }
 0x5ca   : > { %15533 = vmatmul.mubr.f32.vlgmr.msra.gmra.mxu0 %v20207_v38  ;;  %15570 = vmatprep.subr.mxu0 %v25039_v43 }
 0x5cb   : > { %15613 = vmatprep.subr.mxu1 %v25039_v43  ;;  %15571 = vmatpush3.msra.mxu0 %v20726_v39 }
 0x5cc   : > { %15614 = vmatpush3.msra.mxu1 %v20757_v15  ;;  %15572 = vmatprep.subr.mxu0 %v25039_v43 }
 0x5cd   : > { %15615 = vmatprep.subr.mxu1 %v25039_v43  ;;  %15573 = vmatpush3.msra.mxu0 %v20736_v53 }
 0x5ce   : > { %15616 = vmatpush3.msra.mxu1 %v20771_v63  ;;  %15574 = vmatprep.subr.mxu0 %v25039_v43 }
 0x5cf   : > { %15617 = vmatprep.subr.mxu1 %v25039_v43  ;;  %15575 = vmatpush3.msra.mxu0 %v20750_v30 }
 0x5d0   : > { %15618 = vmatpush3.msra.mxu1 %v20783_v51  ;;  %15576 = vmatprep.subr.mxu0 %v25039_v43 }
 0x5d1   : > { %15619 = vmatprep.subr.mxu1 %v25039_v43  ;;  %15577 = vmatpush3.msra.mxu0 %v20767_v19 }
 0x5d2   : > { %15620 = vmatpush3.msra.mxu1 %v20797_v32  ;;  %15578 = vmatprep.subr.mxu0 %v25039_v43 }
 0x5d3   : > { %15621 = vmatprep.subr.mxu1 %v25039_v43  ;;  %15579 = vmatpush3.msra.mxu0 %v20788_v37 }
 0x5d4   : > { %15622 = vmatpush3.msra.mxu1 %v20823_v16  ;;  %15580 = vmatprep.subr.mxu0 %v25039_v43 }
 0x5d5   : > { %15623 = vmatprep.subr.mxu1 %v25039_v43  ;;  %15581 = vmatpush3.msra.mxu0 %v20805_v9  ;;  %v12364_v9 = vld [vmem:[%s24261_s2 + $0x1d0] sm:$0xff] }
 0x5d6   : > { %15624 = vmatpush3.msra.mxu1 %v20840_v57  ;;  %15582 = vmatprep.subr.mxu0 %v25039_v43 }
 0x5d7   : > { %15625 = vmatprep.subr.mxu1 %v25039_v43  ;;  %15583 = vmatpush3.msra.mxu0 %v20814_v29  ;;  %v3389_v36 = vpop.f32.mrf.mxu1 }
 0x5d8   : > { %15626 = vmatpush3.msra.mxu1 %v20856_v62  ;;  %15584 = vmatprep.subr.mxu0 %v25039_v43 }
 0x5d9   : > { %15627 = vmatprep.subr.mxu1 %v25039_v43  ;;  %15585 = vmatpush3.msra.mxu0 %v20831_v33  ;;  %v15219_v42 = vpop.f32.mrf.mxu1 }
 0x5da   : > { %15628 = vmatpush3.msra.mxu1 %v20872_v13  ;;  %15586 = vmatprep.subr.mxu0 %v25039_v43 }
 0x5db   : > { %15629 = vmatprep.subr.mxu1 %v25039_v43  ;;  %15587 = vmatpush3.msra.mxu0 %v20854_v17 }
 0x5dc   : > { %15630 = vmatpush3.msra.mxu1 %v20888_v41  ;;  %15588 = vmatprep.subr.mxu0 %v25039_v43 }
 0x5dd   : > { %15631 = vmatprep.subr.mxu1 %v25039_v43  ;;  %15589 = vmatpush3.msra.mxu0 %v20870_v58 }
 0x5de   : > { %15632 = vmatpush3.msra.mxu1 %v20904_v14  ;;  %15590 = vmatprep.subr.mxu0 %v25039_v43 }
 0x5df   : > { %15633 = vmatprep.subr.mxu1 %v25039_v43  ;;  %15591 = vmatpush3.msra.mxu0 %v20886_v59 }
 0x5e0   : > { %15634 = vmatpush3.msra.mxu1 %v20919_v0  ;;  %15592 = vmatprep.subr.mxu0 %v25039_v43  ;;  %v3300_v35 = vpop.f32.mrf.mxu0 }
 0x5e1   : > { %15635 = vmatprep.subr.mxu1 %v25039_v43  ;;  %15593 = vmatpush3.msra.mxu0 %v20902_v60  ;;  %v3301_v3 = vadd.f32 %v3300_v35, %v20992_v45 }
 0x5e2   : > { %15636 = vmatpush3.msra.mxu1 %v20931_v10  ;;  %15637 = vmatprep.mubr.msk.f32.mxu1 %vm18151_vm0, %v25039_v43  ;;  %v15184_v2 = vpop.f32.mrf.mxu0 }
 0x5e3   : > { %15594 = vmatprep.subr.mxu0 %v25039_v43  ;;  %15638 = vmatmul.mubr.f32.vlgmr.msra.gmra.mxu1 %v20199_v27  ;;  %v21067_v4 = vadd.f32 %v3389_v36, %v3301_v3 }
 0x5e4   : > { %15675 = vmatprep.subr.mxu1 %v25039_v43  ;;  %15595 = vmatpush3.msra.mxu0 %v20917_v7 }
 0x5e5   : > { %15676 = vmatpush3.msra.mxu1 %v20705_v34  ;;  %15596 = vmatprep.subr.mxu0 %v25039_v43  ;;  %v12369_v34 = vld [vmem:[%s24261_s2 + $0x1f8] sm:$0xff] }
 0x5e6   : > { %15677 = vmatprep.subr.mxu1 %v25039_v43  ;;  %15597 = vmatpush3.msra.mxu0 %v20929_v47  ;;  %v21112_v39 = vand.u32 4294901760, %v12369_v34 }
 0x5e7   : > { %15678 = vmatpush3.msra.mxu1 %v20715_v52  ;;  %15598 = vmatprep.subr.mxu0 %v25039_v43  ;;  %v12368_v52 = vld [vmem:[%s24261_s2 + $0x1f0] sm:$0xff] }
 0x5e8   : > { %15679 = vmatprep.subr.mxu1 %v25039_v43  ;;  %15599 = vmatpush3.msra.mxu0 %v20941_v21  ;;  %v21122_v53 = vand.u32 4294901760, %v12368_v52 }
 0x5e9   : > { %15680 = vmatpush3.msra.mxu1 %v20728_v6  ;;  %15600 = vmatprep.subr.mxu0 %v25039_v43  ;;  %v12367_v6 = vld [vmem:[%s24261_s2 + $0x1e8] sm:$0xff] }
 0x5ea   : > { %15681 = vmatprep.subr.mxu1 %v25039_v43  ;;  %15601 = vmatpush3.msra.mxu0 %v20951_v40  ;;  %v21135_v30 = vand.u32 4294901760, %v12367_v6  ;;  %v21143_v19 = vsub.f32 %v12368_v52, %v21122_v53  ;;  %v12360_v52 = vld [vmem:[%s24261_s2 + $0x1b0] sm:$0xff]  ;;  %v12355_v40 = vld [vmem:[%s24261_s2 + $0x188] sm:$0xff] }
 0x5eb   : > { %15602 = vmatprep.mubr.msk.f32.mxu0 %vm18151_vm0, %v25039_v43  ;;  %15682 = vmatpush3.msra.mxu1 %v20738_v55  ;;  %v12366_v55 = vld [vmem:[%s24261_s2 + $0x1e0] sm:$0xff] }
 0x5ec   : > { %15603 = vmatmul.mubr.f32.vlgmr.msra.gmra.mxu0 %v20191_v50  ;;  %15640 = vmatprep.subr.mxu0 %v25039_v43 }
 0x5ed   : > { %15683 = vmatprep.subr.mxu1 %v25039_v43  ;;  %15641 = vmatpush3.msra.mxu0 %v4382_v5  ;;  %v21133_v5 = vsub.f32 %v12369_v34, %v21112_v39 }
 0x5ee   : > { %15684 = vmatpush3.msra.mxu1 %v20757_v15  ;;  %15642 = vmatprep.subr.mxu0 %v25039_v43  ;;  %v25219_v15 = vand.u32 4294901760, %v20814_v29 }
 0x5ef   : > { %15685 = vmatprep.subr.mxu1 %v25039_v43  ;;  %15643 = vmatpush3.msra.mxu0 %v4389_v11  ;;  %v5048_v37 = vand.u32 4294901760, %v21133_v5 }
 0x5f0   : > { %15686 = vmatpush3.msra.mxu1 %v20771_v63  ;;  %15644 = vmatprep.subr.mxu0 %v25039_v43  ;;  %v21145_v63 = vand.u32 4294901760, %v12366_v55 }
 0x5f1   : > { %15687 = vmatprep.subr.mxu1 %v25039_v43  ;;  %15645 = vmatpush3.msra.mxu0 %v4396_v28  ;;  %v12365_v28 = vld [vmem:[%s24261_s2 + $0x1d8] sm:$0xff] }
 0x5f2   : > { %15688 = vmatpush3.msra.mxu1 %v20783_v51  ;;  %15646 = vmatprep.subr.mxu0 %v25039_v43  ;;  %v25220_v51 = vand.u32 4294901760, %v20831_v33  ;;  %v21164_v29 = vand.u32 4294901760, %v12365_v28  ;;  %v5055_v33 = vand.u32 4294901760, %v21143_v19 }
 0x5f3   : > { %15689 = vmatprep.subr.mxu1 %v25039_v43  ;;  %15647 = vmatpush3.msra.mxu0 %v4403_v61 }
 0x5f4   : > { %15690 = vmatpush3.msra.mxu1 %v20797_v32  ;;  %15648 = vmatprep.subr.mxu0 %v25039_v43  ;;  %v21157_v32 = vsub.f32 %v12367_v6, %v21135_v30  ;;  %v21195_v45 = vsub.f32 %v12365_v28, %v21164_v29  ;;  %v5056_v24 = vsub.f32 %v21143_v19, %v5055_v33  ;;  %v12359_v28 = vld [vmem:[%s24261_s2 + $0x1a8] sm:$0xff] }
 0x5f5   : > { %15691 = vmatprep.subr.mxu1 %v25039_v43  ;;  %15649 = vmatpush3.msra.mxu0 %v4410_v26  ;;  %v12363_v26 = vld [vmem:[%s24261_s2 + $0x1c8] sm:$0xff] }
 0x5f6   : > { %15692 = vmatpush3.msra.mxu1 %v20823_v16  ;;  %15650 = vmatprep.subr.mxu0 %v25039_v43  ;;  %v25221_v16 = vand.u32 4294901760, %v20854_v17  ;;  %v25222_v17 = vand.u32 4294901760, %v20870_v58  ;;  %v5062_v56 = vand.u32 4294901760, %v21157_v32  ;;  %v25223_v58 = vand.u32 4294901760, %v20886_v59 }
 0x5f7   : > { %15693 = vmatprep.subr.mxu1 %v25039_v43  ;;  %15651 = vmatpush3.msra.mxu0 %v4417_v48  ;;  %v21174_v48 = vsub.f32 %v12366_v55, %v21145_v63 }
 0x5f8   : > { %15694 = vmatpush3.msra.mxu1 %v20840_v57  ;;  %15652 = vmatprep.subr.mxu0 %v25039_v43  ;;  %v21178_v57 = vand.u32 4294901760, %v12364_v9  ;;  %v5063_v2 = vsub.f32 %v21157_v32, %v5062_v56 }
 0x5f9   : > { %15695 = vmatprep.subr.mxu1 %v25039_v43  ;;  %15653 = vmatpush3.msra.mxu0 %v25219_v15  ;;  %v3595_v11 = vpop.f32.mrf.mxu1  ;;  %v5069_v36 = vand.u32 4294901760, %v21174_v48 }
 0x5fa   : > { %15696 = vmatpush3.msra.mxu1 %v20856_v62  ;;  %15654 = vmatprep.subr.mxu0 %v25039_v43  ;;  %v12362_v62 = vld [vmem:[%s24261_s2 + $0x1c0] sm:$0xff]  ;;  %v21212_v59 = vsub.f32 %v12364_v9, %v21178_v57  ;;  %v21250_v9 = vand.u32 4294901760, %v12360_v52 }
 0x5fb   : > { %15697 = vmatprep.subr.mxu1 %v25039_v43  ;;  %15655 = vmatpush3.msra.mxu0 %v25220_v51  ;;  %v15289_v61 = vpop.f32.mrf.mxu1  ;;  %v21204_v42 = vand.u32 4294901760, %v12362_v62  ;;  %v5070_v55 = vsub.f32 %v21174_v48, %v5069_v36  ;;  %v25224_v51 = vand.u32 4294901760, %v20917_v7 }
 0x5fc   : > { %15698 = vmatpush3.msra.mxu1 %v20872_v13  ;;  %15656 = vmatprep.subr.mxu0 %v25039_v43  ;;  %v5049_v13 = vsub.f32 %v21133_v5, %v5048_v37  ;;  %v24804_v61 = vand.u32 4294901760, %v21212_v59 }
 0x5fd   : > { %15699 = vmatprep.subr.mxu1 %v25039_v43  ;;  %15657 = vmatpush3.msra.mxu0 %v25221_v16  ;;  %v12358_v16 = vld [vmem:[%s24261_s2 + $0x1a0] sm:$0xff] }
 0x5fe   : > { %15700 = vmatpush3.msra.mxu1 %v20888_v41  ;;  %15658 = vmatprep.subr.mxu0 %v25039_v43  ;;  %v21190_v41 = vand.u32 4294901760, %v12363_v26  ;;  %v5050_v3 = vand.u32 4294901760, %v5049_v13  ;;  %v21266_v13 = vand.u32 4294901760, %v12359_v28 }
 0x5ff   : > { %15701 = vmatprep.subr.mxu1 %v25039_v43  ;;  %15659 = vmatpush3.msra.mxu0 %v25222_v17 }
 0x600   : > { %15702 = vmatpush3.msra.mxu1 %v20904_v14  ;;  %15660 = vmatprep.subr.mxu0 %v25039_v43  ;;  %v12361_v14 = vld [vmem:[%s24261_s2 + $0x1b8] sm:$0xff] }
 0x601   : > { %15703 = vmatprep.subr.mxu1 %v25039_v43  ;;  %15661 = vmatpush3.msra.mxu0 %v25223_v58  ;;  %v21231_v6 = vand.u32 4294901760, %v12361_v14  ;;  %v5071_v58 = vand.u32 4294901760, %v5070_v55 }
 0x602   : > { %15704 = vmatpush3.msra.mxu1 %v20919_v0  ;;  %15662 = vmatprep.subr.mxu0 %v25039_v43  ;;  %v3508_v35 = vpop.f32.mrf.mxu0  ;;  %v21222_v0 = vsub.f32 %v12363_v26, %v21190_v41 }
 0x603   : > { %15705 = vmatprep.subr.mxu1 %v25039_v43  ;;  %15663 = vmatpush3.msra.mxu0 %v4459_v22  ;;  %v3509_v34 = vadd.f32 %v3508_v35, %v21067_v4  ;;  %v5076_v22 = vand.u32 4294901760, %v21195_v45  ;;  %v5057_v4 = vand.u32 4294901760, %v5056_v24  ;;  %v21264_v17 = vsub.f32 %v12361_v14, %v21231_v6 }
 0x604   : > { %15706 = vmatpush3.msra.mxu1 %v20931_v10  ;;  %15707 = vmatprep.mubr.msk.f32.mxu1 %vm18151_vm0, %v25039_v43  ;;  %v15254_v60 = vpop.f32.mrf.mxu0  ;;  %v21241_v10 = vsub.f32 %v12362_v62, %v21204_v42  ;;  %v24802_v26 = vand.u32 4294901760, %v21222_v0  ;;  %v25225_v62 = vand.u32 4294901760, %v20929_v47  ;;  %v12357_v47 = vld [vmem:[%s24261_s2 + $0x198] sm:$0xff]  ;;  %v25226_v35 = vand.u32 4294901760, %v20941_v21  ;;  %v12356_v21 = vld [vmem:[%s24261_s2 + $0x190] sm:$0xff] }
 0x605   : > { %15664 = vmatprep.subr.mxu0 %v25039_v43  ;;  %15708 = vmatmul.mubr.f32.vlgmr.msra.gmra.mxu1 %v20187_v12  ;;  %v21238_v15 = vadd.f32 %v3595_v11, %v3509_v34  ;;  %v5064_v11 = vand.u32 4294901760, %v5063_v2  ;;  %v5077_v7 = vsub.f32 %v21195_v45, %v5076_v22  ;;  %v5084_v14 = vsub.f32 %v21212_v59, %v24804_v61 }
 0x606   : > { %15745 = vmatprep.subr.mxu1 %v25039_v43  ;;  %15665 = vmatpush3.msra.mxu0 %v25224_v51  ;;  %v24800_v24 = vand.u32 4294901760, %v21241_v10  ;;  %v21282_v2 = vand.u32 4294901760, %v12358_v16  ;;  %v5091_v34 = vsub.f32 %v21222_v0, %v24802_v26  ;;  %v24801_v60 = vand.u32 4294901760, %v21264_v17 }
 0x607   : > { %15746 = vmatpush3.msra.mxu1 %v5050_v3  ;;  %15666 = vmatprep.subr.mxu0 %v25039_v43  ;;  %v21280_v3 = vsub.f32 %v12360_v52, %v21250_v9  ;;  %v5078_v52 = vand.u32 4294901760, %v5077_v7  ;;  %v21298_v55 = vand.u32 4294901760, %v12357_v47 }
 0x608   : > { %15747 = vmatprep.subr.mxu1 %v25039_v43  ;;  %15667 = vmatpush3.msra.mxu0 %v25225_v62  ;;  %v5098_v51 = vsub.f32 %v21241_v10, %v24800_v24  ;;  %v21314_v62 = vand.u32 4294901760, %v12356_v21  ;;  %v5092_v7 = vand.u32 4294901760, %v5091_v34  ;;  %v21329_v24 = vand.u32 4294901760, %v12355_v40 }
 0x609   : > { %15748 = vmatpush3.msra.mxu1 %v5057_v4  ;;  %15668 = vmatprep.subr.mxu0 %v25039_v43  ;;  %v21296_v4 = vsub.f32 %v12359_v28, %v21266_v13  ;;  %v24803_v28 = vand.u32 4294901760, %v21280_v3 }
 0x60a   : > { %15749 = vmatprep.subr.mxu1 %v25039_v43  ;;  %15669 = vmatpush3.msra.mxu0 %v25226_v35  ;;  %v5105_v35 = vsub.f32 %v21264_v17, %v24801_v60  ;;  %v5099_v34 = vand.u32 4294901760, %v5098_v51  ;;  %v21339_v26 = vsub.f32 %v12356_v21, %v21314_v62  ;;  %v21351_v61 = vsub.f32 %v12355_v40, %v21329_v24 }
 0x60b   : > { %15750 = vmatpush3.msra.mxu1 %v5064_v11  ;;  %15670 = vmatprep.subr.mxu0 %v25039_v43  ;;  %v21312_v11 = vsub.f32 %v12358_v16, %v21282_v2  ;;  %v24805_v16 = vand.u32 4294901760, %v21296_v4 }
 0x60c   : > { %15751 = vmatprep.subr.mxu1 %v25039_v43  ;;  %15671 = vmatpush3.msra.mxu0 %v4487_v8  ;;  %v5085_v8 = vand.u32 4294901760, %v5084_v14  ;;  %v21327_v14 = vsub.f32 %v12357_v47, %v21298_v55  ;;  %v5106_v51 = vand.u32 4294901760, %v5105_v35  ;;  %v24808_v35 = vand.u32 4294901760, %v21339_v26 }
 0x60d   : > { %15672 = vmatprep.mubr.msk.f32.mxu0 %vm18151_vm0, %v25039_v43  ;;  %15752 = vmatpush3.msra.mxu1 %v5071_v58  ;;  %v12354_v58 = vld [vmem:[%s24261_s2 + $0x180] sm:$0xff]  ;;  %v24807_v60 = vand.u32 4294901760, %v21312_v11 }
 0x60e   : > { %15673 = vmatmul.mubr.f32.vlgmr.msra.gmra.mxu0 %v20187_v12  ;;  %15710 = vmatprep.subr.mxu0 %v25039_v43  ;;  %v21341_v47 = vand.u32 4294901760, %v12354_v58 }
 0x60f   : > { %15753 = vmatprep.subr.mxu1 %v25039_v43  ;;  %15711 = vmatpush3.msra.mxu0 %v21112_v39 }
 0x610   : > { %15754 = vmatpush3.msra.mxu1 %v5078_v52  ;;  %15712 = vmatprep.subr.mxu0 %v25039_v43  ;;  %v5112_v52 = vsub.f32 %v21280_v3, %v24803_v28  ;;  %v24806_v28 = vand.u32 4294901760, %v21327_v14 }
 0x611   : > { %15755 = vmatprep.subr.mxu1 %v25039_v43  ;;  %15713 = vmatpush3.msra.mxu0 %v21122_v53 }
 0x612   : > { %15756 = vmatpush3.msra.mxu1 %v5085_v8  ;;  %15714 = vmatprep.subr.mxu0 %v25039_v43  ;;  %v5119_v8 = vsub.f32 %v21296_v4, %v24805_v16  ;;  %v5113_v21 = vand.u32 4294901760, %v5112_v52  ;;  %v21361_v16 = vsub.f32 %v12354_v58, %v21341_v47  ;;  %v5146_v52 = vand.u32 4294901760, %v21351_v61 }
 0x613   : > { %15757 = vmatprep.subr.mxu1 %v25039_v43  ;;  %15715 = vmatpush3.msra.mxu0 %v21135_v30 }
 0x614   : > { %15758 = vmatpush3.msra.mxu1 %v5092_v7  ;;  %15716 = vmatprep.subr.mxu0 %v25039_v43  ;;  %v5126_v7 = vsub.f32 %v21312_v11, %v24807_v60  ;;  %v5120_v40 = vand.u32 4294901760, %v5119_v8  ;;  %v5153_v8 = vand.u32 4294901760, %v21361_v16 }
 0x615   : > { %15759 = vmatprep.subr.mxu1 %v25039_v43  ;;  %15717 = vmatpush3.msra.mxu0 %v21145_v63 }
 0x616   : > { %15760 = vmatpush3.msra.mxu1 %v5099_v34  ;;  %15718 = vmatprep.subr.mxu0 %v25039_v43  ;;  %v5133_v34 = vsub.f32 %v21327_v14, %v24806_v28  ;;  %v5127_v58 = vand.u32 4294901760, %v5126_v7 }
 0x617   : > { %15761 = vmatprep.subr.mxu1 %v25039_v43  ;;  %15719 = vmatpush3.msra.mxu0 %v21164_v29 }
 0x618   : > { %15762 = vmatpush3.msra.mxu1 %v5106_v51  ;;  %15720 = vmatprep.subr.mxu0 %v25039_v43  ;;  %v5140_v51 = vsub.f32 %v21339_v26, %v24808_v35  ;;  %v5134_v60 = vand.u32 4294901760, %v5133_v34 }
 0x619   : > { %15763 = vmatprep.subr.mxu1 %v25039_v43  ;;  %15721 = vmatpush3.msra.mxu0 %v21178_v57 }
 0x61a   : > { %15764 = vmatpush3.msra.mxu1 %v5113_v21  ;;  %15722 = vmatprep.subr.mxu0 %v25039_v43  ;;  %v5147_v21 = vsub.f32 %v21351_v61, %v5146_v52  ;;  %v5141_v35 = vand.u32 4294901760, %v5140_v51 }
 0x61b   : > { %15765 = vmatprep.subr.mxu1 %v25039_v43  ;;  %15723 = vmatpush3.msra.mxu0 %v21190_v41  ;;  %v3862_v28 = vpop.f32.mrf.mxu1 }
 0x61c   : > { %15766 = vmatpush3.msra.mxu1 %v5120_v40  ;;  %15724 = vmatprep.subr.mxu0 %v25039_v43  ;;  %v5154_v40 = vsub.f32 %v21361_v16, %v5153_v8  ;;  %v5148_v34 = vand.u32 4294901760, %v5147_v21 }
 0x61d   : > { %15767 = vmatprep.subr.mxu1 %v25039_v43  ;;  %15725 = vmatpush3.msra.mxu0 %v21204_v42  ;;  %v15359_v7 = vpop.f32.mrf.mxu1 }
 0x61e   : > { %15768 = vmatpush3.msra.mxu1 %v5127_v58  ;;  %15726 = vmatprep.subr.mxu0 %v25039_v43  ;;  %v5155_v58 = vand.u32 4294901760, %v5154_v40 }
 0x61f   : > { %15769 = vmatprep.subr.mxu1 %v25039_v43  ;;  %15727 = vmatpush3.msra.mxu0 %v21231_v6 }
 0x620   : > { %15770 = vmatpush3.msra.mxu1 %v5134_v60  ;;  %15728 = vmatprep.subr.mxu0 %v25039_v43 }
 0x621   : > { %15771 = vmatprep.subr.mxu1 %v25039_v43  ;;  %15729 = vmatpush3.msra.mxu0 %v21250_v9 }
 0x622   : > { %15772 = vmatpush3.msra.mxu1 %v5141_v35  ;;  %15730 = vmatprep.subr.mxu0 %v25039_v43 }
 0x623   : > { %15773 = vmatprep.subr.mxu1 %v25039_v43  ;;  %15731 = vmatpush3.msra.mxu0 %v21266_v13 }
 0x624   : > { %15774 = vmatpush3.msra.mxu1 %v5148_v34  ;;  %15732 = vmatprep.subr.mxu0 %v25039_v43  ;;  %v3711_v51 = vpop.f32.mrf.mxu0 }
 0x625   : > { %15775 = vmatprep.subr.mxu1 %v25039_v43  ;;  %15733 = vmatpush3.msra.mxu0 %v21282_v2  ;;  %v21400_v60 = vadd.f32 %v3862_v28, %v3711_v51  ;;  %v12378_v51 = vld [vmem:[%s24261_s2 + $0x240] sm:$0xff] }
 0x626   : > { %15776 = vmatpush3.msra.mxu1 %v5155_v58  ;;  %15777 = vmatprep.mubr.msk.f32.mxu1 %vm18151_vm0, %v25039_v43  ;;  %v15324_v35 = vpop.f32.mrf.mxu0 }
 0x627   : > { %15734 = vmatprep.subr.mxu0 %v25039_v43  ;;  %15778 = vmatmul.mubr.f32.vlgmr.msra.gmra.mxu1 %v20187_v12 }
 0x628   : > { %15815 = vmatprep.subr.mxu1 %v25039_v43  ;;  %15735 = vmatpush3.msra.mxu0 %v21298_v55 }
 0x629   : > { %15816 = vmatpush3.msra.mxu1 %v21112_v39  ;;  %15736 = vmatprep.subr.mxu0 %v25039_v43 }
 0x62a   : > { %15817 = vmatprep.subr.mxu1 %v25039_v43  ;;  %15737 = vmatpush3.msra.mxu0 %v21314_v62 }
 0x62b   : > { %15818 = vmatpush3.msra.mxu1 %v21122_v53  ;;  %15738 = vmatprep.subr.mxu0 %v25039_v43 }
 0x62c   : > { %15819 = vmatprep.subr.mxu1 %v25039_v43  ;;  %15739 = vmatpush3.msra.mxu0 %v21329_v24 }
 0x62d   : > { %15820 = vmatpush3.msra.mxu1 %v21135_v30  ;;  %15740 = vmatprep.subr.mxu0 %v25039_v43 }
 0x62e   : > { %15821 = vmatprep.subr.mxu1 %v25039_v43  ;;  %15741 = vmatpush3.msra.mxu0 %v21341_v47 }
 0x62f   : > { %15742 = vmatprep.mubr.msk.f32.mxu0 %vm18151_vm0, %v25039_v43  ;;  %15822 = vmatpush3.msra.mxu1 %v21145_v63 }
 0x630   : > { %15743 = vmatmul.mubr.f32.vlgmr.msra.gmra.mxu0 %v20207_v38  ;;  %15780 = vmatprep.subr.mxu0 %v25039_v43 }
 0x631   : > { %15823 = vmatprep.subr.mxu1 %v25039_v43  ;;  %15781 = vmatpush3.msra.mxu0 %v21133_v5 }
 0x632   : > { %15824 = vmatpush3.msra.mxu1 %v21164_v29  ;;  %15782 = vmatprep.subr.mxu0 %v25039_v43 }
 0x633   : > { %15825 = vmatprep.subr.mxu1 %v25039_v43  ;;  %15783 = vmatpush3.msra.mxu0 %v21143_v19 }
 0x634   : > { %15826 = vmatpush3.msra.mxu1 %v21178_v57  ;;  %15784 = vmatprep.subr.mxu0 %v25039_v43 }
 0x635   : > { %15827 = vmatprep.subr.mxu1 %v25039_v43  ;;  %15785 = vmatpush3.msra.mxu0 %v21157_v32 }
 0x636   : > { %15828 = vmatpush3.msra.mxu1 %v21190_v41  ;;  %15786 = vmatprep.subr.mxu0 %v25039_v43 }
 0x637   : > { %15829 = vmatprep.subr.mxu1 %v25039_v43  ;;  %15787 = vmatpush3.msra.mxu0 %v21174_v48  ;;  %v25228_v48 = vand.u32 4294901760, %v21222_v0 }
 0x638   : > { %15830 = vmatpush3.msra.mxu1 %v21204_v42  ;;  %15788 = vmatprep.subr.mxu0 %v25039_v43 }
 0x639   : > { %15831 = vmatprep.subr.mxu1 %v25039_v43  ;;  %15789 = vmatpush3.msra.mxu0 %v21195_v45  ;;  %v25229_v45 = vand.u32 4294901760, %v21241_v10 }
 0x63a   : > { %15832 = vmatpush3.msra.mxu1 %v21231_v6  ;;  %15790 = vmatprep.subr.mxu0 %v25039_v43 }
 0x63b   : > { %15833 = vmatprep.subr.mxu1 %v25039_v43  ;;  %15791 = vmatpush3.msra.mxu0 %v21212_v59 }
 0x63c   : > { %15834 = vmatpush3.msra.mxu1 %v21250_v9  ;;  %15792 = vmatprep.subr.mxu0 %v25039_v43 }
 0x63d   : > { %15835 = vmatprep.subr.mxu1 %v25039_v43  ;;  %15793 = vmatpush3.msra.mxu0 %v21222_v0  ;;  %v4055_v28 = vpop.f32.mrf.mxu1  ;;  %v12380_v0 = vld [vmem:[%s24261_s2 + $0x250] sm:$0xff] }
 0x63e   : > { %15836 = vmatpush3.msra.mxu1 %v21266_v13  ;;  %15794 = vmatprep.subr.mxu0 %v25039_v43 }
 0x63f   : > { %15837 = vmatprep.subr.mxu1 %v25039_v43  ;;  %15795 = vmatpush3.msra.mxu0 %v21241_v10  ;;  %v15429_v21 = vpop.f32.mrf.mxu1  ;;  %v12379_v10 = vld [vmem:[%s24261_s2 + $0x248] sm:$0xff] }
 0x640   : > { %15838 = vmatpush3.msra.mxu1 %v21282_v2  ;;  %15796 = vmatprep.subr.mxu0 %v25039_v43 }
 0x641   : > { %15839 = vmatprep.subr.mxu1 %v25039_v43  ;;  %15797 = vmatpush3.msra.mxu0 %v21264_v17 }
 0x642   : > { %15840 = vmatpush3.msra.mxu1 %v21298_v55  ;;  %15798 = vmatprep.subr.mxu0 %v25039_v43 }
 0x643   : > { %15841 = vmatprep.subr.mxu1 %v25039_v43  ;;  %15799 = vmatpush3.msra.mxu0 %v21280_v3 }
 0x644   : > { %15842 = vmatpush3.msra.mxu1 %v21314_v62  ;;  %15800 = vmatprep.subr.mxu0 %v25039_v43 }
 0x645   : > { %15843 = vmatprep.subr.mxu1 %v25039_v43  ;;  %15801 = vmatpush3.msra.mxu0 %v21296_v4 }
 0x646   : > { %15844 = vmatpush3.msra.mxu1 %v21329_v24  ;;  %15802 = vmatprep.subr.mxu0 %v25039_v43  ;;  %v3966_v7 = vpop.f32.mrf.mxu0 }
 0x647   : > { %15845 = vmatprep.subr.mxu1 %v25039_v43  ;;  %15803 = vmatpush3.msra.mxu0 %v21312_v11  ;;  %v3967_v40 = vadd.f32 %v3966_v7, %v21400_v60  ;;  %v25231_v60 = vand.u32 4294901760, %v21280_v3  ;;  %v25232_v3 = vand.u32 4294901760, %v21296_v4  ;;  %v25233_v4 = vand.u32 4294901760, %v21312_v11 }
 0x648   : > { %15846 = vmatpush3.msra.mxu1 %v21341_v47  ;;  %15847 = vmatprep.mubr.msk.f32.mxu1 %vm18151_vm0, %v25039_v43  ;;  %v15394_v34 = vpop.f32.mrf.mxu0 }
 0x649   : > { %15804 = vmatprep.subr.mxu0 %v25039_v43  ;;  %15848 = vmatmul.mubr.f32.vlgmr.msra.gmra.mxu1 %v20199_v27  ;;  %v21477_v58 = vadd.f32 %v4055_v28, %v3967_v40  ;;  %v21614_v40 = vand.u32 4294901760, %v12378_v51 }
 0x64a   : > { %15885 = vmatprep.subr.mxu1 %v25039_v43  ;;  %15805 = vmatpush3.msra.mxu0 %v21327_v14 }
 0x64b   : > { %15886 = vmatpush3.msra.mxu1 %v21112_v39  ;;  %15806 = vmatprep.subr.mxu0 %v25039_v43  ;;  %v12385_v39 = vld [vmem:[%s24261_s2 + $0x278] sm:$0xff] }
 0x64c   : > { %15887 = vmatprep.subr.mxu1 %v25039_v43  ;;  %15807 = vmatpush3.msra.mxu0 %v21339_v26  ;;  %v21522_v5 = vand.u32 4294901760, %v12385_v39 }
 0x64d   : > { %15888 = vmatpush3.msra.mxu1 %v21122_v53  ;;  %15808 = vmatprep.subr.mxu0 %v25039_v43  ;;  %v12384_v53 = vld [vmem:[%s24261_s2 + $0x270] sm:$0xff] }
 0x64e   : > { %15889 = vmatprep.subr.mxu1 %v25039_v43  ;;  %15809 = vmatpush3.msra.mxu0 %v21351_v61  ;;  %v21532_v19 = vand.u32 4294901760, %v12384_v53  ;;  %v21543_v32 = vsub.f32 %v12385_v39, %v21522_v5  ;;  %v12372_v61 = vld [vmem:[%s24261_s2 + $0x210] sm:$0xff] }
 0x64f   : > { %15890 = vmatpush3.msra.mxu1 %v21135_v30  ;;  %15810 = vmatprep.subr.mxu0 %v25039_v43  ;;  %v12383_v30 = vld [vmem:[%s24261_s2 + $0x268] sm:$0xff] }
 0x650   : > { %15891 = vmatprep.subr.mxu1 %v25039_v43  ;;  %15811 = vmatpush3.msra.mxu0 %v21361_v16  ;;  %v12371_v16 = vld [vmem:[%s24261_s2 + $0x208] sm:$0xff] }
 0x651   : > { %15812 = vmatprep.mubr.msk.f32.mxu0 %vm18151_vm0, %v25039_v43  ;;  %15892 = vmatpush3.msra.mxu1 %v21145_v63  ;;  %v12382_v63 = vld [vmem:[%s24261_s2 + $0x260] sm:$0xff] }
 0x652   : > { %15813 = vmatmul.mubr.f32.vlgmr.msra.gmra.mxu0 %v20191_v50  ;;  %15850 = vmatprep.subr.mxu0 %v25039_v43 }
 0x653   : > { %15893 = vmatprep.subr.mxu1 %v25039_v43  ;;  %15851 = vmatpush3.msra.mxu0 %v5048_v37  ;;  %v25227_v37 = vand.u32 4294901760, %v21212_v59 }
 0x654   : > { %15894 = vmatpush3.msra.mxu1 %v21164_v29  ;;  %15852 = vmatprep.subr.mxu0 %v25039_v43  ;;  %v21545_v29 = vand.u32 4294901760, %v12383_v30 }
 0x655   : > { %15895 = vmatprep.subr.mxu1 %v25039_v43  ;;  %15853 = vmatpush3.msra.mxu0 %v5055_v33  ;;  %v21549_v33 = vand.u32 4294901760, %v12382_v63 }
 0x656   : > { %15896 = vmatpush3.msra.mxu1 %v21178_v57  ;;  %15854 = vmatprep.subr.mxu0 %v25039_v43  ;;  %v21567_v59 = vsub.f32 %v12383_v30, %v21545_v29 }
 0x657   : > { %15897 = vmatprep.subr.mxu1 %v25039_v43  ;;  %15855 = vmatpush3.msra.mxu0 %v5062_v56  ;;  %v21555_v56 = vsub.f32 %v12384_v53, %v21532_v19 }
 0x658   : > { %15898 = vmatpush3.msra.mxu1 %v21190_v41  ;;  %15856 = vmatprep.subr.mxu0 %v25039_v43  ;;  %v12381_v41 = vld [vmem:[%s24261_s2 + $0x258] sm:$0xff]  ;;  %v5726_v35 = vand.u32 4294901760, %v21567_v59 }
 0x659   : > { %15899 = vmatprep.subr.mxu1 %v25039_v43  ;;  %15857 = vmatpush3.msra.mxu0 %v5069_v36  ;;  %v5712_v36 = vand.u32 4294901760, %v21543_v32 }
 0x65a   : > { %15900 = vmatpush3.msra.mxu1 %v21204_v42  ;;  %15858 = vmatprep.subr.mxu0 %v25039_v43  ;;  %v5727_v30 = vsub.f32 %v21567_v59, %v5726_v35 }
 0x65b   : > { %15901 = vmatprep.subr.mxu1 %v25039_v43  ;;  %15859 = vmatpush3.msra.mxu0 %v5076_v22  ;;  %v21575_v22 = vsub.f32 %v12382_v63, %v21549_v33 }
 0x65c   : > { %15902 = vmatpush3.msra.mxu1 %v21231_v6  ;;  %15860 = vmatprep.subr.mxu0 %v25039_v43  ;;  %v21577_v6 = vand.u32 4294901760, %v12381_v41 }
 0x65d   : > { %15903 = vmatprep.subr.mxu1 %v25039_v43  ;;  %15861 = vmatpush3.msra.mxu0 %v25227_v37  ;;  %v24815_v28 = vand.u32 4294901760, %v21575_v22  ;;  %v12376_v37 = vld [vmem:[%s24261_s2 + $0x230] sm:$0xff] }
 0x65e   : > { %15904 = vmatpush3.msra.mxu1 %v21250_v9  ;;  %15862 = vmatprep.subr.mxu0 %v25039_v43  ;;  %v25230_v9 = vand.u32 4294901760, %v21264_v17  ;;  %v5713_v17 = vsub.f32 %v21543_v32, %v5712_v36  ;;  %v21606_v21 = vsub.f32 %v12381_v41, %v21577_v6 }
 0x65f   : > { %15905 = vmatprep.subr.mxu1 %v25039_v43  ;;  %15863 = vmatpush3.msra.mxu0 %v25228_v48  ;;  %v4261_v57 = vpop.f32.mrf.mxu1  ;;  %v5734_v11 = vsub.f32 %v21575_v22, %v24815_v28 }
 0x660   : > { %15906 = vmatpush3.msra.mxu1 %v21266_v13  ;;  %15864 = vmatprep.subr.mxu0 %v25039_v43  ;;  %v5719_v13 = vand.u32 4294901760, %v21555_v56  ;;  %v5714_v53 = vand.u32 4294901760, %v5713_v17  ;;  %v24813_v48 = vand.u32 4294901760, %v21606_v21  ;;  %v25235_v17 = vand.u32 4294901760, %v21327_v14 }
 0x661   : > { %15907 = vmatprep.subr.mxu1 %v25039_v43  ;;  %15865 = vmatpush3.msra.mxu0 %v25229_v45  ;;  %v15499_v42 = vpop.f32.mrf.mxu1  ;;  %v25234_v45 = vld [vmem:[#allocation137_spill] sm:$0xff]  ;;  %v25236_v14 = vand.u32 4294901760, %v21339_v26 }
 0x662   : > { %15908 = vmatpush3.msra.mxu1 %v21282_v2  ;;  %15866 = vmatprep.subr.mxu0 %v25039_v43  ;;  %v21588_v2 = vand.u32 4294901760, %v12380_v0  ;;  %v5720_v7 = vsub.f32 %v21555_v56, %v5719_v13  ;;  %v3604_v42 = vrot.slane %v21238_v15, %v25234_v45 }
 0x663   : > { %15909 = vmatprep.subr.mxu1 %v25039_v43  ;;  %15867 = vmatpush3.msra.mxu0 %v25230_v9  ;;  %v12375_v9 = vld [vmem:[%s24261_s2 + $0x228] sm:$0xff] }
 0x664   : > { %15910 = vmatpush3.msra.mxu1 %v21298_v55  ;;  %15868 = vmatprep.subr.mxu0 %v25039_v43  ;;  %v21600_v55 = vand.u32 4294901760, %v12379_v10  ;;  %v21622_v39 = vsub.f32 %v12380_v0, %v21588_v2 }
 0x665   : > { %15911 = vmatprep.subr.mxu1 %v25039_v43  ;;  %15869 = vmatpush3.msra.mxu0 %v25231_v60  ;;  %v21656_v60 = vld [vmem:[#allocation2 + $0xc0] sm:$0xff] }
 0x666   : > { %15912 = vmatpush3.msra.mxu1 %v21314_v62  ;;  %15870 = vmatprep.subr.mxu0 %v25039_v43  ;;  %v12377_v62 = vld [vmem:[%s24261_s2 + $0x238] sm:$0xff]  ;;  %v24811_v15 = vand.u32 4294901760, %v21622_v39 }
 0x667   : > { %15913 = vmatprep.subr.mxu1 %v25039_v43  ;;  %15871 = vmatpush3.msra.mxu0 %v25232_v3  ;;  %v21662_v3 = vand.u32 4294901760, %v12376_v37 }
 0x668   : > { %15914 = vmatpush3.msra.mxu1 %v21329_v24  ;;  %15872 = vmatprep.subr.mxu0 %v25039_v43  ;;  %v4174_v34 = vpop.f32.mrf.mxu0  ;;  %v21632_v24 = vsub.f32 %v12379_v10, %v21600_v55  ;;  %v21651_v10 = vsub.f32 %v12378_v51, %v21614_v40 }
 0x669   : > { %15915 = vmatprep.subr.mxu1 %v25039_v43  ;;  %15873 = vmatpush3.msra.mxu0 %v25233_v4  ;;  %v4175_v63 = vadd.f32 %v4174_v34, %v21477_v58  ;;  %v21644_v58 = vand.u32 4294901760, %v12377_v62  ;;  %v12374_v34 = vld [vmem:[%s24261_s2 + $0x220] sm:$0xff]  ;;  %v5741_v4 = vsub.f32 %v21606_v21, %v24813_v48 }
 0x66a   : > { %15916 = vmatpush3.msra.mxu1 %v21341_v47  ;;  %15917 = vmatprep.mubr.msk.f32.mxu1 %vm18151_vm0, %v25039_v43  ;;  %v15464_v41 = vpop.f32.mrf.mxu0  ;;  %v5721_v47 = vand.u32 4294901760, %v5720_v7  ;;  %v24810_v7 = vand.u32 4294901760, %v21632_v24  ;;  %v24809_v26 = vand.u32 4294901760, %v21651_v10 }
 0x66b   : > { %15874 = vmatprep.subr.mxu0 %v25039_v43  ;;  %15918 = vmatmul.mubr.f32.vlgmr.msra.gmra.mxu1 %v20187_v12  ;;  %v4262_v0 = vadd.f32 %v4261_v57, %v4175_v63  ;;  %v5728_v57 = vand.u32 4294901760, %v5727_v30  ;;  %v21679_v30 = vand.u32 4294901760, %v12375_v9  ;;  %v3605_v63 = vmul.f32 %v3604_v42, %v21656_v60 }
 0x66c   : > { %15955 = vmatprep.subr.mxu1 %v25039_v43  ;;  %15875 = vmatpush3.msra.mxu0 %v25235_v17  ;;  %v5735_v41 = vand.u32 4294901760, %v5734_v11  ;;  %v12373_v17 = vld [vmem:[%s24261_s2 + $0x218] sm:$0xff]  ;;  %v21695_v42 = vsub.f32 %v12376_v37, %v21662_v3  ;;  %v21697_v11 = vand.u32 4294901760, %v12374_v34 }
 0x66d   : > { %15956 = vmatpush3.msra.mxu1 %v5714_v53  ;;  %15876 = vmatprep.subr.mxu0 %v25039_v43  ;;  %v4268_v51 = vrot.slane %v4262_v0, %v19357_v49  ;;  %v21677_v53 = vsub.f32 %v12377_v62, %v21644_v58  ;;  %v5748_v62 = vsub.f32 %v21622_v39, %v24811_v15  ;;  %v21746_v15 = vand.u32 4294901760, %v12371_v16 }
 0x66e   : > { %15957 = vmatprep.subr.mxu1 %v25039_v43  ;;  %15877 = vmatpush3.msra.mxu0 %v25236_v14  ;;  %v21715_v14 = vand.u32 4294901760, %v12373_v17 }
 0x66f   : > { %15958 = vmatpush3.msra.mxu1 %v5721_v47  ;;  %15878 = vmatprep.subr.mxu0 %v25039_v43  ;;  %v4269_v0 = vmul.f32 %v4268_v51, %v21656_v60  ;;  %v5755_v51 = vsub.f32 %v21632_v24, %v24810_v7  ;;  %v24812_v37 = vand.u32 4294901760, %v21677_v53  ;;  %v21768_v28 = vsub.f32 %v12371_v16, %v21746_v15 }
 0x670   : > { %15959 = vmatprep.subr.mxu1 %v25039_v43  ;;  %15879 = vmatpush3.msra.mxu0 %v5146_v52  ;;  %v5742_v52 = vand.u32 4294901760, %v5741_v4  ;;  %v21729_v4 = vsub.f32 %v12374_v34, %v21697_v11  ;;  %v21744_v7 = vsub.f32 %v12373_v17, %v21715_v14 }
 0x671   : > { %15960 = vmatpush3.msra.mxu1 %v5728_v57  ;;  %15880 = vmatprep.subr.mxu0 %v25039_v43  ;;  %v21700_v47 = vadd.f32 %v4269_v0, %v3605_v63  ;;  %v21713_v57 = vsub.f32 %v12375_v9, %v21679_v30  ;;  %v5762_v63 = vsub.f32 %v21651_v10, %v24809_v26  ;;  %v24814_v9 = vand.u32 4294901760, %v21695_v42  ;;  %v12370_v26 = vld [vmem:[%s24261_s2 + $0x200] sm:$0xff] }
 0x672   : > { %15961 = vmatprep.subr.mxu1 %v25039_v43  ;;  %15881 = vmatpush3.msra.mxu0 %v5153_v8  ;;  %v5749_v8 = vand.u32 4294901760, %v5748_v62  ;;  %v21731_v0 = vand.u32 4294901760, %v12372_v61  ;;  %v5769_v62 = vsub.f32 %v21677_v53, %v24812_v37  ;;  %v24818_v37 = vand.u32 4294901760, %v21729_v4 }
 0x673   : > { %15882 = vmatprep.mubr.msk.f32.mxu0 %vm18151_vm0, %v25039_v43  ;;  %15962 = vmatpush3.msra.mxu1 %v5735_v41  ;;  %v5756_v41 = vand.u32 4294901760, %v5755_v51  ;;  %v24816_v34 = vand.u32 4294901760, %v21713_v57  ;;  %v5763_v51 = vand.u32 4294901760, %v5762_v63  ;;  %v21758_v17 = vand.u32 4294901760, %v12370_v26 }
 0x674   : > { %15883 = vmatmul.mubr.f32.vlgmr.msra.gmra.mxu0 %v20187_v12  ;;  %15920 = vmatprep.subr.mxu0 %v25039_v43  ;;  %v21756_v48 = vsub.f32 %v12372_v61, %v21731_v0  ;;  %v5770_v63 = vand.u32 4294901760, %v5769_v62 }
 0x675   : > { %15963 = vmatprep.subr.mxu1 %v25039_v43  ;;  %15921 = vmatpush3.msra.mxu0 %v21522_v5 }
 0x676   : > { %15964 = vmatpush3.msra.mxu1 %v5742_v52  ;;  %15922 = vmatprep.subr.mxu0 %v25039_v43  ;;  %v5776_v52 = vsub.f32 %v21695_v42, %v24814_v9  ;;  %v24817_v9 = vand.u32 4294901760, %v21744_v7  ;;  %v24819_v62 = vand.u32 4294901760, %v21756_v48 }
 0x677   : > { %15965 = vmatprep.subr.mxu1 %v25039_v43  ;;  %15923 = vmatpush3.msra.mxu0 %v21532_v19 }
 0x678   : > { %15966 = vmatpush3.msra.mxu1 %v5749_v8  ;;  %15924 = vmatprep.subr.mxu0 %v25039_v43  ;;  %v5783_v8 = vsub.f32 %v21713_v57, %v24816_v34  ;;  %v5777_v61 = vand.u32 4294901760, %v5776_v52  ;;  %v21778_v34 = vsub.f32 %v12370_v26, %v21758_v17  ;;  %v5810_v52 = vand.u32 4294901760, %v21768_v28 }
 0x679   : > { %15967 = vmatprep.subr.mxu1 %v25039_v43  ;;  %15925 = vmatpush3.msra.mxu0 %v21545_v29 }
 0x67a   : > { %15968 = vmatpush3.msra.mxu1 %v5756_v41  ;;  %15926 = vmatprep.subr.mxu0 %v25039_v43  ;;  %v5790_v41 = vsub.f32 %v21729_v4, %v24818_v37  ;;  %v5784_v16 = vand.u32 4294901760, %v5783_v8  ;;  %v5817_v8 = vand.u32 4294901760, %v21778_v34 }
 0x67b   : > { %15969 = vmatprep.subr.mxu1 %v25039_v43  ;;  %15927 = vmatpush3.msra.mxu0 %v21549_v33 }
 0x67c   : > { %15970 = vmatpush3.msra.mxu1 %v5763_v51  ;;  %15928 = vmatprep.subr.mxu0 %v25039_v43  ;;  %v5797_v51 = vsub.f32 %v21744_v7, %v24817_v9  ;;  %v5791_v26 = vand.u32 4294901760, %v5790_v41 }
 0x67d   : > { %15971 = vmatprep.subr.mxu1 %v25039_v43  ;;  %15929 = vmatpush3.msra.mxu0 %v21577_v6 }
 0x67e   : > { %15972 = vmatpush3.msra.mxu1 %v5770_v63  ;;  %15930 = vmatprep.subr.mxu0 %v25039_v43  ;;  %v5804_v63 = vsub.f32 %v21756_v48, %v24819_v62  ;;  %v5798_v37 = vand.u32 4294901760, %v5797_v51 }
 0x67f   : > { %15973 = vmatprep.subr.mxu1 %v25039_v43  ;;  %15931 = vmatpush3.msra.mxu0 %v21588_v2 }
 0x680   : > { %15974 = vmatpush3.msra.mxu1 %v5777_v61  ;;  %15932 = vmatprep.subr.mxu0 %v25039_v43  ;;  %v5811_v61 = vsub.f32 %v21768_v28, %v5810_v52  ;;  %v5805_v62 = vand.u32 4294901760, %v5804_v63 }
 0x681   : > { %15975 = vmatprep.subr.mxu1 %v25039_v43  ;;  %15933 = vmatpush3.msra.mxu0 %v21600_v55  ;;  %v4526_v9 = vpop.f32.mrf.mxu1 }
 0x682   : > { %15976 = vmatpush3.msra.mxu1 %v5784_v16  ;;  %15934 = vmatprep.subr.mxu0 %v25039_v43  ;;  %v5818_v16 = vsub.f32 %v21778_v34, %v5817_v8  ;;  %v5812_v51 = vand.u32 4294901760, %v5811_v61 }
 0x683   : > { %15977 = vmatprep.subr.mxu1 %v25039_v43  ;;  %15935 = vmatpush3.msra.mxu0 %v21614_v40  ;;  %v15569_v41 = vpop.f32.mrf.mxu1 }
 0x684   : > { %15978 = vmatpush3.msra.mxu1 %v5791_v26  ;;  %15936 = vmatprep.subr.mxu0 %v25039_v43  ;;  %v5819_v26 = vand.u32 4294901760, %v5818_v16 }
 0x685   : > { %15979 = vmatprep.subr.mxu1 %v25039_v43  ;;  %15937 = vmatpush3.msra.mxu0 %v21644_v58 }
 0x686   : > { %15980 = vmatpush3.msra.mxu1 %v5798_v37  ;;  %15938 = vmatprep.subr.mxu0 %v25039_v43 }
 0x687   : > { %15981 = vmatprep.subr.mxu1 %v25039_v43  ;;  %15939 = vmatpush3.msra.mxu0 %v21662_v3 }
 0x688   : > { %15982 = vmatpush3.msra.mxu1 %v5805_v62  ;;  %15940 = vmatprep.subr.mxu0 %v25039_v43 }
 0x689   : > { %15983 = vmatprep.subr.mxu1 %v25039_v43  ;;  %15941 = vmatpush3.msra.mxu0 %v21679_v30 }
 0x68a   : > { %15984 = vmatpush3.msra.mxu1 %v5812_v51  ;;  %15942 = vmatprep.subr.mxu0 %v25039_v43  ;;  %v4375_v63 = vpop.f32.mrf.mxu0 }
 0x68b   : > { %15985 = vmatprep.subr.mxu1 %v25039_v43  ;;  %15943 = vmatpush3.msra.mxu0 %v21697_v11  ;;  %v21817_v37 = vadd.f32 %v4526_v9, %v4375_v63  ;;  %v25267_v63 = vld [vmem:[#allocation66_spill] sm:$0xff] }
 0x68c   : > { %15986 = vmatpush3.msra.mxu1 %v5819_v26  ;;  %15987 = vmatprep.mubr.msk.f32.mxu1 %vm18151_vm0, %v25039_v43  ;;  %v15534_v62 = vpop.f32.mrf.mxu0  ;;  %v25266_v26 = vld [vmem:[#allocation25_spill] sm:$0xff] }
 0x68d   : > { %15944 = vmatprep.subr.mxu0 %v25039_v43  ;;  %15988 = vmatmul.mubr.f32.vlgmr.msra.gmra.mxu1 %v20187_v12  ;;  %v25269_v62 = vld [vmem:[#allocation68_spill] sm:$0xff] }
 0x68e   : > { %16025 = vmatprep.subr.mxu1 %v25039_v43  ;;  %15945 = vmatpush3.msra.mxu0 %v21715_v14 }
 0x68f   : > { %16026 = vmatpush3.msra.mxu1 %v21522_v5  ;;  %15946 = vmatprep.subr.mxu0 %v25039_v43 }
 0x690   : > { %16027 = vmatprep.subr.mxu1 %v25039_v43  ;;  %15947 = vmatpush3.msra.mxu0 %v21731_v0 }
 0x691   : > { %16028 = vmatpush3.msra.mxu1 %v21532_v19  ;;  %15948 = vmatprep.subr.mxu0 %v25039_v43 }
 0x692   : > { %16029 = vmatprep.subr.mxu1 %v25039_v43  ;;  %15949 = vmatpush3.msra.mxu0 %v21746_v15 }
 0x693   : > { %16030 = vmatpush3.msra.mxu1 %v21545_v29  ;;  %15950 = vmatprep.subr.mxu0 %v25039_v43 }
 0x694   : > { %16031 = vmatprep.subr.mxu1 %v25039_v43  ;;  %15951 = vmatpush3.msra.mxu0 %v21758_v17 }
 0x695   : > { %15952 = vmatprep.mubr.msk.f32.mxu0 %vm18151_vm0, %v25039_v43  ;;  %16032 = vmatpush3.msra.mxu1 %v21549_v33 }
 0x696   : > { %15953 = vmatmul.mubr.f32.vlgmr.msra.gmra.mxu0 %v20207_v38  ;;  %15990 = vmatprep.subr.mxu0 %v25039_v43 }
 0x697   : > { %16033 = vmatprep.subr.mxu1 %v25039_v43  ;;  %15991 = vmatpush3.msra.mxu0 %v21543_v32 }
 0x698   : > { %16034 = vmatpush3.msra.mxu1 %v21577_v6  ;;  %15992 = vmatprep.subr.mxu0 %v25039_v43 }
 0x699   : > { %16035 = vmatprep.subr.mxu1 %v25039_v43  ;;  %15993 = vmatpush3.msra.mxu0 %v21555_v56  ;;  %v25242_v56 = vand.u32 4294901760, %v21677_v53 }
 0x69a   : > { %16036 = vmatpush3.msra.mxu1 %v21588_v2  ;;  %15994 = vmatprep.subr.mxu0 %v25039_v43 }
 0x69b   : > { %16037 = vmatprep.subr.mxu1 %v25039_v43  ;;  %15995 = vmatpush3.msra.mxu0 %v21567_v59  ;;  %v25244_v59 = vand.u32 4294901760, %v21713_v57 }
 0x69c   : > { %16038 = vmatpush3.msra.mxu1 %v21600_v55  ;;  %15996 = vmatprep.subr.mxu0 %v25039_v43 }
 0x69d   : > { %16039 = vmatprep.subr.mxu1 %v25039_v43  ;;  %15997 = vmatpush3.msra.mxu0 %v21575_v22 }
 0x69e   : > { %16040 = vmatpush3.msra.mxu1 %v21614_v40  ;;  %15998 = vmatprep.subr.mxu0 %v25039_v43 }
 0x69f   : > { %16041 = vmatprep.subr.mxu1 %v25039_v43  ;;  %15999 = vmatpush3.msra.mxu0 %v21606_v21 }
 0x6a0   : > { %16042 = vmatpush3.msra.mxu1 %v21644_v58  ;;  %16000 = vmatprep.subr.mxu0 %v25039_v43 }
 0x6a1   : > { %16043 = vmatprep.subr.mxu1 %v25039_v43  ;;  %16001 = vmatpush3.msra.mxu0 %v21622_v39 }
 0x6a2   : > { %16044 = vmatpush3.msra.mxu1 %v21662_v3  ;;  %16002 = vmatprep.subr.mxu0 %v25039_v43 }
 0x6a3   : > { %16045 = vmatprep.subr.mxu1 %v25039_v43  ;;  %16003 = vmatpush3.msra.mxu0 %v21632_v24  ;;  %v4719_v38 = vpop.f32.mrf.mxu1 }
 0x6a4   : > { %16046 = vmatpush3.msra.mxu1 %v21679_v30  ;;  %16004 = vmatprep.subr.mxu0 %v25039_v43 }
 0x6a5   : > { %16047 = vmatprep.subr.mxu1 %v25039_v43  ;;  %16005 = vmatpush3.msra.mxu0 %v21651_v10  ;;  %v15639_v9 = vpop.f32.mrf.mxu1 }
 0x6a6   : > { %16048 = vmatpush3.msra.mxu1 %v21697_v11  ;;  %16006 = vmatprep.subr.mxu0 %v25039_v43  ;;  %v25271_v9 = vld [vmem:[#allocation70_spill] sm:$0xff] }
 0x6a7   : > { %16049 = vmatprep.subr.mxu1 %v25039_v43  ;;  %16007 = vmatpush3.msra.mxu0 %v21677_v53  ;;  %v25254_v53 = vld [vmem:[#allocation9_spill] sm:$0xff] }
 0x6a8   : > { %16050 = vmatpush3.msra.mxu1 %v21715_v14  ;;  %16008 = vmatprep.subr.mxu0 %v25039_v43 }
 0x6a9   : > { %16051 = vmatprep.subr.mxu1 %v25039_v43  ;;  %16009 = vmatpush3.msra.mxu0 %v21695_v42 }
 0x6aa   : > { %16052 = vmatpush3.msra.mxu1 %v21731_v0  ;;  %16010 = vmatprep.subr.mxu0 %v25039_v43 }
 0x6ab   : > { %16053 = vmatprep.subr.mxu1 %v25039_v43  ;;  %16011 = vmatpush3.msra.mxu0 %v21713_v57  ;;  %v25260_v57 = vld [vmem:[#allocation12_spill] sm:$0xff] }
 0x6ac   : > { %16054 = vmatpush3.msra.mxu1 %v21746_v15  ;;  %16012 = vmatprep.subr.mxu0 %v25039_v43  ;;  %v4630_v61 = vpop.f32.mrf.mxu0 }
 0x6ad   : > { %16055 = vmatprep.subr.mxu1 %v25039_v43  ;;  %16013 = vmatpush3.msra.mxu0 %v21729_v4  ;;  %v4631_v41 = vadd.f32 %v4630_v61, %v21817_v37  ;;  %v25268_v37 = vld [vmem:[#allocation28_spill] sm:$0xff] }
 0x6ae   : > { %16056 = vmatpush3.msra.mxu1 %v21758_v17  ;;  %16057 = vmatprep.mubr.msk.f32.mxu1 %vm18151_vm0, %v25039_v43  ;;  %v15604_v16 = vpop.f32.mrf.mxu0  ;;  %v25272_v61 = vld [vmem:[#allocation36_spill] sm:$0xff] }
 0x6af   : > { %16014 = vmatprep.subr.mxu0 %v25039_v43  ;;  %16058 = vmatmul.mubr.f32.vlgmr.msra.gmra.mxu1 %v20199_v27  ;;  %v21894_v51 = vadd.f32 %v4719_v38, %v4631_v41  ;;  %v25238_v27 = vand.u32 4294901760, %v21606_v21  ;;  %v21983_v21 = vld [vmem:[#allocation2 + $0xc8] sm:$0xff]  ;;  %v25270_v38 = vld [vmem:[#allocation32_spill] sm:$0xff] }
 0x6b0   : > { %16095 = vmatprep.subr.mxu1 %v25039_v43  ;;  %16015 = vmatpush3.msra.mxu0 %v21744_v7  ;;  %v25273_v16 = vld [vmem:[#allocation71_spill] sm:$0xff] }
 0x6b1   : > { %16096 = vmatpush3.msra.mxu1 %v21522_v5  ;;  %16016 = vmatprep.subr.mxu0 %v25039_v43  ;;  %v25239_v5 = vand.u32 4294901760, %v21622_v39  ;;  %v25247_v39 = vand.u32 4294901760, %v21756_v48 }
 0x6b2   : > { %16097 = vmatprep.subr.mxu1 %v25039_v43  ;;  %16017 = vmatpush3.msra.mxu0 %v21756_v48  ;;  %v25250_v48 = vld [vmem:[#allocation35_spill] sm:$0xff] }
 0x6b3   : > { %16098 = vmatpush3.msra.mxu1 %v21532_v19  ;;  %16018 = vmatprep.subr.mxu0 %v25039_v43  ;;  %v25240_v19 = vand.u32 4294901760, %v21632_v24  ;;  %v25248_v24 = vld [vmem:[#allocation30_spill] sm:$0xff] }
 0x6b4   : > { %16099 = vmatprep.subr.mxu1 %v25039_v43  ;;  %16019 = vmatpush3.msra.mxu0 %v21768_v28  ;;  %v25251_v28 = vld [vmem:[#allocation38_spill] sm:$0xff] }
 0x6b5   : > { %16100 = vmatpush3.msra.mxu1 %v21545_v29  ;;  %16020 = vmatprep.subr.mxu0 %v25039_v43  ;;  %v25241_v29 = vand.u32 4294901760, %v21651_v10  ;;  %v25249_v10 = vld [vmem:[#allocation31_spill] sm:$0xff] }
 0x6b6   : > { %16101 = vmatprep.subr.mxu1 %v25039_v43  ;;  %16021 = vmatpush3.msra.mxu0 %v21778_v34 }
 0x6b7   : > { %16022 = vmatprep.mubr.msk.f32.mxu0 %vm18151_vm0, %v25039_v43  ;;  %16102 = vmatpush3.msra.mxu1 %v21549_v33 }
 0x6b8   : > { %16023 = vmatmul.mubr.f32.vlgmr.msra.gmra.mxu0 %v20191_v50  ;;  %16060 = vmatprep.subr.mxu0 %v25039_v43  ;;  %v25237_v50 = vand.u32 4294901760, %v21575_v22 }
 0x6b9   : > { %16103 = vmatprep.subr.mxu1 %v25039_v43  ;;  %16061 = vmatpush3.msra.mxu0 %v5712_v36  ;;  %v25243_v36 = vand.u32 4294901760, %v21695_v42  ;;  %v25257_v42 = vld [vmem:[#allocation50_spill] sm:$0xff] }
 0x6ba   : > { %16104 = vmatpush3.msra.mxu1 %v21577_v6  ;;  %16062 = vmatprep.subr.mxu0 %v25039_v43  ;;  %v25245_v6 = vand.u32 4294901760, %v21729_v4  ;;  %v25262_v4 = vld [vmem:[#allocation13_spill] sm:$0xff] }
 0x6bb   : > { %16105 = vmatprep.subr.mxu1 %v25039_v43  ;;  %16063 = vmatpush3.msra.mxu0 %v5719_v13 }
 0x6bc   : > { %16106 = vmatpush3.msra.mxu1 %v21588_v2  ;;  %16064 = vmatprep.subr.mxu0 %v25039_v43 }
 0x6bd   : > { %16107 = vmatprep.subr.mxu1 %v25039_v43  ;;  %16065 = vmatpush3.msra.mxu0 %v5726_v35 }
 0x6be   : > { %16108 = vmatpush3.msra.mxu1 %v21600_v55  ;;  %16066 = vmatprep.subr.mxu0 %v25039_v43  ;;  %v25246_v55 = vand.u32 4294901760, %v21744_v7  ;;  %v25253_v7 = vld [vmem:[#allocation42_spill] sm:$0xff] }
 0x6bf   : > { %16109 = vmatprep.subr.mxu1 %v25039_v43  ;;  %16067 = vmatpush3.msra.mxu0 %v25237_v50  ;;  %v25274_v50 = vld [vmem:[#allocation40_spill] sm:$0xff] }
 0x6c0   : > { %16110 = vmatpush3.msra.mxu1 %v21614_v40  ;;  %16068 = vmatprep.subr.mxu0 %v25039_v43 }
 0x6c1   : > { %16111 = vmatprep.subr.mxu1 %v25039_v43  ;;  %16069 = vmatpush3.msra.mxu0 %v25238_v27 }
 0x6c2   : > { %16112 = vmatpush3.msra.mxu1 %v21644_v58  ;;  %16070 = vmatprep.subr.mxu0 %v25039_v43 }
 0x6c3   : > { %16113 = vmatprep.subr.mxu1 %v25039_v43  ;;  %16071 = vmatpush3.msra.mxu0 %v25239_v5  ;;  %v25275_v5 = vld [vmem:[#allocation72_spill] sm:$0xff] }
 0x6c4   : > { %16114 = vmatpush3.msra.mxu1 %v21662_v3  ;;  %16072 = vmatprep.subr.mxu0 %v25039_v43  ;;  %v25252_v3 = vld [vmem:[#allocation8_spill] sm:$0xff] }
 0x6c5   : > { %16115 = vmatprep.subr.mxu1 %v25039_v43  ;;  %16073 = vmatpush3.msra.mxu0 %v25240_v19  ;;  %v4925_v32 = vpop.f32.mrf.mxu1  ;;  %v25276_v19 = vld [vmem:[#allocation44_spill] sm:$0xff] }
 0x6c6   : > { %16116 = vmatpush3.msra.mxu1 %v21679_v30  ;;  %16074 = vmatprep.subr.mxu0 %v25039_v43  ;;  %v25255_v30 = vld [vmem:[#allocation46_spill] sm:$0xff] }
 0x6c7   : > { %16117 = vmatprep.subr.mxu1 %v25039_v43  ;;  %16075 = vmatpush3.msra.mxu0 %v25241_v29  ;;  %v15709_v33 = vpop.f32.mrf.mxu1  ;;  %v25278_v29 = vld [vmem:[#allocation52_spill] sm:$0xff] }
 0x6c8   : > { %16118 = vmatpush3.msra.mxu1 %v21697_v11  ;;  %16076 = vmatprep.subr.mxu0 %v25039_v43  ;;  %v25258_v11 = vld [vmem:[#allocation11_spill] sm:$0xff]  ;;  %v25279_v33 = vld [vmem:[#allocation54_spill] sm:$0xff] }
 0x6c9   : > { %16119 = vmatprep.subr.mxu1 %v25039_v43  ;;  %16077 = vmatpush3.msra.mxu0 %v25242_v56 }
 0x6ca   : > { %16120 = vmatpush3.msra.mxu1 %v21715_v14  ;;  %16078 = vmatprep.subr.mxu0 %v25039_v43  ;;  %v25261_v14 = vld [vmem:[#allocation58_spill] sm:$0xff] }
 0x6cb   : > { %16121 = vmatprep.subr.mxu1 %v25039_v43  ;;  %16079 = vmatpush3.msra.mxu0 %v25243_v36 }
 0x6cc   : > { %16122 = vmatpush3.msra.mxu1 %v21731_v0  ;;  %16080 = vmatprep.subr.mxu0 %v25039_v43  ;;  %v25263_v0 = vld [vmem:[#allocation61_spill] sm:$0xff] }
 0x6cd   : > { %16123 = vmatprep.subr.mxu1 %v25039_v43  ;;  %16081 = vmatpush3.msra.mxu0 %v25244_v59 }
 0x6ce   : > { %16124 = vmatpush3.msra.mxu1 %v21746_v15  ;;  %16082 = vmatprep.subr.mxu0 %v25039_v43  ;;  %v4838_v22 = vpop.f32.mrf.mxu0 }
 0x6cf   : > { %16125 = vmatprep.subr.mxu1 %v25039_v43  ;;  %16083 = vmatpush3.msra.mxu0 %v25245_v6  ;;  %v4839_v13 = vadd.f32 %v4838_v22, %v21894_v51 }
 0x6d0   : > { %16126 = vmatpush3.msra.mxu1 %v21758_v17  ;;  %16127 = vmatprep.mubr.msk.f32.mxu1 %vm18151_vm0, %v25039_v43  ;;  %v15674_v2 = vpop.f32.mrf.mxu0  ;;  %v25264_v17 = vld [vmem:[#allocation17_spill] sm:$0xff] }
 0x6d1   : > { %16084 = vmatprep.subr.mxu0 %v25039_v43  ;;  %16128 = vmatmul.mubr.f32.vlgmr.msra.gmra.mxu1 %v20187_v12  ;;  %v4926_v35 = vadd.f32 %v4925_v32, %v4839_v13  ;;  %v25277_v32 = vld [vmem:[#allocation48_spill] sm:$0xff] }
 0x6d2   : > { %16085 = vmatpush3.msra.mxu0 %v25246_v55  ;;  %16092 = vmatprep.mubr.msk.f32.mxu0 %vm18151_vm0, %v25039_v43 }
 0x6d3   : > { %16086 = vmatprep.subr.mxu0 %v25039_v43  ;;  %v4934_v40 = vrot.slane %v4926_v35, %v19781_v54  ;;  %16165 = vmatprep.subr.mxu1 %v25039_v43 }
 0x6d4   : > { %16087 = vmatpush3.msra.mxu0 %v25247_v39  ;;  %16166 = vmatpush3.msra.mxu1 %v25248_v24 }
 0x6d5   : > { %16088 = vmatprep.subr.mxu0 %v25039_v43  ;;  %v4935_v58 = vmul.f32 %v4934_v40, %v21983_v21  ;;  %16167 = vmatprep.subr.mxu1 %v25039_v43 }
 0x6d6   : > { %16089 = vmatpush3.msra.mxu0 %v5810_v52  ;;  %16168 = vmatpush3.msra.mxu1 %v25249_v10  ;;  %v25265_v52 = vld [vmem:[#allocation64_spill] sm:$0xff] }
 0x6d7   : > { %16090 = vmatprep.subr.mxu0 %v25039_v43  ;;  %v21999_v15 = vadd.f32 %v4935_v58, %v21700_v47  ;;  %16169 = vmatprep.subr.mxu1 %v25039_v43  ;;  %v25259_v47 = vld [vmem:[#allocation55_spill] sm:$0xff] }
 0x6d8   : > { %16091 = vmatpush3.msra.mxu0 %v5817_v8  ;;  %16170 = vmatpush3.msra.mxu1 %v25250_v48 }
 0x6d9   : > { %16093 = vmatmul.mubr.f32.vlgmr.msra.gmra.mxu0 %v20187_v12  ;;  %16171 = vmatprep.subr.mxu1 %v25039_v43  ;;  %v25256_v12 = vld [vmem:[#allocation10_spill] sm:$0xff] }
 0x6da   : > { %16172 = vmatpush3.msra.mxu1 %v25251_v28  ;;  %16130 = vmatprep.subr.mxu0 %v25039_v43 }
 0x6db   : > { %16173 = vmatprep.subr.mxu1 %v25039_v43  ;;  %16131 = vmatpush3.msra.mxu0 %v25252_v3 }
 0x6dc   : > { %16174 = vmatpush3.msra.mxu1 %v25253_v7  ;;  %16132 = vmatprep.subr.mxu0 %v25039_v43 }
 0x6dd   : > { %16175 = vmatprep.subr.mxu1 %v25039_v43  ;;  %16133 = vmatpush3.msra.mxu0 %v25254_v53 }
 0x6de   : > { %16176 = vmatpush3.msra.mxu1 %v25255_v30  ;;  %16134 = vmatprep.subr.mxu0 %v25039_v43 }
 0x6df   : > { %16177 = vmatprep.subr.mxu1 %v25039_v43  ;;  %16135 = vmatpush3.msra.mxu0 %v25256_v12 }
 0x6e0   : > { %16178 = vmatpush3.msra.mxu1 %v25257_v42  ;;  %16136 = vmatprep.subr.mxu0 %v25039_v43  ;;  %v8910_v42 = vld [vmem:[#allocation2 + $0x78] sm:$0xff] }
 0x6e1   : > { %16179 = vmatprep.subr.mxu1 %v25039_v43  ;;  %16137 = vmatpush3.msra.mxu0 %v25258_v11 }
 0x6e2   : > { %16180 = vmatpush3.msra.mxu1 %v25259_v47  ;;  %16138 = vmatprep.subr.mxu0 %v25039_v43 }
 0x6e3   : > { %16181 = vmatprep.subr.mxu1 %v25039_v43  ;;  %16139 = vmatpush3.msra.mxu0 %v25260_v57 }
 0x6e4   : > { %16182 = vmatpush3.msra.mxu1 %v25261_v14  ;;  %16140 = vmatprep.subr.mxu0 %v25039_v43 }
 0x6e5   : > { %16183 = vmatprep.subr.mxu1 %v25039_v43  ;;  %16141 = vmatpush3.msra.mxu0 %v25262_v4 }
 0x6e6   : > { %16184 = vmatpush3.msra.mxu1 %v25263_v0  ;;  %16142 = vmatprep.subr.mxu0 %v25039_v43 }
 0x6e7   : > { %v5192_v34 = vpop.f32.mrf.mxu1  ;;  %16185 = vmatprep.subr.mxu1 %v25039_v43  ;;  %16143 = vmatpush3.msra.mxu0 %v25264_v17 }
 0x6e8   : > { %16186 = vmatpush3.msra.mxu1 %v25265_v52  ;;  %16144 = vmatprep.subr.mxu0 %v25039_v43 }
 0x6e9   : > { %v15779_v8 = vpop.f32.mrf.mxu1  ;;  %16187 = vmatprep.subr.mxu1 %v25039_v43  ;;  %16145 = vmatpush3.msra.mxu0 %v25266_v26 }
 0x6ea   : > { %16188 = vmatpush3.msra.mxu1 %v25267_v63  ;;  %16146 = vmatprep.subr.mxu0 %v25039_v43 }
 0x6eb   : > { %16189 = vmatprep.subr.mxu1 %v25039_v43  ;;  %16147 = vmatpush3.msra.mxu0 %v25268_v37 }
 0x6ec   : > { %16190 = vmatpush3.msra.mxu1 %v25269_v62  ;;  %16148 = vmatprep.subr.mxu0 %v25039_v43 }
 0x6ed   : > { %16191 = vmatprep.subr.mxu1 %v25039_v43  ;;  %16149 = vmatpush3.msra.mxu0 %v25270_v38 }
 0x6ee   : > { %16192 = vmatpush3.msra.mxu1 %v25271_v9  ;;  %16150 = vmatprep.subr.mxu0 %v25039_v43 }
 0x6ef   : > { %16193 = vmatprep.subr.mxu1 %v25039_v43  ;;  %16151 = vmatpush3.msra.mxu0 %v25272_v61 }
 0x6f0   : > { %v5041_v41 = vpop.f32.mrf.mxu0  ;;  %16194 = vmatpush3.msra.mxu1 %v25273_v16  ;;  %16152 = vmatprep.subr.mxu0 %v25039_v43 }
 0x6f1   : > { %v5193_v51 = vadd.f32 %v5192_v34, %v5041_v41  ;;  %16195 = vmatprep.subr.mxu1 %v25039_v43  ;;  %16153 = vmatpush3.msra.mxu0 %v25274_v50 }
 0x6f2   : > { %v15744_v27 = vpop.f32.mrf.mxu0  ;;  %16196 = vmatpush3.msra.mxu1 %v25275_v5  ;;  %16154 = vmatprep.subr.mxu0 %v25039_v43 }
 0x6f3   : > { %16197 = vmatprep.mubr.msk.f32.mxu1 %vm18151_vm0, %v25039_v43  ;;  %16235 = vmatprep.subr.mxu1 %v25039_v43 }
 0x6f4   : > { %16155 = vmatpush3.msra.mxu0 %v25276_v19  ;;  %16162 = vmatprep.mubr.msk.f32.mxu0 %vm18151_vm0, %v25039_v43 }
 0x6f5   : > { %16156 = vmatprep.subr.mxu0 %v25039_v43 }
 0x6f6   : > { %16157 = vmatpush3.msra.mxu0 %v25277_v32 }
 0x6f7   : > { %16158 = vmatprep.subr.mxu0 %v25039_v43 }
 0x6f8   : > { %16159 = vmatpush3.msra.mxu0 %v25278_v29 }
 0x6f9   : > { %16160 = vmatprep.subr.mxu0 %v25039_v43 }
 0x6fa   : > { %16161 = vmatpush3.msra.mxu0 %v25279_v33 }
 0x6fb   : > { %16200 = vmatprep.subr.mxu0 %v25039_v43 }
 0x709   : > { %v5385_v56 = vpop.f32.mrf.mxu1 }
 0x70b   : > { %v15849_v36 = vpop.f32.mrf.mxu1 }
 0x712   : > { %v5296_v59 = vpop.f32.mrf.mxu0 }
 0x713   : > { %v5297_v22 = vadd.f32 %v5296_v59, %v5193_v51 }
 0x714   : > { %v15814_v6 = vpop.f32.mrf.mxu0 }
 0x715   : > { %v5386_v13 = vadd.f32 %v5385_v56, %v5297_v22 }
 0x72b   : > { %v5591_v2 = vpop.f32.mrf.mxu1 }
 0x72d   : > { %v15919_v35 = vpop.f32.mrf.mxu1 }
 0x734   : > { %v5504_v55 = vpop.f32.mrf.mxu0 }
 0x735   : > { %v5505_v40 = vadd.f32 %v5504_v55, %v5386_v13 }
 0x736   : > { %v15884_v39 = vpop.f32.mrf.mxu0 }
 0x737   : > { %v5592_v58 = vadd.f32 %v5591_v2, %v5505_v40  ;;  %v6261_v39 = vsub.s32 4, %v18461_v31 }
 0x739   : > { %v5598_v34 = vrot.slane %v5592_v58, %v19781_v54 }
 0x73b   : > { %v5599_v8 = vmul.f32 %v5598_v34, %v21656_v60 }
 0x73d   : > { %v5600_v41 = vadd.f32 %v5599_v8, %v21999_v15 }
 0x74d   : > { %v5856_v27 = vpop.f32.mrf.mxu1 }
 0x74f   : > { %v15989_v5 = vpop.f32.mrf.mxu1 }
 0x756   : > { %v5705_v16 = vpop.f32.mrf.mxu0 }
 0x757   : > { %v5857_v6 = vadd.f32 %v5856_v27, %v5705_v16 }
 0x758   : > { %v15954_v36 = vpop.f32.mrf.mxu0 }
 0x76f   : > { %v6049_v9 = vpop.f32.mrf.mxu1 }
 0x771   : > { %v16059_v51 = vpop.f32.mrf.mxu1 }
 0x772   : > { %v6271_v51 = vld [vmem:[#allocation2 + $0x40] sm:$0xff] }
 0x773   : > { %vm6272_vm5 = vcmp.ne.f32.partialorder %v6271_v51, 0.0  ;;  %v25295_v51 = vld [vmem:[#allocation60_spill] sm:$0xff] }
 0x778   : > { %v5960_v59 = vpop.f32.mrf.mxu0 }
 0x779   : > { %v5961_v13 = vadd.f32 %v5960_v59, %v5857_v6  ;;  %v25280_v59 = vld [vmem:[#allocation69_spill] sm:$0xff] }
 0x77a   : > { %v16024_v56 = vpop.f32.mrf.mxu0 }
 0x77b   : > { %v6050_v55 = vadd.f32 %v6049_v9, %v5961_v13  ;;  %v25281_v13 = vld [vmem:[#allocation14_spill] sm:$0xff] }
 0x791   : > { %v6255_v22 = vpop.f32.mrf.mxu1 }
 0x793   : > { %v16129_v35 = vpop.f32.mrf.mxu1 }
 0x799   : > { %v6168_v2 = vpop.f32.mrf.mxu0 }
 0x79a   : > { %v6169_v40 = vadd.f32 %v6168_v2, %v6050_v55  ;;  %v25282_v55 = vld [vmem:[#allocation15_spill] sm:$0xff]  ;;  %v25283_v2 = vld [vmem:[#allocation16_spill] sm:$0xff] }
 0x79b   : > { %v16094_v60 = vpop.f32.mrf.mxu0 }
 0x79c   : > { %v6256_v58 = vadd.f32 %v6255_v22, %v6169_v40  ;;  %v25284_v40 = vld [vmem:[#allocation18_spill] sm:$0xff]  ;;  %v25286_v60 = vld [vmem:[#allocation23_spill] sm:$0xff] }
 0x79e   : > { %v6262_v15 = vrot.slane %v6256_v58, %v6261_v39  ;;  %v25285_v39 = vld [vmem:[#allocation19_spill] sm:$0xff] }
 0x79f   : > { %v25287_v58 = vld [vmem:[#allocation27_spill] sm:$0xff] }
 0x7a0   : > { %v6263_v5 = vmul.f32 %v6262_v15, %v21983_v21  ;;  %v25288_v15 = vld [vmem:[#allocation34_spill] sm:$0xff] }
 0x7a2   : > { %v6264_v34 = vadd.f32 %v6263_v5, %v5600_v41  ;;  %v25289_v5 = vld [vmem:[#allocation37_spill] sm:$0xff] }
 0x7a4   : > { %v22076_v8 = vsub.f32 %v20184_v18, %v6264_v34  ;;  %v25290_v34 = vld [vmem:[#allocation41_spill] sm:$0xff] }
 0x7a6   : > { %18061 = vrcp.f32 %v22076_v8  ;;  %v6925_v52 = vrot.slane %v22076_v8, %v25280_v59 }
 0x7b3   : > { %v18062_v36 = vpop.eup %18061 }
 0x7b4   : > { %v6267_v16 = vmul.f32 %v18062_v36, %v22076_v8 }
 0x7b6   : > { %v6268_v27 = vsub.f32 2.0, %v6267_v16  ;;  %v25292_v16 = vld [vmem:[#allocation49_spill] sm:$0xff] }
 0x7b8   : > { %v6269_v9 = vmul.f32 %v18062_v36, %v6268_v27  ;;  %v25291_v36 = vld [vmem:[#allocation45_spill] sm:$0xff] }
 0x7b9   : > { %v25293_v27 = vld [vmem:[#allocation53_spill] sm:$0xff] }
 0x7ba   : > { %v6276_v56 = vrot.slane %v6269_v9, %v25280_v59  ;;  %v25294_v9 = vld [vmem:[#allocation57_spill] sm:$0xff] }
 0x7bc   : > { %v6277_v31 = vmul.f32 %v6276_v56, %v22076_v8  ;;  %v25296_v56 = vld [vmem:[#allocation63_spill] sm:$0xff] }
 0x7be   : > { %v22083_v22 = vsel %vm6272_vm5, %v6277_v31, %v22076_v8  ;;  %v25297_v31 = vld [vmem:[#allocation20_spill] sm:$0xff]  ;;  %v25346_v8 = vld [vmem:[#allocation77_spill] sm:$0xff] }
 0x7bf   : > { %v22086_v21 = vand.u32 4294901760, %v22083_v22 }
 0x7c1   : > { %v22090_v18 = vsub.f32 %v22083_v22, %v22086_v21  ;;  %16198 = vmatmul.mubr.f32.vlgmr.msra.gmra.mxu1 %v22086_v21 }
 0x7c2   : > { %16236 = vmatpush3.msra.mxu1 %v25252_v3  ;;  %16267 = vmatprep.mubr.msk.f32.mxu1 %vm18151_vm0, %v25039_v43 }
 0x7c3   : > { %16237 = vmatprep.subr.mxu1 %v25039_v43  ;;  %v6362_v41 = vand.u32 4294901760, %v22090_v18 }
 0x7c4   : > { %16238 = vmatpush3.msra.mxu1 %v25254_v53 }
 0x7c5   : > { %16239 = vmatprep.subr.mxu1 %v25039_v43  ;;  %v6363_v6 = vsub.f32 %v22090_v18, %v6362_v41 }
 0x7c6   : > { %16240 = vmatpush3.msra.mxu1 %v25256_v12 }
 0x7c7   : > { %16241 = vmatprep.subr.mxu1 %v25039_v43  ;;  %v6364_v35 = vand.u32 4294901760, %v6363_v6  ;;  %v25300_v6 = vld [vmem:[#allocation24_spill] sm:$0xff] }
 0x7c8   : > { %16242 = vmatpush3.msra.mxu1 %v25258_v11 }
 0x7c9   : > { %16243 = vmatprep.subr.mxu1 %v25039_v43  ;;  %16163 = vmatmul.mubr.f32.vlgmr.msra.gmra.mxu0 %v6364_v35  ;;  %v25301_v35 = vld [vmem:[#allocation26_spill] sm:$0xff] }
 0x7ca   : > { %16201 = vmatpush3.msra.mxu0 %v25281_v13  ;;  %16244 = vmatpush3.msra.mxu1 %v25260_v57 }
 0x7cb   : > { %16202 = vmatprep.subr.mxu0 %v25039_v43  ;;  %16245 = vmatprep.subr.mxu1 %v25039_v43 }
 0x7cc   : > { %16203 = vmatpush3.msra.mxu0 %v25282_v55  ;;  %16246 = vmatpush3.msra.mxu1 %v25262_v4 }
 0x7cd   : > { %16204 = vmatprep.subr.mxu0 %v25039_v43  ;;  %16247 = vmatprep.subr.mxu1 %v25039_v43 }
 0x7ce   : > { %16205 = vmatpush3.msra.mxu0 %v25283_v2  ;;  %16248 = vmatpush3.msra.mxu1 %v25264_v17 }
 0x7cf   : > { %16206 = vmatprep.subr.mxu0 %v25039_v43  ;;  %16249 = vmatprep.subr.mxu1 %v25039_v43 }
 0x7d0   : > { %16207 = vmatpush3.msra.mxu0 %v25284_v40  ;;  %16250 = vmatpush3.msra.mxu1 %v25266_v26 }
 0x7d1   : > { %16208 = vmatprep.subr.mxu0 %v25039_v43  ;;  %16251 = vmatprep.subr.mxu1 %v25039_v43 }
 0x7d2   : > { %16209 = vmatpush3.msra.mxu0 %v25285_v39  ;;  %16252 = vmatpush3.msra.mxu1 %v25268_v37 }
 0x7d3   : > { %16210 = vmatprep.subr.mxu0 %v25039_v43  ;;  %16253 = vmatprep.subr.mxu1 %v25039_v43 }
 0x7d4   : > { %16211 = vmatpush3.msra.mxu0 %v25286_v60  ;;  %16254 = vmatpush3.msra.mxu1 %v25270_v38 }
 0x7d5   : > { %16212 = vmatprep.subr.mxu0 %v25039_v43  ;;  %16255 = vmatprep.subr.mxu1 %v25039_v43 }
 0x7d6   : > { %16213 = vmatpush3.msra.mxu0 %v25287_v58  ;;  %16256 = vmatpush3.msra.mxu1 %v25272_v61  ;;  %v25343_v58 = vld [vmem:[#allocation122_spill] sm:$0xff] }
 0x7d7   : > { %16214 = vmatprep.subr.mxu0 %v25039_v43  ;;  %16257 = vmatprep.subr.mxu1 %v25039_v43 }
 0x7d8   : > { %16215 = vmatpush3.msra.mxu0 %v25288_v15  ;;  %16258 = vmatpush3.msra.mxu1 %v25274_v50  ;;  %v25340_v15 = vld [vmem:[#allocation136_spill] sm:$0xff] }
 0x7d9   : > { %16216 = vmatprep.subr.mxu0 %v25039_v43  ;;  %16259 = vmatprep.subr.mxu1 %v25039_v43 }
 0x7da   : > { %16217 = vmatpush3.msra.mxu0 %v25289_v5  ;;  %16260 = vmatpush3.msra.mxu1 %v25276_v19  ;;  %v25338_v5 = vld [vmem:[#allocation135_spill] sm:$0xff] }
 0x7db   : > { %16218 = vmatprep.subr.mxu0 %v25039_v43  ;;  %16261 = vmatprep.subr.mxu1 %v25039_v43 }
 0x7dc   : > { %16219 = vmatpush3.msra.mxu0 %v25290_v34  ;;  %16262 = vmatpush3.msra.mxu1 %v25277_v32  ;;  %v25336_v34 = vld [vmem:[#allocation134_spill] sm:$0xff] }
 0x7dd   : > { %16220 = vmatprep.subr.mxu0 %v25039_v43  ;;  %16263 = vmatprep.subr.mxu1 %v25039_v43 }
 0x7de   : > { %16221 = vmatpush3.msra.mxu0 %v25291_v36  ;;  %16264 = vmatpush3.msra.mxu1 %v25278_v29  ;;  %v25334_v36 = vld [vmem:[#allocation133_spill] sm:$0xff] }
 0x7df   : > { %16222 = vmatprep.subr.mxu0 %v25039_v43  ;;  %16265 = vmatprep.subr.mxu1 %v25039_v43 }
 0x7e0   : > { %16223 = vmatpush3.msra.mxu0 %v25292_v16  ;;  %16266 = vmatpush3.msra.mxu1 %v25279_v33  ;;  %v25332_v16 = vld [vmem:[#allocation129_spill] sm:$0xff] }
 0x7e1   : > { %16224 = vmatprep.subr.mxu0 %v25039_v43  ;;  %16268 = vmatmul.mubr.f32.vlgmr.msra.gmra.mxu1 %v6362_v41  ;;  %v25298_v41 = vld [vmem:[#allocation21_spill] sm:$0xff] }
 0x7e2   : > { %16305 = vmatprep.subr.mxu1 %v25039_v43  ;;  %16225 = vmatpush3.msra.mxu0 %v25293_v27  ;;  %v25330_v27 = vld [vmem:[#allocation124_spill] sm:$0xff] }
 0x7e3   : > { %16306 = vmatpush3.msra.mxu1 %v25252_v3  ;;  %16226 = vmatprep.subr.mxu0 %v25039_v43 }
 0x7e4   : > { %16307 = vmatprep.subr.mxu1 %v25039_v43  ;;  %16227 = vmatpush3.msra.mxu0 %v25294_v9  ;;  %v25328_v9 = vld [vmem:[#allocation121_spill] sm:$0xff] }
 0x7e5   : > { %16308 = vmatpush3.msra.mxu1 %v25254_v53  ;;  %16228 = vmatprep.subr.mxu0 %v25039_v43 }
 0x7e6   : > { %16309 = vmatprep.subr.mxu1 %v25039_v43  ;;  %16229 = vmatpush3.msra.mxu0 %v25295_v51  ;;  %v25326_v51 = vld [vmem:[#allocation114_spill] sm:$0xff] }
 0x7e7   : > { %16310 = vmatpush3.msra.mxu1 %v25256_v12  ;;  %16230 = vmatprep.subr.mxu0 %v25039_v43 }
 0x7e8   : > { %16311 = vmatprep.subr.mxu1 %v25039_v43  ;;  %16231 = vmatpush3.msra.mxu0 %v25296_v56  ;;  %v25315_v56 = vld [vmem:[#allocation90_spill] sm:$0xff] }
 0x7e9   : > { %16232 = vmatprep.mubr.msk.f32.mxu0 %vm18151_vm0, %v25039_v43  ;;  %16312 = vmatpush3.msra.mxu1 %v25258_v11 }
 0x7ea   : > { %16233 = vmatmul.mubr.f32.vlgmr.msra.gmra.mxu0 %v22090_v18  ;;  %16270 = vmatprep.subr.mxu0 %v25039_v43  ;;  %v25299_v18 = vld [vmem:[#allocation22_spill] sm:$0xff] }
 0x7eb   : > { %16313 = vmatprep.subr.mxu1 %v25039_v43  ;;  %16271 = vmatpush3.msra.mxu0 %v25297_v31  ;;  %v25313_v31 = vld [vmem:[#allocation86_spill] sm:$0xff] }
 0x7ec   : > { %16314 = vmatpush3.msra.mxu1 %v25260_v57  ;;  %16272 = vmatprep.subr.mxu0 %v25039_v43 }
 0x7ed   : > { %16315 = vmatprep.subr.mxu1 %v25039_v43  ;;  %16273 = vmatpush3.msra.mxu0 %v25298_v41  ;;  %v25312_v41 = vld [vmem:[#allocation65_spill] sm:$0xff] }
 0x7ee   : > { %16316 = vmatpush3.msra.mxu1 %v25262_v4  ;;  %16274 = vmatprep.subr.mxu0 %v25039_v43 }
 0x7ef   : > { %16317 = vmatprep.subr.mxu1 %v25039_v43  ;;  %16275 = vmatpush3.msra.mxu0 %v25299_v18  ;;  %v25302_v18 = vld [vmem:[#allocation29_spill] sm:$0xff] }
 0x7f0   : > { %16318 = vmatpush3.msra.mxu1 %v25264_v17  ;;  %16276 = vmatprep.subr.mxu0 %v25039_v43  ;;  %v6921_v17 = vld [vmem:[#allocation2 + $0x48] sm:$0xff] }
 0x7f1   : > { %16319 = vmatprep.subr.mxu1 %v25039_v43  ;;  %16277 = vmatpush3.msra.mxu0 %v25300_v6  ;;  %v25303_v6 = vld [vmem:[#allocation33_spill] sm:$0xff] }
 0x7f2   : > { %16320 = vmatpush3.msra.mxu1 %v25266_v26  ;;  %16278 = vmatprep.subr.mxu0 %v25039_v43 }
 0x7f3   : > { %16321 = vmatprep.subr.mxu1 %v25039_v43  ;;  %16279 = vmatpush3.msra.mxu0 %v25301_v35  ;;  %v25304_v35 = vld [vmem:[#allocation39_spill] sm:$0xff] }
 0x7f4   : > { %16322 = vmatpush3.msra.mxu1 %v25268_v37  ;;  %16280 = vmatprep.subr.mxu0 %v25039_v43 }
 0x7f5   : > { %16323 = vmatprep.subr.mxu1 %v25039_v43  ;;  %16281 = vmatpush3.msra.mxu0 %v25302_v18  ;;  %v25305_v18 = vld [vmem:[#allocation43_spill] sm:$0xff] }
 0x7f6   : > { %16324 = vmatpush3.msra.mxu1 %v25270_v38  ;;  %16282 = vmatprep.subr.mxu0 %v25039_v43 }
 0x7f7   : > { %16325 = vmatprep.subr.mxu1 %v25039_v43  ;;  %16283 = vmatpush3.msra.mxu0 %v25303_v6  ;;  %v25306_v6 = vld [vmem:[#allocation47_spill] sm:$0xff] }
 0x7f8   : > { %16326 = vmatpush3.msra.mxu1 %v25272_v61  ;;  %16284 = vmatprep.subr.mxu0 %v25039_v43 }
 0x7f9   : > { %16327 = vmatprep.subr.mxu1 %v25039_v43  ;;  %16285 = vmatpush3.msra.mxu0 %v25304_v35  ;;  %v25307_v35 = vld [vmem:[#allocation51_spill] sm:$0xff] }
 0x7fa   : > { %16328 = vmatpush3.msra.mxu1 %v25274_v50  ;;  %16286 = vmatprep.subr.mxu0 %v25039_v43 }
 0x7fb   : > { %16329 = vmatprep.subr.mxu1 %v25039_v43  ;;  %16287 = vmatpush3.msra.mxu0 %v25305_v18  ;;  %v25308_v18 = vld [vmem:[#allocation56_spill] sm:$0xff] }
 0x7fc   : > { %16330 = vmatpush3.msra.mxu1 %v25276_v19  ;;  %16288 = vmatprep.subr.mxu0 %v25039_v43 }
 0x7fd   : > { %16331 = vmatprep.subr.mxu1 %v25039_v43  ;;  %16289 = vmatpush3.msra.mxu0 %v25306_v6  ;;  %v25309_v6 = vld [vmem:[#allocation59_spill] sm:$0xff] }
 0x7fe   : > { %16332 = vmatpush3.msra.mxu1 %v25277_v32  ;;  %16290 = vmatprep.subr.mxu0 %v25039_v43 }
 0x7ff   : > { %16333 = vmatprep.subr.mxu1 %v25039_v43  ;;  %16291 = vmatpush3.msra.mxu0 %v25307_v35  ;;  %v25310_v35 = vld [vmem:[#allocation62_spill] sm:$0xff] }
 0x800   : > { %16334 = vmatpush3.msra.mxu1 %v25278_v29  ;;  %16292 = vmatprep.subr.mxu0 %v25039_v43 }
 0x801   : > { %16335 = vmatprep.subr.mxu1 %v25039_v43  ;;  %16293 = vmatpush3.msra.mxu0 %v25308_v18  ;;  %v25311_v18 = vld [vmem:[#allocation82_spill] sm:$0xff] }
 0x802   : > { %16336 = vmatpush3.msra.mxu1 %v25279_v33  ;;  %16337 = vmatprep.mubr.msk.f32.mxu1 %vm18151_vm0, %v25039_v43 }
 0x803   : > { %16294 = vmatprep.subr.mxu0 %v25039_v43  ;;  %16338 = vmatmul.mubr.f32.vlgmr.msra.gmra.mxu1 %v22086_v21 }
 0x804   : > { %16295 = vmatpush3.msra.mxu0 %v25309_v6  ;;  %16302 = vmatprep.mubr.msk.f32.mxu0 %vm18151_vm0, %v25039_v43  ;;  %v25314_v6 = vld [vmem:[#allocation67_spill] sm:$0xff] }
 0x805   : > { %16296 = vmatprep.subr.mxu0 %v25039_v43  ;;  %16375 = vmatprep.subr.mxu1 %v25039_v43 }
 0x806   : > { %16297 = vmatpush3.msra.mxu0 %v25310_v35  ;;  %16376 = vmatpush3.msra.mxu1 %v25311_v18  ;;  %v25316_v18 = vld [vmem:[#allocation94_spill] sm:$0xff] }
 0x807   : > { %16298 = vmatprep.subr.mxu0 %v25039_v43  ;;  %16377 = vmatprep.subr.mxu1 %v25039_v43  ;;  %v25324_v35 = vld [vmem:[#allocation110_spill] sm:$0xff] }
 0x808   : > { %16299 = vmatpush3.msra.mxu0 %v25312_v41  ;;  %16378 = vmatpush3.msra.mxu1 %v25313_v31  ;;  %v25317_v41 = vld [vmem:[#allocation73_spill] sm:$0xff] }
 0x809   : > { %16300 = vmatprep.subr.mxu0 %v25039_v43  ;;  %16379 = vmatprep.subr.mxu1 %v25039_v43  ;;  %v25318_v31 = vld [vmem:[#allocation101_spill] sm:$0xff] }
 0x80a   : > { %16301 = vmatpush3.msra.mxu0 %v25314_v6  ;;  %16380 = vmatpush3.msra.mxu1 %v25315_v56  ;;  %v25319_v6 = vld [vmem:[#allocation75_spill] sm:$0xff]  ;;  %v25320_v56 = vld [vmem:[#allocation102_spill] sm:$0xff] }
 0x80b   : > { %16303 = vmatmul.mubr.f32.vlgmr.msra.gmra.mxu0 %v22086_v21  ;;  %16381 = vmatprep.subr.mxu1 %v25039_v43  ;;  %v25321_v21 = vld [vmem:[#allocation78_spill] sm:$0xff] }
 0x80c   : > { %16382 = vmatpush3.msra.mxu1 %v25316_v18  ;;  %16340 = vmatprep.subr.mxu0 %v25039_v43  ;;  %v25322_v18 = vld [vmem:[#allocation106_spill] sm:$0xff] }
 0x80d   : > { %16383 = vmatprep.subr.mxu1 %v25039_v43  ;;  %16341 = vmatpush3.msra.mxu0 %v25317_v41 }
 0x80e   : > { %16384 = vmatpush3.msra.mxu1 %v25318_v31  ;;  %16342 = vmatprep.subr.mxu0 %v25039_v43  ;;  %v25323_v31 = vld [vmem:[#allocation81_spill] sm:$0xff] }
 0x80f   : > { %16385 = vmatprep.subr.mxu1 %v25039_v43  ;;  %16343 = vmatpush3.msra.mxu0 %v25319_v6 }
 0x810   : > { %16386 = vmatpush3.msra.mxu1 %v25320_v56  ;;  %16344 = vmatprep.subr.mxu0 %v25039_v43  ;;  %v25325_v56 = vld [vmem:[#allocation85_spill] sm:$0xff] }
 0x811   : > { %16387 = vmatprep.subr.mxu1 %v25039_v43  ;;  %16345 = vmatpush3.msra.mxu0 %v25321_v21 }
 0x812   : > { %16388 = vmatpush3.msra.mxu1 %v25322_v18  ;;  %16346 = vmatprep.subr.mxu0 %v25039_v43  ;;  %v25327_v18 = vld [vmem:[#allocation88_spill] sm:$0xff] }
 0x813   : > { %16389 = vmatprep.subr.mxu1 %v25039_v43  ;;  %16347 = vmatpush3.msra.mxu0 %v25323_v31 }
 0x814   : > { %16390 = vmatpush3.msra.mxu1 %v25324_v35  ;;  %16348 = vmatprep.subr.mxu0 %v25039_v43  ;;  %v25329_v35 = vld [vmem:[#allocation92_spill] sm:$0xff] }
 0x815   : > { %16391 = vmatprep.subr.mxu1 %v25039_v43  ;;  %16349 = vmatpush3.msra.mxu0 %v25325_v56 }
 0x816   : > { %16392 = vmatpush3.msra.mxu1 %v25326_v51  ;;  %16350 = vmatprep.subr.mxu0 %v25039_v43  ;;  %v25331_v51 = vld [vmem:[#allocation97_spill] sm:$0xff] }
 0x817   : > { %16393 = vmatprep.subr.mxu1 %v25039_v43  ;;  %16351 = vmatpush3.msra.mxu0 %v25327_v18 }
 0x818   : > { %16394 = vmatpush3.msra.mxu1 %v25328_v9  ;;  %16352 = vmatprep.subr.mxu0 %v25039_v43  ;;  %v25333_v9 = vld [vmem:[#allocation100_spill] sm:$0xff] }
 0x819   : > { %16395 = vmatprep.subr.mxu1 %v25039_v43  ;;  %16353 = vmatpush3.msra.mxu0 %v25329_v35 }
 0x81a   : > { %16396 = vmatpush3.msra.mxu1 %v25330_v27  ;;  %16354 = vmatprep.subr.mxu0 %v25039_v43  ;;  %v25335_v27 = vld [vmem:[#allocation105_spill] sm:$0xff] }
 0x81b   : > { %16397 = vmatprep.subr.mxu1 %v25039_v43  ;;  %16355 = vmatpush3.msra.mxu0 %v25331_v51 }
 0x81c   : > { %16398 = vmatpush3.msra.mxu1 %v25332_v16  ;;  %16356 = vmatprep.subr.mxu0 %v25039_v43  ;;  %v25337_v16 = vld [vmem:[#allocation108_spill] sm:$0xff] }
 0x81d   : > { %16399 = vmatprep.subr.mxu1 %v25039_v43  ;;  %16357 = vmatpush3.msra.mxu0 %v25333_v9 }
 0x81e   : > { %16400 = vmatpush3.msra.mxu1 %v25334_v36  ;;  %16358 = vmatprep.subr.mxu0 %v25039_v43  ;;  %v25339_v36 = vld [vmem:[#allocation112_spill] sm:$0xff] }
 0x81f   : > { %16401 = vmatprep.subr.mxu1 %v25039_v43  ;;  %16359 = vmatpush3.msra.mxu0 %v25335_v27 }
 0x820   : > { %16402 = vmatpush3.msra.mxu1 %v25336_v34  ;;  %16360 = vmatprep.subr.mxu0 %v25039_v43  ;;  %v25341_v34 = vld [vmem:[#allocation117_spill] sm:$0xff] }
 0x821   : > { %16403 = vmatprep.subr.mxu1 %v25039_v43  ;;  %16361 = vmatpush3.msra.mxu0 %v25337_v16 }
 0x822   : > { %16404 = vmatpush3.msra.mxu1 %v25338_v5  ;;  %16362 = vmatprep.subr.mxu0 %v25039_v43  ;;  %v25342_v5 = vld [vmem:[#allocation120_spill] sm:$0xff] }
 0x823   : > { %16405 = vmatprep.subr.mxu1 %v25039_v43  ;;  %16363 = vmatpush3.msra.mxu0 %v25339_v36 }
 0x824   : > { %16406 = vmatpush3.msra.mxu1 %v25340_v15  ;;  %16364 = vmatprep.subr.mxu0 %v25039_v43  ;;  %v25344_v15 = vld [vmem:[#allocation123_spill] sm:$0xff] }
 0x825   : > { %16407 = vmatprep.mubr.msk.f32.mxu1 %vm18151_vm0, %v25039_v43  ;;  %16445 = vmatprep.subr.mxu1 %v25039_v43 }
 0x826   : > { %16365 = vmatpush3.msra.mxu0 %v25341_v34  ;;  %16372 = vmatprep.mubr.msk.f32.mxu0 %vm18151_vm0, %v25039_v43 }
 0x827   : > { %16366 = vmatprep.subr.mxu0 %v25039_v43 }
 0x828   : > { %16367 = vmatpush3.msra.mxu0 %v25342_v5 }
 0x829   : > { %16368 = vmatprep.subr.mxu0 %v25039_v43 }
 0x82a   : > { %16369 = vmatpush3.msra.mxu0 %v25343_v58 }
 0x82b   : > { %16370 = vmatprep.subr.mxu0 %v25039_v43 }
 0x82c   : > { %16371 = vmatpush3.msra.mxu0 %v25344_v15 }
 0x82d   : > { %16410 = vmatprep.subr.mxu0 %v25039_v43 }
 0x881   : > { %v6517_v60 = vpop.f32.mrf.mxu1 }
 0x883   : > { %v16199_v39 = vpop.f32.mrf.mxu1 }
 0x889   : > { %v6366_v40 = vpop.f32.mrf.mxu0 }
 0x88a   : > { %v6518_v19 = vadd.f32 %v6517_v60, %v6366_v40  ;;  %v25350_v40 = vld [vmem:[#allocation91_spill] sm:$0xff]  ;;  %v25351_v60 = vld [vmem:[#allocation96_spill] sm:$0xff] }
 0x88b   : > { %v16164_v2 = vpop.f32.mrf.mxu0 }
 0x8a1   : > { %v6710_v55 = vpop.f32.mrf.mxu1 }
 0x8a3   : > { %v16269_v13 = vpop.f32.mrf.mxu1 }
 0x8a4   : > { %v25348_v13 = vld [vmem:[#allocation84_spill] sm:$0xff] }
 0x8aa   : > { %v6621_v33 = vpop.f32.mrf.mxu0 }
 0x8ab   : > { %v6622_v61 = vadd.f32 %v6621_v33, %v6518_v19  ;;  %v6934_v33 = vld [vmem:[#allocation2 + $0x50] sm:$0xff] }
 0x8ac   : > { %v16234_v29 = vpop.f32.mrf.mxu0  ;;  %vm6935_vm6 = vcmp.ne.f32.partialorder %v6934_v33, 0.0  ;;  %v25357_v33 = vld [vmem:[#allocation119_spill] sm:$0xff] }
 0x8ad   : > { %v6711_v38 = vadd.f32 %v6710_v55, %v6622_v61  ;;  %v25349_v55 = vld [vmem:[#allocation89_spill] sm:$0xff] }
 0x8c3   : > { %v6916_v32 = vpop.f32.mrf.mxu1 }
 0x8c5   : > { %v16339_v50 = vpop.f32.mrf.mxu1 }
 0x8cb   : > { %v6829_v62 = vpop.f32.mrf.mxu0 }
 0x8cc   : > { %v6830_v37 = vadd.f32 %v6829_v62, %v6711_v38 }
 0x8cd   : > { %v16304_v63 = vpop.f32.mrf.mxu0 }
 0x8ce   : > { %v6917_v26 = vadd.f32 %v6916_v32, %v6830_v37  ;;  %v25345_v32 = vld [vmem:[#allocation74_spill] sm:$0xff] }
 0x8d0   : > { %v6926_v39 = vmul.f32 %v6925_v52, %v6917_v26 }
 0x8d2   : > { %v6927_v0 = vmul.f32 %v6926_v39, %v6921_v17  ;;  %v25352_v39 = vld [vmem:[#allocation99_spill] sm:$0xff] }
 0x8d4   : > { %v22305_v2 = vsub.f32 %v22083_v22, %v6927_v0  ;;  %v25347_v22 = vld [vmem:[#allocation80_spill] sm:$0xff] }
 0x8d6   : > { %18063 = vrcp.f32 %v22305_v2 }
 0x8e3   : > { %v18064_v29 = vpop.eup %18063 }
 0x8e4   : > { %v6930_v50 = vmul.f32 %v18064_v29, %v22305_v2 }
 0x8e6   : > { %v6931_v19 = vsub.f32 2.0, %v6930_v50  ;;  %v25354_v50 = vld [vmem:[#allocation109_spill] sm:$0xff] }
 0x8e8   : > { %v6932_v61 = vmul.f32 %v18064_v29, %v6931_v19  ;;  %v25353_v29 = vld [vmem:[#allocation104_spill] sm:$0xff]  ;;  %v25355_v19 = vld [vmem:[#allocation111_spill] sm:$0xff] }
 0x8ea   : > { %v6939_v63 = vrot.slane %v6932_v61, %v25234_v45  ;;  %v25356_v61 = vld [vmem:[#allocation116_spill] sm:$0xff] }
 0x8ec   : > { %v6940_v37 = vmul.f32 %v6939_v63, %v22305_v2  ;;  %v25358_v63 = vld [vmem:[#allocation126_spill] sm:$0xff] }
 0x8ee   : > { %v22312_v62 = vsel %vm6935_vm6, %v6940_v37, %v22305_v2  ;;  %v25359_v37 = vld [vmem:[#allocation127_spill] sm:$0xff] }
 0x8ef   : > { %v22315_v17 = vand.u32 4294901760, %v22312_v62 }
 0x8f1   : > { %v22319_v0 = vsub.f32 %v22312_v62, %v22315_v17  ;;  %16408 = vmatmul.mubr.f32.vlgmr.msra.gmra.mxu1 %v22315_v17 }
 0x8f2   : > { %16446 = vmatpush3.msra.mxu1 %v25317_v41  ;;  %16477 = vmatprep.mubr.msk.f32.mxu1 %vm18151_vm0, %v25039_v43 }
 0x8f3   : > { %16447 = vmatprep.subr.mxu1 %v25039_v43  ;;  %v7025_v52 = vand.u32 4294901760, %v22319_v0 }
 0x8f4   : > { %16448 = vmatpush3.msra.mxu1 %v25319_v6 }
 0x8f5   : > { %16449 = vmatprep.subr.mxu1 %v25039_v43  ;;  %v7026_v26 = vsub.f32 %v22319_v0, %v7025_v52 }
 0x8f6   : > { %16450 = vmatpush3.msra.mxu1 %v25321_v21 }
 0x8f7   : > { %16451 = vmatprep.subr.mxu1 %v25039_v43  ;;  %v7027_v38 = vand.u32 4294901760, %v7026_v26  ;;  %v25361_v26 = vld [vmem:[#allocation76_spill] sm:$0xff] }
 0x8f8   : > { %16452 = vmatpush3.msra.mxu1 %v25323_v31 }
 0x8f9   : > { %16453 = vmatprep.subr.mxu1 %v25039_v43  ;;  %16373 = vmatmul.mubr.f32.vlgmr.msra.gmra.mxu0 %v7027_v38  ;;  %v25362_v38 = vld [vmem:[#allocation79_spill] sm:$0xff] }
 0x8fa   : > { %16411 = vmatpush3.msra.mxu0 %v25345_v32  ;;  %16454 = vmatpush3.msra.mxu1 %v25325_v56 }
 0x8fb   : > { %16412 = vmatprep.subr.mxu0 %v25039_v43  ;;  %16455 = vmatprep.subr.mxu1 %v25039_v43 }
 0x8fc   : > { %16413 = vmatpush3.msra.mxu0 %v25346_v8  ;;  %16456 = vmatpush3.msra.mxu1 %v25327_v18 }
 0x8fd   : > { %16414 = vmatprep.subr.mxu0 %v25039_v43  ;;  %16457 = vmatprep.subr.mxu1 %v25039_v43 }
 0x8fe   : > { %16415 = vmatpush3.msra.mxu0 %v25347_v22  ;;  %16458 = vmatpush3.msra.mxu1 %v25329_v35 }
 0x8ff   : > { %16416 = vmatprep.subr.mxu0 %v25039_v43  ;;  %16459 = vmatprep.subr.mxu1 %v25039_v43 }
 0x900   : > { %16417 = vmatpush3.msra.mxu0 %v25348_v13  ;;  %16460 = vmatpush3.msra.mxu1 %v25331_v51 }
 0x901   : > { %16418 = vmatprep.subr.mxu0 %v25039_v43  ;;  %16461 = vmatprep.subr.mxu1 %v25039_v43 }
 0x902   : > { %16419 = vmatpush3.msra.mxu0 %v25349_v55  ;;  %16462 = vmatpush3.msra.mxu1 %v25333_v9  ;;  %v25407_v55 = vld [vmem:[#allocation186_spill] sm:$0xff] }
 0x903   : > { %16420 = vmatprep.subr.mxu0 %v25039_v43  ;;  %16463 = vmatprep.subr.mxu1 %v25039_v43 }
 0x904   : > { %16421 = vmatpush3.msra.mxu0 %v25350_v40  ;;  %16464 = vmatpush3.msra.mxu1 %v25335_v27  ;;  %v25404_v40 = vld [vmem:[#allocation201_spill] sm:$0xff] }
 0x905   : > { %16422 = vmatprep.subr.mxu0 %v25039_v43  ;;  %16465 = vmatprep.subr.mxu1 %v25039_v43 }
 0x906   : > { %16423 = vmatpush3.msra.mxu0 %v25351_v60  ;;  %16466 = vmatpush3.msra.mxu1 %v25337_v16  ;;  %v25402_v60 = vld [vmem:[#allocation200_spill] sm:$0xff] }
 0x907   : > { %16424 = vmatprep.subr.mxu0 %v25039_v43  ;;  %16467 = vmatprep.subr.mxu1 %v25039_v43 }
 0x908   : > { %16425 = vmatpush3.msra.mxu0 %v25352_v39  ;;  %16468 = vmatpush3.msra.mxu1 %v25339_v36  ;;  %v25400_v39 = vld [vmem:[#allocation199_spill] sm:$0xff] }
 0x909   : > { %16426 = vmatprep.subr.mxu0 %v25039_v43  ;;  %16469 = vmatprep.subr.mxu1 %v25039_v43 }
 0x90a   : > { %16427 = vmatpush3.msra.mxu0 %v25353_v29  ;;  %16470 = vmatpush3.msra.mxu1 %v25341_v34  ;;  %v25398_v29 = vld [vmem:[#allocation198_spill] sm:$0xff] }
 0x90b   : > { %16428 = vmatprep.subr.mxu0 %v25039_v43  ;;  %16471 = vmatprep.subr.mxu1 %v25039_v43 }
 0x90c   : > { %16429 = vmatpush3.msra.mxu0 %v25354_v50  ;;  %16472 = vmatpush3.msra.mxu1 %v25342_v5  ;;  %v25396_v50 = vld [vmem:[#allocation196_spill] sm:$0xff] }
 0x90d   : > { %16430 = vmatprep.subr.mxu0 %v25039_v43  ;;  %16473 = vmatprep.subr.mxu1 %v25039_v43 }
 0x90e   : > { %16431 = vmatpush3.msra.mxu0 %v25355_v19  ;;  %16474 = vmatpush3.msra.mxu1 %v25343_v58  ;;  %v25394_v19 = vld [vmem:[#allocation194_spill] sm:$0xff] }
 0x90f   : > { %16432 = vmatprep.subr.mxu0 %v25039_v43  ;;  %16475 = vmatprep.subr.mxu1 %v25039_v43 }
 0x910   : > { %16433 = vmatpush3.msra.mxu0 %v25356_v61  ;;  %16476 = vmatpush3.msra.mxu1 %v25344_v15  ;;  %v25392_v61 = vld [vmem:[#allocation191_spill] sm:$0xff] }
 0x911   : > { %16434 = vmatprep.subr.mxu0 %v25039_v43  ;;  %16478 = vmatmul.mubr.f32.vlgmr.msra.gmra.mxu1 %v7025_v52  ;;  %v25360_v52 = vld [vmem:[#allocation128_spill] sm:$0xff] }
 0x912   : > { %16515 = vmatprep.subr.mxu1 %v25039_v43  ;;  %16435 = vmatpush3.msra.mxu0 %v25357_v33  ;;  %v25390_v33 = vld [vmem:[#allocation187_spill] sm:$0xff] }
 0x913   : > { %16516 = vmatpush3.msra.mxu1 %v25317_v41  ;;  %16436 = vmatprep.subr.mxu0 %v25039_v43 }
 0x914   : > { %16517 = vmatprep.subr.mxu1 %v25039_v43  ;;  %16437 = vmatpush3.msra.mxu0 %v25358_v63  ;;  %v25379_v63 = vld [vmem:[#allocation155_spill] sm:$0xff] }
 0x915   : > { %16518 = vmatpush3.msra.mxu1 %v25319_v6  ;;  %16438 = vmatprep.subr.mxu0 %v25039_v43  ;;  %v7584_v6 = vld [vmem:[#allocation2 + $0x58] sm:$0xff] }
 0x916   : > { %16519 = vmatprep.subr.mxu1 %v25039_v43  ;;  %16439 = vmatpush3.msra.mxu0 %v25359_v37  ;;  %v25377_v37 = vld [vmem:[#allocation151_spill] sm:$0xff] }
 0x917   : > { %16520 = vmatpush3.msra.mxu1 %v25321_v21  ;;  %16440 = vmatprep.subr.mxu0 %v25039_v43  ;;  %v7588_v21 = vrot.slane %v22305_v2, %v25234_v45  ;;  %v25412_v2 = vld [vmem:[#allocation149_spill] sm:$0xff] }
 0x918   : > { %16521 = vmatprep.subr.mxu1 %v25039_v43  ;;  %16441 = vmatpush3.msra.mxu0 %v25360_v52  ;;  %v25376_v52 = vld [vmem:[#allocation131_spill] sm:$0xff] }
 0x919   : > { %16442 = vmatprep.mubr.msk.f32.mxu0 %vm18151_vm0, %v25039_v43  ;;  %16522 = vmatpush3.msra.mxu1 %v25323_v31 }
 0x91a   : > { %16443 = vmatmul.mubr.f32.vlgmr.msra.gmra.mxu0 %v22319_v0  ;;  %16480 = vmatprep.subr.mxu0 %v25039_v43  ;;  %v25363_v0 = vld [vmem:[#allocation83_spill] sm:$0xff] }
 0x91b   : > { %16523 = vmatprep.subr.mxu1 %v25039_v43  ;;  %16481 = vmatpush3.msra.mxu0 %v25361_v26  ;;  %v25364_v26 = vld [vmem:[#allocation87_spill] sm:$0xff] }
 0x91c   : > { %16524 = vmatpush3.msra.mxu1 %v25325_v56  ;;  %16482 = vmatprep.subr.mxu0 %v25039_v43 }
 0x91d   : > { %16525 = vmatprep.subr.mxu1 %v25039_v43  ;;  %16483 = vmatpush3.msra.mxu0 %v25362_v38  ;;  %v25365_v38 = vld [vmem:[#allocation93_spill] sm:$0xff] }
 0x91e   : > { %16526 = vmatpush3.msra.mxu1 %v25327_v18  ;;  %16484 = vmatprep.subr.mxu0 %v25039_v43 }
 0x91f   : > { %16527 = vmatprep.subr.mxu1 %v25039_v43  ;;  %16485 = vmatpush3.msra.mxu0 %v25363_v0  ;;  %v25366_v0 = vld [vmem:[#allocation95_spill] sm:$0xff] }
 0x920   : > { %16528 = vmatpush3.msra.mxu1 %v25329_v35  ;;  %16486 = vmatprep.subr.mxu0 %v25039_v43 }
 0x921   : > { %16529 = vmatprep.subr.mxu1 %v25039_v43  ;;  %16487 = vmatpush3.msra.mxu0 %v25364_v26  ;;  %v25367_v26 = vld [vmem:[#allocation98_spill] sm:$0xff] }
 0x922   : > { %16530 = vmatpush3.msra.mxu1 %v25331_v51  ;;  %16488 = vmatprep.subr.mxu0 %v25039_v43 }
 0x923   : > { %16531 = vmatprep.subr.mxu1 %v25039_v43  ;;  %16489 = vmatpush3.msra.mxu0 %v25365_v38  ;;  %v25368_v38 = vld [vmem:[#allocation103_spill] sm:$0xff] }
 0x924   : > { %16532 = vmatpush3.msra.mxu1 %v25333_v9  ;;  %16490 = vmatprep.subr.mxu0 %v25039_v43 }
 0x925   : > { %16533 = vmatprep.subr.mxu1 %v25039_v43  ;;  %16491 = vmatpush3.msra.mxu0 %v25366_v0  ;;  %v25369_v0 = vld [vmem:[#allocation107_spill] sm:$0xff] }
 0x926   : > { %16534 = vmatpush3.msra.mxu1 %v25335_v27  ;;  %16492 = vmatprep.subr.mxu0 %v25039_v43 }
 0x927   : > { %16535 = vmatprep.subr.mxu1 %v25039_v43  ;;  %16493 = vmatpush3.msra.mxu0 %v25367_v26  ;;  %v25370_v26 = vld [vmem:[#allocation113_spill] sm:$0xff] }
 0x928   : > { %16536 = vmatpush3.msra.mxu1 %v25337_v16  ;;  %16494 = vmatprep.subr.mxu0 %v25039_v43 }
 0x929   : > { %16537 = vmatprep.subr.mxu1 %v25039_v43  ;;  %16495 = vmatpush3.msra.mxu0 %v25368_v38  ;;  %v25371_v38 = vld [vmem:[#allocation115_spill] sm:$0xff] }
 0x92a   : > { %16538 = vmatpush3.msra.mxu1 %v25339_v36  ;;  %16496 = vmatprep.subr.mxu0 %v25039_v43 }
 0x92b   : > { %16539 = vmatprep.subr.mxu1 %v25039_v43  ;;  %16497 = vmatpush3.msra.mxu0 %v25369_v0  ;;  %v25372_v0 = vld [vmem:[#allocation118_spill] sm:$0xff] }
 0x92c   : > { %16540 = vmatpush3.msra.mxu1 %v25341_v34  ;;  %16498 = vmatprep.subr.mxu0 %v25039_v43 }
 0x92d   : > { %16541 = vmatprep.subr.mxu1 %v25039_v43  ;;  %16499 = vmatpush3.msra.mxu0 %v25370_v26  ;;  %v25373_v26 = vld [vmem:[#allocation125_spill] sm:$0xff] }
 0x92e   : > { %16542 = vmatpush3.msra.mxu1 %v25342_v5  ;;  %16500 = vmatprep.subr.mxu0 %v25039_v43 }
 0x92f   : > { %16543 = vmatprep.subr.mxu1 %v25039_v43  ;;  %16501 = vmatpush3.msra.mxu0 %v25371_v38  ;;  %v25374_v38 = vld [vmem:[#allocation130_spill] sm:$0xff] }
 0x930   : > { %16544 = vmatpush3.msra.mxu1 %v25343_v58  ;;  %16502 = vmatprep.subr.mxu0 %v25039_v43 }
 0x931   : > { %16545 = vmatprep.subr.mxu1 %v25039_v43  ;;  %16503 = vmatpush3.msra.mxu0 %v25372_v0  ;;  %v25375_v0 = vld [vmem:[#allocation147_spill] sm:$0xff] }
 0x932   : > { %16546 = vmatpush3.msra.mxu1 %v25344_v15  ;;  %16547 = vmatprep.mubr.msk.f32.mxu1 %vm18151_vm0, %v25039_v43 }
 0x933   : > { %16504 = vmatprep.subr.mxu0 %v25039_v43  ;;  %16548 = vmatmul.mubr.f32.vlgmr.msra.gmra.mxu1 %v22315_v17 }
 0x934   : > { %16505 = vmatpush3.msra.mxu0 %v25373_v26  ;;  %16512 = vmatprep.mubr.msk.f32.mxu0 %vm18151_vm0, %v25039_v43  ;;  %v25378_v26 = vld [vmem:[#allocation132_spill] sm:$0xff] }
 0x935   : > { %16506 = vmatprep.subr.mxu0 %v25039_v43  ;;  %16585 = vmatprep.subr.mxu1 %v25039_v43 }
 0x936   : > { %16507 = vmatpush3.msra.mxu0 %v25374_v38  ;;  %16586 = vmatpush3.msra.mxu1 %v25375_v0  ;;  %v25380_v0 = vld [vmem:[#allocation159_spill] sm:$0xff]  ;;  %v25388_v38 = vld [vmem:[#allocation184_spill] sm:$0xff] }
 0x937   : > { %16508 = vmatprep.subr.mxu0 %v25039_v43  ;;  %16587 = vmatprep.subr.mxu1 %v25039_v43 }
 0x938   : > { %16509 = vmatpush3.msra.mxu0 %v25376_v52  ;;  %16588 = vmatpush3.msra.mxu1 %v25377_v37  ;;  %v25381_v52 = vld [vmem:[#allocation138_spill] sm:$0xff]  ;;  %v25382_v37 = vld [vmem:[#allocation169_spill] sm:$0xff] }
 0x939   : > { %16510 = vmatprep.subr.mxu0 %v25039_v43  ;;  %16589 = vmatprep.subr.mxu1 %v25039_v43 }
 0x93a   : > { %16511 = vmatpush3.msra.mxu0 %v25378_v26  ;;  %16590 = vmatpush3.msra.mxu1 %v25379_v63  ;;  %v25383_v26 = vld [vmem:[#allocation140_spill] sm:$0xff]  ;;  %v25384_v63 = vld [vmem:[#allocation173_spill] sm:$0xff] }
 0x93b   : > { %16513 = vmatmul.mubr.f32.vlgmr.msra.gmra.mxu0 %v22315_v17  ;;  %16591 = vmatprep.subr.mxu1 %v25039_v43  ;;  %v25385_v17 = vld [vmem:[#allocation143_spill] sm:$0xff] }
 0x93c   : > { %16592 = vmatpush3.msra.mxu1 %v25380_v0  ;;  %16550 = vmatprep.subr.mxu0 %v25039_v43  ;;  %v25386_v0 = vld [vmem:[#allocation180_spill] sm:$0xff] }
 0x93d   : > { %16593 = vmatprep.subr.mxu1 %v25039_v43  ;;  %16551 = vmatpush3.msra.mxu0 %v25381_v52 }
 0x93e   : > { %16594 = vmatpush3.msra.mxu1 %v25382_v37  ;;  %16552 = vmatprep.subr.mxu0 %v25039_v43  ;;  %v25387_v37 = vld [vmem:[#allocation146_spill] sm:$0xff] }
 0x93f   : > { %16595 = vmatprep.subr.mxu1 %v25039_v43  ;;  %16553 = vmatpush3.msra.mxu0 %v25383_v26 }
 0x940   : > { %16596 = vmatpush3.msra.mxu1 %v25384_v63  ;;  %16554 = vmatprep.subr.mxu0 %v25039_v43  ;;  %v25389_v63 = vld [vmem:[#allocation150_spill] sm:$0xff] }
 0x941   : > { %16597 = vmatprep.subr.mxu1 %v25039_v43  ;;  %16555 = vmatpush3.msra.mxu0 %v25385_v17 }
 0x942   : > { %16598 = vmatpush3.msra.mxu1 %v25386_v0  ;;  %16556 = vmatprep.subr.mxu0 %v25039_v43  ;;  %v25391_v0 = vld [vmem:[#allocation153_spill] sm:$0xff] }
 0x943   : > { %16599 = vmatprep.subr.mxu1 %v25039_v43  ;;  %16557 = vmatpush3.msra.mxu0 %v25387_v37 }
 0x944   : > { %16600 = vmatpush3.msra.mxu1 %v25388_v38  ;;  %16558 = vmatprep.subr.mxu0 %v25039_v43  ;;  %v25393_v38 = vld [vmem:[#allocation157_spill] sm:$0xff] }
 0x945   : > { %16601 = vmatprep.subr.mxu1 %v25039_v43  ;;  %16559 = vmatpush3.msra.mxu0 %v25389_v63 }
 0x946   : > { %16602 = vmatpush3.msra.mxu1 %v25390_v33  ;;  %16560 = vmatprep.subr.mxu0 %v25039_v43  ;;  %v25395_v33 = vld [vmem:[#allocation162_spill] sm:$0xff] }
 0x947   : > { %16603 = vmatprep.subr.mxu1 %v25039_v43  ;;  %16561 = vmatpush3.msra.mxu0 %v25391_v0 }
 0x948   : > { %16604 = vmatpush3.msra.mxu1 %v25392_v61  ;;  %16562 = vmatprep.subr.mxu0 %v25039_v43  ;;  %v25397_v61 = vld [vmem:[#allocation163_spill] sm:$0xff] }
 0x949   : > { %16605 = vmatprep.subr.mxu1 %v25039_v43  ;;  %16563 = vmatpush3.msra.mxu0 %v25393_v38 }
 0x94a   : > { %16606 = vmatpush3.msra.mxu1 %v25394_v19  ;;  %16564 = vmatprep.subr.mxu0 %v25039_v43  ;;  %v25399_v19 = vld [vmem:[#allocation164_spill] sm:$0xff] }
 0x94b   : > { %16607 = vmatprep.subr.mxu1 %v25039_v43  ;;  %16565 = vmatpush3.msra.mxu0 %v25395_v33 }
 0x94c   : > { %16608 = vmatpush3.msra.mxu1 %v25396_v50  ;;  %16566 = vmatprep.subr.mxu0 %v25039_v43  ;;  %v25401_v50 = vld [vmem:[#allocation165_spill] sm:$0xff] }
 0x94d   : > { %16609 = vmatprep.subr.mxu1 %v25039_v43  ;;  %16567 = vmatpush3.msra.mxu0 %v25397_v61 }
 0x94e   : > { %16610 = vmatpush3.msra.mxu1 %v25398_v29  ;;  %16568 = vmatprep.subr.mxu0 %v25039_v43  ;;  %v25403_v29 = vld [vmem:[#allocation168_spill] sm:$0xff] }
 0x94f   : > { %16611 = vmatprep.subr.mxu1 %v25039_v43  ;;  %16569 = vmatpush3.msra.mxu0 %v25399_v19 }
 0x950   : > { %16612 = vmatpush3.msra.mxu1 %v25400_v39  ;;  %16570 = vmatprep.subr.mxu0 %v25039_v43  ;;  %v25405_v39 = vld [vmem:[#allocation179_spill] sm:$0xff] }
 0x951   : > { %16613 = vmatprep.subr.mxu1 %v25039_v43  ;;  %16571 = vmatpush3.msra.mxu0 %v25401_v50 }
 0x952   : > { %16614 = vmatpush3.msra.mxu1 %v25402_v60  ;;  %16572 = vmatprep.subr.mxu0 %v25039_v43  ;;  %v25406_v60 = vld [vmem:[#allocation181_spill] sm:$0xff] }
 0x953   : > { %16615 = vmatprep.subr.mxu1 %v25039_v43  ;;  %16573 = vmatpush3.msra.mxu0 %v25403_v29 }
 0x954   : > { %16616 = vmatpush3.msra.mxu1 %v25404_v40  ;;  %16574 = vmatprep.subr.mxu0 %v25039_v43  ;;  %v25408_v40 = vld [vmem:[#allocation190_spill] sm:$0xff] }
 0x955   : > { %16617 = vmatprep.mubr.msk.f32.mxu1 %vm18151_vm0, %v25039_v43  ;;  %16655 = vmatprep.subr.mxu1 %v25039_v43 }
 0x956   : > { %16575 = vmatpush3.msra.mxu0 %v25405_v39  ;;  %16582 = vmatprep.mubr.msk.f32.mxu0 %vm18151_vm0, %v25039_v43 }
 0x957   : > { %16576 = vmatprep.subr.mxu0 %v25039_v43 }
 0x958   : > { %16577 = vmatpush3.msra.mxu0 %v25406_v60 }
 0x959   : > { %16578 = vmatprep.subr.mxu0 %v25039_v43 }
 0x95a   : > { %16579 = vmatpush3.msra.mxu0 %v25407_v55 }
 0x95b   : > { %16580 = vmatprep.subr.mxu0 %v25039_v43 }
 0x95c   : > { %16581 = vmatpush3.msra.mxu0 %v25408_v40 }
 0x95d   : > { %16620 = vmatprep.subr.mxu0 %v25039_v43 }
 0x9b1   : > { %v7180_v13 = vpop.f32.mrf.mxu1 }
 0x9b3   : > { %v16409_v22 = vpop.f32.mrf.mxu1 }
 0x9b9   : > { %v7029_v8 = vpop.f32.mrf.mxu0 }
 0x9ba   : > { %v7181_v16 = vadd.f32 %v7180_v13, %v7029_v8  ;;  %v25414_v8 = vld [vmem:[#allocation156_spill] sm:$0xff]  ;;  %v25415_v13 = vld [vmem:[#allocation161_spill] sm:$0xff] }
 0x9bb   : > { %v16374_v32 = vpop.f32.mrf.mxu0 }
 0x9d1   : > { %v7373_v15 = vpop.f32.mrf.mxu1 }
 0x9d3   : > { %v16479_v58 = vpop.f32.mrf.mxu1 }
 0x9da   : > { %v7284_v5 = vpop.f32.mrf.mxu0 }
 0x9db   : > { %v7285_v9 = vadd.f32 %v7284_v5, %v7181_v16  ;;  %v7597_v16 = vld [vmem:[#allocation2 + $0x60] sm:$0xff] }
 0x9dc   : > { %v16444_v34 = vpop.f32.mrf.mxu0  ;;  %vm7598_vm7 = vcmp.ne.f32.partialorder %v7597_v16, 0.0  ;;  %v25421_v16 = vld [vmem:[#allocation183_spill] sm:$0xff] }
 0x9dd   : > { %v7374_v51 = vadd.f32 %v7373_v15, %v7285_v9 }
 0x9f3   : > { %v7579_v36 = vpop.f32.mrf.mxu1 }
 0x9f5   : > { %v16549_v27 = vpop.f32.mrf.mxu1 }
 0x9fb   : > { %v7492_v35 = vpop.f32.mrf.mxu0 }
 0x9fc   : > { %v7493_v18 = vadd.f32 %v7492_v35, %v7374_v51  ;;  %v25410_v35 = vld [vmem:[#allocation142_spill] sm:$0xff] }
 0x9fd   : > { %v16514_v56 = vpop.f32.mrf.mxu0 }
 0x9fe   : > { %v7580_v31 = vadd.f32 %v7579_v36, %v7493_v18 }
 0xa00   : > { %v7589_v22 = vmul.f32 %v7588_v21, %v7580_v31  ;;  %v25411_v21 = vld [vmem:[#allocation145_spill] sm:$0xff] }
 0xa02   : > { %v7590_v41 = vmul.f32 %v7589_v22, %v7584_v6  ;;  %v25409_v6 = vld [vmem:[#allocation139_spill] sm:$0xff] }
 0xa03   : > { %v25416_v22 = vld [vmem:[#allocation167_spill] sm:$0xff] }
 0xa04   : > { %v22534_v32 = vsub.f32 %v22312_v62, %v7590_v41  ;;  %v25413_v62 = vld [vmem:[#allocation154_spill] sm:$0xff] }
 0xa06   : > { %18065 = vrcp.f32 %v22534_v32 }
 0xa13   : > { %v18066_v58 = vpop.eup %18065 }
 0xa14   : > { %v7593_v34 = vmul.f32 %v18066_v58, %v22534_v32 }
 0xa16   : > { %v7594_v5 = vsub.f32 2.0, %v7593_v34  ;;  %v25418_v34 = vld [vmem:[#allocation171_spill] sm:$0xff] }
 0xa18   : > { %v7595_v15 = vmul.f32 %v18066_v58, %v7594_v5  ;;  %v25417_v58 = vld [vmem:[#allocation170_spill] sm:$0xff]  ;;  %v25419_v5 = vld [vmem:[#allocation172_spill] sm:$0xff] }
 0xa1a   : > { %v7602_v27 = vrot.slane %v7595_v15, %v19357_v49  ;;  %v25420_v15 = vld [vmem:[#allocation175_spill] sm:$0xff] }
 0xa1c   : > { %v7603_v36 = vmul.f32 %v7602_v27, %v22534_v32  ;;  %v25422_v27 = vld [vmem:[#allocation185_spill] sm:$0xff] }
 0xa1e   : > { %v22541_v9 = vsel %vm7598_vm7, %v7603_v36, %v22534_v32  ;;  %v25423_v36 = vld [vmem:[#allocation189_spill] sm:$0xff] }
 0xa1f   : > { %v22544_v51 = vand.u32 4294901760, %v22541_v9 }
 0xa21   : > { %v22548_v56 = vsub.f32 %v22541_v9, %v22544_v51  ;;  %16618 = vmatmul.mubr.f32.vlgmr.msra.gmra.mxu1 %v22544_v51 }
 0xa22   : > { %16656 = vmatpush3.msra.mxu1 %v25381_v52  ;;  %16687 = vmatprep.mubr.msk.f32.mxu1 %vm18151_vm0, %v25039_v43 }
 0xa23   : > { %16657 = vmatprep.subr.mxu1 %v25039_v43  ;;  %v7688_v31 = vand.u32 4294901760, %v22548_v56 }
 0xa24   : > { %16658 = vmatpush3.msra.mxu1 %v25383_v26 }
 0xa25   : > { %16659 = vmatprep.subr.mxu1 %v25039_v43  ;;  %v7689_v41 = vsub.f32 %v22548_v56, %v7688_v31 }
 0xa26   : > { %16660 = vmatpush3.msra.mxu1 %v25385_v17 }
 0xa27   : > { %16661 = vmatprep.subr.mxu1 %v25039_v43  ;;  %v7690_v18 = vand.u32 4294901760, %v7689_v41  ;;  %v25425_v41 = vld [vmem:[#allocation141_spill] sm:$0xff] }
 0xa28   : > { %16662 = vmatpush3.msra.mxu1 %v25387_v37 }
 0xa29   : > { %16663 = vmatprep.subr.mxu1 %v25039_v43  ;;  %16583 = vmatmul.mubr.f32.vlgmr.msra.gmra.mxu0 %v7690_v18  ;;  %v25426_v18 = vld [vmem:[#allocation144_spill] sm:$0xff] }
 0xa2a   : > { %16621 = vmatpush3.msra.mxu0 %v25409_v6  ;;  %16664 = vmatpush3.msra.mxu1 %v25389_v63 }
 0xa2b   : > { %16622 = vmatprep.subr.mxu0 %v25039_v43  ;;  %16665 = vmatprep.subr.mxu1 %v25039_v43 }
 0xa2c   : > { %16623 = vmatpush3.msra.mxu0 %v25410_v35  ;;  %16666 = vmatpush3.msra.mxu1 %v25391_v0 }
 0xa2d   : > { %16624 = vmatprep.subr.mxu0 %v25039_v43  ;;  %16667 = vmatprep.subr.mxu1 %v25039_v43 }
 0xa2e   : > { %16625 = vmatpush3.msra.mxu0 %v25411_v21  ;;  %16668 = vmatpush3.msra.mxu1 %v25393_v38 }
 0xa2f   : > { %16626 = vmatprep.subr.mxu0 %v25039_v43  ;;  %16669 = vmatprep.subr.mxu1 %v25039_v43 }
 0xa30   : > { %16627 = vmatpush3.msra.mxu0 %v25412_v2  ;;  %16670 = vmatpush3.msra.mxu1 %v25395_v33 }
 0xa31   : > { %16628 = vmatprep.subr.mxu0 %v25039_v43  ;;  %16671 = vmatprep.subr.mxu1 %v25039_v43 }
 0xa32   : > { %16629 = vmatpush3.msra.mxu0 %v25413_v62  ;;  %16672 = vmatpush3.msra.mxu1 %v25397_v61 }
 0xa33   : > { %16630 = vmatprep.subr.mxu0 %v25039_v43  ;;  %16673 = vmatprep.subr.mxu1 %v25039_v43 }
 0xa34   : > { %16631 = vmatpush3.msra.mxu0 %v25414_v8  ;;  %16674 = vmatpush3.msra.mxu1 %v25399_v19 }
 0xa35   : > { %16632 = vmatprep.subr.mxu0 %v25039_v43  ;;  %16675 = vmatprep.subr.mxu1 %v25039_v43 }
 0xa36   : > { %16633 = vmatpush3.msra.mxu0 %v25415_v13  ;;  %16676 = vmatpush3.msra.mxu1 %v25401_v50 }
 0xa37   : > { %16634 = vmatprep.subr.mxu0 %v25039_v43  ;;  %16677 = vmatprep.subr.mxu1 %v25039_v43 }
 0xa38   : > { %16635 = vmatpush3.msra.mxu0 %v25416_v22  ;;  %16678 = vmatpush3.msra.mxu1 %v25403_v29 }
 0xa39   : > { %16636 = vmatprep.subr.mxu0 %v25039_v43  ;;  %16679 = vmatprep.subr.mxu1 %v25039_v43 }
 0xa3a   : > { %16637 = vmatpush3.msra.mxu0 %v25417_v58  ;;  %16680 = vmatpush3.msra.mxu1 %v25405_v39 }
 0xa3b   : > { %16638 = vmatprep.subr.mxu0 %v25039_v43  ;;  %16681 = vmatprep.subr.mxu1 %v25039_v43 }
 0xa3c   : > { %16639 = vmatpush3.msra.mxu0 %v25418_v34  ;;  %16682 = vmatpush3.msra.mxu1 %v25406_v60 }
 0xa3d   : > { %16640 = vmatprep.subr.mxu0 %v25039_v43  ;;  %16683 = vmatprep.subr.mxu1 %v25039_v43 }
 0xa3e   : > { %16641 = vmatpush3.msra.mxu0 %v25419_v5  ;;  %16684 = vmatpush3.msra.mxu1 %v25407_v55  ;;  %v25465_v5 = vld [vmem:[#allocation251_spill] sm:$0xff] }
 0xa3f   : > { %16642 = vmatprep.subr.mxu0 %v25039_v43  ;;  %16685 = vmatprep.subr.mxu1 %v25039_v43 }
 0xa40   : > { %16643 = vmatpush3.msra.mxu0 %v25420_v15  ;;  %16686 = vmatpush3.msra.mxu1 %v25408_v40  ;;  %v25462_v15 = vld [vmem:[#allocation266_spill] sm:$0xff] }
 0xa41   : > { %16644 = vmatprep.subr.mxu0 %v25039_v43  ;;  %16688 = vmatmul.mubr.f32.vlgmr.msra.gmra.mxu1 %v7688_v31  ;;  %v25424_v31 = vld [vmem:[#allocation193_spill] sm:$0xff] }
 0xa42   : > { %16725 = vmatprep.subr.mxu1 %v25039_v43  ;;  %16645 = vmatpush3.msra.mxu0 %v25421_v16  ;;  %v25460_v16 = vld [vmem:[#allocation265_spill] sm:$0xff] }
 0xa43   : > { %16726 = vmatpush3.msra.mxu1 %v25381_v52  ;;  %16646 = vmatprep.subr.mxu0 %v25039_v43 }
 0xa44   : > { %16727 = vmatprep.subr.mxu1 %v25039_v43  ;;  %16647 = vmatpush3.msra.mxu0 %v25422_v27  ;;  %v25443_v27 = vld [vmem:[#allocation220_spill] sm:$0xff] }
 0xa45   : > { %16728 = vmatpush3.msra.mxu1 %v25383_v26  ;;  %16648 = vmatprep.subr.mxu0 %v25039_v43 }
 0xa46   : > { %16729 = vmatprep.subr.mxu1 %v25039_v43  ;;  %16649 = vmatpush3.msra.mxu0 %v25423_v36  ;;  %v25441_v36 = vld [vmem:[#allocation216_spill] sm:$0xff] }
 0xa47   : > { %16730 = vmatpush3.msra.mxu1 %v25385_v17  ;;  %16650 = vmatprep.subr.mxu0 %v25039_v43 }
 0xa48   : > { %16731 = vmatprep.subr.mxu1 %v25039_v43  ;;  %16651 = vmatpush3.msra.mxu0 %v25424_v31  ;;  %v25440_v31 = vld [vmem:[#allocation195_spill] sm:$0xff] }
 0xa49   : > { %16652 = vmatprep.mubr.msk.f32.mxu0 %vm18151_vm0, %v25039_v43  ;;  %16732 = vmatpush3.msra.mxu1 %v25387_v37 }
 0xa4a   : > { %16653 = vmatmul.mubr.f32.vlgmr.msra.gmra.mxu0 %v22548_v56  ;;  %16690 = vmatprep.subr.mxu0 %v25039_v43  ;;  %v25427_v56 = vld [vmem:[#allocation148_spill] sm:$0xff] }
 0xa4b   : > { %16733 = vmatprep.subr.mxu1 %v25039_v43  ;;  %16691 = vmatpush3.msra.mxu0 %v25425_v41  ;;  %v25428_v41 = vld [vmem:[#allocation152_spill] sm:$0xff] }
 0xa4c   : > { %16734 = vmatpush3.msra.mxu1 %v25389_v63  ;;  %16692 = vmatprep.subr.mxu0 %v25039_v43 }
 0xa4d   : > { %16735 = vmatprep.subr.mxu1 %v25039_v43  ;;  %16693 = vmatpush3.msra.mxu0 %v25426_v18  ;;  %v25429_v18 = vld [vmem:[#allocation158_spill] sm:$0xff] }
 0xa4e   : > { %16736 = vmatpush3.msra.mxu1 %v25391_v0  ;;  %16694 = vmatprep.subr.mxu0 %v25039_v43 }
 0xa4f   : > { %16737 = vmatprep.subr.mxu1 %v25039_v43  ;;  %16695 = vmatpush3.msra.mxu0 %v25427_v56  ;;  %v25430_v56 = vld [vmem:[#allocation160_spill] sm:$0xff] }
 0xa50   : > { %16738 = vmatpush3.msra.mxu1 %v25393_v38  ;;  %16696 = vmatprep.subr.mxu0 %v25039_v43 }
 0xa51   : > { %16739 = vmatprep.subr.mxu1 %v25039_v43  ;;  %16697 = vmatpush3.msra.mxu0 %v25428_v41  ;;  %v25431_v41 = vld [vmem:[#allocation166_spill] sm:$0xff] }
 0xa52   : > { %16740 = vmatpush3.msra.mxu1 %v25395_v33  ;;  %16698 = vmatprep.subr.mxu0 %v25039_v43  ;;  %v8247_v33 = vld [vmem:[#allocation2 + $0x68] sm:$0xff] }
 0xa53   : > { %16741 = vmatprep.subr.mxu1 %v25039_v43  ;;  %16699 = vmatpush3.msra.mxu0 %v25429_v18  ;;  %v25432_v18 = vld [vmem:[#allocation174_spill] sm:$0xff] }
 0xa54   : > { %16742 = vmatpush3.msra.mxu1 %v25397_v61  ;;  %16700 = vmatprep.subr.mxu0 %v25039_v43  ;;  %v8251_v61 = vrot.slane %v22534_v32, %v19357_v49  ;;  %v25467_v32 = vld [vmem:[#allocation204_spill] sm:$0xff] }
 0xa55   : > { %16743 = vmatprep.subr.mxu1 %v25039_v43  ;;  %16701 = vmatpush3.msra.mxu0 %v25430_v56  ;;  %v25433_v56 = vld [vmem:[#allocation176_spill] sm:$0xff] }
 0xa56   : > { %16744 = vmatpush3.msra.mxu1 %v25399_v19  ;;  %16702 = vmatprep.subr.mxu0 %v25039_v43 }
 0xa57   : > { %16745 = vmatprep.subr.mxu1 %v25039_v43  ;;  %16703 = vmatpush3.msra.mxu0 %v25431_v41  ;;  %v25434_v41 = vld [vmem:[#allocation177_spill] sm:$0xff] }
 0xa58   : > { %16746 = vmatpush3.msra.mxu1 %v25401_v50  ;;  %16704 = vmatprep.subr.mxu0 %v25039_v43 }
 0xa59   : > { %16747 = vmatprep.subr.mxu1 %v25039_v43  ;;  %16705 = vmatpush3.msra.mxu0 %v25432_v18  ;;  %v25435_v18 = vld [vmem:[#allocation178_spill] sm:$0xff] }
 0xa5a   : > { %16748 = vmatpush3.msra.mxu1 %v25403_v29  ;;  %16706 = vmatprep.subr.mxu0 %v25039_v43 }
 0xa5b   : > { %16749 = vmatprep.subr.mxu1 %v25039_v43  ;;  %16707 = vmatpush3.msra.mxu0 %v25433_v56  ;;  %v25436_v56 = vld [vmem:[#allocation182_spill] sm:$0xff] }
 0xa5c   : > { %16750 = vmatpush3.msra.mxu1 %v25405_v39  ;;  %16708 = vmatprep.subr.mxu0 %v25039_v43 }
 0xa5d   : > { %16751 = vmatprep.subr.mxu1 %v25039_v43  ;;  %16709 = vmatpush3.msra.mxu0 %v25434_v41  ;;  %v25437_v41 = vld [vmem:[#allocation188_spill] sm:$0xff] }
 0xa5e   : > { %16752 = vmatpush3.msra.mxu1 %v25406_v60  ;;  %16710 = vmatprep.subr.mxu0 %v25039_v43 }
 0xa5f   : > { %16753 = vmatprep.subr.mxu1 %v25039_v43  ;;  %16711 = vmatpush3.msra.mxu0 %v25435_v18  ;;  %v25438_v18 = vld [vmem:[#allocation192_spill] sm:$0xff] }
 0xa60   : > { %16754 = vmatpush3.msra.mxu1 %v25407_v55  ;;  %16712 = vmatprep.subr.mxu0 %v25039_v43 }
 0xa61   : > { %16755 = vmatprep.subr.mxu1 %v25039_v43  ;;  %16713 = vmatpush3.msra.mxu0 %v25436_v56  ;;  %v25439_v56 = vld [vmem:[#allocation212_spill] sm:$0xff] }
 0xa62   : > { %16756 = vmatpush3.msra.mxu1 %v25408_v40  ;;  %16757 = vmatprep.mubr.msk.f32.mxu1 %vm18151_vm0, %v25039_v43 }
 0xa63   : > { %16714 = vmatprep.subr.mxu0 %v25039_v43  ;;  %16758 = vmatmul.mubr.f32.vlgmr.msra.gmra.mxu1 %v22544_v51 }
 0xa64   : > { %16715 = vmatpush3.msra.mxu0 %v25437_v41  ;;  %16722 = vmatprep.mubr.msk.f32.mxu0 %vm18151_vm0, %v25039_v43  ;;  %v25442_v41 = vld [vmem:[#allocation197_spill] sm:$0xff] }
 0xa65   : > { %16716 = vmatprep.subr.mxu0 %v25039_v43  ;;  %16795 = vmatprep.subr.mxu1 %v25039_v43 }
 0xa66   : > { %16717 = vmatpush3.msra.mxu0 %v25438_v18  ;;  %16796 = vmatpush3.msra.mxu1 %v25439_v56  ;;  %v25444_v56 = vld [vmem:[#allocation224_spill] sm:$0xff] }
 0xa67   : > { %16718 = vmatprep.subr.mxu0 %v25039_v43  ;;  %16797 = vmatprep.subr.mxu1 %v25039_v43  ;;  %v25458_v18 = vld [vmem:[#allocation264_spill] sm:$0xff] }
 0xa68   : > { %16719 = vmatpush3.msra.mxu0 %v25440_v31  ;;  %16798 = vmatpush3.msra.mxu1 %v25441_v36  ;;  %v25445_v36 = vld [vmem:[#allocation231_spill] sm:$0xff] }
 0xa69   : > { %16720 = vmatprep.subr.mxu0 %v25039_v43  ;;  %16799 = vmatprep.subr.mxu1 %v25039_v43  ;;  %v25456_v31 = vld [vmem:[#allocation263_spill] sm:$0xff] }
 0xa6a   : > { %16721 = vmatpush3.msra.mxu0 %v25442_v41  ;;  %16800 = vmatpush3.msra.mxu1 %v25443_v27  ;;  %v25446_v27 = vld [vmem:[#allocation235_spill] sm:$0xff]  ;;  %v25454_v41 = vld [vmem:[#allocation261_spill] sm:$0xff] }
 0xa6b   : > { %16723 = vmatmul.mubr.f32.vlgmr.msra.gmra.mxu0 %v22544_v51  ;;  %16801 = vmatprep.subr.mxu1 %v25039_v43  ;;  %v25447_v51 = vld [vmem:[#allocation242_spill] sm:$0xff] }
 0xa6c   : > { %16802 = vmatpush3.msra.mxu1 %v25444_v56  ;;  %16760 = vmatprep.subr.mxu0 %v25039_v43  ;;  %v25452_v56 = vld [vmem:[#allocation259_spill] sm:$0xff] }
 0xa6d   : > { %16803 = vmatprep.subr.mxu1 %v25039_v43  ;;  %16761 = vmatpush3.msra.mxu0 %v19517_v23 }
 0xa6e   : > { %16804 = vmatpush3.msra.mxu1 %v25445_v36  ;;  %16762 = vmatprep.subr.mxu0 %v25039_v43  ;;  %v25448_v36 = vld [vmem:[#allocation249_spill] sm:$0xff] }
 0xa6f   : > { %16805 = vmatprep.subr.mxu1 %v25039_v43  ;;  %16763 = vmatpush3.msra.mxu0 %v19522_v44 }
 0xa70   : > { %16806 = vmatpush3.msra.mxu1 %v25446_v27  ;;  %16764 = vmatprep.subr.mxu0 %v25039_v43  ;;  %v25449_v27 = vld [vmem:[#allocation253_spill] sm:$0xff] }
 0xa71   : > { %16807 = vmatprep.subr.mxu1 %v25039_v43  ;;  %16765 = vmatpush3.msra.mxu0 %v19532_v25 }
 0xa72   : > { %16808 = vmatpush3.msra.mxu1 %v25447_v51  ;;  %16766 = vmatprep.subr.mxu0 %v25039_v43  ;;  %v25450_v51 = vld [vmem:[#allocation256_spill] sm:$0xff] }
 0xa73   : > { %16809 = vmatprep.subr.mxu1 %v25039_v43  ;;  %16767 = vmatpush3.msra.mxu0 %v19544_v1 }
 0xa74   : > { %16810 = vmatpush3.msra.mxu1 %v25448_v36  ;;  %16768 = vmatprep.subr.mxu0 %v25039_v43  ;;  %v25451_v36 = vld [vmem:[#allocation222_spill] sm:$0xff] }
 0xa75   : > { %16811 = vmatprep.subr.mxu1 %v25039_v43  ;;  %16769 = vmatpush3.msra.mxu0 %v19559_v20 }
 0xa76   : > { %16812 = vmatpush3.msra.mxu1 %v25449_v27  ;;  %16770 = vmatprep.subr.mxu0 %v25039_v43  ;;  %v25453_v27 = vld [vmem:[#allocation227_spill] sm:$0xff] }
 0xa77   : > { %16813 = vmatprep.subr.mxu1 %v25039_v43  ;;  %16771 = vmatpush3.msra.mxu0 %v19570_v46 }
 0xa78   : > { %16814 = vmatpush3.msra.mxu1 %v25450_v51  ;;  %16772 = vmatprep.subr.mxu0 %v25039_v43  ;;  %v25455_v51 = vld [vmem:[#allocation230_spill] sm:$0xff] }
 0xa79   : > { %16815 = vmatprep.subr.mxu1 %v25039_v43  ;;  %16773 = vmatpush3.msra.mxu0 %v25451_v36 }
 0xa7a   : > { %16816 = vmatpush3.msra.mxu1 %v25452_v56  ;;  %16774 = vmatprep.subr.mxu0 %v25039_v43  ;;  %v25457_v56 = vld [vmem:[#allocation232_spill] sm:$0xff] }
 0xa7b   : > { %16817 = vmatprep.subr.mxu1 %v25039_v43  ;;  %16775 = vmatpush3.msra.mxu0 %v25453_v27 }
 0xa7c   : > { %16818 = vmatpush3.msra.mxu1 %v25454_v41  ;;  %16776 = vmatprep.subr.mxu0 %v25039_v43  ;;  %v25459_v41 = vld [vmem:[#allocation233_spill] sm:$0xff] }
 0xa7d   : > { %16819 = vmatprep.subr.mxu1 %v25039_v43  ;;  %16777 = vmatpush3.msra.mxu0 %v25455_v51 }
 0xa7e   : > { %16820 = vmatpush3.msra.mxu1 %v25456_v31  ;;  %16778 = vmatprep.subr.mxu0 %v25039_v43  ;;  %v25461_v31 = vld [vmem:[#allocation234_spill] sm:$0xff] }
 0xa7f   : > { %16821 = vmatprep.subr.mxu1 %v25039_v43  ;;  %16779 = vmatpush3.msra.mxu0 %v25457_v56 }
 0xa80   : > { %16822 = vmatpush3.msra.mxu1 %v25458_v18  ;;  %16780 = vmatprep.subr.mxu0 %v25039_v43  ;;  %v25463_v18 = vld [vmem:[#allocation241_spill] sm:$0xff] }
 0xa81   : > { %16823 = vmatprep.subr.mxu1 %v25039_v43  ;;  %16781 = vmatpush3.msra.mxu0 %v25459_v41 }
 0xa82   : > { %16824 = vmatpush3.msra.mxu1 %v25460_v16  ;;  %16782 = vmatprep.subr.mxu0 %v25039_v43  ;;  %v25464_v16 = vld [vmem:[#allocation244_spill] sm:$0xff] }
 0xa83   : > { %16825 = vmatprep.subr.mxu1 %v25039_v43  ;;  %16783 = vmatpush3.msra.mxu0 %v25461_v31 }
 0xa84   : > { %16826 = vmatpush3.msra.mxu1 %v25462_v15  ;;  %16784 = vmatprep.subr.mxu0 %v25039_v43  ;;  %v25466_v15 = vld [vmem:[#allocation255_spill] sm:$0xff] }
 0xa85   : > { %16827 = vmatprep.mubr.msk.f32.mxu1 %vm18151_vm0, %v25039_v43  ;;  %16865 = vmatprep.subr.mxu1 %v25039_v43 }
 0xa86   : > { %16785 = vmatpush3.msra.mxu0 %v25463_v18  ;;  %16792 = vmatprep.mubr.msk.f32.mxu0 %vm18151_vm0, %v25039_v43 }
 0xa87   : > { %16786 = vmatprep.subr.mxu0 %v25039_v43 }
 0xa88   : > { %16787 = vmatpush3.msra.mxu0 %v25464_v16 }
 0xa89   : > { %16788 = vmatprep.subr.mxu0 %v25039_v43 }
 0xa8a   : > { %16789 = vmatpush3.msra.mxu0 %v25465_v5 }
 0xa8b   : > { %16790 = vmatprep.subr.mxu0 %v25039_v43 }
 0xa8c   : > { %16791 = vmatpush3.msra.mxu0 %v25466_v15 }
 0xa8d   : > { %16830 = vmatprep.subr.mxu0 %v25039_v43 }
 0xae1   : > { %v7843_v34 = vpop.f32.mrf.mxu1 }
 0xae3   : > { %v16619_v58 = vpop.f32.mrf.mxu1 }
 0xae9   : > { %v7692_v22 = vpop.f32.mrf.mxu0 }
 0xaea   : > { %v7844_v6 = vadd.f32 %v7843_v34, %v7692_v22  ;;  %v25472_v22 = vld [vmem:[#allocation221_spill] sm:$0xff]  ;;  %v25473_v34 = vld [vmem:[#allocation226_spill] sm:$0xff] }
 0xaeb   : > { %v16584_v13 = vpop.f32.mrf.mxu0 }
 0xb01   : > { %v8036_v8 = vpop.f32.mrf.mxu1 }
 0xb03   : > { %v16689_v62 = vpop.f32.mrf.mxu1 }
 0xb04   : > { %v25470_v62 = vld [vmem:[#allocation214_spill] sm:$0xff] }
 0xb0a   : > { %v7947_v2 = vpop.f32.mrf.mxu0 }
 0xb0b   : > { %v7948_v55 = vadd.f32 %v7947_v2, %v7844_v6  ;;  %v8260_v2 = vld [vmem:[#allocation2 + $0x70] sm:$0xff] }
 0xb0c   : > { %v16654_v21 = vpop.f32.mrf.mxu0  ;;  %vm8261_vm8 = vcmp.ne.f32.partialorder %v8260_v2, 0.0  ;;  %v25479_v2 = vld [vmem:[#allocation248_spill] sm:$0xff] }
 0xb0d   : > { %v8037_v60 = vadd.f32 %v8036_v8, %v7948_v55  ;;  %v25471_v8 = vld [vmem:[#allocation219_spill] sm:$0xff] }
 0xb23   : > { %v8242_v35 = vpop.f32.mrf.mxu1 }
 0xb25   : > { %v16759_v40 = vpop.f32.mrf.mxu1 }
 0xb2b   : > { %v8155_v39 = vpop.f32.mrf.mxu0 }
 0xb2c   : > { %v8156_v29 = vadd.f32 %v8155_v39, %v8037_v60 }
 0xb2d   : > { %v16724_v50 = vpop.f32.mrf.mxu0 }
 0xb2e   : > { %v8243_v19 = vadd.f32 %v8242_v35, %v8156_v29  ;;  %v25469_v35 = vld [vmem:[#allocation210_spill] sm:$0xff] }
 0xb30   : > { %v8252_v58 = vmul.f32 %v8251_v61, %v8243_v19 }
 0xb32   : > { %v8253_v38 = vmul.f32 %v8252_v58, %v8247_v33  ;;  %v25474_v58 = vld [vmem:[#allocation229_spill] sm:$0xff] }
 0xb34   : > { %v22763_v13 = vsub.f32 %v22541_v9, %v8253_v38  ;;  %v25468_v9 = vld [vmem:[#allocation207_spill] sm:$0xff] }
 0xb36   : > { %18067 = vrcp.f32 %v22763_v13 }
 0xb43   : > { %v18068_v21 = vpop.eup %18067 }
 0xb44   : > { %v8256_v40 = vmul.f32 %v18068_v21, %v22763_v13 }
 0xb46   : > { %v8257_v6 = vsub.f32 2.0, %v8256_v40  ;;  %v25476_v40 = vld [vmem:[#allocation238_spill] sm:$0xff] }
 0xb48   : > { %v8258_v55 = vmul.f32 %v18068_v21, %v8257_v6  ;;  %v25475_v21 = vld [vmem:[#allocation237_spill] sm:$0xff]  ;;  %v25477_v6 = vld [vmem:[#allocation239_spill] sm:$0xff] }
 0xb4a   : > { %v8265_v60 = vrot.slane %v8258_v55, %v19781_v54  ;;  %v25478_v55 = vld [vmem:[#allocation240_spill] sm:$0xff] }
 0xb4c   : > { %v8266_v39 = vmul.f32 %v8265_v60, %v22763_v13  ;;  %v25480_v60 = vld [vmem:[#allocation250_spill] sm:$0xff] }
 0xb4e   : > { %v22770_v29 = vsel %vm8261_vm8, %v8266_v39, %v22763_v13  ;;  %v25481_v39 = vld [vmem:[#allocation254_spill] sm:$0xff] }
 0xb4f   : > { %v22773_v50 = vand.u32 4294901760, %v22770_v29 }
 0xb51   : > { %v22777_v19 = vsub.f32 %v22770_v29, %v22773_v50  ;;  %16828 = vmatmul.mubr.f32.vlgmr.msra.gmra.mxu1 %v22773_v50 }
 0xb52   : > { %16866 = vmatpush3.msra.mxu1 %v19517_v23  ;;  %16897 = vmatprep.mubr.msk.f32.mxu1 %vm18151_vm0, %v25039_v43 }
 0xb53   : > { %16867 = vmatprep.subr.mxu1 %v25039_v43  ;;  %v8351_v61 = vand.u32 4294901760, %v22777_v19 }
 0xb54   : > { %16868 = vmatpush3.msra.mxu1 %v19522_v44 }
 0xb55   : > { %16869 = vmatprep.subr.mxu1 %v25039_v43  ;;  %v8352_v33 = vsub.f32 %v22777_v19, %v8351_v61 }
 0xb56   : > { %16870 = vmatpush3.msra.mxu1 %v19532_v25 }
 0xb57   : > { %16871 = vmatprep.subr.mxu1 %v25039_v43  ;;  %v8353_v38 = vand.u32 4294901760, %v8352_v33  ;;  %v25483_v33 = vld [vmem:[#allocation206_spill] sm:$0xff] }
 0xb58   : > { %16872 = vmatpush3.msra.mxu1 %v19544_v1 }
 0xb59   : > { %16873 = vmatprep.subr.mxu1 %v25039_v43  ;;  %16793 = vmatmul.mubr.f32.vlgmr.msra.gmra.mxu0 %v8353_v38  ;;  %v25484_v38 = vld [vmem:[#allocation209_spill] sm:$0xff] }
 0xb5a   : > { %16831 = vmatpush3.msra.mxu0 %v25467_v32  ;;  %16874 = vmatpush3.msra.mxu1 %v19559_v20 }
 0xb5b   : > { %16832 = vmatprep.subr.mxu0 %v25039_v43  ;;  %16875 = vmatprep.subr.mxu1 %v25039_v43 }
 0xb5c   : > { %16833 = vmatpush3.msra.mxu0 %v25468_v9  ;;  %16876 = vmatpush3.msra.mxu1 %v19570_v46 }
 0xb5d   : > { %16834 = vmatprep.subr.mxu0 %v25039_v43  ;;  %16877 = vmatprep.subr.mxu1 %v25039_v43 }
 0xb5e   : > { %16835 = vmatpush3.msra.mxu0 %v25469_v35  ;;  %16878 = vmatpush3.msra.mxu1 %v25451_v36 }
 0xb5f   : > { %16836 = vmatprep.subr.mxu0 %v25039_v43  ;;  %16879 = vmatprep.subr.mxu1 %v25039_v43 }
 0xb60   : > { %16837 = vmatpush3.msra.mxu0 %v25470_v62  ;;  %16880 = vmatpush3.msra.mxu1 %v25453_v27 }
 0xb61   : > { %16838 = vmatprep.subr.mxu0 %v25039_v43  ;;  %16881 = vmatprep.subr.mxu1 %v25039_v43 }
 0xb62   : > { %16839 = vmatpush3.msra.mxu0 %v25471_v8  ;;  %16882 = vmatpush3.msra.mxu1 %v25455_v51 }
 0xb63   : > { %16840 = vmatprep.subr.mxu0 %v25039_v43  ;;  %16883 = vmatprep.subr.mxu1 %v25039_v43 }
 0xb64   : > { %16841 = vmatpush3.msra.mxu0 %v25472_v22  ;;  %16884 = vmatpush3.msra.mxu1 %v25457_v56 }
 0xb65   : > { %16842 = vmatprep.subr.mxu0 %v25039_v43  ;;  %16885 = vmatprep.subr.mxu1 %v25039_v43 }
 0xb66   : > { %16843 = vmatpush3.msra.mxu0 %v25473_v34  ;;  %16886 = vmatpush3.msra.mxu1 %v25459_v41 }
 0xb67   : > { %16844 = vmatprep.subr.mxu0 %v25039_v43  ;;  %16887 = vmatprep.subr.mxu1 %v25039_v43 }
 0xb68   : > { %16845 = vmatpush3.msra.mxu0 %v25474_v58  ;;  %16888 = vmatpush3.msra.mxu1 %v25461_v31 }
 0xb69   : > { %16846 = vmatprep.subr.mxu0 %v25039_v43  ;;  %16889 = vmatprep.subr.mxu1 %v25039_v43 }
 0xb6a   : > { %16847 = vmatpush3.msra.mxu0 %v25475_v21  ;;  %16890 = vmatpush3.msra.mxu1 %v25463_v18 }
 0xb6b   : > { %16848 = vmatprep.subr.mxu0 %v25039_v43  ;;  %16891 = vmatprep.subr.mxu1 %v25039_v43 }
 0xb6c   : > { %16849 = vmatpush3.msra.mxu0 %v25476_v40  ;;  %16892 = vmatpush3.msra.mxu1 %v25464_v16 }
 0xb6d   : > { %16850 = vmatprep.subr.mxu0 %v25039_v43  ;;  %16893 = vmatprep.subr.mxu1 %v25039_v43 }
 0xb6e   : > { %16851 = vmatpush3.msra.mxu0 %v25477_v6  ;;  %16894 = vmatpush3.msra.mxu1 %v25465_v5 }
 0xb6f   : > { %16852 = vmatprep.subr.mxu0 %v25039_v43  ;;  %16895 = vmatprep.subr.mxu1 %v25039_v43 }
 0xb70   : > { %16853 = vmatpush3.msra.mxu0 %v25478_v55  ;;  %16896 = vmatpush3.msra.mxu1 %v25466_v15  ;;  %v12396_v55 = vld [vmem:[%s24261_s2 + $0x2d0] sm:$0xff] }
 0xb71   : > { %16854 = vmatprep.subr.mxu0 %v25039_v43  ;;  %16898 = vmatmul.mubr.f32.vlgmr.msra.gmra.mxu1 %v8351_v61  ;;  %v25482_v61 = vld [vmem:[#allocation258_spill] sm:$0xff]  ;;  %v22953_v21 = vand.u32 4294901760, %v12396_v55 }
 0xb72   : > { %16935 = vmatprep.subr.mxu1 %v25039_v43  ;;  %16855 = vmatpush3.msra.mxu0 %v25479_v2  ;;  %v12397_v2 = vld [vmem:[%s24261_s2 + $0x2d8] sm:$0xff] }
 0xb73   : > { %16936 = vmatpush3.msra.mxu1 %v19517_v23  ;;  %16856 = vmatprep.subr.mxu0 %v25039_v43  ;;  %v22951_v40 = vand.u32 4294901760, %v12397_v2 }
 0xb74   : > { %16937 = vmatprep.subr.mxu1 %v25039_v43  ;;  %16857 = vmatpush3.msra.mxu0 %v25480_v60  ;;  %v12398_v60 = vld [vmem:[%s24261_s2 + $0x2e0] sm:$0xff] }
 0xb75   : > { %16938 = vmatpush3.msra.mxu1 %v19522_v44  ;;  %16858 = vmatprep.subr.mxu0 %v25039_v43  ;;  %v22949_v6 = vand.u32 4294901760, %v12398_v60  ;;  %v22969_v62 = vsub.f32 %v12397_v2, %v22951_v40 }
 0xb76   : > { %16939 = vmatprep.subr.mxu1 %v25039_v43  ;;  %16859 = vmatpush3.msra.mxu0 %v25481_v39 }
 0xb77   : > { %16940 = vmatpush3.msra.mxu1 %v19532_v25  ;;  %16860 = vmatprep.subr.mxu0 %v25039_v43  ;;  %v22966_v8 = vsub.f32 %v12398_v60, %v22949_v6 }
 0xb78   : > { %16941 = vmatprep.subr.mxu1 %v25039_v43  ;;  %16861 = vmatpush3.msra.mxu0 %v25482_v61  ;;  %v25498_v61 = vld [vmem:[#allocation262_spill] sm:$0xff] }
 0xb79   : > { %16862 = vmatprep.mubr.msk.f32.mxu0 %vm18151_vm0, %v25039_v43  ;;  %16942 = vmatpush3.msra.mxu1 %v19544_v1 }
 0xb7a   : > { %16863 = vmatmul.mubr.f32.vlgmr.msra.gmra.mxu0 %v22777_v19  ;;  %16900 = vmatprep.subr.mxu0 %v25039_v43  ;;  %v25485_v19 = vld [vmem:[#allocation213_spill] sm:$0xff] }
 0xb7b   : > { %16943 = vmatprep.subr.mxu1 %v25039_v43  ;;  %16901 = vmatpush3.msra.mxu0 %v25483_v33  ;;  %v25486_v33 = vld [vmem:[#allocation217_spill] sm:$0xff] }
 0xb7c   : > { %16944 = vmatpush3.msra.mxu1 %v19559_v20  ;;  %16902 = vmatprep.subr.mxu0 %v25039_v43  ;;  %v12389_v20 = vld [vmem:[%s24261_s2 + $0x298] sm:$0xff] }
 0xb7d   : > { %16945 = vmatprep.subr.mxu1 %v25039_v43  ;;  %16903 = vmatpush3.msra.mxu0 %v25484_v38  ;;  %v25487_v38 = vld [vmem:[#allocation223_spill] sm:$0xff]  ;;  %v23092_v1 = vand.u32 4294901760, %v12389_v20 }
 0xb7e   : > { %16946 = vmatpush3.msra.mxu1 %v19570_v46  ;;  %16904 = vmatprep.subr.mxu0 %v25039_v43 }
 0xb7f   : > { %16947 = vmatprep.subr.mxu1 %v25039_v43  ;;  %16905 = vmatpush3.msra.mxu0 %v25485_v19  ;;  %v25488_v19 = vld [vmem:[#allocation225_spill] sm:$0xff] }
 0xb80   : > { %16948 = vmatpush3.msra.mxu1 %v25451_v36  ;;  %16906 = vmatprep.subr.mxu0 %v25039_v43 }
 0xb81   : > { %16949 = vmatprep.subr.mxu1 %v25039_v43  ;;  %16907 = vmatpush3.msra.mxu0 %v25486_v33  ;;  %v25489_v33 = vld [vmem:[#allocation228_spill] sm:$0xff] }
 0xb82   : > { %16950 = vmatpush3.msra.mxu1 %v25453_v27  ;;  %16908 = vmatprep.subr.mxu0 %v25039_v43  ;;  %v12390_v27 = vld [vmem:[%s24261_s2 + $0x2a0] sm:$0xff] }
 0xb83   : > { %16951 = vmatprep.subr.mxu1 %v25039_v43  ;;  %16909 = vmatpush3.msra.mxu0 %v25487_v38  ;;  %v25490_v38 = vld [vmem:[#allocation236_spill] sm:$0xff] }
 0xb84   : > { %16952 = vmatpush3.msra.mxu1 %v25455_v51  ;;  %16910 = vmatprep.subr.mxu0 %v25039_v43 }
 0xb85   : > { %16953 = vmatprep.subr.mxu1 %v25039_v43  ;;  %16911 = vmatpush3.msra.mxu0 %v25488_v19  ;;  %v25491_v19 = vld [vmem:[#allocation243_spill] sm:$0xff] }
 0xb86   : > { %16954 = vmatpush3.msra.mxu1 %v25457_v56  ;;  %16912 = vmatprep.subr.mxu0 %v25039_v43 }
 0xb87   : > { %16955 = vmatprep.subr.mxu1 %v25039_v43  ;;  %16913 = vmatpush3.msra.mxu0 %v25489_v33  ;;  %v25492_v33 = vld [vmem:[#allocation245_spill] sm:$0xff] }
 0xb88   : > { %16956 = vmatpush3.msra.mxu1 %v25459_v41  ;;  %16914 = vmatprep.subr.mxu0 %v25039_v43 }
 0xb89   : > { %16957 = vmatprep.subr.mxu1 %v25039_v43  ;;  %16915 = vmatpush3.msra.mxu0 %v25490_v38  ;;  %v25493_v38 = vld [vmem:[#allocation246_spill] sm:$0xff] }
 0xb8a   : > { %16958 = vmatpush3.msra.mxu1 %v25461_v31  ;;  %16916 = vmatprep.subr.mxu0 %v25039_v43 }
 0xb8b   : > { %16959 = vmatprep.subr.mxu1 %v25039_v43  ;;  %16917 = vmatpush3.msra.mxu0 %v25491_v19  ;;  %v25494_v19 = vld [vmem:[#allocation247_spill] sm:$0xff] }
 0xb8c   : > { %16960 = vmatpush3.msra.mxu1 %v25463_v18  ;;  %16918 = vmatprep.subr.mxu0 %v25039_v43 }
 0xb8d   : > { %16961 = vmatprep.subr.mxu1 %v25039_v43  ;;  %16919 = vmatpush3.msra.mxu0 %v25492_v33  ;;  %v25495_v33 = vld [vmem:[#allocation252_spill] sm:$0xff] }
 0xb8e   : > { %16962 = vmatpush3.msra.mxu1 %v25464_v16  ;;  %16920 = vmatprep.subr.mxu0 %v25039_v43 }
 0xb8f   : > { %16963 = vmatprep.subr.mxu1 %v25039_v43  ;;  %16921 = vmatpush3.msra.mxu0 %v25493_v38  ;;  %v25496_v38 = vld [vmem:[#allocation257_spill] sm:$0xff] }
 0xb90   : > { %16964 = vmatpush3.msra.mxu1 %v25465_v5  ;;  %16922 = vmatprep.subr.mxu0 %v25039_v43  ;;  %v25499_v5 = vand.u32 4294901760, %v22966_v8 }
 0xb91   : > { %16965 = vmatprep.subr.mxu1 %v25039_v43  ;;  %16923 = vmatpush3.msra.mxu0 %v25494_v19  ;;  %v25497_v19 = vld [vmem:[#allocation260_spill] sm:$0xff] }
 0xb92   : > { %16966 = vmatpush3.msra.mxu1 %v25466_v15  ;;  %16967 = vmatprep.mubr.msk.f32.mxu1 %vm18151_vm0, %v25039_v43  ;;  %v24863_v15 = vand.u32 4294901760, %v22969_v62 }
 0xb93   : > { %16924 = vmatprep.subr.mxu0 %v25039_v43  ;;  %16968 = vmatmul.mubr.f32.vlgmr.msra.gmra.mxu1 %v22773_v50 }
 0xb94   : > { %16925 = vmatpush3.msra.mxu0 %v25495_v33  ;;  %16932 = vmatprep.mubr.msk.f32.mxu0 %vm18151_vm0, %v25039_v43  ;;  %v12400_v33 = vld [vmem:[%s24261_s2 + $0x2f0] sm:$0xff] }
 0xb95   : > { %16926 = vmatprep.subr.mxu0 %v25039_v43  ;;  %17005 = vmatprep.subr.mxu1 %v25039_v43 }
 0xb96   : > { %16927 = vmatpush3.msra.mxu0 %v25496_v38  ;;  %17037 = vmatprep.mubr.msk.f32.mxu1 %vm18151_vm0, %v25039_v43  ;;  %v12401_v38 = vld [vmem:[%s24261_s2 + $0x2f8] sm:$0xff] }
 0xb97   : > { %16928 = vmatprep.subr.mxu0 %v25039_v43 }
 0xb98   : > { %16929 = vmatpush3.msra.mxu0 %v25497_v19  ;;  %v12399_v19 = vld [vmem:[%s24261_s2 + $0x2e8] sm:$0xff] }
 0xb99   : > { %16930 = vmatprep.subr.mxu0 %v25039_v43  ;;  %v22938_v39 = vand.u32 4294901760, %v12399_v19 }
 0xb9a   : > { %16931 = vmatpush3.msra.mxu0 %v25498_v61  ;;  %v22934_v61 = vand.u32 4294901760, %v12401_v38 }
 0xb9b   : > { %16933 = vmatmul.mubr.f32.vlgmr.msra.gmra.mxu0 %v22773_v50  ;;  %16970 = vmatprep.subr.mxu0 %v25039_v43  ;;  %v22936_v50 = vand.u32 4294901760, %v12400_v33  ;;  %v22962_v22 = vsub.f32 %v12399_v19, %v22938_v39  ;;  %v22977_v19 = vsub.f32 %v12396_v55, %v22953_v21 }
 0xb9c   : > { %17002 = vmatprep.mubr.msk.f32.mxu0 %vm18151_vm0, %v25039_v43  ;;  %v22956_v58 = vsub.f32 %v12401_v38, %v22934_v61  ;;  %16971 = vmatpush3.msra.mxu0 %v22934_v61 }
 0xb9d   : > { %v22959_v34 = vsub.f32 %v12400_v33, %v22936_v50  ;;  %16972 = vmatprep.subr.mxu0 %v25039_v43  ;;  %v24860_v33 = vand.u32 4294901760, %v22962_v22  ;;  %v24862_v16 = vand.u32 4294901760, %v22977_v19 }
 0xb9e   : > { %v24858_v35 = vand.u32 4294901760, %v22956_v58  ;;  %16973 = vmatpush3.msra.mxu0 %v22936_v50 }
 0xb9f   : > { %v24861_v38 = vand.u32 4294901760, %v22959_v34  ;;  %16974 = vmatprep.subr.mxu0 %v25039_v43  ;;  %v9044_v32 = vsub.f32 %v22962_v22, %v24860_v33 }
 0xba0   : > { %v9030_v2 = vsub.f32 %v22956_v58, %v24858_v35  ;;  %16975 = vmatpush3.msra.mxu0 %v22938_v39  ;;  %v9051_v35 = vsub.f32 %v22966_v8, %v25499_v5 }
 0xba1   : > { %v9037_v60 = vsub.f32 %v22959_v34, %v24861_v38  ;;  %16976 = vmatprep.subr.mxu0 %v25039_v43  ;;  %v9045_v33 = vand.u32 4294901760, %v9044_v32  ;;  %v9058_v38 = vsub.f32 %v22969_v62, %v24863_v15  ;;  %v12395_v32 = vld [vmem:[%s24261_s2 + $0x2c8] sm:$0xff] }
 0xba2   : > { %v9031_v55 = vand.u32 4294901760, %v9030_v2  ;;  %16977 = vmatpush3.msra.mxu0 %v22949_v6  ;;  %v9052_v5 = vand.u32 4294901760, %v9051_v35  ;;  %v9065_v2 = vsub.f32 %v22977_v19, %v24862_v16 }
 0xba3   : > { %v9038_v9 = vand.u32 4294901760, %v9037_v60  ;;  %16978 = vmatprep.subr.mxu0 %v25039_v43  ;;  %v23013_v60 = vand.u32 4294901760, %v12395_v32 }
 0xba4   : > { %17006 = vmatpush3.msra.mxu1 %v9031_v55  ;;  %16979 = vmatpush3.msra.mxu0 %v22951_v40  ;;  %v9059_v55 = vand.u32 4294901760, %v9058_v38  ;;  %v9066_v15 = vand.u32 4294901760, %v9065_v2 }
 0xba5   : > { %17007 = vmatprep.subr.mxu1 %v25039_v43  ;;  %16980 = vmatprep.subr.mxu0 %v25039_v43  ;;  %v23021_v35 = vsub.f32 %v12395_v32, %v23013_v60 }
 0xba6   : > { %17008 = vmatpush3.msra.mxu1 %v9038_v9  ;;  %16981 = vmatpush3.msra.mxu0 %v22953_v21  ;;  %v12394_v9 = vld [vmem:[%s24261_s2 + $0x2c0] sm:$0xff] }
 0xba7   : > { %17009 = vmatprep.subr.mxu1 %v25039_v43  ;;  %16982 = vmatprep.subr.mxu0 %v25039_v43  ;;  %v23023_v16 = vand.u32 4294901760, %v12394_v9  ;;  %v24868_v38 = vand.u32 4294901760, %v23021_v35 }
 0xba8   : > { %17010 = vmatpush3.msra.mxu1 %v9045_v33  ;;  %16983 = vmatpush3.msra.mxu0 %v23013_v60  ;;  %v12393_v33 = vld [vmem:[%s24261_s2 + $0x2b8] sm:$0xff] }
 0xba9   : > { %17011 = vmatprep.subr.mxu1 %v25039_v43  ;;  %16984 = vmatprep.subr.mxu0 %v25039_v43  ;;  %v23033_v18 = vsub.f32 %v12394_v9, %v23023_v16  ;;  %v23035_v32 = vand.u32 4294901760, %v12393_v33  ;;  %v9072_v2 = vsub.f32 %v23021_v35, %v24868_v38 }
 0xbaa   : > { %17012 = vmatpush3.msra.mxu1 %v9052_v5  ;;  %16985 = vmatpush3.msra.mxu0 %v23023_v16  ;;  %v12392_v5 = vld [vmem:[%s24261_s2 + $0x2b0] sm:$0xff] }
 0xbab   : > { %17013 = vmatprep.subr.mxu1 %v25039_v43  ;;  %16986 = vmatprep.subr.mxu0 %v25039_v43  ;;  %v24871_v9 = vand.u32 4294901760, %v23033_v18  ;;  %v23048_v31 = vsub.f32 %v12393_v33, %v23035_v32  ;;  %v23050_v41 = vand.u32 4294901760, %v12392_v5  ;;  %v9073_v56 = vand.u32 4294901760, %v9072_v2 }
 0xbac   : > { %17014 = vmatpush3.msra.mxu1 %v9059_v55  ;;  %16987 = vmatpush3.msra.mxu0 %v23035_v32  ;;  %v12391_v55 = vld [vmem:[%s24261_s2 + $0x2a8] sm:$0xff] }
 0xbad   : > { %17015 = vmatprep.subr.mxu1 %v25039_v43  ;;  %16988 = vmatprep.subr.mxu0 %v25039_v43  ;;  %v9079_v38 = vsub.f32 %v23033_v18, %v24871_v9  ;;  %v24877_v33 = vand.u32 4294901760, %v23048_v31  ;;  %v23063_v51 = vsub.f32 %v12392_v5, %v23050_v41  ;;  %v23076_v5 = vand.u32 4294901760, %v12390_v27 }
 0xbae   : > { %17016 = vmatpush3.msra.mxu1 %v9066_v15  ;;  %16989 = vmatpush3.msra.mxu0 %v23050_v41  ;;  %v23066_v15 = vand.u32 4294901760, %v12391_v55 }
 0xbaf   : > { %17017 = vmatprep.subr.mxu1 %v25039_v43  ;;  %16990 = vmatprep.subr.mxu0 %v25039_v43  ;;  %v9080_v2 = vand.u32 4294901760, %v9079_v38  ;;  %v9086_v9 = vsub.f32 %v23048_v31, %v24877_v33  ;;  %v24880_v36 = vand.u32 4294901760, %v23063_v51  ;;  %v23090_v33 = vsub.f32 %v12390_v27, %v23076_v5 }
 0xbb0   : > { %17018 = vmatpush3.msra.mxu1 %v9073_v56  ;;  %v23080_v46 = vsub.f32 %v12391_v55, %v23066_v15  ;;  %16991 = vmatpush3.msra.mxu0 %v23066_v15  ;;  %v23103_v27 = vsub.f32 %v12389_v20, %v23092_v1 }
 0xbb1   : > { %17019 = vmatprep.subr.mxu1 %v25039_v43  ;;  %v9087_v56 = vand.u32 4294901760, %v9086_v9  ;;  %v9093_v38 = vsub.f32 %v23063_v51, %v24880_v36  ;;  %16992 = vmatprep.subr.mxu0 %v25039_v43  ;;  %v24891_v36 = vand.u32 4294901760, %v23090_v33 }
 0xbb2   : > { %17020 = vmatpush3.msra.mxu1 %v9080_v2  ;;  %v24889_v55 = vand.u32 4294901760, %v23080_v46  ;;  %v12388_v2 = vld [vmem:[%s24261_s2 + $0x290] sm:$0xff]  ;;  %16993 = vmatpush3.msra.mxu0 %v23076_v5 }
 0xbb3   : > { %17021 = vmatprep.subr.mxu1 %v25039_v43  ;;  %v9094_v9 = vand.u32 4294901760, %v9093_v38  ;;  %v23105_v25 = vand.u32 4294901760, %v12388_v2  ;;  %16994 = vmatprep.subr.mxu0 %v25039_v43  ;;  %v9107_v20 = vsub.f32 %v23090_v33, %v24891_v36  ;;  %v24894_v38 = vand.u32 4294901760, %v23103_v27 }
 0xbb4   : > { %17022 = vmatpush3.msra.mxu1 %v9087_v56  ;;  %v9100_v44 = vsub.f32 %v23080_v46, %v24889_v55  ;;  %v12387_v56 = vld [vmem:[%s24261_s2 + $0x288] sm:$0xff]  ;;  %16995 = vmatpush3.msra.mxu0 %v23092_v1 }
 0xbb5   : > { %17023 = vmatprep.subr.mxu1 %v25039_v43  ;;  %v23121_v23 = vsub.f32 %v12388_v2, %v23105_v25  ;;  %v23123_v49 = vand.u32 4294901760, %v12387_v56  ;;  %16996 = vmatprep.subr.mxu0 %v25039_v43  ;;  %v9108_v0 = vand.u32 4294901760, %v9107_v20  ;;  %v9114_v36 = vsub.f32 %v23103_v27, %v24894_v38 }
 0xbb6   : > { %17024 = vmatpush3.msra.mxu1 %v9094_v9  ;;  %v9101_v55 = vand.u32 4294901760, %v9100_v44  ;;  %v12386_v9 = vld [vmem:[%s24261_s2 + $0x280] sm:$0xff]  ;;  %16997 = vmatpush3.msra.mxu0 %v23105_v25 }
 0xbb7   : > { %17025 = vmatprep.subr.mxu1 %v25039_v43  ;;  %v24895_v2 = vand.u32 4294901760, %v23121_v23  ;;  %v23136_v63 = vsub.f32 %v12387_v56, %v23123_v49  ;;  %16998 = vmatprep.subr.mxu0 %v25039_v43  ;;  %v23139_v44 = vand.u32 4294901760, %v12386_v9  ;;  %v9115_v37 = vand.u32 4294901760, %v9114_v36 }
 0xbb8   : > { %17026 = vmatpush3.msra.mxu1 %v9101_v55  ;;  %16999 = vmatpush3.msra.mxu0 %v23123_v49 }
 0xbb9   : > { %17027 = vmatprep.subr.mxu1 %v25039_v43  ;;  %v9121_v20 = vsub.f32 %v23121_v23, %v24895_v2  ;;  %v24896_v38 = vand.u32 4294901760, %v23136_v63  ;;  %17000 = vmatprep.subr.mxu0 %v25039_v43  ;;  %v23149_v56 = vsub.f32 %v12386_v9, %v23139_v44 }
 0xbba   : > { %17028 = vmatpush3.msra.mxu1 %v9108_v0  ;;  %17001 = vmatpush3.msra.mxu0 %v23139_v44 }
 0xbbb   : > { %17029 = vmatprep.subr.mxu1 %v25039_v43  ;;  %v9122_v55 = vand.u32 4294901760, %v9121_v20  ;;  %v9128_v36 = vsub.f32 %v23136_v63, %v24896_v38  ;;  %17040 = vmatprep.subr.mxu0 %v25039_v43  ;;  %v24903_v2 = vand.u32 4294901760, %v23149_v56 }
 0xbbc   : > { %17030 = vmatpush3.msra.mxu1 %v9115_v37 }
 0xbbd   : > { %17031 = vmatprep.subr.mxu1 %v25039_v43  ;;  %v9129_v0 = vand.u32 4294901760, %v9128_v36  ;;  %v9135_v9 = vsub.f32 %v23149_v56, %v24903_v2 }
 0xbbe   : > { %17032 = vmatpush3.msra.mxu1 %v9122_v55 }
 0xbbf   : > { %17033 = vmatprep.subr.mxu1 %v25039_v43  ;;  %v9136_v20 = vand.u32 4294901760, %v9135_v9 }
 0xbc0   : > { %17034 = vmatpush3.msra.mxu1 %v9129_v0 }
 0xbc1   : > { %17035 = vmatprep.subr.mxu1 %v25039_v43 }
 0xbc2   : > { %17036 = vmatpush3.msra.mxu1 %v9136_v20  ;;  %v8914_v20 = vrot.slane %v22763_v13, %v19781_v54  ;;  %v25507_v13 = vand.u32 4294901760, %v23033_v18 }
 0xbc3   : > { %17075 = vmatprep.subr.mxu1 %v25039_v43 }
 0xc11   : > { %v8506_v37 = vpop.f32.mrf.mxu1 }
 0xc13   : > { %v16829_v38 = vpop.f32.mrf.mxu1 }
 0xc19   : > { %v8355_v17 = vpop.f32.mrf.mxu0 }
 0xc1a   : > { %v8507_v4 = vadd.f32 %v8506_v37, %v8355_v17  ;;  %v25505_v17 = vand.u32 4294901760, %v22977_v19 }
 0xc1b   : > { %v16794_v26 = vpop.f32.mrf.mxu0 }
 0xc31   : > { %v8699_v52 = vpop.f32.mrf.mxu1 }
 0xc33   : > { %v16899_v36 = vpop.f32.mrf.mxu1 }
 0xc3a   : > { %v8610_v55 = vpop.f32.mrf.mxu0 }
 0xc3b   : > { %v8611_v14 = vadd.f32 %v8610_v55, %v8507_v4  ;;  %v25503_v4 = vand.u32 4294901760, %v22966_v8 }
 0xc3c   : > { %v16864_v59 = vpop.f32.mrf.mxu0 }
 0xc3d   : > { %v8700_v57 = vadd.f32 %v8699_v52, %v8611_v14  ;;  %v25504_v52 = vand.u32 4294901760, %v22969_v62 }
 0xc53   : > { %v8905_v45 = vpop.f32.mrf.mxu1 }
 0xc55   : > { %v16969_v2 = vpop.f32.mrf.mxu1 }
 0xc5b   : > { %v8818_v0 = vpop.f32.mrf.mxu0 }
 0xc5c   : > { %v8819_v9 = vadd.f32 %v8818_v0, %v8700_v57  ;;  %v25502_v57 = vand.u32 4294901760, %v22962_v22 }
 0xc5d   : > { %v16934_v47 = vpop.f32.mrf.mxu0 }
 0xc5e   : > { %v8906_v11 = vadd.f32 %v8905_v45, %v8819_v9  ;;  %v25501_v47 = vand.u32 4294901760, %v22959_v34 }
 0xc60   : > { %v8915_v38 = vmul.f32 %v8914_v20, %v8906_v11  ;;  %v25500_v11 = vand.u32 4294901760, %v22956_v58 }
 0xc62   : > { %v8916_v12 = vmul.f32 %v8915_v38, %v8910_v42 }
 0xc64   : > { %v23168_v26 = vsub.f32 %v22770_v29, %v8916_v12  ;;  %v25509_v29 = vand.u32 4294901760, %v23063_v51 }
 0xc66   : > { %v23171_v59 = vand.u32 4294901760, %v23168_v26 }
 0xc68   : > { %17038 = vmatmul.mubr.f32.vlgmr.msra.gmra.mxu1 %v23171_v59  ;;  %v23176_v14 = vsub.f32 %v23168_v26, %v23171_v59 }
 0xc69   : > { %17076 = vmatpush3.msra.mxu1 %v22934_v61  ;;  %17107 = vmatprep.mubr.msk.f32.mxu1 %vm18151_vm0, %v25039_v43 }
 0xc6a   : > { %17077 = vmatprep.subr.mxu1 %v25039_v43  ;;  %v9018_v45 = vand.u32 4294901760, %v23176_v14 }
 0xc6b   : > { %17078 = vmatpush3.msra.mxu1 %v22936_v50 }
 0xc6c   : > { %17079 = vmatprep.subr.mxu1 %v25039_v43  ;;  %v9019_v12 = vsub.f32 %v23176_v14, %v9018_v45 }
 0xc6d   : > { %17080 = vmatpush3.msra.mxu1 %v22938_v39 }
 0xc6e   : > { %17081 = vmatprep.subr.mxu1 %v25039_v43  ;;  %v9020_v42 = vand.u32 4294901760, %v9019_v12  ;;  %v25540_v12 = vld [vmem:[#allocation137_spill] sm:$0xff] }
 0xc6f   : > { %17082 = vmatpush3.msra.mxu1 %v22949_v6 }
 0xc70   : > { %17083 = vmatprep.subr.mxu1 %v25039_v43  ;;  %17003 = vmatmul.mubr.f32.vlgmr.msra.gmra.mxu0 %v9020_v42 }
 0xc71   : > { %17041 = vmatpush3.msra.mxu0 %v22956_v58  ;;  %17084 = vmatpush3.msra.mxu1 %v22951_v40  ;;  %v25529_v58 = vld [vmem:[#allocation68_spill] sm:$0xff] }
 0xc72   : > { %17042 = vmatprep.subr.mxu0 %v25039_v43  ;;  %17085 = vmatprep.subr.mxu1 %v25039_v43 }
 0xc73   : > { %17043 = vmatpush3.msra.mxu0 %v22959_v34  ;;  %17086 = vmatpush3.msra.mxu1 %v22953_v21  ;;  %v25528_v34 = vld [vmem:[#allocation28_spill] sm:$0xff] }
 0xc74   : > { %17044 = vmatprep.subr.mxu0 %v25039_v43  ;;  %17087 = vmatprep.subr.mxu1 %v25039_v43 }
 0xc75   : > { %17045 = vmatpush3.msra.mxu0 %v22962_v22  ;;  %17088 = vmatpush3.msra.mxu1 %v23013_v60  ;;  %v25527_v22 = vld [vmem:[#allocation66_spill] sm:$0xff] }
 0xc76   : > { %17046 = vmatprep.subr.mxu0 %v25039_v43  ;;  %17089 = vmatprep.subr.mxu1 %v25039_v43 }
 0xc77   : > { %17047 = vmatpush3.msra.mxu0 %v22966_v8  ;;  %17090 = vmatpush3.msra.mxu1 %v23023_v16  ;;  %v25526_v8 = vld [vmem:[#allocation25_spill] sm:$0xff] }
 0xc78   : > { %17048 = vmatprep.subr.mxu0 %v25039_v43  ;;  %17091 = vmatprep.subr.mxu1 %v25039_v43 }
 0xc79   : > { %17049 = vmatpush3.msra.mxu0 %v22969_v62  ;;  %17092 = vmatpush3.msra.mxu1 %v23035_v32  ;;  %v25525_v62 = vld [vmem:[#allocation64_spill] sm:$0xff] }
 0xc7a   : > { %17050 = vmatprep.subr.mxu0 %v25039_v43  ;;  %17093 = vmatprep.subr.mxu1 %v25039_v43 }
 0xc7b   : > { %17051 = vmatpush3.msra.mxu0 %v22977_v19  ;;  %17094 = vmatpush3.msra.mxu1 %v23050_v41  ;;  %v25536_v19 = vld [vmem:[#allocation44_spill] sm:$0xff] }
 0xc7c   : > { %17052 = vmatprep.subr.mxu0 %v25039_v43  ;;  %17095 = vmatprep.subr.mxu1 %v25039_v43 }
 0xc7d   : > { %17053 = vmatpush3.msra.mxu0 %v23021_v35  ;;  %17096 = vmatpush3.msra.mxu1 %v23066_v15 }
 0xc7e   : > { %17054 = vmatprep.subr.mxu0 %v25039_v43  ;;  %17097 = vmatprep.subr.mxu1 %v25039_v43 }
 0xc7f   : > { %17055 = vmatpush3.msra.mxu0 %v23033_v18  ;;  %17098 = vmatpush3.msra.mxu1 %v23076_v5  ;;  %v25510_v18 = vand.u32 4294901760, %v23080_v46 }
 0xc80   : > { %17056 = vmatprep.subr.mxu0 %v25039_v43  ;;  %17099 = vmatprep.subr.mxu1 %v25039_v43 }
 0xc81   : > { %17057 = vmatpush3.msra.mxu0 %v23048_v31  ;;  %17100 = vmatpush3.msra.mxu1 %v23092_v1 }
 0xc82   : > { %17058 = vmatprep.subr.mxu0 %v25039_v43  ;;  %17101 = vmatprep.subr.mxu1 %v25039_v43 }
 0xc83   : > { %17059 = vmatpush3.msra.mxu0 %v23063_v51  ;;  %17102 = vmatpush3.msra.mxu1 %v23105_v25  ;;  %v25524_v51 = vld [vmem:[#allocation17_spill] sm:$0xff] }
 0xc84   : > { %17060 = vmatprep.subr.mxu0 %v25039_v43  ;;  %17103 = vmatprep.subr.mxu1 %v25039_v43 }
 0xc85   : > { %17061 = vmatpush3.msra.mxu0 %v23080_v46  ;;  %17104 = vmatpush3.msra.mxu1 %v23123_v49  ;;  %v25512_v46 = vand.u32 4294901760, %v23103_v27 }
 0xc86   : > { %17062 = vmatprep.subr.mxu0 %v25039_v43  ;;  %17105 = vmatprep.subr.mxu1 %v25039_v43 }
 0xc87   : > { %17063 = vmatpush3.msra.mxu0 %v23090_v33  ;;  %17106 = vmatpush3.msra.mxu1 %v23139_v44 }
 0xc88   : > { %17064 = vmatprep.subr.mxu0 %v25039_v43  ;;  %17108 = vmatmul.mubr.f32.vlgmr.msra.gmra.mxu1 %v9018_v45 }
 0xc89   : > { %17145 = vmatprep.subr.mxu1 %v25039_v43  ;;  %17065 = vmatpush3.msra.mxu0 %v23103_v27 }
 0xc8a   : > { %17146 = vmatpush3.msra.mxu1 %v22934_v61  ;;  %17066 = vmatprep.subr.mxu0 %v25039_v43  ;;  %v25534_v61 = vld [vmem:[#allocation40_spill] sm:$0xff] }
 0xc8b   : > { %17147 = vmatprep.subr.mxu1 %v25039_v43  ;;  %17067 = vmatpush3.msra.mxu0 %v23121_v23 }
 0xc8c   : > { %17148 = vmatpush3.msra.mxu1 %v22936_v50  ;;  %17068 = vmatprep.subr.mxu0 %v25039_v43  ;;  %v25535_v50 = vld [vmem:[#allocation72_spill] sm:$0xff] }
 0xc8d   : > { %17149 = vmatprep.subr.mxu1 %v25039_v43  ;;  %17069 = vmatpush3.msra.mxu0 %v23136_v63 }
 0xc8e   : > { %17150 = vmatpush3.msra.mxu1 %v22938_v39  ;;  %17070 = vmatprep.subr.mxu0 %v25039_v43  ;;  %v25533_v39 = vld [vmem:[#allocation71_spill] sm:$0xff] }
 0xc8f   : > { %17151 = vmatprep.subr.mxu1 %v25039_v43  ;;  %17071 = vmatpush3.msra.mxu0 %v23149_v56 }
 0xc90   : > { %17072 = vmatprep.mubr.msk.f32.mxu0 %vm18151_vm0, %v25039_v43  ;;  %17152 = vmatpush3.msra.mxu1 %v22949_v6  ;;  %v25532_v6 = vld [vmem:[#allocation36_spill] sm:$0xff] }
 0xc91   : > { %17073 = vmatmul.mubr.f32.vlgmr.msra.gmra.mxu0 %v23176_v14  ;;  %17110 = vmatprep.subr.mxu0 %v25039_v43 }
 0xc92   : > { %17153 = vmatprep.subr.mxu1 %v25039_v43  ;;  %17111 = vmatpush3.msra.mxu0 %v25500_v11  ;;  %v18077_v11 = vld [vmem:[#allocation2 + $0xc0] sm:$0xff] }
 0xc93   : > { %17154 = vmatpush3.msra.mxu1 %v22951_v40  ;;  %17112 = vmatprep.subr.mxu0 %v25039_v43  ;;  %v25531_v40 = vld [vmem:[#allocation70_spill] sm:$0xff] }
 0xc94   : > { %17155 = vmatprep.subr.mxu1 %v25039_v43  ;;  %17113 = vmatpush3.msra.mxu0 %v25501_v47 }
 0xc95   : > { %17156 = vmatpush3.msra.mxu1 %v22953_v21  ;;  %17114 = vmatprep.subr.mxu0 %v25039_v43  ;;  %v25530_v21 = vld [vmem:[#allocation32_spill] sm:$0xff] }
 0xc96   : > { %17157 = vmatprep.subr.mxu1 %v25039_v43  ;;  %17115 = vmatpush3.msra.mxu0 %v25502_v57 }
 0xc97   : > { %17158 = vmatpush3.msra.mxu1 %v23013_v60  ;;  %17116 = vmatprep.subr.mxu0 %v25039_v43  ;;  %v25537_v60 = vld [vmem:[#allocation48_spill] sm:$0xff] }
 0xc98   : > { %17159 = vmatprep.subr.mxu1 %v25039_v43  ;;  %17117 = vmatpush3.msra.mxu0 %v25503_v4 }
 0xc99   : > { %17160 = vmatpush3.msra.mxu1 %v23023_v16  ;;  %17118 = vmatprep.subr.mxu0 %v25039_v43  ;;  %v25506_v16 = vand.u32 4294901760, %v23021_v35  ;;  %v25538_v35 = vld [vmem:[#allocation52_spill] sm:$0xff] }
 0xc9a   : > { %17161 = vmatprep.subr.mxu1 %v25039_v43  ;;  %17119 = vmatpush3.msra.mxu0 %v25504_v52 }
 0xc9b   : > { %17162 = vmatpush3.msra.mxu1 %v23035_v32  ;;  %17120 = vmatprep.subr.mxu0 %v25039_v43  ;;  %v25539_v32 = vld [vmem:[#allocation54_spill] sm:$0xff] }
 0xc9c   : > { %17163 = vmatprep.subr.mxu1 %v25039_v43  ;;  %17121 = vmatpush3.msra.mxu0 %v25505_v17 }
 0xc9d   : > { %17164 = vmatpush3.msra.mxu1 %v23050_v41  ;;  %17122 = vmatprep.subr.mxu0 %v25039_v43  ;;  %v25508_v41 = vand.u32 4294901760, %v23048_v31  ;;  %v25515_v31 = vand.u32 4294901760, %v23149_v56 }
 0xc9e   : > { %17165 = vmatprep.subr.mxu1 %v25039_v43  ;;  %17123 = vmatpush3.msra.mxu0 %v25506_v16 }
 0xc9f   : > { %17166 = vmatpush3.msra.mxu1 %v23066_v15  ;;  %17124 = vmatprep.subr.mxu0 %v25039_v43 }
 0xca0   : > { %17167 = vmatprep.subr.mxu1 %v25039_v43  ;;  %17125 = vmatpush3.msra.mxu0 %v25507_v13  ;;  %v9588_v13 = vld [vmem:[#allocation2 + $0x80] sm:$0xff] }
 0xca1   : > { %17168 = vmatpush3.msra.mxu1 %v23076_v5  ;;  %17126 = vmatprep.subr.mxu0 %v25039_v43  ;;  %vm9589_vm9 = vcmp.ne.f32.partialorder %v9588_v13, 0.0  ;;  %v25592_v13 = vld [vmem:[#allocation97_spill] sm:$0xff] }
 0xca2   : > { %17169 = vmatprep.subr.mxu1 %v25039_v43  ;;  %17127 = vmatpush3.msra.mxu0 %v25508_v41  ;;  %v25541_v41 = vld [vmem:[#allocation69_spill] sm:$0xff] }
 0xca3   : > { %17170 = vmatpush3.msra.mxu1 %v23092_v1  ;;  %17128 = vmatprep.subr.mxu0 %v25039_v43  ;;  %v25511_v1 = vand.u32 4294901760, %v23090_v33 }
 0xca4   : > { %17171 = vmatprep.subr.mxu1 %v25039_v43  ;;  %17129 = vmatpush3.msra.mxu0 %v25509_v29 }
 0xca5   : > { %17172 = vmatpush3.msra.mxu1 %v23105_v25  ;;  %17130 = vmatprep.subr.mxu0 %v25039_v43  ;;  %v25514_v25 = vand.u32 4294901760, %v23136_v63  ;;  %v25523_v63 = vld [vmem:[#allocation61_spill] sm:$0xff] }
 0xca6   : > { %17173 = vmatprep.subr.mxu1 %v25039_v43  ;;  %17131 = vmatpush3.msra.mxu0 %v25510_v18 }
 0xca7   : > { %17174 = vmatpush3.msra.mxu1 %v23123_v49  ;;  %17132 = vmatprep.subr.mxu0 %v25039_v43  ;;  %v25513_v49 = vand.u32 4294901760, %v23121_v23  ;;  %v25516_v23 = vld [vmem:[#allocation10_spill] sm:$0xff] }
 0xca8   : > { %17175 = vmatprep.subr.mxu1 %v25039_v43  ;;  %17133 = vmatpush3.msra.mxu0 %v25511_v1 }
 0xca9   : > { %17176 = vmatpush3.msra.mxu1 %v23139_v44  ;;  %17177 = vmatprep.mubr.msk.f32.mxu1 %vm18151_vm0, %v25039_v43 }
 0xcaa   : > { %17134 = vmatprep.subr.mxu0 %v25039_v43  ;;  %17178 = vmatmul.mubr.f32.vlgmr.msra.gmra.mxu1 %v23171_v59 }
 0xcab   : > { %17135 = vmatpush3.msra.mxu0 %v25512_v46  ;;  %17142 = vmatprep.mubr.msk.f32.mxu0 %vm18151_vm0, %v25039_v43 }
 0xcac   : > { %17136 = vmatprep.subr.mxu0 %v25039_v43  ;;  %17215 = vmatprep.subr.mxu1 %v25039_v43 }
 0xcad   : > { %17137 = vmatpush3.msra.mxu0 %v25513_v49  ;;  %17216 = vmatpush3.msra.mxu1 %v25248_v24  ;;  %v25517_v24 = vld [vmem:[#allocation50_spill] sm:$0xff] }
 0xcae   : > { %17138 = vmatprep.subr.mxu0 %v25039_v43  ;;  %17217 = vmatprep.subr.mxu1 %v25039_v43 }
 0xcaf   : > { %17139 = vmatpush3.msra.mxu0 %v25514_v25  ;;  %17218 = vmatpush3.msra.mxu1 %v25249_v10  ;;  %v25518_v10 = vld [vmem:[#allocation11_spill] sm:$0xff] }
 0xcb0   : > { %17140 = vmatprep.subr.mxu0 %v25039_v43  ;;  %17219 = vmatprep.subr.mxu1 %v25039_v43 }
 0xcb1   : > { %17141 = vmatpush3.msra.mxu0 %v25515_v31  ;;  %17220 = vmatpush3.msra.mxu1 %v25250_v48  ;;  %v25519_v48 = vld [vmem:[#allocation55_spill] sm:$0xff] }
 0xcb2   : > { %17143 = vmatmul.mubr.f32.vlgmr.msra.gmra.mxu0 %v23171_v59  ;;  %17221 = vmatprep.subr.mxu1 %v25039_v43 }
 0xcb3   : > { %17222 = vmatpush3.msra.mxu1 %v25251_v28  ;;  %17180 = vmatprep.subr.mxu0 %v25039_v43  ;;  %v25520_v28 = vld [vmem:[#allocation12_spill] sm:$0xff] }
 0xcb4   : > { %17223 = vmatprep.subr.mxu1 %v25039_v43  ;;  %17181 = vmatpush3.msra.mxu0 %v25252_v3 }
 0xcb5   : > { %17224 = vmatpush3.msra.mxu1 %v25253_v7  ;;  %17182 = vmatprep.subr.mxu0 %v25039_v43  ;;  %v25521_v7 = vld [vmem:[#allocation58_spill] sm:$0xff] }
 0xcb6   : > { %17225 = vmatprep.subr.mxu1 %v25039_v43  ;;  %17183 = vmatpush3.msra.mxu0 %v25254_v53 }
 0xcb7   : > { %17226 = vmatpush3.msra.mxu1 %v25255_v30  ;;  %17184 = vmatprep.subr.mxu0 %v25039_v43  ;;  %v25522_v30 = vld [vmem:[#allocation13_spill] sm:$0xff] }
 0xcb8   : > { %17227 = vmatprep.subr.mxu1 %v25039_v43  ;;  %17185 = vmatpush3.msra.mxu0 %v25516_v23 }
 0xcb9   : > { %17228 = vmatpush3.msra.mxu1 %v25517_v24  ;;  %17186 = vmatprep.subr.mxu0 %v25039_v43  ;;  %v25542_v24 = vld [vmem:[#allocation14_spill] sm:$0xff] }
 0xcba   : > { %17229 = vmatprep.subr.mxu1 %v25039_v43  ;;  %17187 = vmatpush3.msra.mxu0 %v25518_v10 }
 0xcbb   : > { %17230 = vmatpush3.msra.mxu1 %v25519_v48  ;;  %17188 = vmatprep.subr.mxu0 %v25039_v43  ;;  %v25543_v48 = vld [vmem:[#allocation15_spill] sm:$0xff] }
 0xcbc   : > { %17231 = vmatprep.subr.mxu1 %v25039_v43  ;;  %17189 = vmatpush3.msra.mxu0 %v25520_v28 }
 0xcbd   : > { %17232 = vmatpush3.msra.mxu1 %v25521_v7  ;;  %17190 = vmatprep.subr.mxu0 %v25039_v43  ;;  %v25544_v7 = vld [vmem:[#allocation16_spill] sm:$0xff] }
 0xcbe   : > { %17233 = vmatprep.subr.mxu1 %v25039_v43  ;;  %17191 = vmatpush3.msra.mxu0 %v25522_v30 }
 0xcbf   : > { %17234 = vmatpush3.msra.mxu1 %v25523_v63  ;;  %17192 = vmatprep.subr.mxu0 %v25039_v43  ;;  %v25545_v63 = vld [vmem:[#allocation18_spill] sm:$0xff] }
 0xcc0   : > { %17235 = vmatprep.subr.mxu1 %v25039_v43  ;;  %17193 = vmatpush3.msra.mxu0 %v25524_v51 }
 0xcc1   : > { %17236 = vmatpush3.msra.mxu1 %v25525_v62  ;;  %17194 = vmatprep.subr.mxu0 %v25039_v43  ;;  %v25546_v62 = vld [vmem:[#allocation19_spill] sm:$0xff] }
 0xcc2   : > { %17237 = vmatprep.subr.mxu1 %v25039_v43  ;;  %17195 = vmatpush3.msra.mxu0 %v25526_v8 }
 0xcc3   : > { %17238 = vmatpush3.msra.mxu1 %v25527_v22  ;;  %17196 = vmatprep.subr.mxu0 %v25039_v43  ;;  %v25547_v22 = vld [vmem:[#allocation23_spill] sm:$0xff] }
 0xcc4   : > { %17239 = vmatprep.subr.mxu1 %v25039_v43  ;;  %17197 = vmatpush3.msra.mxu0 %v25528_v34 }
 0xcc5   : > { %17240 = vmatpush3.msra.mxu1 %v25529_v58  ;;  %17198 = vmatprep.subr.mxu0 %v25039_v43  ;;  %v25548_v58 = vld [vmem:[#allocation27_spill] sm:$0xff] }
 0xcc6   : > { %17241 = vmatprep.subr.mxu1 %v25039_v43  ;;  %17199 = vmatpush3.msra.mxu0 %v25530_v21 }
 0xcc7   : > { %17242 = vmatpush3.msra.mxu1 %v25531_v40  ;;  %17200 = vmatprep.subr.mxu0 %v25039_v43  ;;  %v25549_v40 = vld [vmem:[#allocation34_spill] sm:$0xff] }
 0xcc8   : > { %17243 = vmatprep.subr.mxu1 %v25039_v43  ;;  %17201 = vmatpush3.msra.mxu0 %v25532_v6 }
 0xcc9   : > { %17244 = vmatpush3.msra.mxu1 %v25533_v39  ;;  %17202 = vmatprep.subr.mxu0 %v25039_v43  ;;  %v25550_v39 = vld [vmem:[#allocation37_spill] sm:$0xff] }
 0xcca   : > { %17245 = vmatprep.subr.mxu1 %v25039_v43  ;;  %17203 = vmatpush3.msra.mxu0 %v25534_v61 }
 0xccb   : > { %17246 = vmatpush3.msra.mxu1 %v25535_v50  ;;  %17204 = vmatprep.subr.mxu0 %v25039_v43  ;;  %v25551_v50 = vld [vmem:[#allocation41_spill] sm:$0xff] }
 0xccc   : > { %17247 = vmatprep.mubr.msk.f32.mxu1 %vm18151_vm0, %v25039_v43  ;;  %17285 = vmatprep.subr.mxu1 %v25039_v43 }
 0xccd   : > { %17205 = vmatpush3.msra.mxu0 %v25536_v19  ;;  %17212 = vmatprep.mubr.msk.f32.mxu0 %vm18151_vm0, %v25039_v43 }
 0xcce   : > { %17206 = vmatprep.subr.mxu0 %v25039_v43 }
 0xccf   : > { %17207 = vmatpush3.msra.mxu0 %v25537_v60 }
 0xcd0   : > { %17208 = vmatprep.subr.mxu0 %v25039_v43 }
 0xcd1   : > { %17209 = vmatpush3.msra.mxu0 %v25538_v35 }
 0xcd2   : > { %17210 = vmatprep.subr.mxu0 %v25039_v43 }
 0xcd3   : > { %17211 = vmatpush3.msra.mxu0 %v25539_v32 }
 0xcd4   : > { %17250 = vmatprep.subr.mxu0 %v25039_v43 }
 0xd28   : > { %v9173_v33 = vpop.f32.mrf.mxu1 }
 0xd2a   : > { %v17039_v15 = vpop.f32.mrf.mxu1 }
 0xd2b   : > { %v25553_v15 = vld [vmem:[#allocation49_spill] sm:$0xff] }
 0xd30   : > { %v9022_v5 = vpop.f32.mrf.mxu0 }
 0xd31   : > { %v9174_v55 = vadd.f32 %v9173_v33, %v9022_v5  ;;  %v25552_v33 = vld [vmem:[#allocation45_spill] sm:$0xff] }
 0xd32   : > { %v17004_v27 = vpop.f32.mrf.mxu0  ;;  %v25554_v5 = vld [vmem:[#allocation53_spill] sm:$0xff] }
 0xd33   : > { %v25555_v27 = vld [vmem:[#allocation57_spill] sm:$0xff] }
 0xd48   : > { %v9366_v2 = vpop.f32.mrf.mxu1 }
 0xd4a   : > { %v17109_v44 = vpop.f32.mrf.mxu1 }
 0xd4b   : > { %v25572_v44 = vld [vmem:[#allocation82_spill] sm:$0xff] }
 0xd51   : > { %v9277_v56 = vpop.f32.mrf.mxu0 }
 0xd52   : > { %v9278_v9 = vadd.f32 %v9277_v56, %v9174_v55  ;;  %v25574_v56 = vld [vmem:[#allocation86_spill] sm:$0xff] }
 0xd53   : > { %v17074_v37 = vpop.f32.mrf.mxu0  ;;  %v25577_v55 = vld [vmem:[#allocation94_spill] sm:$0xff] }
 0xd54   : > { %v9367_v20 = vadd.f32 %v9366_v2, %v9278_v9  ;;  %v25556_v2 = vld [vmem:[#allocation60_spill] sm:$0xff]  ;;  %v25575_v37 = vld [vmem:[#allocation67_spill] sm:$0xff]  ;;  %v25579_v9 = vld [vmem:[#allocation101_spill] sm:$0xff] }
 0xd6a   : > { %v9572_v36 = vpop.f32.mrf.mxu1 }
 0xd6c   : > { %v17179_v0 = vpop.f32.mrf.mxu1 }
 0xd6d   : > { %v25578_v0 = vld [vmem:[#allocation73_spill] sm:$0xff] }
 0xd72   : > { %v9485_v38 = vpop.f32.mrf.mxu0 }
 0xd73   : > { %v9486_v59 = vadd.f32 %v9485_v38, %v9367_v20  ;;  %v25580_v20 = vld [vmem:[#allocation75_spill] sm:$0xff]  ;;  %v25581_v38 = vld [vmem:[#allocation102_spill] sm:$0xff] }
 0xd74   : > { %v17144_v14 = vpop.f32.mrf.mxu0 }
 0xd75   : > { %v9573_v45 = vadd.f32 %v9572_v36, %v9486_v59  ;;  %v25576_v36 = vld [vmem:[#allocation90_spill] sm:$0xff] }
 0xd76   : > { %v25582_v59 = vld [vmem:[#allocation78_spill] sm:$0xff] }
 0xd77   : > { %v9579_v42 = vrot.slane %v9573_v45, %v25540_v12  ;;  %v25583_v14 = vld [vmem:[#allocation106_spill] sm:$0xff]  ;;  %v25584_v45 = vld [vmem:[#allocation81_spill] sm:$0xff] }
 0xd79   : > { %v9580_v47 = vmul.f32 %v18077_v11, %v9579_v42  ;;  %v25585_v42 = vld [vmem:[#allocation110_spill] sm:$0xff]  ;;  %v25586_v11 = vld [vmem:[#allocation85_spill] sm:$0xff] }
 0xd7b   : > { %v23405_v57 = vsub.f32 %v23168_v26, %v9580_v47  ;;  %v25587_v47 = vld [vmem:[#allocation114_spill] sm:$0xff] }
 0xd7d   : > { %18069 = vrcp.f32 %v23405_v57 }
 0xd8a   : > { %v18070_v4 = vpop.eup %18069 }
 0xd8b   : > { %v9584_v52 = vmul.f32 %v18070_v4, %v23405_v57 }
 0xd8d   : > { %v9585_v17 = vsub.f32 2.0, %v9584_v52  ;;  %v25589_v52 = vld [vmem:[#allocation121_spill] sm:$0xff] }
 0xd8f   : > { %v9586_v16 = vmul.f32 %v18070_v4, %v9585_v17  ;;  %v25588_v4 = vld [vmem:[#allocation88_spill] sm:$0xff] }
 0xd90   : > { %v25590_v17 = vld [vmem:[#allocation92_spill] sm:$0xff] }
 0xd91   : > { %v9593_v29 = vrot.slane %v9586_v16, %v25541_v41  ;;  %v25591_v16 = vld [vmem:[#allocation124_spill] sm:$0xff] }
 0xd93   : > { %v9594_v18 = vmul.f32 %v9593_v29, %v23405_v57  ;;  %v25593_v29 = vld [vmem:[#allocation129_spill] sm:$0xff] }
 0xd95   : > { %v23412_v1 = vsel %vm9589_vm9, %v9594_v18, %v23405_v57  ;;  %v25594_v18 = vld [vmem:[#allocation100_spill] sm:$0xff] }
 0xd96   : > { %v23415_v46 = vand.u32 4294901760, %v23412_v1 }
 0xd98   : > { %v23419_v26 = vsub.f32 %v23412_v1, %v23415_v46  ;;  %17248 = vmatmul.mubr.f32.vlgmr.msra.gmra.mxu1 %v23415_v46 }
 0xd99   : > { %17286 = vmatpush3.msra.mxu1 %v25252_v3  ;;  %17317 = vmatprep.mubr.msk.f32.mxu1 %vm18151_vm0, %v25039_v43 }
 0xd9a   : > { %17287 = vmatprep.subr.mxu1 %v25039_v43  ;;  %v9679_v49 = vand.u32 4294901760, %v23419_v26 }
 0xd9b   : > { %17288 = vmatpush3.msra.mxu1 %v25254_v53 }
 0xd9c   : > { %17289 = vmatprep.subr.mxu1 %v25039_v43  ;;  %v9680_v25 = vsub.f32 %v23419_v26, %v9679_v49 }
 0xd9d   : > { %17290 = vmatpush3.msra.mxu1 %v25516_v23 }
 0xd9e   : > { %17291 = vmatprep.subr.mxu1 %v25039_v43  ;;  %v9681_v31 = vand.u32 4294901760, %v9680_v25  ;;  %v25598_v25 = vld [vmem:[#allocation108_spill] sm:$0xff] }
 0xd9f   : > { %17292 = vmatpush3.msra.mxu1 %v25518_v10 }
 0xda0   : > { %17293 = vmatprep.subr.mxu1 %v25039_v43  ;;  %17213 = vmatmul.mubr.f32.vlgmr.msra.gmra.mxu0 %v9681_v31  ;;  %v25599_v31 = vld [vmem:[#allocation135_spill] sm:$0xff] }
 0xda1   : > { %17251 = vmatpush3.msra.mxu0 %v25542_v24  ;;  %17294 = vmatpush3.msra.mxu1 %v25520_v28  ;;  %v25600_v24 = vld [vmem:[#allocation112_spill] sm:$0xff] }
 0xda2   : > { %17252 = vmatprep.subr.mxu0 %v25039_v43  ;;  %17295 = vmatprep.subr.mxu1 %v25039_v43 }
 0xda3   : > { %17253 = vmatpush3.msra.mxu0 %v25543_v48  ;;  %17296 = vmatpush3.msra.mxu1 %v25522_v30  ;;  %v25601_v48 = vld [vmem:[#allocation136_spill] sm:$0xff] }
 0xda4   : > { %17254 = vmatprep.subr.mxu0 %v25039_v43  ;;  %17297 = vmatprep.subr.mxu1 %v25039_v43 }
 0xda5   : > { %17255 = vmatpush3.msra.mxu0 %v25544_v7  ;;  %17298 = vmatpush3.msra.mxu1 %v25524_v51  ;;  %v25602_v7 = vld [vmem:[#allocation117_spill] sm:$0xff] }
 0xda6   : > { %17256 = vmatprep.subr.mxu0 %v25039_v43  ;;  %17299 = vmatprep.subr.mxu1 %v25039_v43 }
 0xda7   : > { %17257 = vmatpush3.msra.mxu0 %v25545_v63  ;;  %17300 = vmatpush3.msra.mxu1 %v25526_v8  ;;  %v25603_v63 = vld [vmem:[#allocation120_spill] sm:$0xff] }
 0xda8   : > { %17258 = vmatprep.subr.mxu0 %v25039_v43  ;;  %17301 = vmatprep.subr.mxu1 %v25039_v43 }
 0xda9   : > { %17259 = vmatpush3.msra.mxu0 %v25546_v62  ;;  %17302 = vmatpush3.msra.mxu1 %v25528_v34  ;;  %v25604_v62 = vld [vmem:[#allocation122_spill] sm:$0xff] }
 0xdaa   : > { %17260 = vmatprep.subr.mxu0 %v25039_v43  ;;  %17303 = vmatprep.subr.mxu1 %v25039_v43 }
 0xdab   : > { %17261 = vmatpush3.msra.mxu0 %v25547_v22  ;;  %17304 = vmatpush3.msra.mxu1 %v25530_v21  ;;  %v25605_v22 = vld [vmem:[#allocation123_spill] sm:$0xff] }
 0xdac   : > { %17262 = vmatprep.subr.mxu0 %v25039_v43  ;;  %17305 = vmatprep.subr.mxu1 %v25039_v43 }
 0xdad   : > { %17263 = vmatpush3.msra.mxu0 %v25548_v58  ;;  %17306 = vmatpush3.msra.mxu1 %v25532_v6 }
 0xdae   : > { %17264 = vmatprep.subr.mxu0 %v25039_v43  ;;  %17307 = vmatprep.subr.mxu1 %v25039_v43 }
 0xdaf   : > { %17265 = vmatpush3.msra.mxu0 %v25549_v40  ;;  %17308 = vmatpush3.msra.mxu1 %v25534_v61 }
 0xdb0   : > { %17266 = vmatprep.subr.mxu0 %v25039_v43  ;;  %17309 = vmatprep.subr.mxu1 %v25039_v43 }
 0xdb1   : > { %17267 = vmatpush3.msra.mxu0 %v25550_v39  ;;  %17310 = vmatpush3.msra.mxu1 %v25536_v19 }
 0xdb2   : > { %17268 = vmatprep.subr.mxu0 %v25039_v43  ;;  %17311 = vmatprep.subr.mxu1 %v25039_v43 }
 0xdb3   : > { %17269 = vmatpush3.msra.mxu0 %v25551_v50  ;;  %17312 = vmatpush3.msra.mxu1 %v25537_v60 }
 0xdb4   : > { %17270 = vmatprep.subr.mxu0 %v25039_v43  ;;  %17313 = vmatprep.subr.mxu1 %v25039_v43 }
 0xdb5   : > { %17271 = vmatpush3.msra.mxu0 %v25552_v33  ;;  %17314 = vmatpush3.msra.mxu1 %v25538_v35 }
 0xdb6   : > { %17272 = vmatprep.subr.mxu0 %v25039_v43  ;;  %17315 = vmatprep.subr.mxu1 %v25039_v43 }
 0xdb7   : > { %17273 = vmatpush3.msra.mxu0 %v25553_v15  ;;  %17316 = vmatpush3.msra.mxu1 %v25539_v32 }
 0xdb8   : > { %17274 = vmatprep.subr.mxu0 %v25039_v43  ;;  %17318 = vmatmul.mubr.f32.vlgmr.msra.gmra.mxu1 %v9679_v49  ;;  %v25597_v49 = vld [vmem:[#allocation134_spill] sm:$0xff] }
 0xdb9   : > { %17355 = vmatprep.subr.mxu1 %v25039_v43  ;;  %17275 = vmatpush3.msra.mxu0 %v25554_v5 }
 0xdba   : > { %17356 = vmatpush3.msra.mxu1 %v25252_v3  ;;  %17276 = vmatprep.subr.mxu0 %v25039_v43  ;;  %v25557_v3 = vld [vmem:[#allocation63_spill] sm:$0xff] }
 0xdbb   : > { %17357 = vmatprep.subr.mxu1 %v25039_v43  ;;  %17277 = vmatpush3.msra.mxu0 %v25555_v27 }
 0xdbc   : > { %17358 = vmatpush3.msra.mxu1 %v25254_v53  ;;  %17278 = vmatprep.subr.mxu0 %v25039_v43  ;;  %v25558_v53 = vld [vmem:[#allocation20_spill] sm:$0xff] }
 0xdbd   : > { %17359 = vmatprep.subr.mxu1 %v25039_v43  ;;  %17279 = vmatpush3.msra.mxu0 %v25556_v2 }
 0xdbe   : > { %17360 = vmatpush3.msra.mxu1 %v25516_v23  ;;  %17280 = vmatprep.subr.mxu0 %v25039_v43  ;;  %v25559_v23 = vld [vmem:[#allocation21_spill] sm:$0xff] }
 0xdbf   : > { %17361 = vmatprep.subr.mxu1 %v25039_v43  ;;  %17281 = vmatpush3.msra.mxu0 %v25557_v3 }
 0xdc0   : > { %17282 = vmatprep.mubr.msk.f32.mxu0 %vm18151_vm0, %v25039_v43  ;;  %17362 = vmatpush3.msra.mxu1 %v25518_v10  ;;  %v25560_v10 = vld [vmem:[#allocation22_spill] sm:$0xff] }
 0xdc1   : > { %17283 = vmatmul.mubr.f32.vlgmr.msra.gmra.mxu0 %v23419_v26  ;;  %17320 = vmatprep.subr.mxu0 %v25039_v43  ;;  %v25596_v26 = vld [vmem:[#allocation105_spill] sm:$0xff] }
 0xdc2   : > { %17363 = vmatprep.subr.mxu1 %v25039_v43  ;;  %17321 = vmatpush3.msra.mxu0 %v25558_v53 }
 0xdc3   : > { %17364 = vmatpush3.msra.mxu1 %v25520_v28  ;;  %17322 = vmatprep.subr.mxu0 %v25039_v43  ;;  %v25561_v28 = vld [vmem:[#allocation24_spill] sm:$0xff] }
 0xdc4   : > { %17365 = vmatprep.subr.mxu1 %v25039_v43  ;;  %17323 = vmatpush3.msra.mxu0 %v25559_v23 }
 0xdc5   : > { %17366 = vmatpush3.msra.mxu1 %v25522_v30  ;;  %17324 = vmatprep.subr.mxu0 %v25039_v43  ;;  %v25562_v30 = vld [vmem:[#allocation26_spill] sm:$0xff] }
 0xdc6   : > { %17367 = vmatprep.subr.mxu1 %v25039_v43  ;;  %17325 = vmatpush3.msra.mxu0 %v25560_v10 }
 0xdc7   : > { %17368 = vmatpush3.msra.mxu1 %v25524_v51  ;;  %17326 = vmatprep.subr.mxu0 %v25039_v43  ;;  %v25563_v51 = vld [vmem:[#allocation29_spill] sm:$0xff] }
 0xdc8   : > { %17369 = vmatprep.subr.mxu1 %v25039_v43  ;;  %17327 = vmatpush3.msra.mxu0 %v25561_v28 }
 0xdc9   : > { %17370 = vmatpush3.msra.mxu1 %v25526_v8  ;;  %17328 = vmatprep.subr.mxu0 %v25039_v43  ;;  %v25564_v8 = vld [vmem:[#allocation33_spill] sm:$0xff] }
 0xdca   : > { %17371 = vmatprep.subr.mxu1 %v25039_v43  ;;  %17329 = vmatpush3.msra.mxu0 %v25562_v30 }
 0xdcb   : > { %17372 = vmatpush3.msra.mxu1 %v25528_v34  ;;  %17330 = vmatprep.subr.mxu0 %v25039_v43  ;;  %v25565_v34 = vld [vmem:[#allocation39_spill] sm:$0xff] }
 0xdcc   : > { %17373 = vmatprep.subr.mxu1 %v25039_v43  ;;  %17331 = vmatpush3.msra.mxu0 %v25563_v51 }
 0xdcd   : > { %17374 = vmatpush3.msra.mxu1 %v25530_v21  ;;  %17332 = vmatprep.subr.mxu0 %v25039_v43  ;;  %v25566_v21 = vld [vmem:[#allocation43_spill] sm:$0xff] }
 0xdce   : > { %17375 = vmatprep.subr.mxu1 %v25039_v43  ;;  %17333 = vmatpush3.msra.mxu0 %v25564_v8 }
 0xdcf   : > { %17376 = vmatpush3.msra.mxu1 %v25532_v6  ;;  %17334 = vmatprep.subr.mxu0 %v25039_v43  ;;  %v25567_v6 = vld [vmem:[#allocation47_spill] sm:$0xff] }
 0xdd0   : > { %17377 = vmatprep.subr.mxu1 %v25039_v43  ;;  %17335 = vmatpush3.msra.mxu0 %v25565_v34  ;;  %v10242_v34 = vrot.slane %v23405_v57, %v25541_v41 }
 0xdd1   : > { %17378 = vmatpush3.msra.mxu1 %v25534_v61  ;;  %17336 = vmatprep.subr.mxu0 %v25039_v43  ;;  %v25568_v61 = vld [vmem:[#allocation51_spill] sm:$0xff] }
 0xdd2   : > { %17379 = vmatprep.subr.mxu1 %v25039_v43  ;;  %17337 = vmatpush3.msra.mxu0 %v25566_v21  ;;  %v10238_v21 = vld [vmem:[#allocation2 + $0x88] sm:$0xff] }
 0xdd3   : > { %17380 = vmatpush3.msra.mxu1 %v25536_v19  ;;  %17338 = vmatprep.subr.mxu0 %v25039_v43  ;;  %v25569_v19 = vld [vmem:[#allocation56_spill] sm:$0xff] }
 0xdd4   : > { %17381 = vmatprep.subr.mxu1 %v25039_v43  ;;  %17339 = vmatpush3.msra.mxu0 %v25567_v6 }
 0xdd5   : > { %17382 = vmatpush3.msra.mxu1 %v25537_v60  ;;  %17340 = vmatprep.subr.mxu0 %v25039_v43  ;;  %v25570_v60 = vld [vmem:[#allocation59_spill] sm:$0xff] }
 0xdd6   : > { %17383 = vmatprep.subr.mxu1 %v25039_v43  ;;  %17341 = vmatpush3.msra.mxu0 %v25568_v61 }
 0xdd7   : > { %17384 = vmatpush3.msra.mxu1 %v25538_v35  ;;  %17342 = vmatprep.subr.mxu0 %v25039_v43  ;;  %v25571_v35 = vld [vmem:[#allocation62_spill] sm:$0xff] }
 0xdd8   : > { %17385 = vmatprep.subr.mxu1 %v25039_v43  ;;  %17343 = vmatpush3.msra.mxu0 %v25569_v19 }
 0xdd9   : > { %17386 = vmatpush3.msra.mxu1 %v25539_v32  ;;  %17387 = vmatprep.mubr.msk.f32.mxu1 %vm18151_vm0, %v25039_v43  ;;  %v25573_v32 = vld [vmem:[#allocation65_spill] sm:$0xff] }
 0xdda   : > { %17344 = vmatprep.subr.mxu0 %v25039_v43  ;;  %17388 = vmatmul.mubr.f32.vlgmr.msra.gmra.mxu1 %v23415_v46 }
 0xddb   : > { %17345 = vmatpush3.msra.mxu0 %v25570_v60  ;;  %17352 = vmatprep.mubr.msk.f32.mxu0 %vm18151_vm0, %v25039_v43 }
 0xddc   : > { %17346 = vmatprep.subr.mxu0 %v25039_v43  ;;  %17425 = vmatprep.subr.mxu1 %v25039_v43 }
 0xddd   : > { %17347 = vmatpush3.msra.mxu0 %v25571_v35  ;;  %17426 = vmatpush3.msra.mxu1 %v25572_v44 }
 0xdde   : > { %17348 = vmatprep.subr.mxu0 %v25039_v43  ;;  %17427 = vmatprep.subr.mxu1 %v25039_v43 }
 0xddf   : > { %17349 = vmatpush3.msra.mxu0 %v25573_v32  ;;  %17428 = vmatpush3.msra.mxu1 %v25574_v56  ;;  %v10251_v56 = vld [vmem:[#allocation2 + $0x90] sm:$0xff] }
 0xde0   : > { %17350 = vmatprep.subr.mxu0 %v25039_v43  ;;  %17429 = vmatprep.subr.mxu1 %v25039_v43  ;;  %vm10252_vm10 = vcmp.ne.f32.partialorder %v10251_v56, 0.0  ;;  %v25657_v56 = vld [vmem:[#allocation196_spill] sm:$0xff] }
 0xde1   : > { %17351 = vmatpush3.msra.mxu0 %v25575_v37  ;;  %17430 = vmatpush3.msra.mxu1 %v25576_v36 }
 0xde2   : > { %17353 = vmatmul.mubr.f32.vlgmr.msra.gmra.mxu0 %v23415_v46  ;;  %17431 = vmatprep.subr.mxu1 %v25039_v43  ;;  %v25595_v46 = vld [vmem:[#allocation133_spill] sm:$0xff] }
 0xde3   : > { %17432 = vmatpush3.msra.mxu1 %v25577_v55  ;;  %17390 = vmatprep.subr.mxu0 %v25039_v43 }
 0xde4   : > { %17433 = vmatprep.subr.mxu1 %v25039_v43  ;;  %17391 = vmatpush3.msra.mxu0 %v25578_v0 }
 0xde5   : > { %17434 = vmatpush3.msra.mxu1 %v25579_v9  ;;  %17392 = vmatprep.subr.mxu0 %v25039_v43 }
 0xde6   : > { %17435 = vmatprep.subr.mxu1 %v25039_v43  ;;  %17393 = vmatpush3.msra.mxu0 %v25580_v20 }
 0xde7   : > { %17436 = vmatpush3.msra.mxu1 %v25581_v38  ;;  %17394 = vmatprep.subr.mxu0 %v25039_v43 }
 0xde8   : > { %17437 = vmatprep.subr.mxu1 %v25039_v43  ;;  %17395 = vmatpush3.msra.mxu0 %v25582_v59 }
 0xde9   : > { %17438 = vmatpush3.msra.mxu1 %v25583_v14  ;;  %17396 = vmatprep.subr.mxu0 %v25039_v43  ;;  %v25606_v14 = vld [vmem:[#allocation74_spill] sm:$0xff] }
 0xdea   : > { %17439 = vmatprep.subr.mxu1 %v25039_v43  ;;  %17397 = vmatpush3.msra.mxu0 %v25584_v45 }
 0xdeb   : > { %17440 = vmatpush3.msra.mxu1 %v25585_v42  ;;  %17398 = vmatprep.subr.mxu0 %v25039_v43  ;;  %v25607_v42 = vld [vmem:[#allocation77_spill] sm:$0xff] }
 0xdec   : > { %17441 = vmatprep.subr.mxu1 %v25039_v43  ;;  %17399 = vmatpush3.msra.mxu0 %v25586_v11 }
 0xded   : > { %17442 = vmatpush3.msra.mxu1 %v25587_v47  ;;  %17400 = vmatprep.subr.mxu0 %v25039_v43  ;;  %v25608_v47 = vld [vmem:[#allocation80_spill] sm:$0xff] }
 0xdee   : > { %17443 = vmatprep.subr.mxu1 %v25039_v43  ;;  %17401 = vmatpush3.msra.mxu0 %v25588_v4 }
 0xdef   : > { %17444 = vmatpush3.msra.mxu1 %v25589_v52  ;;  %17402 = vmatprep.subr.mxu0 %v25039_v43  ;;  %v25609_v52 = vld [vmem:[#allocation84_spill] sm:$0xff] }
 0xdf0   : > { %17445 = vmatprep.subr.mxu1 %v25039_v43  ;;  %17403 = vmatpush3.msra.mxu0 %v25590_v17 }
 0xdf1   : > { %17446 = vmatpush3.msra.mxu1 %v25591_v16  ;;  %17404 = vmatprep.subr.mxu0 %v25039_v43  ;;  %v25610_v16 = vld [vmem:[#allocation89_spill] sm:$0xff] }
 0xdf2   : > { %17447 = vmatprep.subr.mxu1 %v25039_v43  ;;  %17405 = vmatpush3.msra.mxu0 %v25592_v13 }
 0xdf3   : > { %17448 = vmatpush3.msra.mxu1 %v25593_v29  ;;  %17406 = vmatprep.subr.mxu0 %v25039_v43  ;;  %v25611_v29 = vld [vmem:[#allocation91_spill] sm:$0xff] }
 0xdf4   : > { %17449 = vmatprep.subr.mxu1 %v25039_v43  ;;  %17407 = vmatpush3.msra.mxu0 %v25594_v18 }
 0xdf5   : > { %17450 = vmatpush3.msra.mxu1 %v25595_v46  ;;  %17408 = vmatprep.subr.mxu0 %v25039_v43  ;;  %v25612_v46 = vld [vmem:[#allocation96_spill] sm:$0xff] }
 0xdf6   : > { %17451 = vmatprep.subr.mxu1 %v25039_v43  ;;  %17409 = vmatpush3.msra.mxu0 %v25596_v26 }
 0xdf7   : > { %17452 = vmatpush3.msra.mxu1 %v25597_v49  ;;  %17410 = vmatprep.subr.mxu0 %v25039_v43  ;;  %v25613_v49 = vld [vmem:[#allocation99_spill] sm:$0xff] }
 0xdf8   : > { %17453 = vmatprep.subr.mxu1 %v25039_v43  ;;  %17411 = vmatpush3.msra.mxu0 %v25598_v25 }
 0xdf9   : > { %17454 = vmatpush3.msra.mxu1 %v25599_v31  ;;  %17412 = vmatprep.subr.mxu0 %v25039_v43  ;;  %v25614_v31 = vld [vmem:[#allocation104_spill] sm:$0xff] }
 0xdfa   : > { %17455 = vmatprep.subr.mxu1 %v25039_v43  ;;  %17413 = vmatpush3.msra.mxu0 %v25600_v24 }
 0xdfb   : > { %17456 = vmatpush3.msra.mxu1 %v25601_v48  ;;  %17414 = vmatprep.subr.mxu0 %v25039_v43  ;;  %v25615_v48 = vld [vmem:[#allocation109_spill] sm:$0xff] }
 0xdfc   : > { %17457 = vmatprep.mubr.msk.f32.mxu1 %vm18151_vm0, %v25039_v43  ;;  %17495 = vmatprep.subr.mxu1 %v25039_v43 }
 0xdfd   : > { %17415 = vmatpush3.msra.mxu0 %v25602_v7  ;;  %17422 = vmatprep.mubr.msk.f32.mxu0 %vm18151_vm0, %v25039_v43 }
 0xdfe   : > { %17416 = vmatprep.subr.mxu0 %v25039_v43 }
 0xdff   : > { %17417 = vmatpush3.msra.mxu0 %v25603_v63 }
 0xe00   : > { %17418 = vmatprep.subr.mxu0 %v25039_v43 }
 0xe01   : > { %17419 = vmatpush3.msra.mxu0 %v25604_v62 }
 0xe02   : > { %17420 = vmatprep.subr.mxu0 %v25039_v43 }
 0xe03   : > { %17421 = vmatpush3.msra.mxu0 %v25605_v22 }
 0xe04   : > { %17460 = vmatprep.subr.mxu0 %v25039_v43 }
 0xe58   : > { %v9834_v58 = vpop.f32.mrf.mxu1 }
 0xe5a   : > { %v17249_v40 = vpop.f32.mrf.mxu1 }
 0xe5b   : > { %v25617_v40 = vld [vmem:[#allocation116_spill] sm:$0xff] }
 0xe60   : > { %v9683_v39 = vpop.f32.mrf.mxu0 }
 0xe61   : > { %v9835_v3 = vadd.f32 %v9834_v58, %v9683_v39  ;;  %v25616_v58 = vld [vmem:[#allocation111_spill] sm:$0xff] }
 0xe62   : > { %v17214_v50 = vpop.f32.mrf.mxu0  ;;  %v25618_v39 = vld [vmem:[#allocation119_spill] sm:$0xff] }
 0xe63   : > { %v25619_v50 = vld [vmem:[#allocation126_spill] sm:$0xff] }
 0xe78   : > { %v10027_v33 = vpop.f32.mrf.mxu1 }
 0xe7a   : > { %v17319_v15 = vpop.f32.mrf.mxu1 }
 0xe7b   : > { %v25636_v15 = vld [vmem:[#allocation147_spill] sm:$0xff] }
 0xe81   : > { %v9938_v5 = vpop.f32.mrf.mxu0 }
 0xe82   : > { %v9939_v23 = vadd.f32 %v9938_v5, %v9835_v3  ;;  %v25638_v5 = vld [vmem:[#allocation151_spill] sm:$0xff] }
 0xe83   : > { %v17284_v27 = vpop.f32.mrf.mxu0  ;;  %v25641_v3 = vld [vmem:[#allocation159_spill] sm:$0xff] }
 0xe84   : > { %v10028_v10 = vadd.f32 %v10027_v33, %v9939_v23  ;;  %v25620_v33 = vld [vmem:[#allocation127_spill] sm:$0xff]  ;;  %v25639_v27 = vld [vmem:[#allocation132_spill] sm:$0xff]  ;;  %v25643_v23 = vld [vmem:[#allocation169_spill] sm:$0xff] }
 0xe9a   : > { %v10233_v2 = vpop.f32.mrf.mxu1 }
 0xe9c   : > { %v17389_v53 = vpop.f32.mrf.mxu1 }
 0xe9d   : > { %v25642_v53 = vld [vmem:[#allocation138_spill] sm:$0xff] }
 0xea2   : > { %v10146_v28 = vpop.f32.mrf.mxu0 }
 0xea3   : > { %v10147_v30 = vadd.f32 %v10146_v28, %v10028_v10  ;;  %v25644_v10 = vld [vmem:[#allocation140_spill] sm:$0xff]  ;;  %v25645_v28 = vld [vmem:[#allocation173_spill] sm:$0xff] }
 0xea4   : > { %v17354_v51 = vpop.f32.mrf.mxu0 }
 0xea5   : > { %v10234_v8 = vadd.f32 %v10233_v2, %v10147_v30  ;;  %v25640_v2 = vld [vmem:[#allocation155_spill] sm:$0xff]  ;;  %v25647_v51 = vld [vmem:[#allocation180_spill] sm:$0xff] }
 0xea6   : > { %v25646_v30 = vld [vmem:[#allocation143_spill] sm:$0xff] }
 0xea7   : > { %v10243_v6 = vmul.f32 %v10242_v34, %v10234_v8  ;;  %v25648_v8 = vld [vmem:[#allocation146_spill] sm:$0xff]  ;;  %v25649_v34 = vld [vmem:[#allocation184_spill] sm:$0xff] }
 0xea9   : > { %v10244_v61 = vmul.f32 %v10243_v6, %v10238_v21  ;;  %v25650_v21 = vld [vmem:[#allocation150_spill] sm:$0xff]  ;;  %v25651_v6 = vld [vmem:[#allocation187_spill] sm:$0xff] }
 0xeab   : > { %v23634_v19 = vsub.f32 %v23412_v1, %v10244_v61  ;;  %v25652_v61 = vld [vmem:[#allocation153_spill] sm:$0xff] }
 0xead   : > { %18071 = vrcp.f32 %v23634_v19 }
 0xeba   : > { %v18072_v60 = vpop.eup %18071 }
 0xebb   : > { %v10247_v35 = vmul.f32 %v18072_v60, %v23634_v19 }
 0xebd   : > { %v10248_v44 = vsub.f32 2.0, %v10247_v35  ;;  %v25654_v35 = vld [vmem:[#allocation157_spill] sm:$0xff] }
 0xebf   : > { %v10249_v32 = vmul.f32 %v18072_v60, %v10248_v44  ;;  %v25653_v60 = vld [vmem:[#allocation191_spill] sm:$0xff]  ;;  %v25655_v44 = vld [vmem:[#allocation194_spill] sm:$0xff] }
 0xec1   : > { %v10256_v37 = vrot.slane %v10249_v32, %v25540_v12  ;;  %v25656_v32 = vld [vmem:[#allocation162_spill] sm:$0xff] }
 0xec3   : > { %v10257_v36 = vmul.f32 %v10256_v37, %v23634_v19  ;;  %v25658_v37 = vld [vmem:[#allocation163_spill] sm:$0xff] }
 0xec5   : > { %v23641_v57 = vsel %vm10252_vm10, %v10257_v36, %v23634_v19  ;;  %v25659_v36 = vld [vmem:[#allocation198_spill] sm:$0xff] }
 0xec6   : > { %v23644_v41 = vand.u32 4294901760, %v23641_v57 }
 0xec8   : > { %v23648_v1 = vsub.f32 %v23641_v57, %v23644_v41  ;;  %17458 = vmatmul.mubr.f32.vlgmr.msra.gmra.mxu1 %v23644_v41 }
 0xec9   : > { %17496 = vmatpush3.msra.mxu1 %v25578_v0  ;;  %17527 = vmatprep.mubr.msk.f32.mxu1 %vm18151_vm0, %v25039_v43 }
 0xeca   : > { %17497 = vmatprep.subr.mxu1 %v25039_v43  ;;  %v10342_v55 = vand.u32 4294901760, %v23648_v1 }
 0xecb   : > { %17498 = vmatpush3.msra.mxu1 %v25580_v20 }
 0xecc   : > { %17499 = vmatprep.subr.mxu1 %v25039_v43  ;;  %v10343_v9 = vsub.f32 %v23648_v1, %v10342_v55 }
 0xecd   : > { %17500 = vmatpush3.msra.mxu1 %v25582_v59 }
 0xece   : > { %17501 = vmatprep.subr.mxu1 %v25039_v43  ;;  %v10344_v38 = vand.u32 4294901760, %v10343_v9  ;;  %v25663_v9 = vld [vmem:[#allocation200_spill] sm:$0xff] }
 0xecf   : > { %17502 = vmatpush3.msra.mxu1 %v25584_v45 }
 0xed0   : > { %17503 = vmatprep.subr.mxu1 %v25039_v43  ;;  %17423 = vmatmul.mubr.f32.vlgmr.msra.gmra.mxu0 %v10344_v38  ;;  %v25664_v38 = vld [vmem:[#allocation168_spill] sm:$0xff] }
 0xed1   : > { %17461 = vmatpush3.msra.mxu0 %v25606_v14  ;;  %17504 = vmatpush3.msra.mxu1 %v25586_v11  ;;  %v25665_v14 = vld [vmem:[#allocation201_spill] sm:$0xff] }
 0xed2   : > { %17462 = vmatprep.subr.mxu0 %v25039_v43  ;;  %17505 = vmatprep.subr.mxu1 %v25039_v43 }
 0xed3   : > { %17463 = vmatpush3.msra.mxu0 %v25607_v42  ;;  %17506 = vmatpush3.msra.mxu1 %v25588_v4  ;;  %v25666_v42 = vld [vmem:[#allocation179_spill] sm:$0xff] }
 0xed4   : > { %17464 = vmatprep.subr.mxu0 %v25039_v43  ;;  %17507 = vmatprep.subr.mxu1 %v25039_v43 }
 0xed5   : > { %17465 = vmatpush3.msra.mxu0 %v25608_v47  ;;  %17508 = vmatpush3.msra.mxu1 %v25590_v17  ;;  %v25667_v47 = vld [vmem:[#allocation181_spill] sm:$0xff] }
 0xed6   : > { %17466 = vmatprep.subr.mxu0 %v25039_v43  ;;  %17509 = vmatprep.subr.mxu1 %v25039_v43 }
 0xed7   : > { %17467 = vmatpush3.msra.mxu0 %v25609_v52  ;;  %17510 = vmatpush3.msra.mxu1 %v25592_v13  ;;  %v25668_v52 = vld [vmem:[#allocation186_spill] sm:$0xff] }
 0xed8   : > { %17468 = vmatprep.subr.mxu0 %v25039_v43  ;;  %17511 = vmatprep.subr.mxu1 %v25039_v43 }
 0xed9   : > { %17469 = vmatpush3.msra.mxu0 %v25610_v16  ;;  %17512 = vmatpush3.msra.mxu1 %v25594_v18  ;;  %v25669_v16 = vld [vmem:[#allocation190_spill] sm:$0xff] }
 0xeda   : > { %17470 = vmatprep.subr.mxu0 %v25039_v43  ;;  %17513 = vmatprep.subr.mxu1 %v25039_v43 }
 0xedb   : > { %17471 = vmatpush3.msra.mxu0 %v25611_v29  ;;  %17514 = vmatpush3.msra.mxu1 %v25596_v26 }
 0xedc   : > { %17472 = vmatprep.subr.mxu0 %v25039_v43  ;;  %17515 = vmatprep.subr.mxu1 %v25039_v43 }
 0xedd   : > { %17473 = vmatpush3.msra.mxu0 %v25612_v46  ;;  %17516 = vmatpush3.msra.mxu1 %v25598_v25 }
 0xede   : > { %17474 = vmatprep.subr.mxu0 %v25039_v43  ;;  %17517 = vmatprep.subr.mxu1 %v25039_v43 }
 0xedf   : > { %17475 = vmatpush3.msra.mxu0 %v25613_v49  ;;  %17518 = vmatpush3.msra.mxu1 %v25600_v24 }
 0xee0   : > { %17476 = vmatprep.subr.mxu0 %v25039_v43  ;;  %17519 = vmatprep.subr.mxu1 %v25039_v43 }
 0xee1   : > { %17477 = vmatpush3.msra.mxu0 %v25614_v31  ;;  %17520 = vmatpush3.msra.mxu1 %v25602_v7 }
 0xee2   : > { %17478 = vmatprep.subr.mxu0 %v25039_v43  ;;  %17521 = vmatprep.subr.mxu1 %v25039_v43 }
 0xee3   : > { %17479 = vmatpush3.msra.mxu0 %v25615_v48  ;;  %17522 = vmatpush3.msra.mxu1 %v25603_v63 }
 0xee4   : > { %17480 = vmatprep.subr.mxu0 %v25039_v43  ;;  %17523 = vmatprep.subr.mxu1 %v25039_v43 }
 0xee5   : > { %17481 = vmatpush3.msra.mxu0 %v25616_v58  ;;  %17524 = vmatpush3.msra.mxu1 %v25604_v62 }
 0xee6   : > { %17482 = vmatprep.subr.mxu0 %v25039_v43  ;;  %17525 = vmatprep.subr.mxu1 %v25039_v43 }
 0xee7   : > { %17483 = vmatpush3.msra.mxu0 %v25617_v40  ;;  %17526 = vmatpush3.msra.mxu1 %v25605_v22 }
 0xee8   : > { %17484 = vmatprep.subr.mxu0 %v25039_v43  ;;  %17528 = vmatmul.mubr.f32.vlgmr.msra.gmra.mxu1 %v10342_v55  ;;  %v25662_v55 = vld [vmem:[#allocation165_spill] sm:$0xff] }
 0xee9   : > { %17565 = vmatprep.subr.mxu1 %v25039_v43  ;;  %17485 = vmatpush3.msra.mxu0 %v25618_v39 }
 0xeea   : > { %17566 = vmatpush3.msra.mxu1 %v25578_v0  ;;  %17486 = vmatprep.subr.mxu0 %v25039_v43  ;;  %v25621_v0 = vld [vmem:[#allocation128_spill] sm:$0xff] }
 0xeeb   : > { %17567 = vmatprep.subr.mxu1 %v25039_v43  ;;  %17487 = vmatpush3.msra.mxu0 %v25619_v50 }
 0xeec   : > { %17568 = vmatpush3.msra.mxu1 %v25580_v20  ;;  %17488 = vmatprep.subr.mxu0 %v25039_v43  ;;  %v25622_v20 = vld [vmem:[#allocation76_spill] sm:$0xff] }
 0xeed   : > { %17569 = vmatprep.subr.mxu1 %v25039_v43  ;;  %17489 = vmatpush3.msra.mxu0 %v25620_v33 }
 0xeee   : > { %17570 = vmatpush3.msra.mxu1 %v25582_v59  ;;  %17490 = vmatprep.subr.mxu0 %v25039_v43  ;;  %v25623_v59 = vld [vmem:[#allocation79_spill] sm:$0xff] }
 0xeef   : > { %17571 = vmatprep.subr.mxu1 %v25039_v43  ;;  %17491 = vmatpush3.msra.mxu0 %v25621_v0 }
 0xef0   : > { %17492 = vmatprep.mubr.msk.f32.mxu0 %vm18151_vm0, %v25039_v43  ;;  %17572 = vmatpush3.msra.mxu1 %v25584_v45  ;;  %v25624_v45 = vld [vmem:[#allocation83_spill] sm:$0xff] }
 0xef1   : > { %17493 = vmatmul.mubr.f32.vlgmr.msra.gmra.mxu0 %v23648_v1  ;;  %17530 = vmatprep.subr.mxu0 %v25039_v43  ;;  %v25661_v1 = vld [vmem:[#allocation199_spill] sm:$0xff] }
 0xef2   : > { %17573 = vmatprep.subr.mxu1 %v25039_v43  ;;  %17531 = vmatpush3.msra.mxu0 %v25622_v20 }
 0xef3   : > { %17574 = vmatpush3.msra.mxu1 %v25586_v11  ;;  %17532 = vmatprep.subr.mxu0 %v25039_v43  ;;  %v25625_v11 = vld [vmem:[#allocation87_spill] sm:$0xff] }
 0xef4   : > { %17575 = vmatprep.subr.mxu1 %v25039_v43  ;;  %17533 = vmatpush3.msra.mxu0 %v25623_v59 }
 0xef5   : > { %17576 = vmatpush3.msra.mxu1 %v25588_v4  ;;  %17534 = vmatprep.subr.mxu0 %v25039_v43  ;;  %v25626_v4 = vld [vmem:[#allocation93_spill] sm:$0xff] }
 0xef6   : > { %17577 = vmatprep.subr.mxu1 %v25039_v43  ;;  %17535 = vmatpush3.msra.mxu0 %v25624_v45 }
 0xef7   : > { %17578 = vmatpush3.msra.mxu1 %v25590_v17  ;;  %17536 = vmatprep.subr.mxu0 %v25039_v43  ;;  %v25627_v17 = vld [vmem:[#allocation95_spill] sm:$0xff] }
 0xef8   : > { %17579 = vmatprep.subr.mxu1 %v25039_v43  ;;  %17537 = vmatpush3.msra.mxu0 %v25625_v11 }
 0xef9   : > { %17580 = vmatpush3.msra.mxu1 %v25592_v13  ;;  %17538 = vmatprep.subr.mxu0 %v25039_v43  ;;  %v25628_v13 = vld [vmem:[#allocation98_spill] sm:$0xff] }
 0xefa   : > { %17581 = vmatprep.subr.mxu1 %v25039_v43  ;;  %17539 = vmatpush3.msra.mxu0 %v25626_v4 }
 0xefb   : > { %17582 = vmatpush3.msra.mxu1 %v25594_v18  ;;  %17540 = vmatprep.subr.mxu0 %v25039_v43  ;;  %v25629_v18 = vld [vmem:[#allocation103_spill] sm:$0xff] }
 0xefc   : > { %17583 = vmatprep.subr.mxu1 %v25039_v43  ;;  %17541 = vmatpush3.msra.mxu0 %v25627_v17 }
 0xefd   : > { %17584 = vmatpush3.msra.mxu1 %v25596_v26  ;;  %17542 = vmatprep.subr.mxu0 %v25039_v43  ;;  %v25630_v26 = vld [vmem:[#allocation107_spill] sm:$0xff] }
 0xefe   : > { %17585 = vmatprep.subr.mxu1 %v25039_v43  ;;  %17543 = vmatpush3.msra.mxu0 %v25628_v13  ;;  %v10905_v13 = vrot.slane %v23634_v19, %v25540_v12 }
 0xeff   : > { %17586 = vmatpush3.msra.mxu1 %v25598_v25  ;;  %17544 = vmatprep.subr.mxu0 %v25039_v43  ;;  %v25631_v25 = vld [vmem:[#allocation113_spill] sm:$0xff] }
 0xf00   : > { %17587 = vmatprep.subr.mxu1 %v25039_v43  ;;  %17545 = vmatpush3.msra.mxu0 %v25629_v18  ;;  %v10901_v18 = vld [vmem:[#allocation2 + $0x98] sm:$0xff] }
 0xf01   : > { %17588 = vmatpush3.msra.mxu1 %v25600_v24  ;;  %17546 = vmatprep.subr.mxu0 %v25039_v43  ;;  %v25632_v24 = vld [vmem:[#allocation115_spill] sm:$0xff] }
 0xf02   : > { %17589 = vmatprep.subr.mxu1 %v25039_v43  ;;  %17547 = vmatpush3.msra.mxu0 %v25630_v26 }
 0xf03   : > { %17590 = vmatpush3.msra.mxu1 %v25602_v7  ;;  %17548 = vmatprep.subr.mxu0 %v25039_v43  ;;  %v25633_v7 = vld [vmem:[#allocation118_spill] sm:$0xff] }
 0xf04   : > { %17591 = vmatprep.subr.mxu1 %v25039_v43  ;;  %17549 = vmatpush3.msra.mxu0 %v25631_v25 }
 0xf05   : > { %17592 = vmatpush3.msra.mxu1 %v25603_v63  ;;  %17550 = vmatprep.subr.mxu0 %v25039_v43  ;;  %v25634_v63 = vld [vmem:[#allocation125_spill] sm:$0xff] }
 0xf06   : > { %17593 = vmatprep.subr.mxu1 %v25039_v43  ;;  %17551 = vmatpush3.msra.mxu0 %v25632_v24 }
 0xf07   : > { %17594 = vmatpush3.msra.mxu1 %v25604_v62  ;;  %17552 = vmatprep.subr.mxu0 %v25039_v43  ;;  %v25635_v62 = vld [vmem:[#allocation130_spill] sm:$0xff] }
 0xf08   : > { %17595 = vmatprep.subr.mxu1 %v25039_v43  ;;  %17553 = vmatpush3.msra.mxu0 %v25633_v7 }
 0xf09   : > { %17596 = vmatpush3.msra.mxu1 %v25605_v22  ;;  %17597 = vmatprep.mubr.msk.f32.mxu1 %vm18151_vm0, %v25039_v43  ;;  %v25637_v22 = vld [vmem:[#allocation131_spill] sm:$0xff] }
 0xf0a   : > { %17554 = vmatprep.subr.mxu0 %v25039_v43  ;;  %17598 = vmatmul.mubr.f32.vlgmr.msra.gmra.mxu1 %v23644_v41 }
 0xf0b   : > { %17555 = vmatpush3.msra.mxu0 %v25634_v63  ;;  %17562 = vmatprep.mubr.msk.f32.mxu0 %vm18151_vm0, %v25039_v43 }
 0xf0c   : > { %17556 = vmatprep.subr.mxu0 %v25039_v43  ;;  %17635 = vmatprep.subr.mxu1 %v25039_v43 }
 0xf0d   : > { %17557 = vmatpush3.msra.mxu0 %v25635_v62  ;;  %17636 = vmatpush3.msra.mxu1 %v25636_v15 }
 0xf0e   : > { %17558 = vmatprep.subr.mxu0 %v25039_v43  ;;  %17637 = vmatprep.subr.mxu1 %v25039_v43 }
 0xf0f   : > { %17559 = vmatpush3.msra.mxu0 %v25637_v22  ;;  %17638 = vmatpush3.msra.mxu1 %v25638_v5  ;;  %v10914_v22 = vld [vmem:[#allocation2 + $0xa0] sm:$0xff] }
 0xf10   : > { %17560 = vmatprep.subr.mxu0 %v25039_v43  ;;  %17639 = vmatprep.subr.mxu1 %v25039_v43  ;;  %v25670_v5 = vld [vmem:[#allocation202_spill] sm:$0xff]  ;;  %vm10915_vm11 = vcmp.ne.f32.partialorder %v10914_v22, 0.0  ;;  %v25722_v22 = vld [vmem:[#allocation261_spill] sm:$0xff] }
 0xf11   : > { %17561 = vmatpush3.msra.mxu0 %v25639_v27  ;;  %17640 = vmatpush3.msra.mxu1 %v25640_v2 }
 0xf12   : > { %17563 = vmatmul.mubr.f32.vlgmr.msra.gmra.mxu0 %v23644_v41  ;;  %17641 = vmatprep.subr.mxu1 %v25039_v43  ;;  %v25660_v41 = vld [vmem:[#allocation164_spill] sm:$0xff] }
 0xf13   : > { %17642 = vmatpush3.msra.mxu1 %v25641_v3  ;;  %17600 = vmatprep.subr.mxu0 %v25039_v43 }
 0xf14   : > { %17643 = vmatprep.subr.mxu1 %v25039_v43  ;;  %17601 = vmatpush3.msra.mxu0 %v25642_v53 }
 0xf15   : > { %17644 = vmatpush3.msra.mxu1 %v25643_v23  ;;  %17602 = vmatprep.subr.mxu0 %v25039_v43 }
 0xf16   : > { %17645 = vmatprep.subr.mxu1 %v25039_v43  ;;  %17603 = vmatpush3.msra.mxu0 %v25644_v10 }
 0xf17   : > { %17646 = vmatpush3.msra.mxu1 %v25645_v28  ;;  %17604 = vmatprep.subr.mxu0 %v25039_v43 }
 0xf18   : > { %17647 = vmatprep.subr.mxu1 %v25039_v43  ;;  %17605 = vmatpush3.msra.mxu0 %v25646_v30 }
 0xf19   : > { %17648 = vmatpush3.msra.mxu1 %v25647_v51  ;;  %17606 = vmatprep.subr.mxu0 %v25039_v43  ;;  %v25671_v51 = vld [vmem:[#allocation139_spill] sm:$0xff] }
 0xf1a   : > { %17649 = vmatprep.subr.mxu1 %v25039_v43  ;;  %17607 = vmatpush3.msra.mxu0 %v25648_v8 }
 0xf1b   : > { %17650 = vmatpush3.msra.mxu1 %v25649_v34  ;;  %17608 = vmatprep.subr.mxu0 %v25039_v43  ;;  %v25672_v34 = vld [vmem:[#allocation142_spill] sm:$0xff] }
 0xf1c   : > { %17651 = vmatprep.subr.mxu1 %v25039_v43  ;;  %17609 = vmatpush3.msra.mxu0 %v25650_v21 }
 0xf1d   : > { %17652 = vmatpush3.msra.mxu1 %v25651_v6  ;;  %17610 = vmatprep.subr.mxu0 %v25039_v43  ;;  %v25673_v6 = vld [vmem:[#allocation145_spill] sm:$0xff] }
 0xf1e   : > { %17653 = vmatprep.subr.mxu1 %v25039_v43  ;;  %17611 = vmatpush3.msra.mxu0 %v25652_v61 }
 0xf1f   : > { %17654 = vmatpush3.msra.mxu1 %v25653_v60  ;;  %17612 = vmatprep.subr.mxu0 %v25039_v43  ;;  %v25674_v60 = vld [vmem:[#allocation149_spill] sm:$0xff] }
 0xf20   : > { %17655 = vmatprep.subr.mxu1 %v25039_v43  ;;  %17613 = vmatpush3.msra.mxu0 %v25654_v35 }
 0xf21   : > { %17656 = vmatpush3.msra.mxu1 %v25655_v44  ;;  %17614 = vmatprep.subr.mxu0 %v25039_v43  ;;  %v25675_v44 = vld [vmem:[#allocation154_spill] sm:$0xff] }
 0xf22   : > { %17657 = vmatprep.subr.mxu1 %v25039_v43  ;;  %17615 = vmatpush3.msra.mxu0 %v25656_v32 }
 0xf23   : > { %17658 = vmatpush3.msra.mxu1 %v25657_v56  ;;  %17616 = vmatprep.subr.mxu0 %v25039_v43  ;;  %v25676_v56 = vld [vmem:[#allocation156_spill] sm:$0xff] }
 0xf24   : > { %17659 = vmatprep.subr.mxu1 %v25039_v43  ;;  %17617 = vmatpush3.msra.mxu0 %v25658_v37 }
 0xf25   : > { %17660 = vmatpush3.msra.mxu1 %v25659_v36  ;;  %17618 = vmatprep.subr.mxu0 %v25039_v43  ;;  %v25677_v36 = vld [vmem:[#allocation161_spill] sm:$0xff] }
 0xf26   : > { %17661 = vmatprep.subr.mxu1 %v25039_v43  ;;  %17619 = vmatpush3.msra.mxu0 %v25660_v41 }
 0xf27   : > { %17662 = vmatpush3.msra.mxu1 %v25661_v1  ;;  %17620 = vmatprep.subr.mxu0 %v25039_v43  ;;  %v25678_v1 = vld [vmem:[#allocation167_spill] sm:$0xff] }
 0xf28   : > { %17663 = vmatprep.subr.mxu1 %v25039_v43  ;;  %17621 = vmatpush3.msra.mxu0 %v25662_v55 }
 0xf29   : > { %17664 = vmatpush3.msra.mxu1 %v25663_v9  ;;  %17622 = vmatprep.subr.mxu0 %v25039_v43  ;;  %v25679_v9 = vld [vmem:[#allocation170_spill] sm:$0xff] }
 0xf2a   : > { %17665 = vmatprep.subr.mxu1 %v25039_v43  ;;  %17623 = vmatpush3.msra.mxu0 %v25664_v38 }
 0xf2b   : > { %17666 = vmatpush3.msra.mxu1 %v25665_v14  ;;  %17624 = vmatprep.subr.mxu0 %v25039_v43  ;;  %v25680_v14 = vld [vmem:[#allocation171_spill] sm:$0xff] }
 0xf2c   : > { %17667 = vmatprep.mubr.msk.f32.mxu1 %vm18151_vm0, %v25039_v43  ;;  %17705 = vmatprep.subr.mxu1 %v25039_v43 }
 0xf2d   : > { %17625 = vmatpush3.msra.mxu0 %v25666_v42  ;;  %17632 = vmatprep.mubr.msk.f32.mxu0 %vm18151_vm0, %v25039_v43 }
 0xf2e   : > { %17626 = vmatprep.subr.mxu0 %v25039_v43 }
 0xf2f   : > { %17627 = vmatpush3.msra.mxu0 %v25667_v47 }
 0xf30   : > { %17628 = vmatprep.subr.mxu0 %v25039_v43 }
 0xf31   : > { %17629 = vmatpush3.msra.mxu0 %v25668_v52 }
 0xf32   : > { %17630 = vmatprep.subr.mxu0 %v25039_v43 }
 0xf33   : > { %17631 = vmatpush3.msra.mxu0 %v25669_v16 }
 0xf34   : > { %17670 = vmatprep.subr.mxu0 %v25039_v43 }
 0xf88   : > { %v10497_v29 = vpop.f32.mrf.mxu1 }
 0xf8a   : > { %v17459_v46 = vpop.f32.mrf.mxu1 }
 0xf8b   : > { %v25682_v46 = vld [vmem:[#allocation175_spill] sm:$0xff] }
 0xf90   : > { %v10346_v49 = vpop.f32.mrf.mxu0 }
 0xf91   : > { %v10498_v33 = vadd.f32 %v10497_v29, %v10346_v49  ;;  %v25681_v29 = vld [vmem:[#allocation172_spill] sm:$0xff]  ;;  %v25683_v49 = vld [vmem:[#allocation183_spill] sm:$0xff] }
 0xf92   : > { %v17424_v31 = vpop.f32.mrf.mxu0 }
 0xf93   : > { %v25684_v31 = vld [vmem:[#allocation185_spill] sm:$0xff] }
 0xfa8   : > { %v10690_v48 = vpop.f32.mrf.mxu1 }
 0xfaa   : > { %v17529_v58 = vpop.f32.mrf.mxu1 }
 0xfab   : > { %v25701_v58 = vld [vmem:[#allocation212_spill] sm:$0xff] }
 0xfb1   : > { %v10601_v40 = vpop.f32.mrf.mxu0 }
 0xfb2   : > { %v10602_v20 = vadd.f32 %v10601_v40, %v10498_v33  ;;  %v25703_v40 = vld [vmem:[#allocation216_spill] sm:$0xff] }
 0xfb3   : > { %v17494_v39 = vpop.f32.mrf.mxu0  ;;  %v25706_v33 = vld [vmem:[#allocation224_spill] sm:$0xff] }
 0xfb4   : > { %v10691_v59 = vadd.f32 %v10690_v48, %v10602_v20  ;;  %v25685_v48 = vld [vmem:[#allocation189_spill] sm:$0xff]  ;;  %v25708_v20 = vld [vmem:[#allocation231_spill] sm:$0xff] }
 0xfb5   : > { %v25704_v39 = vld [vmem:[#allocation197_spill] sm:$0xff] }
 0xfca   : > { %v10896_v50 = vpop.f32.mrf.mxu1 }
 0xfcc   : > { %v17599_v0 = vpop.f32.mrf.mxu1 }
 0xfcd   : > { %v25707_v0 = vld [vmem:[#allocation203_spill] sm:$0xff] }
 0xfd2   : > { %v10809_v45 = vpop.f32.mrf.mxu0 }
 0xfd3   : > { %v10810_v11 = vadd.f32 %v10809_v45, %v10691_v59  ;;  %v25709_v59 = vld [vmem:[#allocation205_spill] sm:$0xff]  ;;  %v25710_v45 = vld [vmem:[#allocation235_spill] sm:$0xff] }
 0xfd4   : > { %v17564_v4 = vpop.f32.mrf.mxu0 }
 0xfd5   : > { %v10897_v17 = vadd.f32 %v10896_v50, %v10810_v11  ;;  %v25705_v50 = vld [vmem:[#allocation220_spill] sm:$0xff]  ;;  %v25712_v4 = vld [vmem:[#allocation242_spill] sm:$0xff] }
 0xfd6   : > { %v25711_v11 = vld [vmem:[#allocation208_spill] sm:$0xff] }
 0xfd7   : > { %v10906_v26 = vmul.f32 %v10905_v13, %v10897_v17  ;;  %v25713_v17 = vld [vmem:[#allocation211_spill] sm:$0xff]  ;;  %v25714_v13 = vld [vmem:[#allocation249_spill] sm:$0xff] }
 0xfd9   : > { %v10907_v25 = vmul.f32 %v10906_v26, %v10901_v18  ;;  %v25715_v18 = vld [vmem:[#allocation215_spill] sm:$0xff]  ;;  %v25716_v26 = vld [vmem:[#allocation253_spill] sm:$0xff] }
 0xfdb   : > { %v23863_v24 = vsub.f32 %v23641_v57, %v10907_v25  ;;  %v25717_v25 = vld [vmem:[#allocation218_spill] sm:$0xff] }
 0xfdd   : > { %18073 = vrcp.f32 %v23863_v24 }
 0xfea   : > { %v18074_v7 = vpop.eup %18073 }
 0xfeb   : > { %v10910_v63 = vmul.f32 %v18074_v7, %v23863_v24 }
 0xfed   : > { %v10911_v62 = vsub.f32 2.0, %v10910_v63  ;;  %v25719_v63 = vld [vmem:[#allocation222_spill] sm:$0xff] }
 0xfef   : > { %v10912_v15 = vmul.f32 %v18074_v7, %v10911_v62  ;;  %v25718_v7 = vld [vmem:[#allocation256_spill] sm:$0xff]  ;;  %v25720_v62 = vld [vmem:[#allocation259_spill] sm:$0xff] }
 0xff1   : > { %v10919_v27 = vrot.slane %v10912_v15, %v25670_v5  ;;  %v25721_v15 = vld [vmem:[#allocation227_spill] sm:$0xff] }
 0xff3   : > { %v10920_v2 = vmul.f32 %v10919_v27, %v23863_v24  ;;  %v25723_v27 = vld [vmem:[#allocation230_spill] sm:$0xff] }
 0xff5   : > { %v23870_v12 = vsel %vm10915_vm11, %v10920_v2, %v23863_v24  ;;  %v25724_v2 = vld [vmem:[#allocation263_spill] sm:$0xff] }
 0xff6   : > { %v23873_v19 = vand.u32 4294901760, %v23870_v12 }
 0xff8   : > { %v23877_v57 = vsub.f32 %v23870_v12, %v23873_v19  ;;  %17668 = vmatmul.mubr.f32.vlgmr.msra.gmra.mxu1 %v23873_v19 }
 0xff9   : > { %17706 = vmatpush3.msra.mxu1 %v25642_v53  ;;  %17737 = vmatprep.mubr.msk.f32.mxu1 %vm18151_vm0, %v25039_v43 }
 0xffa   : > { %17707 = vmatprep.subr.mxu1 %v25039_v43  ;;  %v11005_v3 = vand.u32 4294901760, %v23877_v57 }
 0xffb   : > { %17708 = vmatpush3.msra.mxu1 %v25644_v10 }
 0xffc   : > { %17709 = vmatprep.subr.mxu1 %v25039_v43  ;;  %v11006_v23 = vsub.f32 %v23877_v57, %v11005_v3 }
 0xffd   : > { %17710 = vmatpush3.msra.mxu1 %v25646_v30 }
 0xffe   : > { %17711 = vmatprep.subr.mxu1 %v25039_v43  ;;  %v11007_v28 = vand.u32 4294901760, %v11006_v23  ;;  %v25728_v23 = vld [vmem:[#allocation265_spill] sm:$0xff] }
 0xfff   : > { %17712 = vmatpush3.msra.mxu1 %v25648_v8 }
0x1000   : > { %17713 = vmatprep.subr.mxu1 %v25039_v43  ;;  %17633 = vmatmul.mubr.f32.vlgmr.msra.gmra.mxu0 %v11007_v28  ;;  %v25729_v28 = vld [vmem:[#allocation234_spill] sm:$0xff] }
0x1001   : > { %17671 = vmatpush3.msra.mxu0 %v25671_v51  ;;  %17714 = vmatpush3.msra.mxu1 %v25650_v21  ;;  %v25730_v51 = vld [vmem:[#allocation266_spill] sm:$0xff] }
0x1002   : > { %17672 = vmatprep.subr.mxu0 %v25039_v43  ;;  %17715 = vmatprep.subr.mxu1 %v25039_v43 }
0x1003   : > { %17673 = vmatpush3.msra.mxu0 %v25672_v34  ;;  %17716 = vmatpush3.msra.mxu1 %v25652_v61  ;;  %v25731_v34 = vld [vmem:[#allocation241_spill] sm:$0xff] }
0x1004   : > { %17674 = vmatprep.subr.mxu0 %v25039_v43  ;;  %17717 = vmatprep.subr.mxu1 %v25039_v43 }
0x1005   : > { %17675 = vmatpush3.msra.mxu0 %v25673_v6  ;;  %17718 = vmatpush3.msra.mxu1 %v25654_v35  ;;  %v25732_v6 = vld [vmem:[#allocation244_spill] sm:$0xff] }
0x1006   : > { %17676 = vmatprep.subr.mxu0 %v25039_v43  ;;  %17719 = vmatprep.subr.mxu1 %v25039_v43 }
0x1007   : > { %17677 = vmatpush3.msra.mxu0 %v25674_v60  ;;  %17720 = vmatpush3.msra.mxu1 %v25656_v32  ;;  %v25733_v60 = vld [vmem:[#allocation251_spill] sm:$0xff] }
0x1008   : > { %17678 = vmatprep.subr.mxu0 %v25039_v43  ;;  %17721 = vmatprep.subr.mxu1 %v25039_v43 }
0x1009   : > { %17679 = vmatpush3.msra.mxu0 %v25675_v44  ;;  %17722 = vmatpush3.msra.mxu1 %v25658_v37  ;;  %v25734_v44 = vld [vmem:[#allocation255_spill] sm:$0xff] }
0x100a   : > { %17680 = vmatprep.subr.mxu0 %v25039_v43  ;;  %17723 = vmatprep.subr.mxu1 %v25039_v43 }
0x100b   : > { %17681 = vmatpush3.msra.mxu0 %v25676_v56  ;;  %17724 = vmatpush3.msra.mxu1 %v25660_v41 }
0x100c   : > { %17682 = vmatprep.subr.mxu0 %v25039_v43  ;;  %17725 = vmatprep.subr.mxu1 %v25039_v43 }
0x100d   : > { %17683 = vmatpush3.msra.mxu0 %v25677_v36  ;;  %17726 = vmatpush3.msra.mxu1 %v25662_v55 }
0x100e   : > { %17684 = vmatprep.subr.mxu0 %v25039_v43  ;;  %17727 = vmatprep.subr.mxu1 %v25039_v43 }
0x100f   : > { %17685 = vmatpush3.msra.mxu0 %v25678_v1  ;;  %17728 = vmatpush3.msra.mxu1 %v25664_v38 }
0x1010   : > { %17686 = vmatprep.subr.mxu0 %v25039_v43  ;;  %17729 = vmatprep.subr.mxu1 %v25039_v43 }
0x1011   : > { %17687 = vmatpush3.msra.mxu0 %v25679_v9  ;;  %17730 = vmatpush3.msra.mxu1 %v25666_v42 }
0x1012   : > { %17688 = vmatprep.subr.mxu0 %v25039_v43  ;;  %17731 = vmatprep.subr.mxu1 %v25039_v43 }
0x1013   : > { %17689 = vmatpush3.msra.mxu0 %v25680_v14  ;;  %17732 = vmatpush3.msra.mxu1 %v25667_v47 }
0x1014   : > { %17690 = vmatprep.subr.mxu0 %v25039_v43  ;;  %17733 = vmatprep.subr.mxu1 %v25039_v43 }
0x1015   : > { %17691 = vmatpush3.msra.mxu0 %v25681_v29  ;;  %17734 = vmatpush3.msra.mxu1 %v25668_v52 }
0x1016   : > { %17692 = vmatprep.subr.mxu0 %v25039_v43  ;;  %17735 = vmatprep.subr.mxu1 %v25039_v43 }
0x1017   : > { %17693 = vmatpush3.msra.mxu0 %v25682_v46  ;;  %17736 = vmatpush3.msra.mxu1 %v25669_v16 }
0x1018   : > { %17694 = vmatprep.subr.mxu0 %v25039_v43  ;;  %17738 = vmatmul.mubr.f32.vlgmr.msra.gmra.mxu1 %v11005_v3  ;;  %v25727_v3 = vld [vmem:[#allocation233_spill] sm:$0xff] }
0x1019   : > { %17775 = vmatprep.subr.mxu1 %v25039_v43  ;;  %17695 = vmatpush3.msra.mxu0 %v25683_v49 }
0x101a   : > { %17776 = vmatpush3.msra.mxu1 %v25642_v53  ;;  %17696 = vmatprep.subr.mxu0 %v25039_v43  ;;  %v25686_v53 = vld [vmem:[#allocation193_spill] sm:$0xff] }
0x101b   : > { %17777 = vmatprep.subr.mxu1 %v25039_v43  ;;  %17697 = vmatpush3.msra.mxu0 %v25684_v31 }
0x101c   : > { %17778 = vmatpush3.msra.mxu1 %v25644_v10  ;;  %17698 = vmatprep.subr.mxu0 %v25039_v43  ;;  %v25687_v10 = vld [vmem:[#allocation141_spill] sm:$0xff] }
0x101d   : > { %17779 = vmatprep.subr.mxu1 %v25039_v43  ;;  %17699 = vmatpush3.msra.mxu0 %v25685_v48 }
0x101e   : > { %17780 = vmatpush3.msra.mxu1 %v25646_v30  ;;  %17700 = vmatprep.subr.mxu0 %v25039_v43  ;;  %v25688_v30 = vld [vmem:[#allocation144_spill] sm:$0xff] }
0x101f   : > { %17781 = vmatprep.subr.mxu1 %v25039_v43  ;;  %17701 = vmatpush3.msra.mxu0 %v25686_v53 }
0x1020   : > { %17702 = vmatprep.mubr.msk.f32.mxu0 %vm18151_vm0, %v25039_v43  ;;  %17782 = vmatpush3.msra.mxu1 %v25648_v8  ;;  %v25689_v8 = vld [vmem:[#allocation148_spill] sm:$0xff] }
0x1021   : > { %17703 = vmatmul.mubr.f32.vlgmr.msra.gmra.mxu0 %v23877_v57  ;;  %17740 = vmatprep.subr.mxu0 %v25039_v43  ;;  %v25726_v57 = vld [vmem:[#allocation264_spill] sm:$0xff] }
0x1022   : > { %17783 = vmatprep.subr.mxu1 %v25039_v43  ;;  %17741 = vmatpush3.msra.mxu0 %v25687_v10 }
0x1023   : > { %17784 = vmatpush3.msra.mxu1 %v25650_v21  ;;  %17742 = vmatprep.subr.mxu0 %v25039_v43  ;;  %v25690_v21 = vld [vmem:[#allocation152_spill] sm:$0xff] }
0x1024   : > { %17785 = vmatprep.subr.mxu1 %v25039_v43  ;;  %17743 = vmatpush3.msra.mxu0 %v25688_v30 }
0x1025   : > { %17786 = vmatpush3.msra.mxu1 %v25652_v61  ;;  %17744 = vmatprep.subr.mxu0 %v25039_v43  ;;  %v25691_v61 = vld [vmem:[#allocation158_spill] sm:$0xff] }
0x1026   : > { %17787 = vmatprep.subr.mxu1 %v25039_v43  ;;  %17745 = vmatpush3.msra.mxu0 %v25689_v8 }
0x1027   : > { %17788 = vmatpush3.msra.mxu1 %v25654_v35  ;;  %17746 = vmatprep.subr.mxu0 %v25039_v43  ;;  %v25692_v35 = vld [vmem:[#allocation160_spill] sm:$0xff] }
0x1028   : > { %17789 = vmatprep.subr.mxu1 %v25039_v43  ;;  %17747 = vmatpush3.msra.mxu0 %v25690_v21 }
0x1029   : > { %17790 = vmatpush3.msra.mxu1 %v25656_v32  ;;  %17748 = vmatprep.subr.mxu0 %v25039_v43  ;;  %v25693_v32 = vld [vmem:[#allocation166_spill] sm:$0xff] }
0x102a   : > { %17791 = vmatprep.subr.mxu1 %v25039_v43  ;;  %17749 = vmatpush3.msra.mxu0 %v25691_v61 }
0x102b   : > { %17792 = vmatpush3.msra.mxu1 %v25658_v37  ;;  %17750 = vmatprep.subr.mxu0 %v25039_v43  ;;  %v25694_v37 = vld [vmem:[#allocation174_spill] sm:$0xff] }
0x102c   : > { %17793 = vmatprep.subr.mxu1 %v25039_v43  ;;  %17751 = vmatpush3.msra.mxu0 %v25692_v35 }
0x102d   : > { %17794 = vmatpush3.msra.mxu1 %v25660_v41  ;;  %17752 = vmatprep.subr.mxu0 %v25039_v43  ;;  %v25695_v41 = vld [vmem:[#allocation176_spill] sm:$0xff] }
0x102e   : > { %17795 = vmatprep.subr.mxu1 %v25039_v43  ;;  %17753 = vmatpush3.msra.mxu0 %v25693_v32  ;;  %v11568_v32 = vrot.slane %v23863_v24, %v25670_v5 }
0x102f   : > { %17796 = vmatpush3.msra.mxu1 %v25662_v55  ;;  %17754 = vmatprep.subr.mxu0 %v25039_v43  ;;  %v25696_v55 = vld [vmem:[#allocation177_spill] sm:$0xff] }
0x1030   : > { %17797 = vmatprep.subr.mxu1 %v25039_v43  ;;  %17755 = vmatpush3.msra.mxu0 %v25694_v37  ;;  %v11564_v37 = vld [vmem:[#allocation2 + $0xa8] sm:$0xff] }
0x1031   : > { %17798 = vmatpush3.msra.mxu1 %v25664_v38  ;;  %17756 = vmatprep.subr.mxu0 %v25039_v43  ;;  %v25697_v38 = vld [vmem:[#allocation178_spill] sm:$0xff] }
0x1032   : > { %17799 = vmatprep.subr.mxu1 %v25039_v43  ;;  %17757 = vmatpush3.msra.mxu0 %v25695_v41 }
0x1033   : > { %17800 = vmatpush3.msra.mxu1 %v25666_v42  ;;  %17758 = vmatprep.subr.mxu0 %v25039_v43  ;;  %v25698_v42 = vld [vmem:[#allocation182_spill] sm:$0xff] }
0x1034   : > { %17801 = vmatprep.subr.mxu1 %v25039_v43  ;;  %17759 = vmatpush3.msra.mxu0 %v25696_v55 }
0x1035   : > { %17802 = vmatpush3.msra.mxu1 %v25667_v47  ;;  %17760 = vmatprep.subr.mxu0 %v25039_v43  ;;  %v25699_v47 = vld [vmem:[#allocation188_spill] sm:$0xff] }
0x1036   : > { %17803 = vmatprep.subr.mxu1 %v25039_v43  ;;  %17761 = vmatpush3.msra.mxu0 %v25697_v38 }
0x1037   : > { %17804 = vmatpush3.msra.mxu1 %v25668_v52  ;;  %17762 = vmatprep.subr.mxu0 %v25039_v43  ;;  %v25700_v52 = vld [vmem:[#allocation192_spill] sm:$0xff] }
0x1038   : > { %17805 = vmatprep.subr.mxu1 %v25039_v43  ;;  %17763 = vmatpush3.msra.mxu0 %v25698_v42 }
0x1039   : > { %17806 = vmatpush3.msra.mxu1 %v25669_v16  ;;  %17807 = vmatprep.mubr.msk.f32.mxu1 %vm18151_vm0, %v25039_v43  ;;  %v25702_v16 = vld [vmem:[#allocation195_spill] sm:$0xff] }
0x103a   : > { %17764 = vmatprep.subr.mxu0 %v25039_v43  ;;  %17808 = vmatmul.mubr.f32.vlgmr.msra.gmra.mxu1 %v23873_v19 }
0x103b   : > { %17765 = vmatpush3.msra.mxu0 %v25699_v47  ;;  %17772 = vmatprep.mubr.msk.f32.mxu0 %vm18151_vm0, %v25039_v43 }
0x103c   : > { %17766 = vmatprep.subr.mxu0 %v25039_v43  ;;  %17845 = vmatprep.subr.mxu1 %v25039_v43 }
0x103d   : > { %17767 = vmatpush3.msra.mxu0 %v25700_v52  ;;  %17846 = vmatpush3.msra.mxu1 %v25701_v58 }
0x103e   : > { %17768 = vmatprep.subr.mxu0 %v25039_v43  ;;  %17847 = vmatprep.subr.mxu1 %v25039_v43 }
0x103f   : > { %17769 = vmatpush3.msra.mxu0 %v25702_v16  ;;  %17848 = vmatpush3.msra.mxu1 %v25703_v40  ;;  %v11577_v16 = vld [vmem:[#allocation2 + $0xb0] sm:$0xff] }
0x1040   : > { %17770 = vmatprep.subr.mxu0 %v25039_v43  ;;  %17849 = vmatprep.subr.mxu1 %v25039_v43  ;;  %vm11578_vm12 = vcmp.ne.f32.partialorder %v11577_v16, 0.0 }
0x1041   : > { %17771 = vmatpush3.msra.mxu0 %v25704_v39  ;;  %17850 = vmatpush3.msra.mxu1 %v25705_v50 }
0x1042   : > { %17773 = vmatmul.mubr.f32.vlgmr.msra.gmra.mxu0 %v23873_v19  ;;  %17851 = vmatprep.subr.mxu1 %v25039_v43  ;;  %v25725_v19 = vld [vmem:[#allocation232_spill] sm:$0xff] }
0x1043   : > { %17852 = vmatpush3.msra.mxu1 %v25706_v33  ;;  %17810 = vmatprep.subr.mxu0 %v25039_v43 }
0x1044   : > { %17853 = vmatprep.subr.mxu1 %v25039_v43  ;;  %17811 = vmatpush3.msra.mxu0 %v25707_v0 }
0x1045   : > { %17854 = vmatpush3.msra.mxu1 %v25708_v20  ;;  %17812 = vmatprep.subr.mxu0 %v25039_v43 }
0x1046   : > { %17855 = vmatprep.subr.mxu1 %v25039_v43  ;;  %17813 = vmatpush3.msra.mxu0 %v25709_v59 }
0x1047   : > { %17856 = vmatpush3.msra.mxu1 %v25710_v45  ;;  %17814 = vmatprep.subr.mxu0 %v25039_v43  ;;  %v25735_v45 = vld [vmem:[#allocation204_spill] sm:$0xff] }
0x1048   : > { %17857 = vmatprep.subr.mxu1 %v25039_v43  ;;  %17815 = vmatpush3.msra.mxu0 %v25711_v11 }
0x1049   : > { %17858 = vmatpush3.msra.mxu1 %v25712_v4  ;;  %17816 = vmatprep.subr.mxu0 %v25039_v43  ;;  %v25736_v4 = vld [vmem:[#allocation207_spill] sm:$0xff] }
0x104a   : > { %17859 = vmatprep.subr.mxu1 %v25039_v43  ;;  %17817 = vmatpush3.msra.mxu0 %v25713_v17 }
0x104b   : > { %17860 = vmatpush3.msra.mxu1 %v25714_v13  ;;  %17818 = vmatprep.subr.mxu0 %v25039_v43  ;;  %v25737_v13 = vld [vmem:[#allocation210_spill] sm:$0xff] }
0x104c   : > { %17861 = vmatprep.subr.mxu1 %v25039_v43  ;;  %17819 = vmatpush3.msra.mxu0 %v25715_v18 }
0x104d   : > { %17862 = vmatpush3.msra.mxu1 %v25716_v26  ;;  %17820 = vmatprep.subr.mxu0 %v25039_v43  ;;  %v25738_v26 = vld [vmem:[#allocation214_spill] sm:$0xff] }
0x104e   : > { %17863 = vmatprep.subr.mxu1 %v25039_v43  ;;  %17821 = vmatpush3.msra.mxu0 %v25717_v25 }
0x104f   : > { %17864 = vmatpush3.msra.mxu1 %v25718_v7  ;;  %17822 = vmatprep.subr.mxu0 %v25039_v43  ;;  %v25739_v7 = vld [vmem:[#allocation219_spill] sm:$0xff] }
0x1050   : > { %17865 = vmatprep.subr.mxu1 %v25039_v43  ;;  %17823 = vmatpush3.msra.mxu0 %v25719_v63 }
0x1051   : > { %17866 = vmatpush3.msra.mxu1 %v25720_v62  ;;  %17824 = vmatprep.subr.mxu0 %v25039_v43  ;;  %v25740_v62 = vld [vmem:[#allocation221_spill] sm:$0xff] }
0x1052   : > { %17867 = vmatprep.subr.mxu1 %v25039_v43  ;;  %17825 = vmatpush3.msra.mxu0 %v25721_v15 }
0x1053   : > { %17868 = vmatpush3.msra.mxu1 %v25722_v22  ;;  %17826 = vmatprep.subr.mxu0 %v25039_v43  ;;  %v25741_v22 = vld [vmem:[#allocation226_spill] sm:$0xff] }
0x1054   : > { %17869 = vmatprep.subr.mxu1 %v25039_v43  ;;  %17827 = vmatpush3.msra.mxu0 %v25723_v27 }
0x1055   : > { %17870 = vmatpush3.msra.mxu1 %v25724_v2  ;;  %17828 = vmatprep.subr.mxu0 %v25039_v43  ;;  %v25742_v2 = vld [vmem:[#allocation229_spill] sm:$0xff] }
0x1056   : > { %17871 = vmatprep.subr.mxu1 %v25039_v43  ;;  %17829 = vmatpush3.msra.mxu0 %v25725_v19 }
0x1057   : > { %17872 = vmatpush3.msra.mxu1 %v25726_v57  ;;  %17830 = vmatprep.subr.mxu0 %v25039_v43  ;;  %v25743_v57 = vld [vmem:[#allocation237_spill] sm:$0xff] }
0x1058   : > { %17873 = vmatprep.subr.mxu1 %v25039_v43  ;;  %17831 = vmatpush3.msra.mxu0 %v25727_v3 }
0x1059   : > { %17874 = vmatpush3.msra.mxu1 %v25728_v23  ;;  %17832 = vmatprep.subr.mxu0 %v25039_v43  ;;  %v25744_v23 = vld [vmem:[#allocation238_spill] sm:$0xff] }
0x105a   : > { %17875 = vmatprep.subr.mxu1 %v25039_v43  ;;  %17833 = vmatpush3.msra.mxu0 %v25729_v28 }
0x105b   : > { %17876 = vmatpush3.msra.mxu1 %v25730_v51  ;;  %17834 = vmatprep.subr.mxu0 %v25039_v43  ;;  %v25745_v51 = vld [vmem:[#allocation239_spill] sm:$0xff] }
0x105c   : > { %17877 = vmatprep.mubr.msk.f32.mxu1 %vm18151_vm0, %v25039_v43  ;;  %17915 = vmatprep.subr.mxu1 %v25039_v43 }
0x105d   : > { %17835 = vmatpush3.msra.mxu0 %v25731_v34  ;;  %17842 = vmatprep.mubr.msk.f32.mxu0 %vm18151_vm0, %v25039_v43 }
0x105e   : > { %17836 = vmatprep.subr.mxu0 %v25039_v43 }
0x105f   : > { %17837 = vmatpush3.msra.mxu0 %v25732_v6 }
0x1060   : > { %17838 = vmatprep.subr.mxu0 %v25039_v43 }
0x1061   : > { %17839 = vmatpush3.msra.mxu0 %v25733_v60 }
0x1062   : > { %17840 = vmatprep.subr.mxu0 %v25039_v43 }
0x1063   : > { %17841 = vmatpush3.msra.mxu0 %v25734_v44 }
0x1064   : > { %17880 = vmatprep.subr.mxu0 %v25039_v43 }
0x10b8   : > { %v11160_v56 = vpop.f32.mrf.mxu1 }
0x10ba   : > { %v17669_v36 = vpop.f32.mrf.mxu1 }
0x10bb   : > { %v25747_v36 = vld [vmem:[#allocation248_spill] sm:$0xff] }
0x10c0   : > { %v11009_v1 = vpop.f32.mrf.mxu0 }
0x10c1   : > { %v11161_v48 = vadd.f32 %v11160_v56, %v11009_v1  ;;  %v25746_v56 = vld [vmem:[#allocation240_spill] sm:$0xff]  ;;  %v25748_v1 = vld [vmem:[#allocation250_spill] sm:$0xff] }
0x10c2   : > { %v17634_v9 = vpop.f32.mrf.mxu0 }
0x10c3   : > { %v25749_v9 = vld [vmem:[#allocation254_spill] sm:$0xff] }
0x10d8   : > { %v11353_v14 = vpop.f32.mrf.mxu1 }
0x10da   : > { %v17739_v29 = vpop.f32.mrf.mxu1 }
0x10e1   : > { %v11264_v46 = vpop.f32.mrf.mxu0 }
0x10e2   : > { %v11265_v10 = vadd.f32 %v11264_v46, %v11161_v48 }
0x10e3   : > { %v17704_v49 = vpop.f32.mrf.mxu0 }
0x10e4   : > { %v11354_v30 = vadd.f32 %v11353_v14, %v11265_v10  ;;  %v25765_v14 = vld [vmem:[#allocation260_spill] sm:$0xff] }
0x10fa   : > { %v11559_v31 = vpop.f32.mrf.mxu1 }
0x10fc   : > { %v17809_v53 = vpop.f32.mrf.mxu1 }
0x1102   : > { %v11472_v8 = vpop.f32.mrf.mxu0 }
0x1103   : > { %v11473_v21 = vadd.f32 %v11472_v8, %v11354_v30 }
0x1104   : > { %v17774_v61 = vpop.f32.mrf.mxu0 }
0x1105   : > { %v11560_v35 = vadd.f32 %v11559_v31, %v11473_v21 }
0x1107   : > { %v11569_v41 = vmul.f32 %v11568_v32, %v11560_v35 }
0x1109   : > { %v11570_v55 = vmul.f32 %v11569_v41, %v11564_v37 }
0x110b   : > { %v24092_v38 = vsub.f32 %v23870_v12, %v11570_v55 }
0x110d   : > { %18075 = vrcp.f32 %v24092_v38 }
0x111a   : > { %v18076_v42 = vpop.eup %18075 }
0x111b   : > { %v11573_v47 = vmul.f32 %v18076_v42, %v24092_v38 }
0x111d   : > { %v11574_v52 = vsub.f32 2.0, %v11573_v47  ;;  %v12227_v47 = vld [vmem:[#allocation2 + $0xb8] sm:$0xff] }
0x111f   : > { %v11575_v58 = vmul.f32 %v18076_v42, %v11574_v52  ;;  %v12231_v42 = vrot.slane %v24092_v38, %v19781_v54 }
0x1121   : > { %v11582_v40 = vrot.slane %v11575_v58, %v19781_v54 }
0x1123   : > { %v11583_v39 = vmul.f32 %v11582_v40, %v24092_v38 }
0x1125   : > { %v24099_v24 = vsel %vm11578_vm12, %v11583_v39, %v24092_v38 }
0x1126   : > { %v24102_v5 = vand.u32 4294901760, %v24099_v24 }
0x1128   : > { %v24106_v12 = vsub.f32 %v24099_v24, %v24102_v5  ;;  %17878 = vmatmul.mubr.f32.vlgmr.msra.gmra.mxu1 %v24102_v5 }
0x1129   : > { %17916 = vmatpush3.msra.mxu1 %v25707_v0  ;;  %17947 = vmatprep.mubr.msk.f32.mxu1 %vm18151_vm0, %v25039_v43 }
0x112a   : > { %17917 = vmatprep.subr.mxu1 %v25039_v43  ;;  %v11668_v50 = vand.u32 4294901760, %v24106_v12 }
0x112b   : > { %17918 = vmatpush3.msra.mxu1 %v25709_v59 }
0x112c   : > { %17919 = vmatprep.subr.mxu1 %v25039_v43  ;;  %v11669_v33 = vsub.f32 %v24106_v12, %v11668_v50 }
0x112d   : > { %17920 = vmatpush3.msra.mxu1 %v25711_v11 }
0x112e   : > { %17921 = vmatprep.subr.mxu1 %v25039_v43  ;;  %v11670_v20 = vand.u32 4294901760, %v11669_v33 }
0x112f   : > { %17922 = vmatpush3.msra.mxu1 %v25713_v17 }
0x1130   : > { %17923 = vmatprep.subr.mxu1 %v25039_v43  ;;  %17843 = vmatmul.mubr.f32.vlgmr.msra.gmra.mxu0 %v11670_v20 }
0x1131   : > { %17881 = vmatpush3.msra.mxu0 %v25735_v45  ;;  %17924 = vmatpush3.msra.mxu1 %v25715_v18 }
0x1132   : > { %17882 = vmatprep.subr.mxu0 %v25039_v43  ;;  %17925 = vmatprep.subr.mxu1 %v25039_v43 }
0x1133   : > { %17883 = vmatpush3.msra.mxu0 %v25736_v4  ;;  %17926 = vmatpush3.msra.mxu1 %v25717_v25 }
0x1134   : > { %17884 = vmatprep.subr.mxu0 %v25039_v43  ;;  %17927 = vmatprep.subr.mxu1 %v25039_v43 }
0x1135   : > { %17885 = vmatpush3.msra.mxu0 %v25737_v13  ;;  %17928 = vmatpush3.msra.mxu1 %v25719_v63 }
0x1136   : > { %17886 = vmatprep.subr.mxu0 %v25039_v43  ;;  %17929 = vmatprep.subr.mxu1 %v25039_v43 }
0x1137   : > { %17887 = vmatpush3.msra.mxu0 %v25738_v26  ;;  %17930 = vmatpush3.msra.mxu1 %v25721_v15 }
0x1138   : > { %17888 = vmatprep.subr.mxu0 %v25039_v43  ;;  %17931 = vmatprep.subr.mxu1 %v25039_v43 }
0x1139   : > { %17889 = vmatpush3.msra.mxu0 %v25739_v7  ;;  %17932 = vmatpush3.msra.mxu1 %v25723_v27 }
0x113a   : > { %17890 = vmatprep.subr.mxu0 %v25039_v43  ;;  %17933 = vmatprep.subr.mxu1 %v25039_v43 }
0x113b   : > { %17891 = vmatpush3.msra.mxu0 %v25740_v62  ;;  %17934 = vmatpush3.msra.mxu1 %v25725_v19 }
0x113c   : > { %17892 = vmatprep.subr.mxu0 %v25039_v43  ;;  %17935 = vmatprep.subr.mxu1 %v25039_v43 }
0x113d   : > { %17893 = vmatpush3.msra.mxu0 %v25741_v22  ;;  %17936 = vmatpush3.msra.mxu1 %v25727_v3 }
0x113e   : > { %17894 = vmatprep.subr.mxu0 %v25039_v43  ;;  %17937 = vmatprep.subr.mxu1 %v25039_v43 }
0x113f   : > { %17895 = vmatpush3.msra.mxu0 %v25742_v2  ;;  %17938 = vmatpush3.msra.mxu1 %v25729_v28 }
0x1140   : > { %17896 = vmatprep.subr.mxu0 %v25039_v43  ;;  %17939 = vmatprep.subr.mxu1 %v25039_v43 }
0x1141   : > { %17897 = vmatpush3.msra.mxu0 %v25743_v57  ;;  %17940 = vmatpush3.msra.mxu1 %v25731_v34 }
0x1142   : > { %17898 = vmatprep.subr.mxu0 %v25039_v43  ;;  %17941 = vmatprep.subr.mxu1 %v25039_v43 }
0x1143   : > { %17899 = vmatpush3.msra.mxu0 %v25744_v23  ;;  %17942 = vmatpush3.msra.mxu1 %v25732_v6 }
0x1144   : > { %17900 = vmatprep.subr.mxu0 %v25039_v43  ;;  %17943 = vmatprep.subr.mxu1 %v25039_v43 }
0x1145   : > { %17901 = vmatpush3.msra.mxu0 %v25745_v51  ;;  %17944 = vmatpush3.msra.mxu1 %v25733_v60 }
0x1146   : > { %17902 = vmatprep.subr.mxu0 %v25039_v43  ;;  %17945 = vmatprep.subr.mxu1 %v25039_v43 }
0x1147   : > { %17903 = vmatpush3.msra.mxu0 %v25746_v56  ;;  %17946 = vmatpush3.msra.mxu1 %v25734_v44 }
0x1148   : > { %17904 = vmatprep.subr.mxu0 %v25039_v43  ;;  %17948 = vmatmul.mubr.f32.vlgmr.msra.gmra.mxu1 %v11668_v50 }
0x1149   : > { %17985 = vmatprep.subr.mxu1 %v25039_v43  ;;  %17905 = vmatpush3.msra.mxu0 %v25747_v36 }
0x114a   : > { %17986 = vmatpush3.msra.mxu1 %v25707_v0  ;;  %17906 = vmatprep.subr.mxu0 %v25039_v43  ;;  %v25750_v0 = vld [vmem:[#allocation258_spill] sm:$0xff] }
0x114b   : > { %17987 = vmatprep.subr.mxu1 %v25039_v43  ;;  %17907 = vmatpush3.msra.mxu0 %v25748_v1 }
0x114c   : > { %17988 = vmatpush3.msra.mxu1 %v25709_v59  ;;  %17908 = vmatprep.subr.mxu0 %v25039_v43  ;;  %v25751_v59 = vld [vmem:[#allocation206_spill] sm:$0xff] }
0x114d   : > { %17989 = vmatprep.subr.mxu1 %v25039_v43  ;;  %17909 = vmatpush3.msra.mxu0 %v25749_v9 }
0x114e   : > { %17990 = vmatpush3.msra.mxu1 %v25711_v11  ;;  %17910 = vmatprep.subr.mxu0 %v25039_v43  ;;  %v25752_v11 = vld [vmem:[#allocation209_spill] sm:$0xff] }
0x114f   : > { %17991 = vmatprep.subr.mxu1 %v25039_v43  ;;  %17911 = vmatpush3.msra.mxu0 %v25750_v0 }
0x1150   : > { %17912 = vmatprep.mubr.msk.f32.mxu0 %vm18151_vm0, %v25039_v43  ;;  %17992 = vmatpush3.msra.mxu1 %v25713_v17  ;;  %v25753_v17 = vld [vmem:[#allocation213_spill] sm:$0xff] }
0x1151   : > { %17913 = vmatmul.mubr.f32.vlgmr.msra.gmra.mxu0 %v24106_v12  ;;  %17950 = vmatprep.subr.mxu0 %v25039_v43 }
0x1152   : > { %17993 = vmatprep.subr.mxu1 %v25039_v43  ;;  %17951 = vmatpush3.msra.mxu0 %v25751_v59 }
0x1153   : > { %17994 = vmatpush3.msra.mxu1 %v25715_v18  ;;  %17952 = vmatprep.subr.mxu0 %v25039_v43  ;;  %v25754_v18 = vld [vmem:[#allocation217_spill] sm:$0xff] }
0x1154   : > { %17995 = vmatprep.subr.mxu1 %v25039_v43  ;;  %17953 = vmatpush3.msra.mxu0 %v25752_v11 }
0x1155   : > { %17996 = vmatpush3.msra.mxu1 %v25717_v25  ;;  %17954 = vmatprep.subr.mxu0 %v25039_v43  ;;  %v25755_v25 = vld [vmem:[#allocation223_spill] sm:$0xff] }
0x1156   : > { %17997 = vmatprep.subr.mxu1 %v25039_v43  ;;  %17955 = vmatpush3.msra.mxu0 %v25753_v17 }
0x1157   : > { %17998 = vmatpush3.msra.mxu1 %v25719_v63  ;;  %17956 = vmatprep.subr.mxu0 %v25039_v43  ;;  %v25756_v63 = vld [vmem:[#allocation225_spill] sm:$0xff] }
0x1158   : > { %17999 = vmatprep.subr.mxu1 %v25039_v43  ;;  %17957 = vmatpush3.msra.mxu0 %v25754_v18 }
0x1159   : > { %18000 = vmatpush3.msra.mxu1 %v25721_v15  ;;  %17958 = vmatprep.subr.mxu0 %v25039_v43  ;;  %v25757_v15 = vld [vmem:[#allocation228_spill] sm:$0xff] }
0x115a   : > { %18001 = vmatprep.subr.mxu1 %v25039_v43  ;;  %17959 = vmatpush3.msra.mxu0 %v25755_v25 }
0x115b   : > { %18002 = vmatpush3.msra.mxu1 %v25723_v27  ;;  %17960 = vmatprep.subr.mxu0 %v25039_v43  ;;  %v25758_v27 = vld [vmem:[#allocation236_spill] sm:$0xff] }
0x115c   : > { %18003 = vmatprep.subr.mxu1 %v25039_v43  ;;  %17961 = vmatpush3.msra.mxu0 %v25756_v63 }
0x115d   : > { %18004 = vmatpush3.msra.mxu1 %v25725_v19  ;;  %17962 = vmatprep.subr.mxu0 %v25039_v43  ;;  %v25759_v19 = vld [vmem:[#allocation243_spill] sm:$0xff] }
0x115e   : > { %18005 = vmatprep.subr.mxu1 %v25039_v43  ;;  %17963 = vmatpush3.msra.mxu0 %v25757_v15 }
0x115f   : > { %18006 = vmatpush3.msra.mxu1 %v25727_v3  ;;  %17964 = vmatprep.subr.mxu0 %v25039_v43  ;;  %v25760_v3 = vld [vmem:[#allocation245_spill] sm:$0xff] }
0x1160   : > { %18007 = vmatprep.subr.mxu1 %v25039_v43  ;;  %17965 = vmatpush3.msra.mxu0 %v25758_v27 }
0x1161   : > { %18008 = vmatpush3.msra.mxu1 %v25729_v28  ;;  %17966 = vmatprep.subr.mxu0 %v25039_v43  ;;  %v25761_v28 = vld [vmem:[#allocation246_spill] sm:$0xff] }
0x1162   : > { %18009 = vmatprep.subr.mxu1 %v25039_v43  ;;  %17967 = vmatpush3.msra.mxu0 %v25759_v19 }
0x1163   : > { %18010 = vmatpush3.msra.mxu1 %v25731_v34  ;;  %17968 = vmatprep.subr.mxu0 %v25039_v43  ;;  %v25762_v34 = vld [vmem:[#allocation247_spill] sm:$0xff] }
0x1164   : > { %18011 = vmatprep.subr.mxu1 %v25039_v43  ;;  %17969 = vmatpush3.msra.mxu0 %v25760_v3 }
0x1165   : > { %18012 = vmatpush3.msra.mxu1 %v25732_v6  ;;  %17970 = vmatprep.subr.mxu0 %v25039_v43  ;;  %v25763_v6 = vld [vmem:[#allocation252_spill] sm:$0xff] }
0x1166   : > { %18013 = vmatprep.subr.mxu1 %v25039_v43  ;;  %17971 = vmatpush3.msra.mxu0 %v25761_v28 }
0x1167   : > { %18014 = vmatpush3.msra.mxu1 %v25733_v60  ;;  %17972 = vmatprep.subr.mxu0 %v25039_v43  ;;  %v25764_v60 = vld [vmem:[#allocation257_spill] sm:$0xff] }
0x1168   : > { %18015 = vmatprep.subr.mxu1 %v25039_v43  ;;  %17973 = vmatpush3.msra.mxu0 %v25762_v34 }
0x1169   : > { %18016 = vmatpush3.msra.mxu1 %v25734_v44  ;;  %18017 = vmatprep.mubr.msk.f32.mxu1 %vm18151_vm0, %v25039_v43  ;;  %v25766_v44 = vld [vmem:[#allocation262_spill] sm:$0xff] }
0x116a   : > { %17974 = vmatprep.subr.mxu0 %v25039_v43  ;;  %18018 = vmatmul.mubr.f32.vlgmr.msra.gmra.mxu1 %v24102_v5 }
0x116b   : > { %17975 = vmatpush3.msra.mxu0 %v25763_v6  ;;  %17982 = vmatprep.mubr.msk.f32.mxu0 %vm18151_vm0, %v25039_v43 }
0x116c   : > { %17976 = vmatprep.subr.mxu0 %v25039_v43 }
0x116d   : > { %17977 = vmatpush3.msra.mxu0 %v25764_v60 }
0x116e   : > { %17978 = vmatprep.subr.mxu0 %v25039_v43 }
0x116f   : > { %17979 = vmatpush3.msra.mxu0 %v25765_v14 }
0x1170   : > { %17980 = vmatprep.subr.mxu0 %v25039_v43 }
0x1171   : > { %17981 = vmatpush3.msra.mxu0 %v25766_v44 }
0x1172   : > { %17983 = vmatmul.mubr.f32.vlgmr.msra.gmra.mxu0 %v24102_v5 }
0x11e8   : > { %v11823_v29 = vpop.f32.mrf.mxu1 }
0x11ea   : > { %v17879_v46 = vpop.f32.mrf.mxu1 }
0x11f0   : > { %v11672_v49 = vpop.f32.mrf.mxu0 }
0x11f1   : > { %v11824_v21 = vadd.f32 %v11823_v29, %v11672_v49 }
0x11f2   : > { %v17844_v31 = vpop.f32.mrf.mxu0 }
0x1208   : > { %v12016_v48 = vpop.f32.mrf.mxu1 }
0x120a   : > { %v17949_v53 = vpop.f32.mrf.mxu1 }
0x1211   : > { %v11927_v10 = vpop.f32.mrf.mxu0 }
0x1212   : > { %v11928_v35 = vadd.f32 %v11927_v10, %v11824_v21 }
0x1213   : > { %v17914_v30 = vpop.f32.mrf.mxu0 }
0x1214   : > { %v12017_v32 = vadd.f32 %v12016_v48, %v11928_v35 }
0x122a   : > { %v12222_v8 = vpop.f32.mrf.mxu1 }
0x122c   : > { %v18019_v61 = vpop.f32.mrf.mxu1 }
0x1232   : > { %v12135_v37 = vpop.f32.mrf.mxu0 }
0x1233   : > { %v12136_v43 = vadd.f32 %v12135_v37, %v12017_v32 }
0x1234   : > { %v17984_v41 = vpop.f32.mrf.mxu0 }
0x1235   : > { %v12223_v55 = vadd.f32 %v12222_v8, %v12136_v43 }
0x1237   : > { %v12232_v52 = vmul.f32 %v12231_v42, %v12223_v55 }
0x1239   : > { %v12233_v58 = vmul.f32 %v12232_v52, %v12227_v47 }
0x123b   : > { %v12234_v16 = vsub.f32 %v24099_v24, %v12233_v58 }
0x123d   : > { %12235 = vst [vmem:[%s222_s21] sm:$0xff] %v12234_v16 }
0x123e PF: > { %s16_s15 = sadd.s32 1, %s18144_s15  }
0x123f   : > { %p13_p3 = scmp.ge.s32.totalorder %s16_s15, 4  }
0x1241   :  { %15 = sbr.rel (!%p13_p3) target bundleno = 2 (0x2), region = 108 }
0x1246   :  { %12255 = vsyncpa [#allocation3], 1 }
0x1247   :  { %12257 = vsyncpa [#allocation3 + $0x1], 1 }
0x1248   :  { %12258 = vsyncpa [#allocation5], 1 }

</bundles_post_ra>
